<compile_context>
chip_gen: v6e
topology: v6e:2x2x1
jax: 0.10.0
libtpu: 0.0.40
codegen_flags: <defaults>
</compile_context>

<pallas_src>
import numpy as np
import jax
import jax.numpy as jnp
from jax.experimental import pallas as pl
from jax.experimental.pallas import tpu as pltpu

# ---------------------------------------------------------------------------
# Model configuration (== ConvNetModel(cnn_plan, fc_plan, in_ch, classes, size))
# ---------------------------------------------------------------------------
CNN_PLAN = [8, 'M', 16, 'D', 'M']   # conv(8) -> pool -> conv(16) -> dropout -> pool
FC_PLAN = [32, 'D']                 # Linear(256,32)+ReLU -> dropout -> Linear(32,10)
INPUT_CHANNELS = 4
NUM_CLASSES = 10
INPUT_SIZE = 16
BN_EPS = 1e-5

# Static sizes the fused kernel is specialized to (derived from the plan above).
C0 = INPUT_CHANNELS          # 4   conv1 in-channels
C1 = 8                       # conv1 out-channels
C2 = 16                      # conv2 out-channels
S0 = INPUT_SIZE              # 16  conv1 spatial
S1 = S0 // 2                 # 8   conv2 spatial (after pool1)
S2 = S1 // 2                 # 4   spatial after pool2
NFC1 = 32                    # first FC width
NFEAT = C2 * S2 * S2         # 256 flattened features


# ---------------------------------------------------------------------------
# Fused Pallas kernel: whole forward pass, full batch, VMEM-resident
# ---------------------------------------------------------------------------
def fused_convnet_kernel(x_ref, w1_ref, b1_ref, w2_ref, b2_ref,
                         wf1_ref, bf1_ref, wf2_ref, bf2_ref,
                         out_ref, xpad_ref, p1pad_ref):
    """x_ref: (N,16,16,4) NHWC.  w1/w2: (9,Cin,Cout) BN-folded taps.  b*: (1,Cout).
    wf1: (256,32) rows permuted to NHWC-flatten order.  wf2: (32,10).
    out_ref: (N,10).  xpad/p1pad: zero-padded conv inputs in VMEM scratch."""
    N = x_ref.shape[0]
    f32 = jnp.float32

    # ---- conv1 input: zero-pad (padding=1) into VMEM scratch ----
    xpad_ref[...] = jnp.zeros_like(xpad_ref)
    xpad_ref[:, 1:S0 + 1, 1:S0 + 1, :] = x_ref[...]
    xp = xpad_ref[...]                                         # (N, 18, 18, 4)

    # ---- conv1 (3x3, BN folded into w/b) + ReLU ----
    acc1 = jnp.zeros((N * S0 * S0, C1), f32)
    for t in range(9):                                         # unrolled taps -> MXU dots
        dy, dx = t // 3, t % 3
        xs = xp[:, dy:dy + S0, dx:dx + S0, :].reshape(N * S0 * S0, C0)
        acc1 = acc1 + jnp.dot(xs, w1_ref[t], preferred_element_type=f32)
    a1 = jnp.maximum(acc1 + b1_ref[...], 0.0)                  # (N*256, 8)

    # ---- maxpool 2x2 #1, written straight into the zero-padded conv2 input ----
    a1 = a1.reshape(N, S1, 2, S0, C1)                          # rows = (n, h2, hp, w)
    hmax = jnp.maximum(a1[:, :, 0], a1[:, :, 1])               # (N, 8, 16, 8)
    p1pad_ref[...] = jnp.zeros_like(p1pad_ref)
    for w in range(S1):
        col = jnp.maximum(hmax[:, :, 2 * w:2 * w + 1, :],
                          hmax[:, :, 2 * w + 1:2 * w + 2, :])  # (N, 8, 1, 8)
        p1pad_ref[:, 1:S1 + 1, 1 + w:2 + w, :] = col

    # ---- conv2 (3x3, BN folded) + ReLU ----
    pp = p1pad_ref[...]                                        # (N, 10, 10, 8)
    acc2 = jnp.zeros((N * S1 * S1, C2), f32)
    for t in range(9):
        dy, dx = t // 3, t % 3
        xs = pp[:, dy:dy + S1, dx:dx + S1, :].reshape(N * S1 * S1, C1)
        acc2 = acc2 + jnp.dot(xs, w2_ref[t], preferred_element_type=f32)
    a2 = jnp.maximum(acc2 + b2_ref[...], 0.0)                  # (N*64, 16)

    # TODO(synk): nn.Dropout layers are eval-mode identity (no training-mode RNG masking).

    # ---- maxpool 2x2 #2 + flatten + FC1, fused: accumulate FC1 directly from each
    #      pooled (N, C2) channel block so the (N, 256) feature matrix never materializes ----
    a2 = a2.reshape(N, S2, 2, S1, C2)                          # rows = (n, i, hp, w)
    hmax2 = jnp.maximum(a2[:, :, 0], a2[:, :, 1])              # (N, 4, 8, 16)
    h = jnp.zeros((N, NFC1), f32)
    for i in range(S2):
        for j in range(S2):
            part = jnp.maximum(hmax2[:, i, 2 * j, :],
                               hmax2[:, i, 2 * j + 1, :])      # (N, 16) == pooled (n,i,j,:)
            s = i * S2 + j
            h = h + jnp.dot(part, wf1_ref[s * C2:(s + 1) * C2, :],
                            preferred_element_type=f32)
    h = jnp.maximum(h + bf1_ref[...], 0.0)                     # (N, 32)

    # ---- FC2 -> logits ----
    out_ref[...] = jnp.dot(h, wf2_ref[...], preferred_element_type=f32) + bf2_ref[...]


# ---------------------------------------------------------------------------
# Wrapper: trace-time weight prep (BN fold, FC1 row permutation) + one pallas_call
# ---------------------------------------------------------------------------
def _fold_bn_into_conv(w_hwio, b, gamma, beta, mean, var):
    """Fold eval-mode BatchNorm into conv weights/bias; return per-tap (9, Cin, Cout)."""
    scale = gamma * jax.lax.rsqrt(var + BN_EPS)                # (Cout,)
    w_f = (w_hwio * scale).reshape(9, w_hwio.shape[2], w_hwio.shape[3])
    b_f = ((b - mean) * scale + beta).reshape(1, -1)
    return w_f.astype(jnp.float32), b_f.astype(jnp.float32)


# FC1 weight rows are stored in torch NCHW-flatten order (c*S2*S2 + i*S2 + j); the kernel
# consumes features in NHWC order ((i*S2 + j)*C2 + c).  Permute rows once at trace time.
_FC1_PERM = np.array([c * (S2 * S2) + i * S2 + j
                      for i in range(S2)
                      for j in range(S2)
                      for c in range(C2)], dtype=np.int32)


@jax.jit
def convnet_forward(x_nchw, params):
    N = x_nchw.shape[0]
    x = jnp.transpose(x_nchw, (0, 2, 3, 1)).astype(jnp.float32)        # NCHW -> NHWC

    (w1, b1, g1, be1, mu1, v1), (w2, b2, g2, be2, mu2, v2) = params['cnn']
    w1f, b1f = _fold_bn_into_conv(w1, b1, g1, be1, mu1, v1)            # (9,4,8), (1,8)
    w2f, b2f = _fold_bn_into_conv(w2, b2, g2, be2, mu2, v2)            # (9,8,16), (1,16)

    (wfc1, bfc1, _), (wfc2, bfc2, _) = params['fc']
    wfc1p = wfc1[_FC1_PERM, :].astype(jnp.float32)                     # (256, 32)
    bfc1r = bfc1.reshape(1, -1).astype(jnp.float32)
    wfc2f = wfc2.astype(jnp.float32)                                   # (32, 10)
    bfc2r = bfc2.reshape(1, -1).astype(jnp.float32)

    return pl.pallas_call(
        fused_convnet_kernel,
        out_shape=jax.ShapeDtypeStruct((N, NUM_CLASSES), jnp.float32),
        scratch_shapes=[
            pltpu.VMEM((N, S0 + 2, S0 + 2, C0), jnp.float32),   # padded conv1 input
            pltpu.VMEM((N, S1 + 2, S1 + 2, C1), jnp.float32),   # padded conv2 input
        ],
    )(x, w1f, b1f, w2f, b2f, wfc1p, bfc1r, wfc2f, bfc2r)


# ---------------------------------------------------------------------------
# Parameters (deterministic synthetic init)
# ---------------------------------------------------------------------------
def init_params(key):
    params = {'cnn': [], 'fc': []}
    in_ch = INPUT_CHANNELS
    for layer in CNN_PLAN:
        if layer in ('M', 'D'):
            continue
        out_ch = int(layer)
        key, k1, k2, k3, k4, k5, k6 = jax.random.split(key, 7)
        w = 0.1 * jax.random.normal(k1, (3, 3, in_ch, out_ch), jnp.float32)   # HWIO
        b = 0.05 * jax.random.normal(k2, (out_ch,), jnp.float32)
        gamma = 1.0 + 0.1 * jax.random.normal(k3, (out_ch,), jnp.float32)
        beta = 0.05 * jax.random.normal(k4, (out_ch,), jnp.float32)
        mean = 0.1 * jax.random.normal(k5, (out_ch,), jnp.float32)
        var = jnp.abs(jax.random.normal(k6, (out_ch,), jnp.float32)) + 0.5
        params['cnn'].append((w, b, gamma, beta, mean, var))
        in_ch = out_ch

    # in_features computation mirrors make_fc_layers()
    size = INPUT_SIZE
    last_ch = None
    for layer in CNN_PLAN:
        if layer == 'M':
            size //= 2
        elif layer != 'D':
            last_ch = int(layer)
    fin = last_ch * size * size

    for layer in FC_PLAN:
        if layer == 'D':
            continue
        fout = int(layer)
        key, k1, k2 = jax.random.split(key, 3)
        w = jax.random.normal(k1, (fin, fout), jnp.float32) / jnp.sqrt(float(fin))
        b = 0.05 * jax.random.normal(k2, (fout,), jnp.float32)
        params['fc'].append((w, b, True))
        fin = fout
    key, k1, k2 = jax.random.split(key, 3)
    w = jax.random.normal(k1, (fin, NUM_CLASSES), jnp.float32) / jnp.sqrt(float(fin))
    b = 0.05 * jax.random.normal(k2, (NUM_CLASSES,), jnp.float32)
    params['fc'].append((w, b, False))
    return params


# ---------------------------------------------------------------------------
# Pure-JAX reference (un-fused: conv + bias, separate BN, reduce_window pool)
# ---------------------------------------------------------------------------
def reference_forward(x_nchw, params):
    x = jnp.transpose(x_nchw, (0, 2, 3, 1)).astype(jnp.float32)
    ci = 0
    for layer in CNN_PLAN:
        if layer == 'M':
            x = jax.lax.reduce_window(x, -jnp.inf, jax.lax.max,
                                      (1, 2, 2, 1), (1, 2, 2, 1), 'VALID')
        elif layer == 'D':
            pass
        else:
            w, b, g, be, mu, var = params['cnn'][ci]; ci += 1
            x = jax.lax.conv_general_dilated(
                x, w, window_strides=(1, 1), padding=((1, 1), (1, 1)),
                dimension_numbers=('NHWC', 'HWIO', 'NHWC')) + b
            x = (x - mu) * jax.lax.rsqrt(var + BN_EPS) * g + be
            x = jnp.maximum(x, 0.0)
    x = jnp.transpose(x, (0, 3, 1, 2)).reshape(x.shape[0], -1)   # torch view order
    for (w, b, relu) in params['fc']:
        x = x @ w + b
        if relu:
            x = jnp.maximum(x, 0.0)
    return x


if __name__ == "__main__":
    key = jax.random.PRNGKey(0)
    kx, kp = jax.random.split(key)
    x = jax.random.normal(kx, (2, INPUT_CHANNELS, INPUT_SIZE, INPUT_SIZE), jnp.float32)
    params = init_params(kp)

    logits = jax.block_until_ready(convnet_forward(x, params))
    ref = jax.block_until_ready(reference_forward(x, params))

    assert logits.shape == (2, NUM_CLASSES), logits.shape
    max_err = float(jnp.max(jnp.abs(logits - ref)))
    if max_err > 1e-3:
        raise SystemExit(f"mismatch vs reference: max abs err = {max_err}")
    print("KERNEL_OK")
</pallas_src>

<mosaic_0001>
module attributes {stable_mosaic.version = 11 : i64} {
  func.func @fused_convnet_kernel(%arg0: memref<2x16x16x4xf32, #tpu.memory_space<vmem>>, %arg1: memref<9x4x8xf32, #tpu.memory_space<vmem>>, %arg2: memref<1x8xf32, #tpu.memory_space<vmem>>, %arg3: memref<9x8x16xf32, #tpu.memory_space<vmem>>, %arg4: memref<1x16xf32, #tpu.memory_space<vmem>>, %arg5: memref<256x32xf32, #tpu.memory_space<vmem>>, %arg6: memref<1x32xf32, #tpu.memory_space<vmem>>, %arg7: memref<32x10xf32, #tpu.memory_space<vmem>>, %arg8: memref<1x10xf32, #tpu.memory_space<vmem>>, %arg9: memref<2x10xf32, #tpu.memory_space<vmem>>, %arg10: memref<2x18x18x4xf32, #tpu.memory_space<vmem>>, %arg11: memref<2x10x10x8xf32, #tpu.memory_space<vmem>>) attributes {dimension_semantics = [], scalar_prefetch = 0 : i64, scratch_operands = 2 : i64, tpu.core_type = #tpu.core_type<tc>} {
    %cst = arith.constant 0.000000e+00 : f32
    %0 = vector.broadcast %cst : f32 to vector<2x18x18x4xf32>
    %c0 = arith.constant 0 : index
    %c0_0 = arith.constant 0 : index
    %c0_1 = arith.constant 0 : index
    %c0_2 = arith.constant 0 : index
    %1 = vector.load %arg10[%c0, %c0_0, %c0_1, %c0_2] : memref<2x18x18x4xf32, #tpu.memory_space<vmem>>, vector<2x18x18x4xf32>
    tpu.vector_store %arg10[%c0, %c0_0, %c0_1, %c0_2], %0 {strides = array<i32>} : memref<2x18x18x4xf32, #tpu.memory_space<vmem>>, vector<2x18x18x4xf32>,
    %c0_3 = arith.constant 0 : index
    %c0_4 = arith.constant 0 : index
    %c0_5 = arith.constant 0 : index
    %c0_6 = arith.constant 0 : index
    %2 = vector.load %arg0[%c0_3, %c0_4, %c0_5, %c0_6] : memref<2x16x16x4xf32, #tpu.memory_space<vmem>>, vector<2x16x16x4xf32>
    %c0_7 = arith.constant 0 : index
    %c1 = arith.constant 1 : index
    %c1_8 = arith.constant 1 : index
    %c0_9 = arith.constant 0 : index
    %3 = vector.load %arg10[%c0_7, %c1, %c1_8, %c0_9] : memref<2x18x18x4xf32, #tpu.memory_space<vmem>>, vector<2x16x16x4xf32>
    tpu.vector_store %arg10[%c0_7, %c1, %c1_8, %c0_9], %2 {strides = array<i32>} : memref<2x18x18x4xf32, #tpu.memory_space<vmem>>, vector<2x16x16x4xf32>,
    %c0_10 = arith.constant 0 : index
    %c0_11 = arith.constant 0 : index
    %c0_12 = arith.constant 0 : index
    %c0_13 = arith.constant 0 : index
    %4 = vector.load %arg10[%c0_10, %c0_11, %c0_12, %c0_13] : memref<2x18x18x4xf32, #tpu.memory_space<vmem>>, vector<2x18x18x4xf32>
    %cst_14 = arith.constant 0.000000e+00 : f32
    %5 = vector.broadcast %cst_14 : f32 to vector<512x8xf32>
    %6 = vector.extract_strided_slice %4 {offsets = [0, 0, 0, 0], sizes = [2, 16, 16, 4], strides = [1, 1, 1, 1]} : vector<2x18x18x4xf32> to vector<2x16x16x4xf32>
    %7 = vector.shape_cast %6 : vector<2x16x16x4xf32> to vector<512x4xf32>
    %c0_15 = arith.constant 0 : index
    %c0_16 = arith.constant 0 : index
    %c0_17 = arith.constant 0 : index
    %8 = vector.load %arg1[%c0_15, %c0_16, %c0_17] : memref<9x4x8xf32, #tpu.memory_space<vmem>>, vector<1x4x8xf32>
    %9 = vector.shape_cast %8 : vector<1x4x8xf32> to vector<4x8xf32>
    %cst_18 = arith.constant dense<0.000000e+00> : vector<512x8xf32>
    %10 = tpu.matmul %7, %9, %cst_18 {dimension_numbers = #tpu.dot_dimension_numbers<[1], [0], [0], [1], [0, 0, 1, 1], [], []>} : vector<512x4xf32>, vector<4x8xf32>, vector<512x8xf32> -> vector<512x8xf32>
    %11 = arith.addf %5, %10 : vector<512x8xf32>
    %12 = vector.extract_strided_slice %4 {offsets = [0, 0, 1, 0], sizes = [2, 16, 16, 4], strides = [1, 1, 1, 1]} : vector<2x18x18x4xf32> to vector<2x16x16x4xf32>
    %13 = vector.shape_cast %12 : vector<2x16x16x4xf32> to vector<512x4xf32>
    %c1_19 = arith.constant 1 : index
    %c0_20 = arith.constant 0 : index
    %c0_21 = arith.constant 0 : index
    %14 = vector.load %arg1[%c1_19, %c0_20, %c0_21] : memref<9x4x8xf32, #tpu.memory_space<vmem>>, vector<1x4x8xf32>
    %15 = vector.shape_cast %14 : vector<1x4x8xf32> to vector<4x8xf32>
    %cst_22 = arith.constant dense<0.000000e+00> : vector<512x8xf32>
    %16 = tpu.matmul %13, %15, %cst_22 {dimension_numbers = #tpu.dot_dimension_numbers<[1], [0], [0], [1], [0, 0, 1, 1], [], []>} : vector<512x4xf32>, vector<4x8xf32>, vector<512x8xf32> -> vector<512x8xf32>
    %17 = arith.addf %11, %16 : vector<512x8xf32>
    %18 = vector.extract_strided_slice %4 {offsets = [0, 0, 2, 0], sizes = [2, 16, 16, 4], strides = [1, 1, 1, 1]} : vector<2x18x18x4xf32> to vector<2x16x16x4xf32>
    %19 = vector.shape_cast %18 : vector<2x16x16x4xf32> to vector<512x4xf32>
    %c2 = arith.constant 2 : index
    %c0_23 = arith.constant 0 : index
    %c0_24 = arith.constant 0 : index
    %20 = vector.load %arg1[%c2, %c0_23, %c0_24] : memref<9x4x8xf32, #tpu.memory_space<vmem>>, vector<1x4x8xf32>
    %21 = vector.shape_cast %20 : vector<1x4x8xf32> to vector<4x8xf32>
    %cst_25 = arith.constant dense<0.000000e+00> : vector<512x8xf32>
    %22 = tpu.matmul %19, %21, %cst_25 {dimension_numbers = #tpu.dot_dimension_numbers<[1], [0], [0], [1], [0, 0, 1, 1], [], []>} : vector<512x4xf32>, vector<4x8xf32>, vector<512x8xf32> -> vector<512x8xf32>
    %23 = arith.addf %17, %22 : vector<512x8xf32>
    %24 = vector.extract_strided_slice %4 {offsets = [0, 1, 0, 0], sizes = [2, 16, 16, 4], strides = [1, 1, 1, 1]} : vector<2x18x18x4xf32> to vector<2x16x16x4xf32>
    %25 = vector.shape_cast %24 : vector<2x16x16x4xf32> to vector<512x4xf32>
    %c3 = arith.constant 3 : index
    %c0_26 = arith.constant 0 : index
    %c0_27 = arith.constant 0 : index
    %26 = vector.load %arg1[%c3, %c0_26, %c0_27] : memref<9x4x8xf32, #tpu.memory_space<vmem>>, vector<1x4x8xf32>
    %27 = vector.shape_cast %26 : vector<1x4x8xf32> to vector<4x8xf32>
    %cst_28 = arith.constant dense<0.000000e+00> : vector<512x8xf32>
    %28 = tpu.matmul %25, %27, %cst_28 {dimension_numbers = #tpu.dot_dimension_numbers<[1], [0], [0], [1], [0, 0, 1, 1], [], []>} : vector<512x4xf32>, vector<4x8xf32>, vector<512x8xf32> -> vector<512x8xf32>
    %29 = arith.addf %23, %28 : vector<512x8xf32>
    %30 = vector.extract_strided_slice %4 {offsets = [0, 1, 1, 0], sizes = [2, 16, 16, 4], strides = [1, 1, 1, 1]} : vector<2x18x18x4xf32> to vector<2x16x16x4xf32>
    %31 = vector.shape_cast %30 : vector<2x16x16x4xf32> to vector<512x4xf32>
    %c4 = arith.constant 4 : index
    %c0_29 = arith.constant 0 : index
    %c0_30 = arith.constant 0 : index
    %32 = vector.load %arg1[%c4, %c0_29, %c0_30] : memref<9x4x8xf32, #tpu.memory_space<vmem>>, vector<1x4x8xf32>
    %33 = vector.shape_cast %32 : vector<1x4x8xf32> to vector<4x8xf32>
    %cst_31 = arith.constant dense<0.000000e+00> : vector<512x8xf32>
    %34 = tpu.matmul %31, %33, %cst_31 {dimension_numbers = #tpu.dot_dimension_numbers<[1], [0], [0], [1], [0, 0, 1, 1], [], []>} : vector<512x4xf32>, vector<4x8xf32>, vector<512x8xf32> -> vector<512x8xf32>
    %35 = arith.addf %29, %34 : vector<512x8xf32>
    %36 = vector.extract_strided_slice %4 {offsets = [0, 1, 2, 0], sizes = [2, 16, 16, 4], strides = [1, 1, 1, 1]} : vector<2x18x18x4xf32> to vector<2x16x16x4xf32>
    %37 = vector.shape_cast %36 : vector<2x16x16x4xf32> to vector<512x4xf32>
    %c5 = arith.constant 5 : index
    %c0_32 = arith.constant 0 : index
    %c0_33 = arith.constant 0 : index
    %38 = vector.load %arg1[%c5, %c0_32, %c0_33] : memref<9x4x8xf32, #tpu.memory_space<vmem>>, vector<1x4x8xf32>
    %39 = vector.shape_cast %38 : vector<1x4x8xf32> to vector<4x8xf32>
    %cst_34 = arith.constant dense<0.000000e+00> : vector<512x8xf32>
    %40 = tpu.matmul %37, %39, %cst_34 {dimension_numbers = #tpu.dot_dimension_numbers<[1], [0], [0], [1], [0, 0, 1, 1], [], []>} : vector<512x4xf32>, vector<4x8xf32>, vector<512x8xf32> -> vector<512x8xf32>
    %41 = arith.addf %35, %40 : vector<512x8xf32>
    %42 = vector.extract_strided_slice %4 {offsets = [0, 2, 0, 0], sizes = [2, 16, 16, 4], strides = [1, 1, 1, 1]} : vector<2x18x18x4xf32> to vector<2x16x16x4xf32>
    %43 = vector.shape_cast %42 : vector<2x16x16x4xf32> to vector<512x4xf32>
    %c6 = arith.constant 6 : index
    %c0_35 = arith.constant 0 : index
    %c0_36 = arith.constant 0 : index
    %44 = vector.load %arg1[%c6, %c0_35, %c0_36] : memref<9x4x8xf32, #tpu.memory_space<vmem>>, vector<1x4x8xf32>
    %45 = vector.shape_cast %44 : vector<1x4x8xf32> to vector<4x8xf32>
    %cst_37 = arith.constant dense<0.000000e+00> : vector<512x8xf32>
    %46 = tpu.matmul %43, %45, %cst_37 {dimension_numbers = #tpu.dot_dimension_numbers<[1], [0], [0], [1], [0, 0, 1, 1], [], []>} : vector<512x4xf32>, vector<4x8xf32>, vector<512x8xf32> -> vector<512x8xf32>
    %47 = arith.addf %41, %46 : vector<512x8xf32>
    %48 = vector.extract_strided_slice %4 {offsets = [0, 2, 1, 0], sizes = [2, 16, 16, 4], strides = [1, 1, 1, 1]} : vector<2x18x18x4xf32> to vector<2x16x16x4xf32>
    %49 = vector.shape_cast %48 : vector<2x16x16x4xf32> to vector<512x4xf32>
    %c7 = arith.constant 7 : index
    %c0_38 = arith.constant 0 : index
    %c0_39 = arith.constant 0 : index
    %50 = vector.load %arg1[%c7, %c0_38, %c0_39] : memref<9x4x8xf32, #tpu.memory_space<vmem>>, vector<1x4x8xf32>
    %51 = vector.shape_cast %50 : vector<1x4x8xf32> to vector<4x8xf32>
    %cst_40 = arith.constant dense<0.000000e+00> : vector<512x8xf32>
    %52 = tpu.matmul %49, %51, %cst_40 {dimension_numbers = #tpu.dot_dimension_numbers<[1], [0], [0], [1], [0, 0, 1, 1], [], []>} : vector<512x4xf32>, vector<4x8xf32>, vector<512x8xf32> -> vector<512x8xf32>
    %53 = arith.addf %47, %52 : vector<512x8xf32>
    %54 = vector.extract_strided_slice %4 {offsets = [0, 2, 2, 0], sizes = [2, 16, 16, 4], strides = [1, 1, 1, 1]} : vector<2x18x18x4xf32> to vector<2x16x16x4xf32>
    %55 = vector.shape_cast %54 : vector<2x16x16x4xf32> to vector<512x4xf32>
    %c8 = arith.constant 8 : index
    %c0_41 = arith.constant 0 : index
    %c0_42 = arith.constant 0 : index
    %56 = vector.load %arg1[%c8, %c0_41, %c0_42] : memref<9x4x8xf32, #tpu.memory_space<vmem>>, vector<1x4x8xf32>
    %57 = vector.shape_cast %56 : vector<1x4x8xf32> to vector<4x8xf32>
    %cst_43 = arith.constant dense<0.000000e+00> : vector<512x8xf32>
    %58 = tpu.matmul %55, %57, %cst_43 {dimension_numbers = #tpu.dot_dimension_numbers<[1], [0], [0], [1], [0, 0, 1, 1], [], []>} : vector<512x4xf32>, vector<4x8xf32>, vector<512x8xf32> -> vector<512x8xf32>
    %59 = arith.addf %53, %58 : vector<512x8xf32>
    %c0_44 = arith.constant 0 : index
    %c0_45 = arith.constant 0 : index
    %60 = vector.load %arg2[%c0_44, %c0_45] : memref<1x8xf32, #tpu.memory_space<vmem>>, vector<1x8xf32>
    %61 = vector.broadcast %60 : vector<1x8xf32> to vector<512x8xf32>
    %62 = arith.addf %59, %61 : vector<512x8xf32>
    %cst_46 = arith.constant 0.000000e+00 : f32
    %63 = vector.broadcast %cst_46 : f32 to vector<512x8xf32>
    %64 = arith.maximumf %62, %63 : vector<512x8xf32>
    %65 = vector.shape_cast %64 : vector<512x8xf32> to vector<2x8x2x16x8xf32>
    %66 = vector.extract_strided_slice %65 {offsets = [0, 0, 0, 0, 0], sizes = [2, 8, 1, 16, 8], strides = [1, 1, 1, 1, 1]} : vector<2x8x2x16x8xf32> to vector<2x8x1x16x8xf32>
    %67 = vector.shape_cast %66 : vector<2x8x1x16x8xf32> to vector<2x8x16x8xf32>
    %68 = vector.extract_strided_slice %65 {offsets = [0, 0, 1, 0, 0], sizes = [2, 8, 1, 16, 8], strides = [1, 1, 1, 1, 1]} : vector<2x8x2x16x8xf32> to vector<2x8x1x16x8xf32>
    %69 = vector.shape_cast %68 : vector<2x8x1x16x8xf32> to vector<2x8x16x8xf32>
    %70 = arith.maximumf %67, %69 : vector<2x8x16x8xf32>
    %cst_47 = arith.constant 0.000000e+00 : f32
    %71 = vector.broadcast %cst_47 : f32 to vector<2x10x10x8xf32>
    %c0_48 = arith.constant 0 : index
    %c0_49 = arith.constant 0 : index
    %c0_50 = arith.constant 0 : index
    %c0_51 = arith.constant 0 : index
    %72 = vector.load %arg11[%c0_48, %c0_49, %c0_50, %c0_51] : memref<2x10x10x8xf32, #tpu.memory_space<vmem>>, vector<2x10x10x8xf32>
    tpu.vector_store %arg11[%c0_48, %c0_49, %c0_50, %c0_51], %71 {strides = array<i32>} : memref<2x10x10x8xf32, #tpu.memory_space<vmem>>, vector<2x10x10x8xf32>,
    %73 = vector.extract_strided_slice %70 {offsets = [0, 0, 0, 0], sizes = [2, 8, 1, 8], strides = [1, 1, 1, 1]} : vector<2x8x16x8xf32> to vector<2x8x1x8xf32>
    %74 = vector.extract_strided_slice %70 {offsets = [0, 0, 1, 0], sizes = [2, 8, 1, 8], strides = [1, 1, 1, 1]} : vector<2x8x16x8xf32> to vector<2x8x1x8xf32>
    %75 = arith.maximumf %73, %74 : vector<2x8x1x8xf32>
    %c0_52 = arith.constant 0 : index
    %c1_53 = arith.constant 1 : index
    %c1_54 = arith.constant 1 : index
    %c0_55 = arith.constant 0 : index
    %76 = vector.load %arg11[%c0_52, %c1_53, %c1_54, %c0_55] : memref<2x10x10x8xf32, #tpu.memory_space<vmem>>, vector<2x8x1x8xf32>
    tpu.vector_store %arg11[%c0_52, %c1_53, %c1_54, %c0_55], %75 {strides = array<i32>} : memref<2x10x10x8xf32, #tpu.memory_space<vmem>>, vector<2x8x1x8xf32>,
    %77 = vector.extract_strided_slice %70 {offsets = [0, 0, 2, 0], sizes = [2, 8, 1, 8], strides = [1, 1, 1, 1]} : vector<2x8x16x8xf32> to vector<2x8x1x8xf32>
    %78 = vector.extract_strided_slice %70 {offsets = [0, 0, 3, 0], sizes = [2, 8, 1, 8], strides = [1, 1, 1, 1]} : vector<2x8x16x8xf32> to vector<2x8x1x8xf32>
    %79 = arith.maximumf %77, %78 : vector<2x8x1x8xf32>
    %c0_56 = arith.constant 0 : index
    %c1_57 = arith.constant 1 : index
    %c2_58 = arith.constant 2 : index
    %c0_59 = arith.constant 0 : index
    %80 = vector.load %arg11[%c0_56, %c1_57, %c2_58, %c0_59] : memref<2x10x10x8xf32, #tpu.memory_space<vmem>>, vector<2x8x1x8xf32>
    tpu.vector_store %arg11[%c0_56, %c1_57, %c2_58, %c0_59], %79 {strides = array<i32>} : memref<2x10x10x8xf32, #tpu.memory_space<vmem>>, vector<2x8x1x8xf32>,
    %81 = vector.extract_strided_slice %70 {offsets = [0, 0, 4, 0], sizes = [2, 8, 1, 8], strides = [1, 1, 1, 1]} : vector<2x8x16x8xf32> to vector<2x8x1x8xf32>
    %82 = vector.extract_strided_slice %70 {offsets = [0, 0, 5, 0], sizes = [2, 8, 1, 8], strides = [1, 1, 1, 1]} : vector<2x8x16x8xf32> to vector<2x8x1x8xf32>
    %83 = arith.maximumf %81, %82 : vector<2x8x1x8xf32>
    %c0_60 = arith.constant 0 : index
    %c1_61 = arith.constant 1 : index
    %c3_62 = arith.constant 3 : index
    %c0_63 = arith.constant 0 : index
    %84 = vector.load %arg11[%c0_60, %c1_61, %c3_62, %c0_63] : memref<2x10x10x8xf32, #tpu.memory_space<vmem>>, vector<2x8x1x8xf32>
    tpu.vector_store %arg11[%c0_60, %c1_61, %c3_62, %c0_63], %83 {strides = array<i32>} : memref<2x10x10x8xf32, #tpu.memory_space<vmem>>, vector<2x8x1x8xf32>,
    %85 = vector.extract_strided_slice %70 {offsets = [0, 0, 6, 0], sizes = [2, 8, 1, 8], strides = [1, 1, 1, 1]} : vector<2x8x16x8xf32> to vector<2x8x1x8xf32>
    %86 = vector.extract_strided_slice %70 {offsets = [0, 0, 7, 0], sizes = [2, 8, 1, 8], strides = [1, 1, 1, 1]} : vector<2x8x16x8xf32> to vector<2x8x1x8xf32>
    %87 = arith.maximumf %85, %86 : vector<2x8x1x8xf32>
    %c0_64 = arith.constant 0 : index
    %c1_65 = arith.constant 1 : index
    %c4_66 = arith.constant 4 : index
    %c0_67 = arith.constant 0 : index
    %88 = vector.load %arg11[%c0_64, %c1_65, %c4_66, %c0_67] : memref<2x10x10x8xf32, #tpu.memory_space<vmem>>, vector<2x8x1x8xf32>
    tpu.vector_store %arg11[%c0_64, %c1_65, %c4_66, %c0_67], %87 {strides = array<i32>} : memref<2x10x10x8xf32, #tpu.memory_space<vmem>>, vector<2x8x1x8xf32>,
    %89 = vector.extract_strided_slice %70 {offsets = [0, 0, 8, 0], sizes = [2, 8, 1, 8], strides = [1, 1, 1, 1]} : vector<2x8x16x8xf32> to vector<2x8x1x8xf32>
    %90 = vector.extract_strided_slice %70 {offsets = [0, 0, 9, 0], sizes = [2, 8, 1, 8], strides = [1, 1, 1, 1]} : vector<2x8x16x8xf32> to vector<2x8x1x8xf32>
    %91 = arith.maximumf %89, %90 : vector<2x8x1x8xf32>
    %c0_68 = arith.constant 0 : index
    %c1_69 = arith.constant 1 : index
    %c5_70 = arith.constant 5 : index
    %c0_71 = arith.constant 0 : index
    %92 = vector.load %arg11[%c0_68, %c1_69, %c5_70, %c0_71] : memref<2x10x10x8xf32, #tpu.memory_space<vmem>>, vector<2x8x1x8xf32>
    tpu.vector_store %arg11[%c0_68, %c1_69, %c5_70, %c0_71], %91 {strides = array<i32>} : memref<2x10x10x8xf32, #tpu.memory_space<vmem>>, vector<2x8x1x8xf32>,
    %93 = vector.extract_strided_slice %70 {offsets = [0, 0, 10, 0], sizes = [2, 8, 1, 8], strides = [1, 1, 1, 1]} : vector<2x8x16x8xf32> to vector<2x8x1x8xf32>
    %94 = vector.extract_strided_slice %70 {offsets = [0, 0, 11, 0], sizes = [2, 8, 1, 8], strides = [1, 1, 1, 1]} : vector<2x8x16x8xf32> to vector<2x8x1x8xf32>
    %95 = arith.maximumf %93, %94 : vector<2x8x1x8xf32>
    %c0_72 = arith.constant 0 : index
    %c1_73 = arith.constant 1 : index
    %c6_74 = arith.constant 6 : index
    %c0_75 = arith.constant 0 : index
    %96 = vector.load %arg11[%c0_72, %c1_73, %c6_74, %c0_75] : memref<2x10x10x8xf32, #tpu.memory_space<vmem>>, vector<2x8x1x8xf32>
    tpu.vector_store %arg11[%c0_72, %c1_73, %c6_74, %c0_75], %95 {strides = array<i32>} : memref<2x10x10x8xf32, #tpu.memory_space<vmem>>, vector<2x8x1x8xf32>,
    %97 = vector.extract_strided_slice %70 {offsets = [0, 0, 12, 0], sizes = [2, 8, 1, 8], strides = [1, 1, 1, 1]} : vector<2x8x16x8xf32> to vector<2x8x1x8xf32>
    %98 = vector.extract_strided_slice %70 {offsets = [0, 0, 13, 0], sizes = [2, 8, 1, 8], strides = [1, 1, 1, 1]} : vector<2x8x16x8xf32> to vector<2x8x1x8xf32>
    %99 = arith.maximumf %97, %98 : vector<2x8x1x8xf32>
    %c0_76 = arith.constant 0 : index
    %c1_77 = arith.constant 1 : index
    %c7_78 = arith.constant 7 : index
    %c0_79 = arith.constant 0 : index
    %100 = vector.load %arg11[%c0_76, %c1_77, %c7_78, %c0_79] : memref<2x10x10x8xf32, #tpu.memory_space<vmem>>, vector<2x8x1x8xf32>
    tpu.vector_store %arg11[%c0_76, %c1_77, %c7_78, %c0_79], %99 {strides = array<i32>} : memref<2x10x10x8xf32, #tpu.memory_space<vmem>>, vector<2x8x1x8xf32>,
    %101 = vector.extract_strided_slice %70 {offsets = [0, 0, 14, 0], sizes = [2, 8, 1, 8], strides = [1, 1, 1, 1]} : vector<2x8x16x8xf32> to vector<2x8x1x8xf32>
    %102 = vector.extract_strided_slice %70 {offsets = [0, 0, 15, 0], sizes = [2, 8, 1, 8], strides = [1, 1, 1, 1]} : vector<2x8x16x8xf32> to vector<2x8x1x8xf32>
    %103 = arith.maximumf %101, %102 : vector<2x8x1x8xf32>
    %c0_80 = arith.constant 0 : index
    %c1_81 = arith.constant 1 : index
    %c8_82 = arith.constant 8 : index
    %c0_83 = arith.constant 0 : index
    %104 = vector.load %arg11[%c0_80, %c1_81, %c8_82, %c0_83] : memref<2x10x10x8xf32, #tpu.memory_space<vmem>>, vector<2x8x1x8xf32>
    tpu.vector_store %arg11[%c0_80, %c1_81, %c8_82, %c0_83], %103 {strides = array<i32>} : memref<2x10x10x8xf32, #tpu.memory_space<vmem>>, vector<2x8x1x8xf32>,
    %c0_84 = arith.constant 0 : index
    %c0_85 = arith.constant 0 : index
    %c0_86 = arith.constant 0 : index
    %c0_87 = arith.constant 0 : index
    %105 = vector.load %arg11[%c0_84, %c0_85, %c0_86, %c0_87] : memref<2x10x10x8xf32, #tpu.memory_space<vmem>>, vector<2x10x10x8xf32>
    %cst_88 = arith.constant 0.000000e+00 : f32
    %106 = vector.broadcast %cst_88 : f32 to vector<128x16xf32>
    %107 = vector.extract_strided_slice %105 {offsets = [0, 0, 0, 0], sizes = [2, 8, 8, 8], strides = [1, 1, 1, 1]} : vector<2x10x10x8xf32> to vector<2x8x8x8xf32>
    %108 = vector.shape_cast %107 : vector<2x8x8x8xf32> to vector<128x8xf32>
    %c0_89 = arith.constant 0 : index
    %c0_90 = arith.constant 0 : index
    %c0_91 = arith.constant 0 : index
    %109 = vector.load %arg3[%c0_89, %c0_90, %c0_91] : memref<9x8x16xf32, #tpu.memory_space<vmem>>, vector<1x8x16xf32>
    %110 = vector.shape_cast %109 : vector<1x8x16xf32> to vector<8x16xf32>
    %cst_92 = arith.constant dense<0.000000e+00> : vector<128x16xf32>
    %111 = tpu.matmul %108, %110, %cst_92 {dimension_numbers = #tpu.dot_dimension_numbers<[1], [0], [0], [1], [0, 0, 1, 1], [], []>} : vector<128x8xf32>, vector<8x16xf32>, vector<128x16xf32> -> vector<128x16xf32>
    %112 = arith.addf %106, %111 : vector<128x16xf32>
    %113 = vector.extract_strided_slice %105 {offsets = [0, 0, 1, 0], sizes = [2, 8, 8, 8], strides = [1, 1, 1, 1]} : vector<2x10x10x8xf32> to vector<2x8x8x8xf32>
    %114 = vector.shape_cast %113 : vector<2x8x8x8xf32> to vector<128x8xf32>
    %c1_93 = arith.constant 1 : index
    %c0_94 = arith.constant 0 : index
    %c0_95 = arith.constant 0 : index
    %115 = vector.load %arg3[%c1_93, %c0_94, %c0_95] : memref<9x8x16xf32, #tpu.memory_space<vmem>>, vector<1x8x16xf32>
    %116 = vector.shape_cast %115 : vector<1x8x16xf32> to vector<8x16xf32>
    %cst_96 = arith.constant dense<0.000000e+00> : vector<128x16xf32>
    %117 = tpu.matmul %114, %116, %cst_96 {dimension_numbers = #tpu.dot_dimension_numbers<[1], [0], [0], [1], [0, 0, 1, 1], [], []>} : vector<128x8xf32>, vector<8x16xf32>, vector<128x16xf32> -> vector<128x16xf32>
    %118 = arith.addf %112, %117 : vector<128x16xf32>
    %119 = vector.extract_strided_slice %105 {offsets = [0, 0, 2, 0], sizes = [2, 8, 8, 8], strides = [1, 1, 1, 1]} : vector<2x10x10x8xf32> to vector<2x8x8x8xf32>
    %120 = vector.shape_cast %119 : vector<2x8x8x8xf32> to vector<128x8xf32>
    %c2_97 = arith.constant 2 : index
    %c0_98 = arith.constant 0 : index
    %c0_99 = arith.constant 0 : index
    %121 = vector.load %arg3[%c2_97, %c0_98, %c0_99] : memref<9x8x16xf32, #tpu.memory_space<vmem>>, vector<1x8x16xf32>
    %122 = vector.shape_cast %121 : vector<1x8x16xf32> to vector<8x16xf32>
    %cst_100 = arith.constant dense<0.000000e+00> : vector<128x16xf32>
    %123 = tpu.matmul %120, %122, %cst_100 {dimension_numbers = #tpu.dot_dimension_numbers<[1], [0], [0], [1], [0, 0, 1, 1], [], []>} : vector<128x8xf32>, vector<8x16xf32>, vector<128x16xf32> -> vector<128x16xf32>
    %124 = arith.addf %118, %123 : vector<128x16xf32>
    %125 = vector.extract_strided_slice %105 {offsets = [0, 1, 0, 0], sizes = [2, 8, 8, 8], strides = [1, 1, 1, 1]} : vector<2x10x10x8xf32> to vector<2x8x8x8xf32>
    %126 = vector.shape_cast %125 : vector<2x8x8x8xf32> to vector<128x8xf32>
    %c3_101 = arith.constant 3 : index
    %c0_102 = arith.constant 0 : index
    %c0_103 = arith.constant 0 : index
    %127 = vector.load %arg3[%c3_101, %c0_102, %c0_103] : memref<9x8x16xf32, #tpu.memory_space<vmem>>, vector<1x8x16xf32>
    %128 = vector.shape_cast %127 : vector<1x8x16xf32> to vector<8x16xf32>
    %cst_104 = arith.constant dense<0.000000e+00> : vector<128x16xf32>
    %129 = tpu.matmul %126, %128, %cst_104 {dimension_numbers = #tpu.dot_dimension_numbers<[1], [0], [0], [1], [0, 0, 1, 1], [], []>} : vector<128x8xf32>, vector<8x16xf32>, vector<128x16xf32> -> vector<128x16xf32>
    %130 = arith.addf %124, %129 : vector<128x16xf32>
    %131 = vector.extract_strided_slice %105 {offsets = [0, 1, 1, 0], sizes = [2, 8, 8, 8], strides = [1, 1, 1, 1]} : vector<2x10x10x8xf32> to vector<2x8x8x8xf32>
    %132 = vector.shape_cast %131 : vector<2x8x8x8xf32> to vector<128x8xf32>
    %c4_105 = arith.constant 4 : index
    %c0_106 = arith.constant 0 : index
    %c0_107 = arith.constant 0 : index
    %133 = vector.load %arg3[%c4_105, %c0_106, %c0_107] : memref<9x8x16xf32, #tpu.memory_space<vmem>>, vector<1x8x16xf32>
    %134 = vector.shape_cast %133 : vector<1x8x16xf32> to vector<8x16xf32>
    %cst_108 = arith.constant dense<0.000000e+00> : vector<128x16xf32>
    %135 = tpu.matmul %132, %134, %cst_108 {dimension_numbers = #tpu.dot_dimension_numbers<[1], [0], [0], [1], [0, 0, 1, 1], [], []>} : vector<128x8xf32>, vector<8x16xf32>, vector<128x16xf32> -> vector<128x16xf32>
    %136 = arith.addf %130, %135 : vector<128x16xf32>
    %137 = vector.extract_strided_slice %105 {offsets = [0, 1, 2, 0], sizes = [2, 8, 8, 8], strides = [1, 1, 1, 1]} : vector<2x10x10x8xf32> to vector<2x8x8x8xf32>
    %138 = vector.shape_cast %137 : vector<2x8x8x8xf32> to vector<128x8xf32>
    %c5_109 = arith.constant 5 : index
    %c0_110 = arith.constant 0 : index
    %c0_111 = arith.constant 0 : index
    %139 = vector.load %arg3[%c5_109, %c0_110, %c0_111] : memref<9x8x16xf32, #tpu.memory_space<vmem>>, vector<1x8x16xf32>
    %140 = vector.shape_cast %139 : vector<1x8x16xf32> to vector<8x16xf32>
    %cst_112 = arith.constant dense<0.000000e+00> : vector<128x16xf32>
    %141 = tpu.matmul %138, %140, %cst_112 {dimension_numbers = #tpu.dot_dimension_numbers<[1], [0], [0], [1], [0, 0, 1, 1], [], []>} : vector<128x8xf32>, vector<8x16xf32>, vector<128x16xf32> -> vector<128x16xf32>
    %142 = arith.addf %136, %141 : vector<128x16xf32>
    %143 = vector.extract_strided_slice %105 {offsets = [0, 2, 0, 0], sizes = [2, 8, 8, 8], strides = [1, 1, 1, 1]} : vector<2x10x10x8xf32> to vector<2x8x8x8xf32>
    %144 = vector.shape_cast %143 : vector<2x8x8x8xf32> to vector<128x8xf32>
    %c6_113 = arith.constant 6 : index
    %c0_114 = arith.constant 0 : index
    %c0_115 = arith.constant 0 : index
    %145 = vector.load %arg3[%c6_113, %c0_114, %c0_115] : memref<9x8x16xf32, #tpu.memory_space<vmem>>, vector<1x8x16xf32>
    %146 = vector.shape_cast %145 : vector<1x8x16xf32> to vector<8x16xf32>
    %cst_116 = arith.constant dense<0.000000e+00> : vector<128x16xf32>
    %147 = tpu.matmul %144, %146, %cst_116 {dimension_numbers = #tpu.dot_dimension_numbers<[1], [0], [0], [1], [0, 0, 1, 1], [], []>} : vector<128x8xf32>, vector<8x16xf32>, vector<128x16xf32> -> vector<128x16xf32>
    %148 = arith.addf %142, %147 : vector<128x16xf32>
    %149 = vector.extract_strided_slice %105 {offsets = [0, 2, 1, 0], sizes = [2, 8, 8, 8], strides = [1, 1, 1, 1]} : vector<2x10x10x8xf32> to vector<2x8x8x8xf32>
    %150 = vector.shape_cast %149 : vector<2x8x8x8xf32> to vector<128x8xf32>
    %c7_117 = arith.constant 7 : index
    %c0_118 = arith.constant 0 : index
    %c0_119 = arith.constant 0 : index
    %151 = vector.load %arg3[%c7_117, %c0_118, %c0_119] : memref<9x8x16xf32, #tpu.memory_space<vmem>>, vector<1x8x16xf32>
    %152 = vector.shape_cast %151 : vector<1x8x16xf32> to vector<8x16xf32>
    %cst_120 = arith.constant dense<0.000000e+00> : vector<128x16xf32>
    %153 = tpu.matmul %150, %152, %cst_120 {dimension_numbers = #tpu.dot_dimension_numbers<[1], [0], [0], [1], [0, 0, 1, 1], [], []>} : vector<128x8xf32>, vector<8x16xf32>, vector<128x16xf32> -> vector<128x16xf32>
    %154 = arith.addf %148, %153 : vector<128x16xf32>
    %155 = vector.extract_strided_slice %105 {offsets = [0, 2, 2, 0], sizes = [2, 8, 8, 8], strides = [1, 1, 1, 1]} : vector<2x10x10x8xf32> to vector<2x8x8x8xf32>
    %156 = vector.shape_cast %155 : vector<2x8x8x8xf32> to vector<128x8xf32>
    %c8_121 = arith.constant 8 : index
    %c0_122 = arith.constant 0 : index
    %c0_123 = arith.constant 0 : index
    %157 = vector.load %arg3[%c8_121, %c0_122, %c0_123] : memref<9x8x16xf32, #tpu.memory_space<vmem>>, vector<1x8x16xf32>
    %158 = vector.shape_cast %157 : vector<1x8x16xf32> to vector<8x16xf32>
    %cst_124 = arith.constant dense<0.000000e+00> : vector<128x16xf32>
    %159 = tpu.matmul %156, %158, %cst_124 {dimension_numbers = #tpu.dot_dimension_numbers<[1], [0], [0], [1], [0, 0, 1, 1], [], []>} : vector<128x8xf32>, vector<8x16xf32>, vector<128x16xf32> -> vector<128x16xf32>
    %160 = arith.addf %154, %159 : vector<128x16xf32>
    %c0_125 = arith.constant 0 : index
    %c0_126 = arith.constant 0 : index
    %161 = vector.load %arg4[%c0_125, %c0_126] : memref<1x16xf32, #tpu.memory_space<vmem>>, vector<1x16xf32>
    %162 = vector.broadcast %161 : vector<1x16xf32> to vector<128x16xf32>
    %163 = arith.addf %160, %162 : vector<128x16xf32>
    %cst_127 = arith.constant 0.000000e+00 : f32
    %164 = vector.broadcast %cst_127 : f32 to vector<128x16xf32>
    %165 = arith.maximumf %163, %164 : vector<128x16xf32>
    %166 = vector.shape_cast %165 : vector<128x16xf32> to vector<2x4x2x8x16xf32>
    %167 = vector.extract_strided_slice %166 {offsets = [0, 0, 0, 0, 0], sizes = [2, 4, 1, 8, 16], strides = [1, 1, 1, 1, 1]} : vector<2x4x2x8x16xf32> to vector<2x4x1x8x16xf32>
    %168 = vector.shape_cast %167 : vector<2x4x1x8x16xf32> to vector<2x4x8x16xf32>
    %169 = vector.extract_strided_slice %166 {offsets = [0, 0, 1, 0, 0], sizes = [2, 4, 1, 8, 16], strides = [1, 1, 1, 1, 1]} : vector<2x4x2x8x16xf32> to vector<2x4x1x8x16xf32>
    %170 = vector.shape_cast %169 : vector<2x4x1x8x16xf32> to vector<2x4x8x16xf32>
    %171 = arith.maximumf %168, %170 : vector<2x4x8x16xf32>
    %cst_128 = arith.constant 0.000000e+00 : f32
    %172 = vector.broadcast %cst_128 : f32 to vector<2x32xf32>
    %173 = vector.extract_strided_slice %171 {offsets = [0, 0, 0, 0], sizes = [2, 1, 1, 16], strides = [1, 1, 1, 1]} : vector<2x4x8x16xf32> to vector<2x1x1x16xf32>
    %174 = vector.shape_cast %173 : vector<2x1x1x16xf32> to vector<2x16xf32>
    %175 = vector.extract_strided_slice %171 {offsets = [0, 0, 1, 0], sizes = [2, 1, 1, 16], strides = [1, 1, 1, 1]} : vector<2x4x8x16xf32> to vector<2x1x1x16xf32>
    %176 = vector.shape_cast %175 : vector<2x1x1x16xf32> to vector<2x16xf32>
    %177 = arith.maximumf %174, %176 : vector<2x16xf32>
    %c0_129 = arith.constant 0 : index
    %c0_130 = arith.constant 0 : index
    %178 = vector.load %arg5[%c0_129, %c0_130] : memref<256x32xf32, #tpu.memory_space<vmem>>, vector<16x32xf32>
    %cst_131 = arith.constant dense<0.000000e+00> : vector<2x32xf32>
    %179 = tpu.matmul %177, %178, %cst_131 {dimension_numbers = #tpu.dot_dimension_numbers<[1], [0], [0], [1], [0, 0, 1, 1], [], []>} : vector<2x16xf32>, vector<16x32xf32>, vector<2x32xf32> -> vector<2x32xf32>
    %180 = arith.addf %172, %179 : vector<2x32xf32>
    %181 = vector.extract_strided_slice %171 {offsets = [0, 0, 2, 0], sizes = [2, 1, 1, 16], strides = [1, 1, 1, 1]} : vector<2x4x8x16xf32> to vector<2x1x1x16xf32>
    %182 = vector.shape_cast %181 : vector<2x1x1x16xf32> to vector<2x16xf32>
    %183 = vector.extract_strided_slice %171 {offsets = [0, 0, 3, 0], sizes = [2, 1, 1, 16], strides = [1, 1, 1, 1]} : vector<2x4x8x16xf32> to vector<2x1x1x16xf32>
    %184 = vector.shape_cast %183 : vector<2x1x1x16xf32> to vector<2x16xf32>
    %185 = arith.maximumf %182, %184 : vector<2x16xf32>
    %c16 = arith.constant 16 : index
    %c0_132 = arith.constant 0 : index
    %186 = vector.load %arg5[%c16, %c0_132] : memref<256x32xf32, #tpu.memory_space<vmem>>, vector<16x32xf32>
    %cst_133 = arith.constant dense<0.000000e+00> : vector<2x32xf32>
    %187 = tpu.matmul %185, %186, %cst_133 {dimension_numbers = #tpu.dot_dimension_numbers<[1], [0], [0], [1], [0, 0, 1, 1], [], []>} : vector<2x16xf32>, vector<16x32xf32>, vector<2x32xf32> -> vector<2x32xf32>
    %188 = arith.addf %180, %187 : vector<2x32xf32>
    %189 = vector.extract_strided_slice %171 {offsets = [0, 0, 4, 0], sizes = [2, 1, 1, 16], strides = [1, 1, 1, 1]} : vector<2x4x8x16xf32> to vector<2x1x1x16xf32>
    %190 = vector.shape_cast %189 : vector<2x1x1x16xf32> to vector<2x16xf32>
    %191 = vector.extract_strided_slice %171 {offsets = [0, 0, 5, 0], sizes = [2, 1, 1, 16], strides = [1, 1, 1, 1]} : vector<2x4x8x16xf32> to vector<2x1x1x16xf32>
    %192 = vector.shape_cast %191 : vector<2x1x1x16xf32> to vector<2x16xf32>
    %193 = arith.maximumf %190, %192 : vector<2x16xf32>
    %c32 = arith.constant 32 : index
    %c0_134 = arith.constant 0 : index
    %194 = vector.load %arg5[%c32, %c0_134] : memref<256x32xf32, #tpu.memory_space<vmem>>, vector<16x32xf32>
    %cst_135 = arith.constant dense<0.000000e+00> : vector<2x32xf32>
    %195 = tpu.matmul %193, %194, %cst_135 {dimension_numbers = #tpu.dot_dimension_numbers<[1], [0], [0], [1], [0, 0, 1, 1], [], []>} : vector<2x16xf32>, vector<16x32xf32>, vector<2x32xf32> -> vector<2x32xf32>
    %196 = arith.addf %188, %195 : vector<2x32xf32>
    %197 = vector.extract_strided_slice %171 {offsets = [0, 0, 6, 0], sizes = [2, 1, 1, 16], strides = [1, 1, 1, 1]} : vector<2x4x8x16xf32> to vector<2x1x1x16xf32>
    %198 = vector.shape_cast %197 : vector<2x1x1x16xf32> to vector<2x16xf32>
    %199 = vector.extract_strided_slice %171 {offsets = [0, 0, 7, 0], sizes = [2, 1, 1, 16], strides = [1, 1, 1, 1]} : vector<2x4x8x16xf32> to vector<2x1x1x16xf32>
    %200 = vector.shape_cast %199 : vector<2x1x1x16xf32> to vector<2x16xf32>
    %201 = arith.maximumf %198, %200 : vector<2x16xf32>
    %c48 = arith.constant 48 : index
    %c0_136 = arith.constant 0 : index
    %202 = vector.load %arg5[%c48, %c0_136] : memref<256x32xf32, #tpu.memory_space<vmem>>, vector<16x32xf32>
    %cst_137 = arith.constant dense<0.000000e+00> : vector<2x32xf32>
    %203 = tpu.matmul %201, %202, %cst_137 {dimension_numbers = #tpu.dot_dimension_numbers<[1], [0], [0], [1], [0, 0, 1, 1], [], []>} : vector<2x16xf32>, vector<16x32xf32>, vector<2x32xf32> -> vector<2x32xf32>
    %204 = arith.addf %196, %203 : vector<2x32xf32>
    %205 = vector.extract_strided_slice %171 {offsets = [0, 1, 0, 0], sizes = [2, 1, 1, 16], strides = [1, 1, 1, 1]} : vector<2x4x8x16xf32> to vector<2x1x1x16xf32>
    %206 = vector.shape_cast %205 : vector<2x1x1x16xf32> to vector<2x16xf32>
    %207 = vector.extract_strided_slice %171 {offsets = [0, 1, 1, 0], sizes = [2, 1, 1, 16], strides = [1, 1, 1, 1]} : vector<2x4x8x16xf32> to vector<2x1x1x16xf32>
    %208 = vector.shape_cast %207 : vector<2x1x1x16xf32> to vector<2x16xf32>
    %209 = arith.maximumf %206, %208 : vector<2x16xf32>
    %c64 = arith.constant 64 : index
    %c0_138 = arith.constant 0 : index
    %210 = vector.load %arg5[%c64, %c0_138] : memref<256x32xf32, #tpu.memory_space<vmem>>, vector<16x32xf32>
    %cst_139 = arith.constant dense<0.000000e+00> : vector<2x32xf32>
    %211 = tpu.matmul %209, %210, %cst_139 {dimension_numbers = #tpu.dot_dimension_numbers<[1], [0], [0], [1], [0, 0, 1, 1], [], []>} : vector<2x16xf32>, vector<16x32xf32>, vector<2x32xf32> -> vector<2x32xf32>
    %212 = arith.addf %204, %211 : vector<2x32xf32>
    %213 = vector.extract_strided_slice %171 {offsets = [0, 1, 2, 0], sizes = [2, 1, 1, 16], strides = [1, 1, 1, 1]} : vector<2x4x8x16xf32> to vector<2x1x1x16xf32>
    %214 = vector.shape_cast %213 : vector<2x1x1x16xf32> to vector<2x16xf32>
    %215 = vector.extract_strided_slice %171 {offsets = [0, 1, 3, 0], sizes = [2, 1, 1, 16], strides = [1, 1, 1, 1]} : vector<2x4x8x16xf32> to vector<2x1x1x16xf32>
    %216 = vector.shape_cast %215 : vector<2x1x1x16xf32> to vector<2x16xf32>
    %217 = arith.maximumf %214, %216 : vector<2x16xf32>
    %c80 = arith.constant 80 : index
    %c0_140 = arith.constant 0 : index
    %218 = vector.load %arg5[%c80, %c0_140] : memref<256x32xf32, #tpu.memory_space<vmem>>, vector<16x32xf32>
    %cst_141 = arith.constant dense<0.000000e+00> : vector<2x32xf32>
    %219 = tpu.matmul %217, %218, %cst_141 {dimension_numbers = #tpu.dot_dimension_numbers<[1], [0], [0], [1], [0, 0, 1, 1], [], []>} : vector<2x16xf32>, vector<16x32xf32>, vector<2x32xf32> -> vector<2x32xf32>
    %220 = arith.addf %212, %219 : vector<2x32xf32>
    %221 = vector.extract_strided_slice %171 {offsets = [0, 1, 4, 0], sizes = [2, 1, 1, 16], strides = [1, 1, 1, 1]} : vector<2x4x8x16xf32> to vector<2x1x1x16xf32>
    %222 = vector.shape_cast %221 : vector<2x1x1x16xf32> to vector<2x16xf32>
    %223 = vector.extract_strided_slice %171 {offsets = [0, 1, 5, 0], sizes = [2, 1, 1, 16], strides = [1, 1, 1, 1]} : vector<2x4x8x16xf32> to vector<2x1x1x16xf32>
    %224 = vector.shape_cast %223 : vector<2x1x1x16xf32> to vector<2x16xf32>
    %225 = arith.maximumf %222, %224 : vector<2x16xf32>
    %c96 = arith.constant 96 : index
    %c0_142 = arith.constant 0 : index
    %226 = vector.load %arg5[%c96, %c0_142] : memref<256x32xf32, #tpu.memory_space<vmem>>, vector<16x32xf32>
    %cst_143 = arith.constant dense<0.000000e+00> : vector<2x32xf32>
    %227 = tpu.matmul %225, %226, %cst_143 {dimension_numbers = #tpu.dot_dimension_numbers<[1], [0], [0], [1], [0, 0, 1, 1], [], []>} : vector<2x16xf32>, vector<16x32xf32>, vector<2x32xf32> -> vector<2x32xf32>
    %228 = arith.addf %220, %227 : vector<2x32xf32>
    %229 = vector.extract_strided_slice %171 {offsets = [0, 1, 6, 0], sizes = [2, 1, 1, 16], strides = [1, 1, 1, 1]} : vector<2x4x8x16xf32> to vector<2x1x1x16xf32>
    %230 = vector.shape_cast %229 : vector<2x1x1x16xf32> to vector<2x16xf32>
    %231 = vector.extract_strided_slice %171 {offsets = [0, 1, 7, 0], sizes = [2, 1, 1, 16], strides = [1, 1, 1, 1]} : vector<2x4x8x16xf32> to vector<2x1x1x16xf32>
    %232 = vector.shape_cast %231 : vector<2x1x1x16xf32> to vector<2x16xf32>
    %233 = arith.maximumf %230, %232 : vector<2x16xf32>
    %c112 = arith.constant 112 : index
    %c0_144 = arith.constant 0 : index
    %234 = vector.load %arg5[%c112, %c0_144] : memref<256x32xf32, #tpu.memory_space<vmem>>, vector<16x32xf32>
    %cst_145 = arith.constant dense<0.000000e+00> : vector<2x32xf32>
    %235 = tpu.matmul %233, %234, %cst_145 {dimension_numbers = #tpu.dot_dimension_numbers<[1], [0], [0], [1], [0, 0, 1, 1], [], []>} : vector<2x16xf32>, vector<16x32xf32>, vector<2x32xf32> -> vector<2x32xf32>
    %236 = arith.addf %228, %235 : vector<2x32xf32>
    %237 = vector.extract_strided_slice %171 {offsets = [0, 2, 0, 0], sizes = [2, 1, 1, 16], strides = [1, 1, 1, 1]} : vector<2x4x8x16xf32> to vector<2x1x1x16xf32>
    %238 = vector.shape_cast %237 : vector<2x1x1x16xf32> to vector<2x16xf32>
    %239 = vector.extract_strided_slice %171 {offsets = [0, 2, 1, 0], sizes = [2, 1, 1, 16], strides = [1, 1, 1, 1]} : vector<2x4x8x16xf32> to vector<2x1x1x16xf32>
    %240 = vector.shape_cast %239 : vector<2x1x1x16xf32> to vector<2x16xf32>
    %241 = arith.maximumf %238, %240 : vector<2x16xf32>
    %c128 = arith.constant 128 : index
    %c0_146 = arith.constant 0 : index
    %242 = vector.load %arg5[%c128, %c0_146] : memref<256x32xf32, #tpu.memory_space<vmem>>, vector<16x32xf32>
    %cst_147 = arith.constant dense<0.000000e+00> : vector<2x32xf32>
    %243 = tpu.matmul %241, %242, %cst_147 {dimension_numbers = #tpu.dot_dimension_numbers<[1], [0], [0], [1], [0, 0, 1, 1], [], []>} : vector<2x16xf32>, vector<16x32xf32>, vector<2x32xf32> -> vector<2x32xf32>
    %244 = arith.addf %236, %243 : vector<2x32xf32>
    %245 = vector.extract_strided_slice %171 {offsets = [0, 2, 2, 0], sizes = [2, 1, 1, 16], strides = [1, 1, 1, 1]} : vector<2x4x8x16xf32> to vector<2x1x1x16xf32>
    %246 = vector.shape_cast %245 : vector<2x1x1x16xf32> to vector<2x16xf32>
    %247 = vector.extract_strided_slice %171 {offsets = [0, 2, 3, 0], sizes = [2, 1, 1, 16], strides = [1, 1, 1, 1]} : vector<2x4x8x16xf32> to vector<2x1x1x16xf32>
    %248 = vector.shape_cast %247 : vector<2x1x1x16xf32> to vector<2x16xf32>
    %249 = arith.maximumf %246, %248 : vector<2x16xf32>
    %c144 = arith.constant 144 : index
    %c0_148 = arith.constant 0 : index
    %250 = vector.load %arg5[%c144, %c0_148] : memref<256x32xf32, #tpu.memory_space<vmem>>, vector<16x32xf32>
    %cst_149 = arith.constant dense<0.000000e+00> : vector<2x32xf32>
    %251 = tpu.matmul %249, %250, %cst_149 {dimension_numbers = #tpu.dot_dimension_numbers<[1], [0], [0], [1], [0, 0, 1, 1], [], []>} : vector<2x16xf32>, vector<16x32xf32>, vector<2x32xf32> -> vector<2x32xf32>
    %252 = arith.addf %244, %251 : vector<2x32xf32>
    %253 = vector.extract_strided_slice %171 {offsets = [0, 2, 4, 0], sizes = [2, 1, 1, 16], strides = [1, 1, 1, 1]} : vector<2x4x8x16xf32> to vector<2x1x1x16xf32>
    %254 = vector.shape_cast %253 : vector<2x1x1x16xf32> to vector<2x16xf32>
    %255 = vector.extract_strided_slice %171 {offsets = [0, 2, 5, 0], sizes = [2, 1, 1, 16], strides = [1, 1, 1, 1]} : vector<2x4x8x16xf32> to vector<2x1x1x16xf32>
    %256 = vector.shape_cast %255 : vector<2x1x1x16xf32> to vector<2x16xf32>
    %257 = arith.maximumf %254, %256 : vector<2x16xf32>
    %c160 = arith.constant 160 : index
    %c0_150 = arith.constant 0 : index
    %258 = vector.load %arg5[%c160, %c0_150] : memref<256x32xf32, #tpu.memory_space<vmem>>, vector<16x32xf32>
    %cst_151 = arith.constant dense<0.000000e+00> : vector<2x32xf32>
    %259 = tpu.matmul %257, %258, %cst_151 {dimension_numbers = #tpu.dot_dimension_numbers<[1], [0], [0], [1], [0, 0, 1, 1], [], []>} : vector<2x16xf32>, vector<16x32xf32>, vector<2x32xf32> -> vector<2x32xf32>
    %260 = arith.addf %252, %259 : vector<2x32xf32>
    %261 = vector.extract_strided_slice %171 {offsets = [0, 2, 6, 0], sizes = [2, 1, 1, 16], strides = [1, 1, 1, 1]} : vector<2x4x8x16xf32> to vector<2x1x1x16xf32>
    %262 = vector.shape_cast %261 : vector<2x1x1x16xf32> to vector<2x16xf32>
    %263 = vector.extract_strided_slice %171 {offsets = [0, 2, 7, 0], sizes = [2, 1, 1, 16], strides = [1, 1, 1, 1]} : vector<2x4x8x16xf32> to vector<2x1x1x16xf32>
    %264 = vector.shape_cast %263 : vector<2x1x1x16xf32> to vector<2x16xf32>
    %265 = arith.maximumf %262, %264 : vector<2x16xf32>
    %c176 = arith.constant 176 : index
    %c0_152 = arith.constant 0 : index
    %266 = vector.load %arg5[%c176, %c0_152] : memref<256x32xf32, #tpu.memory_space<vmem>>, vector<16x32xf32>
    %cst_153 = arith.constant dense<0.000000e+00> : vector<2x32xf32>
    %267 = tpu.matmul %265, %266, %cst_153 {dimension_numbers = #tpu.dot_dimension_numbers<[1], [0], [0], [1], [0, 0, 1, 1], [], []>} : vector<2x16xf32>, vector<16x32xf32>, vector<2x32xf32> -> vector<2x32xf32>
    %268 = arith.addf %260, %267 : vector<2x32xf32>
    %269 = vector.extract_strided_slice %171 {offsets = [0, 3, 0, 0], sizes = [2, 1, 1, 16], strides = [1, 1, 1, 1]} : vector<2x4x8x16xf32> to vector<2x1x1x16xf32>
    %270 = vector.shape_cast %269 : vector<2x1x1x16xf32> to vector<2x16xf32>
    %271 = vector.extract_strided_slice %171 {offsets = [0, 3, 1, 0], sizes = [2, 1, 1, 16], strides = [1, 1, 1, 1]} : vector<2x4x8x16xf32> to vector<2x1x1x16xf32>
    %272 = vector.shape_cast %271 : vector<2x1x1x16xf32> to vector<2x16xf32>
    %273 = arith.maximumf %270, %272 : vector<2x16xf32>
    %c192 = arith.constant 192 : index
    %c0_154 = arith.constant 0 : index
    %274 = vector.load %arg5[%c192, %c0_154] : memref<256x32xf32, #tpu.memory_space<vmem>>, vector<16x32xf32>
    %cst_155 = arith.constant dense<0.000000e+00> : vector<2x32xf32>
    %275 = tpu.matmul %273, %274, %cst_155 {dimension_numbers = #tpu.dot_dimension_numbers<[1], [0], [0], [1], [0, 0, 1, 1], [], []>} : vector<2x16xf32>, vector<16x32xf32>, vector<2x32xf32> -> vector<2x32xf32>
    %276 = arith.addf %268, %275 : vector<2x32xf32>
    %277 = vector.extract_strided_slice %171 {offsets = [0, 3, 2, 0], sizes = [2, 1, 1, 16], strides = [1, 1, 1, 1]} : vector<2x4x8x16xf32> to vector<2x1x1x16xf32>
    %278 = vector.shape_cast %277 : vector<2x1x1x16xf32> to vector<2x16xf32>
    %279 = vector.extract_strided_slice %171 {offsets = [0, 3, 3, 0], sizes = [2, 1, 1, 16], strides = [1, 1, 1, 1]} : vector<2x4x8x16xf32> to vector<2x1x1x16xf32>
    %280 = vector.shape_cast %279 : vector<2x1x1x16xf32> to vector<2x16xf32>
    %281 = arith.maximumf %278, %280 : vector<2x16xf32>
    %c208 = arith.constant 208 : index
    %c0_156 = arith.constant 0 : index
    %282 = vector.load %arg5[%c208, %c0_156] : memref<256x32xf32, #tpu.memory_space<vmem>>, vector<16x32xf32>
    %cst_157 = arith.constant dense<0.000000e+00> : vector<2x32xf32>
    %283 = tpu.matmul %281, %282, %cst_157 {dimension_numbers = #tpu.dot_dimension_numbers<[1], [0], [0], [1], [0, 0, 1, 1], [], []>} : vector<2x16xf32>, vector<16x32xf32>, vector<2x32xf32> -> vector<2x32xf32>
    %284 = arith.addf %276, %283 : vector<2x32xf32>
    %285 = vector.extract_strided_slice %171 {offsets = [0, 3, 4, 0], sizes = [2, 1, 1, 16], strides = [1, 1, 1, 1]} : vector<2x4x8x16xf32> to vector<2x1x1x16xf32>
    %286 = vector.shape_cast %285 : vector<2x1x1x16xf32> to vector<2x16xf32>
    %287 = vector.extract_strided_slice %171 {offsets = [0, 3, 5, 0], sizes = [2, 1, 1, 16], strides = [1, 1, 1, 1]} : vector<2x4x8x16xf32> to vector<2x1x1x16xf32>
    %288 = vector.shape_cast %287 : vector<2x1x1x16xf32> to vector<2x16xf32>
    %289 = arith.maximumf %286, %288 : vector<2x16xf32>
    %c224 = arith.constant 224 : index
    %c0_158 = arith.constant 0 : index
    %290 = vector.load %arg5[%c224, %c0_158] : memref<256x32xf32, #tpu.memory_space<vmem>>, vector<16x32xf32>
    %cst_159 = arith.constant dense<0.000000e+00> : vector<2x32xf32>
    %291 = tpu.matmul %289, %290, %cst_159 {dimension_numbers = #tpu.dot_dimension_numbers<[1], [0], [0], [1], [0, 0, 1, 1], [], []>} : vector<2x16xf32>, vector<16x32xf32>, vector<2x32xf32> -> vector<2x32xf32>
    %292 = arith.addf %284, %291 : vector<2x32xf32>
    %293 = vector.extract_strided_slice %171 {offsets = [0, 3, 6, 0], sizes = [2, 1, 1, 16], strides = [1, 1, 1, 1]} : vector<2x4x8x16xf32> to vector<2x1x1x16xf32>
    %294 = vector.shape_cast %293 : vector<2x1x1x16xf32> to vector<2x16xf32>
    %295 = vector.extract_strided_slice %171 {offsets = [0, 3, 7, 0], sizes = [2, 1, 1, 16], strides = [1, 1, 1, 1]} : vector<2x4x8x16xf32> to vector<2x1x1x16xf32>
    %296 = vector.shape_cast %295 : vector<2x1x1x16xf32> to vector<2x16xf32>
    %297 = arith.maximumf %294, %296 : vector<2x16xf32>
    %c240 = arith.constant 240 : index
    %c0_160 = arith.constant 0 : index
    %298 = vector.load %arg5[%c240, %c0_160] : memref<256x32xf32, #tpu.memory_space<vmem>>, vector<16x32xf32>
    %cst_161 = arith.constant dense<0.000000e+00> : vector<2x32xf32>
    %299 = tpu.matmul %297, %298, %cst_161 {dimension_numbers = #tpu.dot_dimension_numbers<[1], [0], [0], [1], [0, 0, 1, 1], [], []>} : vector<2x16xf32>, vector<16x32xf32>, vector<2x32xf32> -> vector<2x32xf32>
    %300 = arith.addf %292, %299 : vector<2x32xf32>
    %c0_162 = arith.constant 0 : index
    %c0_163 = arith.constant 0 : index
    %301 = vector.load %arg6[%c0_162, %c0_163] : memref<1x32xf32, #tpu.memory_space<vmem>>, vector<1x32xf32>
    %302 = vector.broadcast %301 : vector<1x32xf32> to vector<2x32xf32>
    %303 = arith.addf %300, %302 : vector<2x32xf32>
    %cst_164 = arith.constant 0.000000e+00 : f32
    %304 = vector.broadcast %cst_164 : f32 to vector<2x32xf32>
    %305 = arith.maximumf %303, %304 : vector<2x32xf32>
    %c0_165 = arith.constant 0 : index
    %c0_166 = arith.constant 0 : index
    %306 = vector.load %arg7[%c0_165, %c0_166] : memref<32x10xf32, #tpu.memory_space<vmem>>, vector<32x10xf32>
    %cst_167 = arith.constant dense<0.000000e+00> : vector<2x10xf32>
    %307 = tpu.matmul %305, %306, %cst_167 {dimension_numbers = #tpu.dot_dimension_numbers<[1], [0], [0], [1], [0, 0, 1, 1], [], []>} : vector<2x32xf32>, vector<32x10xf32>, vector<2x10xf32> -> vector<2x10xf32>
    %c0_168 = arith.constant 0 : index
    %c0_169 = arith.constant 0 : index
    %308 = vector.load %arg8[%c0_168, %c0_169] : memref<1x10xf32, #tpu.memory_space<vmem>>, vector<1x10xf32>
    %309 = vector.broadcast %308 : vector<1x10xf32> to vector<2x10xf32>
    %310 = arith.addf %307, %309 : vector<2x10xf32>
    %c0_170 = arith.constant 0 : index
    %c0_171 = arith.constant 0 : index
    %311 = vector.load %arg9[%c0_170, %c0_171] : memref<2x10xf32, #tpu.memory_space<vmem>>, vector<2x10xf32>
    tpu.vector_store %arg9[%c0_170, %c0_171], %310 {strides = array<i32>} : memref<2x10xf32, #tpu.memory_space<vmem>>, vector<2x10xf32>,
    return
  }
}

</mosaic_0001>

<bundles_post_ra>
// kernel: convnet_forward.1
= control target key start
LH: loop header
LB: loop body
LE: loop exit
PB: predicated region body
PF: predicated region fallthrough
CT: control target
= control target key end

     0   :  { %vm768_vm0 = vcmask 1043456   ;;  %vm33_vm1 = vcmask 31744   ;;  %v16632_v1 = vmov 0.0   ;;  %vm36_vm2 = vcmask 25600   ;;  %s16622_s0 = inlined_call_operand.vmem [shape: f32[2,16,16,4], index: 0, kind: input, shape index: {}]   ;;  %s16623_s1 = inlined_call_operand.vmem [shape: f32[9,4,8], index: 1, kind: input, shape index: {}]   ;;  %s16624_s2 = inlined_call_operand.vmem [shape: f32[1,8], index: 2, kind: input, shape index: {}]   ;;  %s16625_s3 = inlined_call_operand.vmem [shape: f32[9,8,16], index: 3, kind: input, shape index: {}]   ;;  %s16626_s4 = inlined_call_operand.vmem [shape: f32[1,16], index: 4, kind: input, shape index: {}]   ;;  %s16627_s5 = inlined_call_operand.vmem [shape: f32[256,32], index: 5, kind: input, shape index: {}]   ;;  %s16628_s6 = inlined_call_operand.vmem [shape: f32[1,32], index: 6, kind: input, shape index: {}]   ;;  %s16629_s7 = inlined_call_operand.vmem [shape: f32[32,10], index: 7, kind: input, shape index: {}]   ;;  %s16630_s8 = inlined_call_operand.vmem [shape: f32[1,10], index: 8, kind: input, shape index: {}]   ;;  %s16631_s9 = inlined_call_operand.hbm [shape: f32[2,10], index: 9, kind: output, shape index: {}]  }
   0x1   :  { %v11862_v0 = vld [vmem:[%s16623_s1 + $0x4] sm:$0xf]  ;;  %34 = vst.msk [vmem:[#allocation2] sm:$0xff] %vm33_vm1, %v16632_v1  ;;  %35 = vst.msk [vmem:[#allocation2 + $0x8] sm:$0xff] %vm33_vm1, %v16632_v1  ;;  %v12015_v2 = vld [vmem:[%s16623_s1 + $0x8] sm:$0xf] }
   0x2   :  { %10462 = vmatprep.subr.msk.mxu0 %vm768_vm0, %v11862_v0  ;;  %11701 = vmatprep.subr.msk.mxu1 %vm768_vm0, %v11862_v0  ;;  %38 = vst.msk [vmem:[#allocation2 + $0x18] sm:$0xff] %vm33_vm1, %v16632_v1  ;;  %39 = vst.msk [vmem:[#allocation2 + $0x20] sm:$0xff] %vm33_vm1, %v16632_v1  ;;  %v203_v3 = vld [vmem:[%s16622_s0 + $0x1e0] sm:$0xff]  ;;  %v204_v4 = vld [vmem:[%s16622_s0 + $0x1e8] sm:$0xff]  ;;  %vm477_vm3 = vcmask 1046528   ;;  %vm1673_vm4 = vcmask 1045504  }
   0x3   :  { %41 = vst.msk [vmem:[#allocation2 + $0x30] sm:$0xff] %vm33_vm1, %v16632_v1  ;;  %42 = vst.msk [vmem:[#allocation2 + $0x38] sm:$0xff] %vm33_vm1, %v16632_v1  ;;  %10463 = vmatpush3.msk.msra.mxu0 %vm768_vm0, %v11862_v0  ;;  %11702 = vmatpush3.msk.msra.mxu1 %vm768_vm0, %v11862_v0  ;;  %v143_v5 = vld [vmem:[%s16622_s0] sm:$0xff]  ;;  %v144_v6 = vld [vmem:[%s16622_s0 + $0x8] sm:$0xff] }
   0x4   :  { %44 = vst.msk [vmem:[#allocation2 + $0x48] sm:$0xff] %vm33_vm1, %v16632_v1  ;;  %45 = vst.msk [vmem:[#allocation2 + $0x50] sm:$0xff] %vm33_vm1, %v16632_v1  ;;  %v12109_v7 = vld [vmem:[%s16623_s1] sm:$0xf]  ;;  %10658 = vmatprep.subr.msk.mxu0 %vm768_vm0, %v12015_v2  ;;  %v145_v8 = vld [vmem:[%s16622_s0 + $0x10] sm:$0xff] }
   0x5   :  { %47 = vst.msk [vmem:[#allocation2 + $0x60] sm:$0xff] %vm33_vm1, %v16632_v1  ;;  %48 = vst.msk [vmem:[#allocation2 + $0x68] sm:$0xff] %vm33_vm1, %v16632_v1  ;;  %10560 = vmatprep.subr.msk.mxu1 %vm768_vm0, %v12109_v7  ;;  %v146_v9 = vld [vmem:[%s16622_s0 + $0x18] sm:$0xff]  ;;  %v147_v10 = vld [vmem:[%s16622_s0 + $0x20] sm:$0xff] }
   0x6   :  { %50 = vst.msk [vmem:[#allocation2 + $0x78] sm:$0xff] %vm33_vm1, %v16632_v1  ;;  %51 = vst.msk [vmem:[#allocation2 + $0x80] sm:$0xff] %vm33_vm1, %v16632_v1  ;;  %v148_v11 = vld [vmem:[%s16622_s0 + $0x28] sm:$0xff]  ;;  %v149_v12 = vld [vmem:[%s16622_s0 + $0x30] sm:$0xff] }
   0x7   :  { %53 = vst.msk [vmem:[#allocation2 + $0x90] sm:$0xff] %vm33_vm1, %v16632_v1  ;;  %54 = vst.msk [vmem:[#allocation2 + $0x98] sm:$0xff] %vm33_vm1, %v16632_v1  ;;  %v150_v13 = vld [vmem:[%s16622_s0 + $0x38] sm:$0xff]  ;;  %v151_v14 = vld [vmem:[%s16622_s0 + $0x40] sm:$0xff] }
   0x8   :  { %56 = vst.msk [vmem:[#allocation2 + $0xa8] sm:$0xff] %vm33_vm1, %v16632_v1  ;;  %57 = vst.msk [vmem:[#allocation2 + $0xb0] sm:$0xff] %vm33_vm1, %v16632_v1  ;;  %v152_v15 = vld [vmem:[%s16622_s0 + $0x48] sm:$0xff]  ;;  %v153_v16 = vld [vmem:[%s16622_s0 + $0x50] sm:$0xff] }
   0x9   :  { %59 = vst.msk [vmem:[#allocation2 + $0xc0] sm:$0xff] %vm33_vm1, %v16632_v1  ;;  %60 = vst.msk [vmem:[#allocation2 + $0xc8] sm:$0xff] %vm33_vm1, %v16632_v1  ;;  %v154_v17 = vld [vmem:[%s16622_s0 + $0x58] sm:$0xff]  ;;  %v155_v18 = vld [vmem:[%s16622_s0 + $0x60] sm:$0xff] }
   0xa   :  { %62 = vst.msk [vmem:[#allocation2 + $0xd8] sm:$0xff] %vm33_vm1, %v16632_v1  ;;  %63 = vst.msk [vmem:[#allocation2 + $0xe0] sm:$0xff] %vm33_vm1, %v16632_v1  ;;  %v156_v19 = vld [vmem:[%s16622_s0 + $0x68] sm:$0xff]  ;;  %v157_v20 = vld [vmem:[%s16622_s0 + $0x70] sm:$0xff] }
   0xb   :  { %65 = vst.msk [vmem:[#allocation2 + $0xf0] sm:$0xff] %vm33_vm1, %v16632_v1  ;;  %66 = vst.msk [vmem:[#allocation2 + $0xf8] sm:$0xff] %vm33_vm1, %v16632_v1  ;;  %v158_v21 = vld [vmem:[%s16622_s0 + $0x78] sm:$0xff]  ;;  %v159_v22 = vld [vmem:[%s16622_s0 + $0x80] sm:$0xff] }
   0xc   :  { %68 = vst.msk [vmem:[#allocation2 + $0x108] sm:$0xff] %vm33_vm1, %v16632_v1  ;;  %69 = vst.msk [vmem:[#allocation2 + $0x110] sm:$0xff] %vm33_vm1, %v16632_v1  ;;  %v12175_v23 = vld [vmem:[#allocation2] sm:$0xff]  ;;  %v12177_v24 = vld [vmem:[#allocation2 + $0x8] sm:$0xff] }
   0xd   :  { %71 = vst.msk [vmem:[#allocation2 + $0x120] sm:$0xff] %vm33_vm1, %v16632_v1  ;;  %72 = vst.msk [vmem:[#allocation2 + $0x128] sm:$0xff] %vm33_vm1, %v16632_v1  ;;  %v160_v25 = vld [vmem:[%s16622_s0 + $0x88] sm:$0xff]  ;;  %v478_v26 = vrot.slane %v12175_v23, 1  ;;  %v479_v27 = vrot.slane %v12177_v24, 1  ;;  %v161_v30 = vld [vmem:[%s16622_s0 + $0x90] sm:$0xff] }
   0xe   :  { %74 = vst.msk [vmem:[#allocation2 + $0x138] sm:$0xff] %vm33_vm1, %v16632_v1  ;;  %75 = vst.msk [vmem:[#allocation2 + $0x140] sm:$0xff] %vm33_vm1, %v16632_v1 }
   0xf   :  { %77 = vst.msk [vmem:[#allocation2 + $0x150] sm:$0xff] %vm33_vm1, %v16632_v1  ;;  %78 = vst.msk [vmem:[#allocation2 + $0x158] sm:$0xff] %vm33_vm1, %v16632_v1  ;;  %v480_v35 = vsel %vm477_vm3, %v478_v26, %v479_v27  ;;  %v1674_v26 = vrot.slane %v12175_v23, 2 }
  0x10   :  { %80 = vst.msk [vmem:[#allocation2 + $0x168] sm:$0xff] %vm33_vm1, %v16632_v1  ;;  %81 = vst.msk [vmem:[#allocation2 + $0x170] sm:$0xff] %vm33_vm1, %v16632_v1  ;;  %10464 = vmatprep.mubr.msk.f32.mxu0 %vm33_vm1, %v480_v35  ;;  %v175_v35 = vld [vmem:[%s16622_s0 + $0x100] sm:$0xff] }
  0x11   :  { %83 = vst.msk [vmem:[#allocation2 + $0x180] sm:$0xff] %vm33_vm1, %v16632_v1  ;;  %84 = vst.msk [vmem:[#allocation2 + $0x188] sm:$0xff] %vm33_vm1, %v16632_v1 }
  0x12   :  { %86 = vst.msk [vmem:[#allocation2 + $0x198] sm:$0xff] %vm33_vm1, %v16632_v1  ;;  %87 = vst.msk [vmem:[#allocation2 + $0x1a0] sm:$0xff] %vm33_vm1, %v16632_v1 }
  0x13   :  { %89 = vst.msk [vmem:[#allocation2 + $0x1b0] sm:$0xff] %vm33_vm1, %v16632_v1  ;;  %90 = vst.msk [vmem:[#allocation2 + $0x1b8] sm:$0xff] %vm33_vm1, %v16632_v1 }
  0x14   :  { %92 = vst.msk [vmem:[#allocation2 + $0x1c8] sm:$0xff] %vm33_vm1, %v16632_v1  ;;  %93 = vst.msk [vmem:[#allocation2 + $0x1d0] sm:$0xff] %vm33_vm1, %v16632_v1 }
  0x15   :  { %95 = vst.msk [vmem:[#allocation2 + $0x1e0] sm:$0xff] %vm33_vm1, %v16632_v1  ;;  %96 = vst.msk [vmem:[#allocation2 + $0x1e8] sm:$0xff] %vm33_vm1, %v16632_v1 }
  0x16   :  { %98 = vst.msk [vmem:[#allocation2 + $0x1f8] sm:$0xff] %vm33_vm1, %v16632_v1  ;;  %99 = vst.msk [vmem:[#allocation2 + $0x200] sm:$0xff] %vm33_vm1, %v16632_v1 }
  0x17   :  { %101 = vst.msk [vmem:[#allocation2 + $0x210] sm:$0xff] %vm33_vm1, %v16632_v1  ;;  %102 = vst.msk [vmem:[#allocation2 + $0x218] sm:$0xff] %vm33_vm1, %v16632_v1 }
  0x18   :  { %104 = vst.msk [vmem:[#allocation2 + $0x228] sm:$0xff] %vm33_vm1, %v16632_v1  ;;  %105 = vst.msk [vmem:[#allocation2 + $0x230] sm:$0xff] %vm33_vm1, %v16632_v1 }
  0x19   :  { %107 = vst.msk [vmem:[#allocation2 + $0x240] sm:$0xff] %vm33_vm1, %v16632_v1  ;;  %108 = vst.msk [vmem:[#allocation2 + $0x248] sm:$0xff] %vm33_vm1, %v16632_v1 }
  0x1a   :  { %110 = vst.msk [vmem:[#allocation2 + $0x258] sm:$0xff] %vm33_vm1, %v16632_v1  ;;  %111 = vst.msk [vmem:[#allocation2 + $0x260] sm:$0xff] %vm33_vm1, %v16632_v1 }
  0x1b   :  { %113 = vst.msk [vmem:[#allocation2 + $0x270] sm:$0xff] %vm33_vm1, %v16632_v1  ;;  %114 = vst.msk [vmem:[#allocation2 + $0x278] sm:$0xff] %vm33_vm1, %v16632_v1 }
  0x1c   :  { %116 = vst.msk [vmem:[#allocation2 + $0x288] sm:$0xff] %vm33_vm1, %v16632_v1  ;;  %117 = vst.msk [vmem:[#allocation2 + $0x290] sm:$0xff] %vm33_vm1, %v16632_v1 }
  0x1d   :  { %119 = vst.msk [vmem:[#allocation2 + $0x2a0] sm:$0xff] %vm33_vm1, %v16632_v1  ;;  %120 = vst.msk [vmem:[#allocation2 + $0x2a8] sm:$0xff] %vm33_vm1, %v16632_v1 }
  0x1e   :  { %122 = vst.msk [vmem:[#allocation2 + $0x2b8] sm:$0xff] %vm33_vm1, %v16632_v1  ;;  %123 = vst.msk [vmem:[#allocation2 + $0x2c0] sm:$0xff] %vm33_vm1, %v16632_v1 }
  0x1f   :  { %125 = vst.msk [vmem:[#allocation2 + $0x2d0] sm:$0xff] %vm33_vm1, %v16632_v1  ;;  %126 = vst.msk [vmem:[#allocation2 + $0x2d8] sm:$0xff] %vm33_vm1, %v16632_v1 }
  0x20   :  { %128 = vst.msk [vmem:[#allocation2 + $0x2e8] sm:$0xff] %vm33_vm1, %v16632_v1  ;;  %129 = vst.msk [vmem:[#allocation2 + $0x2f0] sm:$0xff] %vm33_vm1, %v16632_v1 }
  0x21   :  { %131 = vst.msk [vmem:[#allocation2 + $0x300] sm:$0xff] %vm33_vm1, %v16632_v1  ;;  %132 = vst.msk [vmem:[#allocation2 + $0x308] sm:$0xff] %vm33_vm1, %v16632_v1 }
  0x22   :  { %134 = vst.msk [vmem:[#allocation2 + $0x318] sm:$0xff] %vm33_vm1, %v16632_v1  ;;  %135 = vst.msk [vmem:[#allocation2 + $0x320] sm:$0xff] %vm33_vm1, %v16632_v1 }
  0x23   :  { %137 = vst.msk [vmem:[#allocation2 + $0x330] sm:$0xff] %vm33_vm1, %v16632_v1  ;;  %138 = vst.msk [vmem:[#allocation2 + $0x338] sm:$0xff] %vm33_vm1, %v16632_v1 }
  0x24   :  { %140 = vst.msk [vmem:[#allocation2 + $0x348] sm:$0xff] %vm33_vm1, %v16632_v1  ;;  %141 = vst.msk [vmem:[#allocation2 + $0x350] sm:$0xff] %vm33_vm1, %v16632_v1 }
  0x25   :  { %37 = vst.msk [vmem:[#allocation2 + $0x10] sm:$0x3] %vm36_vm2, %v16632_v1  ;;  %40 = vst.msk [vmem:[#allocation2 + $0x28] sm:$0x3] %vm36_vm2, %v16632_v1 }
  0x26   :  { %43 = vst.msk [vmem:[#allocation2 + $0x40] sm:$0x3] %vm36_vm2, %v16632_v1  ;;  %46 = vst.msk [vmem:[#allocation2 + $0x58] sm:$0x3] %vm36_vm2, %v16632_v1 }
  0x27   :  { %49 = vst.msk [vmem:[#allocation2 + $0x70] sm:$0x3] %vm36_vm2, %v16632_v1  ;;  %52 = vst.msk [vmem:[#allocation2 + $0x88] sm:$0x3] %vm36_vm2, %v16632_v1 }
  0x28   :  { %55 = vst.msk [vmem:[#allocation2 + $0xa0] sm:$0x3] %vm36_vm2, %v16632_v1  ;;  %58 = vst.msk [vmem:[#allocation2 + $0xb8] sm:$0x3] %vm36_vm2, %v16632_v1 }
  0x29   :  { %61 = vst.msk [vmem:[#allocation2 + $0xd0] sm:$0x3] %vm36_vm2, %v16632_v1  ;;  %64 = vst.msk [vmem:[#allocation2 + $0xe8] sm:$0x3] %vm36_vm2, %v16632_v1 }
  0x2a   :  { %67 = vst.msk [vmem:[#allocation2 + $0x100] sm:$0x3] %vm36_vm2, %v16632_v1  ;;  %70 = vst.msk [vmem:[#allocation2 + $0x118] sm:$0x3] %vm36_vm2, %v16632_v1 }
  0x2b   :  { %73 = vst.msk [vmem:[#allocation2 + $0x130] sm:$0x3] %vm36_vm2, %v16632_v1  ;;  %76 = vst.msk [vmem:[#allocation2 + $0x148] sm:$0x3] %vm36_vm2, %v16632_v1 }
  0x2c   :  { %79 = vst.msk [vmem:[#allocation2 + $0x160] sm:$0x3] %vm36_vm2, %v16632_v1  ;;  %82 = vst.msk [vmem:[#allocation2 + $0x178] sm:$0x3] %vm36_vm2, %v16632_v1  ;;  %v12187_v28 = vld [vmem:[#allocation2 + $0x10] sm:$0x3] }
  0x2d   :  { %85 = vst.msk [vmem:[#allocation2 + $0x190] sm:$0x3] %vm36_vm2, %v16632_v1  ;;  %88 = vst.msk [vmem:[#allocation2 + $0x1a8] sm:$0x3] %vm36_vm2, %v16632_v1  ;;  %v481_v31 = vrot.slane %v12187_v28, 1 }
  0x2e   :  { %91 = vst.msk [vmem:[#allocation2 + $0x1c0] sm:$0x3] %vm36_vm2, %v16632_v1  ;;  %94 = vst.msk [vmem:[#allocation2 + $0x1d8] sm:$0x3] %vm36_vm2, %v16632_v1 }
  0x2f   :  { %97 = vst.msk [vmem:[#allocation2 + $0x1f0] sm:$0x3] %vm36_vm2, %v16632_v1  ;;  %100 = vst.msk [vmem:[#allocation2 + $0x208] sm:$0x3] %vm36_vm2, %v16632_v1  ;;  %v482_v41 = vsel %vm477_vm3, %v479_v27, %v481_v31  ;;  %v169_v27 = vld [vmem:[%s16622_s0 + $0xd0] sm:$0xff]  ;;  %v172_v31 = vld [vmem:[%s16622_s0 + $0xe8] sm:$0xff] }
  0x30   :  { %103 = vst.msk [vmem:[#allocation2 + $0x220] sm:$0x3] %vm36_vm2, %v16632_v1  ;;  %106 = vst.msk [vmem:[#allocation2 + $0x238] sm:$0x3] %vm36_vm2, %v16632_v1  ;;  %10465 = vmatmul.mubr.msk.f32.vlgmr.msra.gmra.mxu0 %vm33_vm1, %v482_v41 }
  0x31   :  { %109 = vst.msk [vmem:[#allocation2 + $0x250] sm:$0x3] %vm36_vm2, %v16632_v1  ;;  %112 = vst.msk [vmem:[#allocation2 + $0x268] sm:$0x3] %vm36_vm2, %v16632_v1  ;;  %10659 = vmatpush3.msk.msra.mxu0 %vm768_vm0, %v12015_v2 }
  0x32   :  { %115 = vst.msk [vmem:[#allocation2 + $0x280] sm:$0x3] %vm36_vm2, %v16632_v1  ;;  %118 = vst.msk [vmem:[#allocation2 + $0x298] sm:$0x3] %vm36_vm2, %v16632_v1 }
  0x33   :  { %121 = vst.msk [vmem:[#allocation2 + $0x2b0] sm:$0x3] %vm36_vm2, %v16632_v1  ;;  %124 = vst.msk [vmem:[#allocation2 + $0x2c8] sm:$0x3] %vm36_vm2, %v16632_v1 }
  0x34   :  { %127 = vst.msk [vmem:[#allocation2 + $0x2e0] sm:$0x3] %vm36_vm2, %v16632_v1  ;;  %130 = vst.msk [vmem:[#allocation2 + $0x2f8] sm:$0x3] %vm36_vm2, %v16632_v1 }
  0x35   :  { %133 = vst.msk [vmem:[#allocation2 + $0x310] sm:$0x3] %vm36_vm2, %v16632_v1  ;;  %136 = vst.msk [vmem:[#allocation2 + $0x328] sm:$0x3] %vm36_vm2, %v16632_v1 }
  0x36   :  { %139 = vst.msk [vmem:[#allocation2 + $0x340] sm:$0x3] %vm36_vm2, %v16632_v1  ;;  %142 = vst.msk [vmem:[#allocation2 + $0x358] sm:$0x3] %vm36_vm2, %v16632_v1 }
  0x37   :  { %268 = vst.msk [vmem:[#allocation2 + $0x319] sm:$0xff] %vm33_vm1, %v203_v3  ;;  %269 = vst.msk [vmem:[#allocation2 + $0x321] sm:$0xff] %vm33_vm1, %v204_v4 }
  0x38   :  { %208 = vst.msk [vmem:[#allocation2 + $0x19] sm:$0xff] %vm33_vm1, %v143_v5  ;;  %209 = vst.msk [vmem:[#allocation2 + $0x21] sm:$0xff] %vm33_vm1, %v144_v6 }
  0x39   :  { %210 = vst.msk [vmem:[#allocation2 + $0x31] sm:$0xff] %vm33_vm1, %v145_v8  ;;  %211 = vst.msk [vmem:[#allocation2 + $0x39] sm:$0xff] %vm33_vm1, %v146_v9  ;;  %v162_v8 = vld [vmem:[%s16622_s0 + $0x98] sm:$0xff] }
  0x3a   :  { %212 = vst.msk [vmem:[#allocation2 + $0x49] sm:$0xff] %vm33_vm1, %v147_v10  ;;  %213 = vst.msk [vmem:[#allocation2 + $0x51] sm:$0xff] %vm33_vm1, %v148_v11  ;;  %v1677_v10 = vrot.slane %v12187_v28, 2  ;;  %v170_v28 = vld [vmem:[%s16622_s0 + $0xd8] sm:$0xff] }
  0x3b   :  { %214 = vst.msk [vmem:[#allocation2 + $0x61] sm:$0xff] %vm33_vm1, %v149_v12  ;;  %215 = vst.msk [vmem:[#allocation2 + $0x69] sm:$0xff] %vm33_vm1, %v150_v13 }
  0x3c   :  { %216 = vst.msk [vmem:[#allocation2 + $0x79] sm:$0xff] %vm33_vm1, %v151_v14  ;;  %217 = vst.msk [vmem:[#allocation2 + $0x81] sm:$0xff] %vm33_vm1, %v152_v15  ;;  %v163_v15 = vld [vmem:[%s16622_s0 + $0xa0] sm:$0xff] }
  0x3d   :  { %218 = vst.msk [vmem:[#allocation2 + $0x91] sm:$0xff] %vm33_vm1, %v153_v16  ;;  %219 = vst.msk [vmem:[#allocation2 + $0x99] sm:$0xff] %vm33_vm1, %v154_v17  ;;  %v164_v16 = vld [vmem:[%s16622_s0 + $0xa8] sm:$0xff]  ;;  %v165_v17 = vld [vmem:[%s16622_s0 + $0xb0] sm:$0xff] }
  0x3e   :  { %220 = vst.msk [vmem:[#allocation2 + $0xa9] sm:$0xff] %vm33_vm1, %v155_v18  ;;  %221 = vst.msk [vmem:[#allocation2 + $0xb1] sm:$0xff] %vm33_vm1, %v156_v19  ;;  %v12189_v29 = vld [vmem:[#allocation2 + $0x318] sm:$0xff]  ;;  %v12196_v32 = vld [vmem:[#allocation2 + $0x320] sm:$0xff] }
  0x3f   :  { %222 = vst.msk [vmem:[#allocation2 + $0xc1] sm:$0xff] %vm33_vm1, %v157_v20  ;;  %223 = vst.msk [vmem:[#allocation2 + $0xc9] sm:$0xff] %vm33_vm1, %v158_v21  ;;  %v633_v33 = vrot.slane %v12189_v29, 1  ;;  %v373_v34 = vld [vmem:[#allocation2 + $0x328] sm:$0x3]  ;;  %v634_v36 = vrot.slane %v12196_v32, 1 }
  0x40   :  { %224 = vst.msk [vmem:[#allocation2 + $0xd9] sm:$0xff] %vm33_vm1, %v159_v22  ;;  %225 = vst.msk [vmem:[#allocation2 + $0xe1] sm:$0xff] %vm33_vm1, %v160_v25  ;;  %v636_v37 = vrot.slane %v373_v34, 1  ;;  %v12202_v38 = vld [vmem:[#allocation2 + $0x18] sm:$0xff]  ;;  %v12204_v39 = vld [vmem:[#allocation2 + $0x20] sm:$0xff] }
  0x41   :  { %226 = vst.msk [vmem:[#allocation2 + $0xf1] sm:$0xff] %vm33_vm1, %v161_v30  ;;  %v12206_v40 = vld [vmem:[#allocation2 + $0x30] sm:$0xff]  ;;  %v483_v42 = vrot.slane %v12202_v38, 1  ;;  %v484_v43 = vrot.slane %v12204_v39, 1  ;;  %v12212_v44 = vld [vmem:[#allocation2 + $0x28] sm:$0x3]  ;;  %v12219_v47 = vsel %vm477_vm3, %v633_v33, %v634_v36 }
  0x42   :  { %v12214_v45 = vld [vmem:[#allocation2 + $0x38] sm:$0xff]  ;;  %v488_v46 = vrot.slane %v12206_v40, 1  ;;  %16914 = vst [vmem:[#allocation7_spill] sm:$0xff] %v12219_v47  ;;  %v12222_v48 = vsel %vm477_vm3, %v634_v36, %v636_v37  ;;  %v486_v49 = vrot.slane %v12212_v44, 1  ;;  %v12226_v51 = vld [vmem:[#allocation2 + $0x40] sm:$0x3]  ;;  %10557 = vmatprep.mubr.msk.f32.mxu1 %vm33_vm1, %v12219_v47 }
  0x43   :  { %16915 = vst [vmem:[#allocation8_spill] sm:$0xff] %v12222_v48  ;;  %v489_v50 = vrot.slane %v12214_v45, 1  ;;  %v12228_v52 = vld [vmem:[#allocation2 + $0x48] sm:$0xff]  ;;  %v12230_v53 = vld [vmem:[#allocation2 + $0x50] sm:$0xff]  ;;  %v12237_v54 = vsel %vm477_vm3, %v483_v42, %v484_v43  ;;  %v491_v55 = vrot.slane %v12226_v51, 1  ;;  %10558 = vmatmul.mubr.msk.f32.vlgmr.msra.gmra.mxu1 %vm33_vm1, %v12222_v48  ;;  %v12258_v61 = vld [vmem:[#allocation2 + $0x60] sm:$0xff] }
  0x44   :  { %16916 = vst [vmem:[#allocation9_spill] sm:$0xff] %v12237_v54  ;;  %10467 = vmatprep.mubr.msk.f32.mxu0 %vm33_vm1, %v12237_v54  ;;  %v12245_v56 = vsel %vm477_vm3, %v484_v43, %v486_v49  ;;  %v493_v58 = vrot.slane %v12228_v52, 1  ;;  %v494_v59 = vrot.slane %v12230_v53, 1  ;;  %v12252_v60 = vld [vmem:[#allocation2 + $0x58] sm:$0x3]  ;;  %10561 = vmatpush3.msk.msra.mxu1 %vm768_vm0, %v12109_v7  ;;  %v12260_v62 = vld [vmem:[#allocation2 + $0x68] sm:$0xff] }
  0x45   :  { %16917 = vst [vmem:[#allocation10_spill] sm:$0xff] %v12245_v56  ;;  %v12248_v57 = vsel %vm477_vm3, %v488_v46, %v489_v50  ;;  %10562 = vmatprep.mubr.msk.f32.mxu1 %vm33_vm1, %v12175_v23  ;;  %10468 = vmatmul.mubr.msk.f32.gmra.mxu0 %vm33_vm1, %v12245_v56  ;;  %v12267_v63 = vsel %vm477_vm3, %v489_v50, %v491_v55  ;;  %v496_v0 = vrot.slane %v12252_v60, 1  ;;  %v498_v3 = vrot.slane %v12258_v61, 1  ;;  %v12277_v5 = vld [vmem:[#allocation2 + $0x70] sm:$0x3]  ;;  %v12281_v6 = vld [vmem:[#allocation2 + $0x78] sm:$0xff] }
  0x46   :  { %16918 = vst [vmem:[#allocation11_spill] sm:$0xff] %v12248_v57  ;;  %10470 = vmatprep.mubr.msk.f32.mxu0 %vm33_vm1, %v12248_v57  ;;  %16919 = vst [vmem:[#allocation12_spill] sm:$0xff] %v12267_v63  ;;  %v12273_v2 = vsel %vm477_vm3, %v493_v58, %v494_v59  ;;  %v499_v4 = vrot.slane %v12260_v62, 1  ;;  %v12283_v7 = vld [vmem:[#allocation2 + $0x80] sm:$0xff]  ;;  %v12290_v9 = vld [vmem:[#allocation2 + $0x88] sm:$0x3] }
  0x47   :  { %10563 = vmatmul.mubr.msk.f32.vlgmr.msra.gmra.mxu1 %vm33_vm1, %v12177_v24  ;;  %16920 = vst [vmem:[#allocation13_spill] sm:$0xff] %v12273_v2  ;;  %227 = vst.msk [vmem:[#allocation2 + $0xf9] sm:$0xff] %vm33_vm1, %v162_v8  ;;  %v12297_v11 = vsel %vm477_vm3, %v494_v59, %v496_v0  ;;  %v501_v12 = vrot.slane %v12277_v5, 1  ;;  %v12300_v13 = vld [vmem:[#allocation2 + $0x90] sm:$0xff]  ;;  %v12302_v14 = vld [vmem:[#allocation2 + $0x98] sm:$0xff]  ;;  %v503_v19 = vrot.slane %v12281_v6, 1 }
  0x48   :  { %10565 = vmatprep.mubr.msk.f32.mxu1 %vm33_vm1, %v12202_v38  ;;  %16921 = vst [vmem:[#allocation14_spill] sm:$0xff] %v12297_v11  ;;  %v12316_v18 = vsel %vm477_vm3, %v498_v3, %v499_v4  ;;  %v504_v20 = vrot.slane %v12283_v7, 1  ;;  %228 = vst.msk [vmem:[#allocation2 + $0x109] sm:$0xff] %vm33_vm1, %v163_v15  ;;  %v166_v21 = vld [vmem:[%s16622_s0 + $0xb8] sm:$0xff]  ;;  %v167_v22 = vld [vmem:[%s16622_s0 + $0xc0] sm:$0xff]  ;;  %v1675_v30 = vrot.slane %v12177_v24, 2 }
  0x49   :  { %10471 = vmatmul.mubr.msk.f32.gmra.mxu0 %vm33_vm1, %v12267_v63  ;;  %16922 = vst [vmem:[#allocation15_spill] sm:$0xff] %v12316_v18  ;;  %229 = vst.msk [vmem:[#allocation2 + $0x111] sm:$0xff] %vm33_vm1, %v164_v16  ;;  %v168_v25 = vld [vmem:[%s16622_s0 + $0xc8] sm:$0xff]  ;;  %v171_v23 = vld [vmem:[%s16622_s0 + $0xe0] sm:$0xff]  ;;  %v12359_v33 = vsel %vm477_vm3, %v499_v4, %v501_v12  ;;  %v506_v24 = vrot.slane %v12290_v9, 1  ;;  %v508_v43 = vrot.slane %v12300_v13, 1 }
  0x4a   :  { %10473 = vmatprep.mubr.msk.f32.mxu0 %vm33_vm1, %v12273_v2  ;;  %230 = vst.msk [vmem:[#allocation2 + $0x121] sm:$0xff] %vm33_vm1, %v165_v17  ;;  %231 = vst.msk [vmem:[#allocation2 + $0x129] sm:$0xff] %vm33_vm1, %v166_v21  ;;  %v12362_v34 = vld [vmem:[#allocation2 + $0xa0] sm:$0x3]  ;;  %v176_v36 = vld [vmem:[%s16622_s0 + $0x108] sm:$0xff]  ;;  %v12372_v37 = vsel %vm1673_vm4, %v1674_v26, %v1675_v30  ;;  %v12375_v41 = vsel %vm1673_vm4, %v1675_v30, %v1677_v10  ;;  %v12380_v42 = vsel %vm477_vm3, %v503_v19, %v504_v20 }
  0x4b   :  { %10566 = vmatmul.mubr.msk.f32.gmra.mxu1 %vm33_vm1, %v12204_v39  ;;  %232 = vst.msk [vmem:[#allocation2 + $0x139] sm:$0xff] %vm33_vm1, %v167_v22  ;;  %233 = vst.msk [vmem:[#allocation2 + $0x141] sm:$0xff] %vm33_vm1, %v168_v25  ;;  %v509_v46 = vrot.slane %v12302_v14, 1  ;;  %v177_v49 = vld [vmem:[%s16622_s0 + $0x110] sm:$0xff]  ;;  %v178_v50 = vld [vmem:[%s16622_s0 + $0x118] sm:$0xff]  ;;  %v12422_v10 = vsel %vm477_vm3, %v504_v20, %v506_v24  ;;  %v511_v12 = vrot.slane %v12362_v34, 1 }
  0x4c   :  { %10568 = vmatprep.mubr.msk.f32.mxu1 %vm33_vm1, %v12206_v40  ;;  %234 = vst.msk [vmem:[#allocation2 + $0x151] sm:$0xff] %vm33_vm1, %v169_v27  ;;  %235 = vst.msk [vmem:[#allocation2 + $0x159] sm:$0xff] %vm33_vm1, %v170_v28  ;;  %v179_v55 = vld [vmem:[%s16622_s0 + $0x120] sm:$0xff]  ;;  %v12397_v58 = vld [vmem:[#allocation2 + $0xa8] sm:$0xff] }
  0x4d   :  { %10474 = vmatmul.mubr.msk.f32.gmra.mxu0 %vm33_vm1, %v12297_v11  ;;  %236 = vst.msk [vmem:[#allocation2 + $0x169] sm:$0xff] %vm33_vm1, %v171_v23  ;;  %16923 = vst [vmem:[#allocation16_spill] sm:$0xff] %v12359_v33  ;;  %v12399_v59 = vld [vmem:[#allocation2 + $0xb0] sm:$0xff]  ;;  %v180_v0 = vld [vmem:[%s16622_s0 + $0x128] sm:$0xff]  ;;  %v12431_v15 = vsel %vm477_vm3, %v508_v43, %v509_v46  ;;  %v513_v16 = vrot.slane %v12397_v58, 1  ;;  %v12448_v22 = vsel %vm477_vm3, %v509_v46, %v511_v12 }
  0x4e   :  { %10476 = vmatprep.mubr.msk.f32.mxu0 %vm33_vm1, %v12316_v18  ;;  %237 = vst.msk [vmem:[#allocation2 + $0x171] sm:$0xff] %vm33_vm1, %v172_v31  ;;  %16924 = vst [vmem:[#allocation17_spill] sm:$0xff] %v12380_v42  ;;  %v181_v3 = vld [vmem:[%s16622_s0 + $0x130] sm:$0xff]  ;;  %v182_v4 = vld [vmem:[%s16622_s0 + $0x138] sm:$0xff]  ;;  %v514_v17 = vrot.slane %v12399_v59, 1 }
  0x4f   :  { %10569 = vmatmul.mubr.msk.f32.gmra.mxu1 %vm33_vm1, %v12214_v45  ;;  %240 = vst.msk [vmem:[#allocation2 + $0x1c9] sm:$0xff] %vm33_vm1, %v175_v35  ;;  %241 = vst.msk [vmem:[#allocation2 + $0x1d1] sm:$0xff] %vm33_vm1, %v176_v36  ;;  %v183_v8 = vld [vmem:[%s16622_s0 + $0x140] sm:$0xff]  ;;  %v12435_v19 = vld [vmem:[#allocation2 + $0xb8] sm:$0x3] }
  0x50   :  { %10571 = vmatprep.mubr.msk.f32.mxu1 %vm33_vm1, %v12228_v52  ;;  %242 = vst.msk [vmem:[#allocation2 + $0x1e1] sm:$0xff] %vm33_vm1, %v177_v49  ;;  %243 = vst.msk [vmem:[#allocation2 + $0x1e9] sm:$0xff] %vm33_vm1, %v178_v50  ;;  %v12439_v20 = vld [vmem:[#allocation2 + $0xc0] sm:$0xff]  ;;  %v12441_v21 = vld [vmem:[#allocation2 + $0xc8] sm:$0xff]  ;;  %v516_v25 = vrot.slane %v12435_v19, 1  ;;  %v12454_v26 = vsel %vm477_vm3, %v513_v16, %v514_v17 }
  0x51   :  { %244 = vst.msk [vmem:[#allocation2 + $0x1f9] sm:$0xff] %vm33_vm1, %v179_v55  ;;  %10477 = vmatmul.mubr.msk.f32.gmra.mxu0 %vm33_vm1, %v12359_v33  ;;  %245 = vst.msk [vmem:[#allocation2 + $0x201] sm:$0xff] %vm33_vm1, %v180_v0  ;;  %v518_v27 = vrot.slane %v12439_v20, 1  ;;  %v519_v28 = vrot.slane %v12441_v21, 1  ;;  %v12458_v23 = vld [vmem:[#allocation2 + $0xd0] sm:$0x3] }
  0x52   :  { %10479 = vmatprep.mubr.msk.f32.mxu0 %vm33_vm1, %v12380_v42  ;;  %16925 = vst [vmem:[#allocation18_spill] sm:$0xff] %v12422_v10  ;;  %246 = vst.msk [vmem:[#allocation2 + $0x211] sm:$0xff] %vm33_vm1, %v181_v3  ;;  %v12462_v30 = vld [vmem:[#allocation2 + $0xd8] sm:$0xff]  ;;  %v12464_v31 = vld [vmem:[#allocation2 + $0xe0] sm:$0xff]  ;;  %v12471_v24 = vsel %vm477_vm3, %v514_v17, %v516_v25  ;;  %v521_v35 = vrot.slane %v12458_v23, 1 }
  0x53   :  { %247 = vst.msk [vmem:[#allocation2 + $0x219] sm:$0xff] %vm33_vm1, %v182_v4  ;;  %248 = vst.msk [vmem:[#allocation2 + $0x229] sm:$0xff] %vm33_vm1, %v183_v8  ;;  %10572 = vmatmul.mubr.msk.f32.gmra.mxu1 %vm33_vm1, %v12230_v53  ;;  %v12477_v36 = vsel %vm477_vm3, %v518_v27, %v519_v28  ;;  %v523_v43 = vrot.slane %v12462_v30, 1  ;;  %v524_v46 = vrot.slane %v12464_v31, 1  ;;  %v12481_v49 = vld [vmem:[#allocation2 + $0xe8] sm:$0x3] }
  0x54   :  { %16926 = vst [vmem:[#allocation19_spill] sm:$0xff] %v12431_v15  ;;  %10574 = vmatprep.mubr.msk.f32.mxu1 %vm33_vm1, %v12258_v61  ;;  %16927 = vst [vmem:[#allocation20_spill] sm:$0xff] %v12448_v22  ;;  %v184_v50 = vld [vmem:[%s16622_s0 + $0x148] sm:$0xff]  ;;  %v12488_v55 = vld [vmem:[#allocation2 + $0xf0] sm:$0xff]  ;;  %v12509_v16 = vsel %vm477_vm3, %v519_v28, %v521_v35  ;;  %v526_v17 = vrot.slane %v12481_v49, 1 }
  0x55   :  { %10480 = vmatmul.mubr.msk.f32.gmra.mxu0 %vm33_vm1, %v12422_v10  ;;  %16928 = vst [vmem:[#allocation21_spill] sm:$0xff] %v12454_v26  ;;  %16929 = vst [vmem:[#allocation22_spill] sm:$0xff] %v12471_v24  ;;  %v12490_v0 = vld [vmem:[#allocation2 + $0xf8] sm:$0xff]  ;;  %v12495_v3 = vld [vmem:[#allocation2 + $0x100] sm:$0x3] }
  0x56   :  { %10482 = vmatprep.mubr.msk.f32.mxu0 %vm33_vm1, %v12431_v15  ;;  %16930 = vst [vmem:[#allocation23_spill] sm:$0xff] %v12477_v36  ;;  %249 = vst.msk [vmem:[#allocation2 + $0x231] sm:$0xff] %vm33_vm1, %v184_v50  ;;  %v185_v4 = vld [vmem:[%s16622_s0 + $0x150] sm:$0xff]  ;;  %v186_v8 = vld [vmem:[%s16622_s0 + $0x158] sm:$0xff]  ;;  %v529_v1 = vrot.slane %v12490_v0, 1 }
  0x57   :  { %10575 = vmatmul.mubr.msk.f32.gmra.mxu1 %vm33_vm1, %v12260_v62  ;;  %v187_v12 = vld [vmem:[%s16622_s0 + $0x160] sm:$0xff]  ;;  %16931 = vst [vmem:[#allocation24_spill] sm:$0xff] %v12509_v16  ;;  %v12512_v25 = vld [vmem:[#allocation2 + $0x108] sm:$0xff]  ;;  %v12514_v27 = vld [vmem:[#allocation2 + $0x110] sm:$0xff] }
  0x58   :  { %10577 = vmatprep.mubr.msk.f32.mxu1 %vm33_vm1, %v12281_v6  ;;  %250 = vst.msk [vmem:[#allocation2 + $0x241] sm:$0xff] %vm33_vm1, %v185_v4  ;;  %251 = vst.msk [vmem:[#allocation2 + $0x249] sm:$0xff] %vm33_vm1, %v186_v8  ;;  %v188_v50 = vld [vmem:[%s16622_s0 + $0x168] sm:$0xff]  ;;  %v189_v28 = vld [vmem:[%s16622_s0 + $0x170] sm:$0xff]  ;;  %v12531_v4 = vsel %vm477_vm3, %v523_v43, %v524_v46  ;;  %v528_v8 = vrot.slane %v12488_v55, 1 }
  0x59   :  { %10483 = vmatmul.mubr.msk.f32.gmra.mxu0 %vm33_vm1, %v12448_v22  ;;  %252 = vst.msk [vmem:[#allocation2 + $0x259] sm:$0xff] %vm33_vm1, %v187_v12  ;;  %v190_v35 = vld [vmem:[%s16622_s0 + $0x178] sm:$0xff]  ;;  %16932 = vst [vmem:[#allocation25_spill] sm:$0xff] %v12531_v4  ;;  %v191_v12 = vld [vmem:[%s16622_s0 + $0x180] sm:$0xff] }
  0x5a   :  { %10485 = vmatprep.mubr.msk.f32.mxu0 %vm33_vm1, %v12454_v26  ;;  %253 = vst.msk [vmem:[#allocation2 + $0x261] sm:$0xff] %vm33_vm1, %v188_v50  ;;  %254 = vst.msk [vmem:[#allocation2 + $0x271] sm:$0xff] %vm33_vm1, %v189_v28  ;;  %v192_v48 = vld [vmem:[%s16622_s0 + $0x188] sm:$0xff]  ;;  %v193_v43 = vld [vmem:[%s16622_s0 + $0x190] sm:$0xff] }
  0x5b   :  { %10578 = vmatmul.mubr.msk.f32.gmra.mxu1 %vm33_vm1, %v12283_v7  ;;  %255 = vst.msk [vmem:[#allocation2 + $0x279] sm:$0xff] %vm33_vm1, %v190_v35  ;;  %256 = vst.msk [vmem:[#allocation2 + $0x289] sm:$0xff] %vm33_vm1, %v191_v12  ;;  %v194_v50 = vld [vmem:[%s16622_s0 + $0x198] sm:$0xff]  ;;  %v195_v28 = vld [vmem:[%s16622_s0 + $0x1a0] sm:$0xff] }
  0x5c   :  { %10580 = vmatprep.mubr.msk.f32.mxu1 %vm33_vm1, %v12300_v13  ;;  %257 = vst.msk [vmem:[#allocation2 + $0x291] sm:$0xff] %vm33_vm1, %v192_v48  ;;  %258 = vst.msk [vmem:[#allocation2 + $0x2a1] sm:$0xff] %vm33_vm1, %v193_v43  ;;  %v196_v35 = vld [vmem:[%s16622_s0 + $0x1a8] sm:$0xff]  ;;  %v197_v48 = vld [vmem:[%s16622_s0 + $0x1b0] sm:$0xff] }
  0x5d   :  { %10486 = vmatmul.mubr.msk.f32.gmra.mxu0 %vm33_vm1, %v12471_v24  ;;  %259 = vst.msk [vmem:[#allocation2 + $0x2a9] sm:$0xff] %vm33_vm1, %v194_v50  ;;  %260 = vst.msk [vmem:[#allocation2 + $0x2b9] sm:$0xff] %vm33_vm1, %v195_v28  ;;  %v198_v12 = vld [vmem:[%s16622_s0 + $0x1b8] sm:$0xff]  ;;  %v199_v43 = vld [vmem:[%s16622_s0 + $0x1c0] sm:$0xff]  ;;  %v12578_v50 = vsel %vm477_vm3, %v524_v46, %v526_v17  ;;  %v531_v28 = vrot.slane %v12495_v3, 1  ;;  %v12596_v17 = vsel %vm477_vm3, %v528_v8, %v529_v1 }
  0x5e   :  { %10488 = vmatprep.mubr.msk.f32.mxu0 %vm33_vm1, %v12477_v36  ;;  %261 = vst.msk [vmem:[#allocation2 + $0x2c1] sm:$0xff] %vm33_vm1, %v196_v35  ;;  %16933 = vst [vmem:[#allocation26_spill] sm:$0xff] %v12578_v50  ;;  %v200_v35 = vld [vmem:[%s16622_s0 + $0x1c8] sm:$0xff]  ;;  %v201_v47 = vld [vmem:[%s16622_s0 + $0x1d0] sm:$0xff] }
  0x5f   :  { %10581 = vmatmul.mubr.msk.f32.gmra.mxu1 %vm33_vm1, %v12302_v14  ;;  %262 = vst.msk [vmem:[#allocation2 + $0x2d1] sm:$0xff] %vm33_vm1, %v197_v48  ;;  %263 = vst.msk [vmem:[#allocation2 + $0x2d9] sm:$0xff] %vm33_vm1, %v198_v12  ;;  %v202_v46 = vld [vmem:[%s16622_s0 + $0x1d8] sm:$0xff]  ;;  %v533_v48 = vrot.slane %v12512_v25, 1  ;;  %v534_v12 = vrot.slane %v12514_v27, 1  ;;  %v12610_v8 = vld [vmem:[#allocation2 + $0x120] sm:$0xff] }
  0x60   :  { %10583 = vmatprep.mubr.msk.f32.mxu1 %vm33_vm1, %v12397_v58  ;;  %264 = vst.msk [vmem:[#allocation2 + $0x2e9] sm:$0xff] %vm33_vm1, %v199_v43  ;;  %16934 = vst [vmem:[#allocation27_spill] sm:$0xff] %v12596_v17  ;;  %v9102_v43 = vld [vmem:[%s16623_s1 + $0xc] sm:$0xf]  ;;  %v12638_v24 = vld [vmem:[#allocation2 + $0x130] sm:$0x3] }
  0x61   :  { %10489 = vmatmul.mubr.msk.f32.gmra.mxu0 %vm33_vm1, %v12509_v16  ;;  %265 = vst.msk [vmem:[#allocation2 + $0x2f1] sm:$0xff] %vm33_vm1, %v200_v35  ;;  %266 = vst.msk [vmem:[#allocation2 + $0x301] sm:$0xff] %vm33_vm1, %v201_v47  ;;  %v12612_v16 = vld [vmem:[#allocation2 + $0x128] sm:$0xff]  ;;  %10756 = vmatprep.subr.msk.mxu1 %vm768_vm0, %v9102_v43  ;;  %v12618_v35 = vld [vmem:[%s16623_s1 + $0x10] sm:$0xf]  ;;  %v12626_v47 = vsel %vm477_vm3, %v529_v1, %v531_v28  ;;  %v12634_v36 = vsel %vm477_vm3, %v533_v48, %v534_v12 }
  0x62   :  { %10491 = vmatprep.mubr.msk.f32.mxu0 %vm33_vm1, %v12531_v4  ;;  %v12600_v4 = vld [vmem:[#allocation2 + $0x118] sm:$0x3]  ;;  %267 = vst.msk [vmem:[#allocation2 + $0x309] sm:$0xff] %vm33_vm1, %v202_v46  ;;  %16935 = vst [vmem:[#allocation28_spill] sm:$0xff] %v12612_v16  ;;  %10757 = vmatpush3.msk.msra.mxu1 %vm768_vm0, %v9102_v43  ;;  %v539_v43 = vrot.slane %v12612_v16, 1  ;;  %v12644_v28 = vld [vmem:[#allocation2 + $0x140] sm:$0xff] }
  0x63   :  { %10584 = vmatmul.mubr.msk.f32.gmra.mxu1 %vm33_vm1, %v12399_v59  ;;  %16936 = vst [vmem:[#allocation29_spill] sm:$0xff] %v12626_v47  ;;  %v536_v46 = vrot.slane %v12600_v4, 1  ;;  %10854 = vmatprep.subr.msk.mxu0 %vm768_vm0, %v12618_v35  ;;  %16937 = vst [vmem:[#allocation30_spill] sm:$0xff] %v12634_v36  ;;  %v12642_v1 = vld [vmem:[#allocation2 + $0x138] sm:$0xff]  ;;  %v544_v15 = vrot.slane %v12644_v28, 1 }
  0x64   :  { %10586 = vmatprep.mubr.msk.f32.mxu1 %vm33_vm1, %v12439_v20  ;;  %16938 = vst [vmem:[#allocation31_spill] sm:$0xff] %v12638_v24  ;;  %16939 = vst [vmem:[#allocation32_spill] sm:$0xff] %v12642_v1  ;;  %v543_v22 = vrot.slane %v12642_v1, 1  ;;  %v12661_v10 = vld [vmem:[#allocation2 + $0x148] sm:$0x3] }
  0x65   :  { %10492 = vmatmul.mubr.msk.f32.gmra.mxu0 %vm33_vm1, %v12578_v50  ;;  %v538_v50 = vrot.slane %v12610_v8, 1  ;;  %16940 = vst [vmem:[#allocation33_spill] sm:$0xff] %v12644_v28  ;;  %v12651_v48 = vsel %vm477_vm3, %v534_v12, %v536_v46  ;;  %16943 = vst [vmem:[#allocation36_spill] sm:$0xff] %v12661_v10  ;;  %v12667_v12 = vld [vmem:[#allocation2 + $0x158] sm:$0xff]  ;;  %v546_v46 = vrot.slane %v12661_v10, 1 }
  0x66   :  { %10494 = vmatprep.mubr.msk.f32.mxu0 %vm33_vm1, %v12596_v17  ;;  %16941 = vst [vmem:[#allocation34_spill] sm:$0xff] %v12651_v48  ;;  %v541_v17 = vrot.slane %v12638_v24, 1  ;;  %v549_v33 = vrot.slane %v12667_v12, 1  ;;  %v12684_v18 = vld [vmem:[#allocation2 + $0x160] sm:$0x3] }
  0x67   :  { %10587 = vmatmul.mubr.msk.f32.gmra.mxu1 %vm33_vm1, %v12441_v21  ;;  %v12657_v26 = vsel %vm477_vm3, %v538_v50, %v539_v43  ;;  %16947 = vst [vmem:[#allocation40_spill] sm:$0xff] %v12684_v18 }
  0x68   :  { %10589 = vmatprep.mubr.msk.f32.mxu1 %vm33_vm1, %v12462_v30  ;;  %16942 = vst [vmem:[#allocation35_spill] sm:$0xff] %v12657_v26  ;;  %v12674_v50 = vsel %vm477_vm3, %v539_v43, %v541_v17 }
  0x69   :  { %10495 = vmatmul.mubr.msk.f32.gmra.mxu0 %vm33_vm1, %v12626_v47  ;;  %16945 = vst [vmem:[#allocation38_spill] sm:$0xff] %v12674_v50  ;;  %v12680_v47 = vsel %vm477_vm3, %v543_v22, %v544_v15 }
  0x6a   :  { %10497 = vmatprep.mubr.msk.f32.mxu0 %vm33_vm1, %v12634_v36  ;;  %v12665_v36 = vld [vmem:[#allocation2 + $0x150] sm:$0xff]  ;;  %16946 = vst [vmem:[#allocation39_spill] sm:$0xff] %v12680_v47 }
  0x6b   :  { %10590 = vmatmul.mubr.msk.f32.gmra.mxu1 %vm33_vm1, %v12464_v31  ;;  %16944 = vst [vmem:[#allocation37_spill] sm:$0xff] %v12665_v36  ;;  %v548_v42 = vrot.slane %v12665_v36, 1 }
  0x6c   :  { %10592 = vmatprep.mubr.msk.f32.mxu1 %vm33_vm1, %v12488_v55 }
  0x6d   :  { %10498 = vmatmul.mubr.msk.f32.gmra.mxu0 %vm33_vm1, %v12651_v48 }
  0x6e   :  { %10500 = vmatprep.mubr.msk.f32.mxu0 %vm33_vm1, %v12657_v26 }
  0x6f   :  { %10593 = vmatmul.mubr.msk.f32.gmra.mxu1 %vm33_vm1, %v12490_v0 }
  0x70   :  { %14 = vsyncpa [#allocation5], 0  ;;  %10595 = vmatprep.mubr.msk.f32.mxu1 %vm33_vm1, %v12512_v25  ;;  %v12688_v17 = vld [vmem:[#allocation2 + $0x168] sm:$0xff]  ;;  %v12690_v43 = vld [vmem:[#allocation2 + $0x170] sm:$0xff]  ;;  %v12697_v22 = vsel %vm477_vm3, %v544_v15, %v546_v46  ;;  %v551_v26 = vrot.slane %v12684_v18, 1  ;;  %v12703_v48 = vsel %vm477_vm3, %v548_v42, %v549_v33  ;;  %vm5407_vm5 = vcmask 64512  }
  0x71   :  { %10501 = vmatmul.mubr.msk.f32.gmra.mxu0 %vm33_vm1, %v12674_v50  ;;  %16948 = vst [vmem:[#allocation41_spill] sm:$0xff] %v12697_v22  ;;  %16949 = vst [vmem:[#allocation42_spill] sm:$0xff] %v12703_v48  ;;  %v553_v11 = vrot.slane %v12688_v17, 1  ;;  %v554_v2 = vrot.slane %v12690_v43, 1  ;;  %v12707_v63 = vld [vmem:[#allocation2 + $0x178] sm:$0x3] }
  0x72   :  { %10503 = vmatprep.mubr.msk.f32.mxu0 %vm33_vm1, %v12680_v47  ;;  %16950 = vst [vmem:[#allocation43_spill] sm:$0xff] %v12707_v63  ;;  %v326_v47 = vld [vmem:[#allocation2 + $0x1b0] sm:$0xff]  ;;  %v327_v15 = vld [vmem:[#allocation2 + $0x1b8] sm:$0xff]  ;;  %v12716_v42 = vsel %vm477_vm3, %v549_v33, %v551_v26  ;;  %v556_v46 = vrot.slane %v12707_v63, 1  ;;  %v328_v54 = vld [vmem:[#allocation2 + $0x1c0] sm:$0x3] }
  0x73   :  { %10596 = vmatmul.mubr.msk.f32.gmra.mxu1 %vm33_vm1, %v12514_v27  ;;  %16951 = vst [vmem:[#allocation44_spill] sm:$0xff] %v12716_v42  ;;  %v12722_v50 = vsel %vm477_vm3, %v553_v11, %v554_v2  ;;  %v558_v57 = vrot.slane %v326_v47, 1  ;;  %v559_v56 = vrot.slane %v327_v15, 1  ;;  %v173_v33 = vld [vmem:[%s16622_s0 + $0xf0] sm:$0xff]  ;;  %v561_v26 = vrot.slane %v328_v54, 1  ;;  %v174_v63 = vld [vmem:[%s16622_s0 + $0xf8] sm:$0xff] }
  0x74   :  { %10598 = vmatprep.mubr.msk.f32.mxu1 %vm33_vm1, %v12610_v8  ;;  %16952 = vst [vmem:[#allocation45_spill] sm:$0xff] %v12722_v50  ;;  %v12738_v11 = vsel %vm477_vm3, %v554_v2, %v556_v46  ;;  %238 = vst.msk [vmem:[#allocation2 + $0x181] sm:$0xff] %vm33_vm1, %v173_v33  ;;  %v12754_v2 = vld [vmem:[#allocation2 + $0x1e0] sm:$0xff]  ;;  %v12756_v46 = vld [vmem:[#allocation2 + $0x1e8] sm:$0xff]  ;;  %v1754_v33 = vrot.slane %v326_v47, 2  ;;  %vm5409_vm6 = vcmask 58368  }
  0x75   :  { %10504 = vmatmul.mubr.msk.f32.gmra.mxu0 %vm33_vm1, %v12697_v22  ;;  %v12726_v22 = vld [vmem:[#allocation2 + $0x1c8] sm:$0xff]  ;;  %16955 = vst [vmem:[#allocation48_spill] sm:$0xff] %v12738_v11  ;;  %239 = vst.msk [vmem:[#allocation2 + $0x189] sm:$0xff] %vm33_vm1, %v174_v63  ;;  %vm5514_vm7 = vcmask 57344   ;;  %vm5531_vm8 = vcmask 59394   ;;  %vm5548_vm9 = vcmask 61444  }
  0x76   :  { %10506 = vmatprep.mubr.msk.f32.mxu0 %vm33_vm1, %v12703_v48  ;;  %16953 = vst [vmem:[#allocation46_spill] sm:$0xff] %v12726_v22  ;;  %v12728_v48 = vld [vmem:[#allocation2 + $0x1d0] sm:$0xff]  ;;  %v563_v18 = vrot.slane %v12726_v22, 1  ;;  %16957 = vst [vmem:[#allocation50_spill] sm:$0xff] %v12754_v2  ;;  %vm5565_vm10 = vcmask 63494   ;;  %vm11807_vm11 = vmmov 0  }
  0x77   :  { %10599 = vmatmul.mubr.msk.f32.gmra.mxu1 %vm33_vm1, %v12612_v16  ;;  %16954 = vst [vmem:[#allocation47_spill] sm:$0xff] %v12728_v48  ;;  %v564_v10 = vrot.slane %v12728_v48, 1  ;;  %16958 = vst [vmem:[#allocation51_spill] sm:$0xff] %v12756_v46  ;;  %v568_v16 = vrot.slane %v12754_v2, 1  ;;  %vm7527_vm12 = vcmask 1041409   ;;  %vm7529_vm13 = vcmask 130048  }
  0x78   :  { %10601 = vmatprep.mubr.msk.f32.mxu1 %vm33_vm1, %v12642_v1  ;;  %v1755_v1 = vrot.slane %v327_v15, 2  ;;  %vm8815_vm14 = vcmask 261120   ;;  %s11808_s26 = smov [#allocation4]   ;;  %vm8889_vm15 = vcmask 74752  }
  0x79   :  { %10507 = vmatmul.mubr.msk.f32.gmra.mxu0 %vm33_vm1, %v12716_v42  ;;  %v560_v42 = vsel %vm477_vm3, %v558_v57, %v559_v56  ;;  %v1757_v57 = vrot.slane %v328_v54, 2  ;;  %v12773_v54 = vld [vmem:[#allocation2 + $0x1f0] sm:$0x3]  ;;  %s8897_s27 = sshll.u32 %s11808_s26, 4  ;;  %s8898_s27 = int_to_ptr.vmem [resolvable:$true] %s8897_s27 }
  0x7a   :  { %10509 = vmatprep.mubr.msk.f32.mxu0 %vm33_vm1, %v12722_v50  ;;  %v12749_v50 = vld [vmem:[#allocation2 + $0x1d8] sm:$0x3]  ;;  %v12764_v63 = vsel %vm1673_vm4, %v1754_v33, %v1755_v1  ;;  %16961 = vst [vmem:[#allocation54_spill] sm:$0xff] %v12773_v54  ;;  %v571_v33 = vrot.slane %v12773_v54, 1  ;;  %p11789_p1 = scmp.lt.s32.totalorder %s8898_s27, %s8898_s27 }
  0x7b   :  { %10602 = vmatmul.mubr.msk.f32.gmra.mxu1 %vm33_vm1, %v12644_v28  ;;  %16956 = vst [vmem:[#allocation49_spill] sm:$0xff] %v12749_v50  ;;  %v562_v28 = vsel %vm477_vm3, %v559_v56, %v561_v26  ;;  %v566_v24 = vrot.slane %v12749_v50, 1  ;;  %16959 = vst [vmem:[#allocation52_spill] sm:$0xff] %v12764_v63  ;;  %v12780_v56 = vld [vmem:[#allocation2 + $0x1f8] sm:$0xff]  ;;  %v12782_v26 = vld [vmem:[#allocation2 + $0x200] sm:$0xff] }
  0x7c   :  { %10604 = vmatprep.mubr.msk.f32.mxu1 %vm33_vm1, %v12665_v36  ;;  %v12769_v36 = vsel %vm477_vm3, %v563_v18, %v564_v10  ;;  %16963 = vst [vmem:[#allocation56_spill] sm:$0xff] %v12780_v56  ;;  %16964 = vst [vmem:[#allocation57_spill] sm:$0xff] %v12782_v26  ;;  %v12798_v50 = vld [vmem:[#allocation2 + $0x208] sm:$0x3]  ;;  %v12819_v63 = vld [vmem:[#allocation2 + $0x220] sm:$0x3] }
  0x7d   :  { %10510 = vmatmul.mubr.msk.f32.gmra.mxu0 %vm33_vm1, %v12738_v11  ;;  %16960 = vst [vmem:[#allocation53_spill] sm:$0xff] %v12769_v36  ;;  %v569_v11 = vrot.slane %v12756_v46, 1  ;;  %v12788_v18 = vsel %vm477_vm3, %v564_v10, %v566_v24  ;;  %16967 = vst [vmem:[#allocation60_spill] sm:$0xff] %v12798_v50  ;;  %v12803_v10 = vld [vmem:[#allocation2 + $0x218] sm:$0xff] }
  0x7e   :  { %10512 = vmatprep.mubr.msk.f32.mxu0 %vm33_vm1, %v560_v42  ;;  %v12776_v42 = vsel %vm1673_vm4, %v1755_v1, %v1757_v57  ;;  %16965 = vst [vmem:[#allocation58_spill] sm:$0xff] %v12788_v18  ;;  %v573_v57 = vrot.slane %v12780_v56, 1  ;;  %16969 = vst [vmem:[#allocation62_spill] sm:$0xff] %v12803_v10  ;;  %v579_v54 = vrot.slane %v12803_v10, 1 }
  0x7f   :  { %10605 = vmatmul.mubr.msk.f32.gmra.mxu1 %vm33_vm1, %v12667_v12  ;;  %16962 = vst [vmem:[#allocation55_spill] sm:$0xff] %v12776_v42  ;;  %v12794_v1 = vsel %vm477_vm3, %v568_v16, %v569_v11  ;;  %v574_v42 = vrot.slane %v12782_v26, 1  ;;  %v12810_v24 = vsel %vm477_vm3, %v569_v11, %v571_v33  ;;  %v576_v16 = vrot.slane %v12798_v50, 1  ;;  %16972 = vst [vmem:[#allocation65_spill] sm:$0xff] %v12819_v63  ;;  %v12825_v11 = vld [vmem:[#allocation2 + $0x230] sm:$0xff] }
  0x80   :  { %10607 = vmatprep.mubr.msk.f32.mxu1 %vm33_vm1, %v12688_v17  ;;  %16966 = vst [vmem:[#allocation59_spill] sm:$0xff] %v12794_v1  ;;  %16970 = vst [vmem:[#allocation63_spill] sm:$0xff] %v12810_v24  ;;  %v581_v33 = vrot.slane %v12819_v63, 1  ;;  %v584_v50 = vrot.slane %v12825_v11, 1 }
  0x81   :  { %10513 = vmatmul.mubr.msk.f32.gmra.mxu0 %vm33_vm1, %v562_v28  ;;  %v12801_v28 = vld [vmem:[#allocation2 + $0x210] sm:$0xff]  ;;  %16974 = vst [vmem:[#allocation67_spill] sm:$0xff] %v12825_v11 }
  0x82   :  { %10515 = vmatprep.mubr.msk.f32.mxu0 %vm33_vm1, %v12769_v36  ;;  %16968 = vst [vmem:[#allocation61_spill] sm:$0xff] %v12801_v28  ;;  %v12815_v36 = vsel %vm477_vm3, %v573_v57, %v574_v42 }
  0x83   :  { %10608 = vmatmul.mubr.msk.f32.gmra.mxu1 %vm33_vm1, %v12690_v43  ;;  %16971 = vst [vmem:[#allocation64_spill] sm:$0xff] %v12815_v36 }
  0x84   :  { %10610 = vmatprep.mubr.msk.f32.mxu1 %vm33_vm1, %v326_v47  ;;  %v578_v47 = vrot.slane %v12801_v28, 1 }
  0x85   :  { %10516 = vmatmul.mubr.msk.f32.gmra.mxu0 %vm33_vm1, %v12788_v18 }
  0x86   :  { %10518 = vmatprep.mubr.msk.f32.mxu0 %vm33_vm1, %v12794_v1  ;;  %v12823_v1 = vld [vmem:[#allocation2 + $0x228] sm:$0xff]  ;;  %v12838_v57 = vsel %vm477_vm3, %v578_v47, %v579_v54 }
  0x87   :  { %10611 = vmatmul.mubr.msk.f32.gmra.mxu1 %vm33_vm1, %v327_v15  ;;  %16973 = vst [vmem:[#allocation66_spill] sm:$0xff] %v12823_v1  ;;  %v12832_v15 = vsel %vm477_vm3, %v574_v42, %v576_v16  ;;  %16976 = vst [vmem:[#allocation69_spill] sm:$0xff] %v12838_v57  ;;  %v583_v18 = vrot.slane %v12823_v1, 1  ;;  %v12848_v42 = vld [vmem:[#allocation2 + $0x248] sm:$0xff]  ;;  %v12855_v16 = vsel %vm477_vm3, %v579_v54, %v581_v33  ;;  %v12871_v54 = vld [vmem:[#allocation2 + $0x260] sm:$0xff] }
  0x88   :  { %10613 = vmatprep.mubr.msk.f32.mxu1 %vm33_vm1, %v12726_v22  ;;  %16975 = vst [vmem:[#allocation68_spill] sm:$0xff] %v12832_v15  ;;  %v12842_v22 = vld [vmem:[#allocation2 + $0x238] sm:$0x3]  ;;  %16979 = vst [vmem:[#allocation72_spill] sm:$0xff] %v12848_v42 }
  0x89   :  { %10519 = vmatmul.mubr.msk.f32.gmra.mxu0 %vm33_vm1, %v12810_v24  ;;  %16977 = vst [vmem:[#allocation70_spill] sm:$0xff] %v12842_v22  ;;  %16980 = vst [vmem:[#allocation73_spill] sm:$0xff] %v12855_v16  ;;  %v586_v47 = vrot.slane %v12842_v22, 1  ;;  %v12861_v24 = vsel %vm477_vm3, %v583_v18, %v584_v50 }
  0x8a   :  { %10521 = vmatprep.mubr.msk.f32.mxu0 %vm33_vm1, %v12815_v36  ;;  %v12846_v36 = vld [vmem:[#allocation2 + $0x240] sm:$0xff]  ;;  %16981 = vst [vmem:[#allocation74_spill] sm:$0xff] %v12861_v24  ;;  %16984 = vst [vmem:[#allocation77_spill] sm:$0xff] %v12871_v54 }
  0x8b   :  { %10614 = vmatmul.mubr.msk.f32.gmra.mxu1 %vm33_vm1, %v12728_v48  ;;  %16978 = vst [vmem:[#allocation71_spill] sm:$0xff] %v12846_v36  ;;  %v588_v63 = vrot.slane %v12846_v36, 1  ;;  %v12865_v48 = vld [vmem:[#allocation2 + $0x250] sm:$0x3]  ;;  %v12878_v18 = vsel %vm477_vm3, %v584_v50, %v586_v47  ;;  %v12894_v50 = vld [vmem:[#allocation2 + $0x278] sm:$0xff] }
  0x8c   :  { %10616 = vmatprep.mubr.msk.f32.mxu1 %vm33_vm1, %v12754_v2  ;;  %v589_v2 = vrot.slane %v12848_v42, 1  ;;  %16982 = vst [vmem:[#allocation75_spill] sm:$0xff] %v12865_v48  ;;  %16985 = vst [vmem:[#allocation78_spill] sm:$0xff] %v12878_v18  ;;  %v591_v33 = vrot.slane %v12865_v48, 1 }
  0x8d   :  { %10522 = vmatmul.mubr.msk.f32.gmra.mxu0 %vm33_vm1, %v12832_v15  ;;  %16989 = vst [vmem:[#allocation82_spill] sm:$0xff] %v12894_v50 }
  0x8e   :  { %10524 = vmatprep.mubr.msk.f32.mxu0 %vm33_vm1, %v12838_v57  ;;  %v12869_v57 = vld [vmem:[#allocation2 + $0x258] sm:$0xff]  ;;  %v12884_v15 = vsel %vm477_vm3, %v588_v63, %v589_v2  ;;  %v12901_v63 = vsel %vm477_vm3, %v589_v2, %v591_v33  ;;  %v12917_v2 = vld [vmem:[#allocation2 + $0x290] sm:$0xff] }
  0x8f   :  { %10617 = vmatmul.mubr.msk.f32.gmra.mxu1 %vm33_vm1, %v12756_v46  ;;  %16983 = vst [vmem:[#allocation76_spill] sm:$0xff] %v12869_v57  ;;  %16986 = vst [vmem:[#allocation79_spill] sm:$0xff] %v12884_v15  ;;  %v593_v22 = vrot.slane %v12869_v57, 1  ;;  %v12888_v46 = vld [vmem:[#allocation2 + $0x268] sm:$0x3] }
  0x90   :  { %10619 = vmatprep.mubr.msk.f32.mxu1 %vm33_vm1, %v12780_v56  ;;  %v594_v56 = vrot.slane %v12871_v54, 1  ;;  %16987 = vst [vmem:[#allocation80_spill] sm:$0xff] %v12888_v46  ;;  %16990 = vst [vmem:[#allocation83_spill] sm:$0xff] %v12901_v63  ;;  %v596_v47 = vrot.slane %v12888_v46, 1 }
  0x91   :  { %10525 = vmatmul.mubr.msk.f32.gmra.mxu0 %vm33_vm1, %v12855_v16  ;;  %16994 = vst [vmem:[#allocation87_spill] sm:$0xff] %v12917_v2 }
  0x92   :  { %10527 = vmatprep.mubr.msk.f32.mxu0 %vm33_vm1, %v12861_v24  ;;  %v12892_v24 = vld [vmem:[#allocation2 + $0x270] sm:$0xff]  ;;  %v12907_v16 = vsel %vm477_vm3, %v593_v22, %v594_v56  ;;  %v12924_v22 = vsel %vm477_vm3, %v594_v56, %v596_v47  ;;  %v12940_v56 = vld [vmem:[#allocation2 + $0x2a8] sm:$0xff] }
  0x93   :  { %10620 = vmatmul.mubr.msk.f32.gmra.mxu1 %vm33_vm1, %v12782_v26  ;;  %16988 = vst [vmem:[#allocation81_spill] sm:$0xff] %v12892_v24  ;;  %16991 = vst [vmem:[#allocation84_spill] sm:$0xff] %v12907_v16  ;;  %v598_v48 = vrot.slane %v12892_v24, 1  ;;  %v12911_v26 = vld [vmem:[#allocation2 + $0x280] sm:$0x3] }
  0x94   :  { %10622 = vmatprep.mubr.msk.f32.mxu1 %vm33_vm1, %v12801_v28  ;;  %v599_v28 = vrot.slane %v12894_v50, 1  ;;  %16992 = vst [vmem:[#allocation85_spill] sm:$0xff] %v12911_v26  ;;  %16995 = vst [vmem:[#allocation88_spill] sm:$0xff] %v12924_v22  ;;  %v601_v33 = vrot.slane %v12911_v26, 1 }
  0x95   :  { %10528 = vmatmul.mubr.msk.f32.gmra.mxu0 %vm33_vm1, %v12878_v18 }
  0x96   :  { %10530 = vmatprep.mubr.msk.f32.mxu0 %vm33_vm1, %v12884_v15  ;;  %v12915_v15 = vld [vmem:[#allocation2 + $0x288] sm:$0xff]  ;;  %v12930_v18 = vsel %vm477_vm3, %v598_v48, %v599_v28  ;;  %v12947_v48 = vsel %vm477_vm3, %v599_v28, %v601_v33  ;;  %v12963_v28 = vld [vmem:[#allocation2 + $0x2c0] sm:$0xff] }
  0x97   :  { %10623 = vmatmul.mubr.msk.f32.gmra.mxu1 %vm33_vm1, %v12803_v10  ;;  %16993 = vst [vmem:[#allocation86_spill] sm:$0xff] %v12915_v15  ;;  %16996 = vst [vmem:[#allocation89_spill] sm:$0xff] %v12930_v18  ;;  %v603_v46 = vrot.slane %v12915_v15, 1  ;;  %v12934_v10 = vld [vmem:[#allocation2 + $0x298] sm:$0x3] }
  0x98   :  { %10625 = vmatprep.mubr.msk.f32.mxu1 %vm33_vm1, %v12823_v1  ;;  %v604_v1 = vrot.slane %v12917_v2, 1  ;;  %16997 = vst [vmem:[#allocation90_spill] sm:$0xff] %v12934_v10  ;;  %16999 = vst [vmem:[#allocation92_spill] sm:$0xff] %v12947_v48  ;;  %v606_v47 = vrot.slane %v12934_v10, 1 }
  0x99   :  { %10531 = vmatmul.mubr.msk.f32.gmra.mxu0 %vm33_vm1, %v12901_v63 }
  0x9a   :  { %10533 = vmatprep.mubr.msk.f32.mxu0 %vm33_vm1, %v12907_v16  ;;  %v12938_v16 = vld [vmem:[#allocation2 + $0x2a0] sm:$0xff]  ;;  %v12953_v63 = vsel %vm477_vm3, %v603_v46, %v604_v1  ;;  %v12970_v46 = vsel %vm477_vm3, %v604_v1, %v606_v47  ;;  %v12986_v1 = vld [vmem:[#allocation2 + $0x2d8] sm:$0xff] }
  0x9b   :  { %10626 = vmatmul.mubr.msk.f32.gmra.mxu1 %vm33_vm1, %v12825_v11  ;;  %16998 = vst [vmem:[#allocation91_spill] sm:$0xff] %v12938_v16  ;;  %17000 = vst [vmem:[#allocation93_spill] sm:$0xff] %v12953_v63  ;;  %v608_v26 = vrot.slane %v12938_v16, 1  ;;  %v12957_v11 = vld [vmem:[#allocation2 + $0x2b0] sm:$0x3] }
  0x9c   :  { %10628 = vmatprep.mubr.msk.f32.mxu1 %vm33_vm1, %v12846_v36  ;;  %v609_v36 = vrot.slane %v12940_v56, 1  ;;  %17001 = vst [vmem:[#allocation94_spill] sm:$0xff] %v12957_v11  ;;  %17002 = vst [vmem:[#allocation95_spill] sm:$0xff] %v12970_v46  ;;  %v611_v33 = vrot.slane %v12957_v11, 1 }
  0x9d   :  { %10534 = vmatmul.mubr.msk.f32.gmra.mxu0 %vm33_vm1, %v12924_v22 }
  0x9e   :  { %10536 = vmatprep.mubr.msk.f32.mxu0 %vm33_vm1, %v12930_v18  ;;  %v12961_v18 = vld [vmem:[#allocation2 + $0x2b8] sm:$0xff]  ;;  %v12976_v22 = vsel %vm477_vm3, %v608_v26, %v609_v36  ;;  %v12993_v26 = vsel %vm477_vm3, %v609_v36, %v611_v33  ;;  %v13009_v36 = vld [vmem:[#allocation2 + $0x2f0] sm:$0xff] }
  0x9f   :  { %10629 = vmatmul.mubr.msk.f32.gmra.mxu1 %vm33_vm1, %v12848_v42  ;;  %17003 = vst [vmem:[#allocation96_spill] sm:$0xff] %v12976_v22  ;;  %v613_v10 = vrot.slane %v12961_v18, 1  ;;  %v12980_v42 = vld [vmem:[#allocation2 + $0x2c8] sm:$0x3]  ;;  %17005 = vst [vmem:[#allocation98_spill] sm:$0xff] %v12993_v26 }
  0xa0   :  { %10631 = vmatprep.mubr.msk.f32.mxu1 %vm33_vm1, %v12869_v57  ;;  %v614_v57 = vrot.slane %v12963_v28, 1  ;;  %17004 = vst [vmem:[#allocation97_spill] sm:$0xff] %v12980_v42  ;;  %v616_v47 = vrot.slane %v12980_v42, 1 }
  0xa1   :  { %10537 = vmatmul.mubr.msk.f32.gmra.mxu0 %vm33_vm1, %v12947_v48 }
  0xa2   :  { %10539 = vmatprep.mubr.msk.f32.mxu0 %vm33_vm1, %v12953_v63  ;;  %v12984_v63 = vld [vmem:[#allocation2 + $0x2d0] sm:$0xff]  ;;  %v12999_v48 = vsel %vm477_vm3, %v613_v10, %v614_v57  ;;  %v13016_v10 = vsel %vm477_vm3, %v614_v57, %v616_v47  ;;  %v13032_v57 = vld [vmem:[#allocation2 + $0x308] sm:$0xff] }
  0xa3   :  { %10632 = vmatmul.mubr.msk.f32.gmra.mxu1 %vm33_vm1, %v12871_v54  ;;  %17006 = vst [vmem:[#allocation99_spill] sm:$0xff] %v12999_v48  ;;  %v618_v11 = vrot.slane %v12984_v63, 1  ;;  %v13003_v54 = vld [vmem:[#allocation2 + $0x2e0] sm:$0x3]  ;;  %17008 = vst [vmem:[#allocation101_spill] sm:$0xff] %v13016_v10 }
  0xa4   :  { %10634 = vmatprep.mubr.msk.f32.mxu1 %vm33_vm1, %v12892_v24  ;;  %v619_v24 = vrot.slane %v12986_v1, 1  ;;  %17007 = vst [vmem:[#allocation100_spill] sm:$0xff] %v13003_v54  ;;  %v621_v33 = vrot.slane %v13003_v54, 1 }
  0xa5   :  { %10540 = vmatmul.mubr.msk.f32.gmra.mxu0 %vm33_vm1, %v12970_v46 }
  0xa6   :  { %10542 = vmatprep.mubr.msk.f32.mxu0 %vm33_vm1, %v12976_v22  ;;  %v13007_v22 = vld [vmem:[#allocation2 + $0x2e8] sm:$0xff]  ;;  %v13022_v46 = vsel %vm477_vm3, %v618_v11, %v619_v24  ;;  %v13039_v11 = vsel %vm477_vm3, %v619_v24, %v621_v33 }
  0xa7   :  { %10635 = vmatmul.mubr.msk.f32.gmra.mxu1 %vm33_vm1, %v12894_v50  ;;  %17009 = vst [vmem:[#allocation102_spill] sm:$0xff] %v13022_v46  ;;  %v623_v42 = vrot.slane %v13007_v22, 1  ;;  %v13026_v50 = vld [vmem:[#allocation2 + $0x2f8] sm:$0x3]  ;;  %17010 = vst [vmem:[#allocation103_spill] sm:$0xff] %v13039_v11 }
  0xa8   :  { %10637 = vmatprep.mubr.msk.f32.mxu1 %vm33_vm1, %v12915_v15  ;;  %v624_v15 = vrot.slane %v13009_v36, 1  ;;  %v626_v47 = vrot.slane %v13026_v50, 1 }
  0xa9   :  { %10543 = vmatmul.mubr.msk.f32.gmra.mxu0 %vm33_vm1, %v12993_v26 }
  0xaa   :  { %10545 = vmatprep.mubr.msk.f32.mxu0 %vm33_vm1, %v12999_v48  ;;  %v13030_v48 = vld [vmem:[#allocation2 + $0x300] sm:$0xff]  ;;  %v13045_v26 = vsel %vm477_vm3, %v623_v42, %v624_v15  ;;  %v13058_v24 = vsel %vm477_vm3, %v624_v15, %v626_v47  ;;  %v1679_v47 = vrot.slane %v12202_v38, 2 }
  0xab   :  { %10638 = vmatmul.mubr.msk.f32.gmra.mxu1 %vm33_vm1, %v12917_v2  ;;  %17011 = vst [vmem:[#allocation104_spill] sm:$0xff] %v13045_v26  ;;  %v628_v54 = vrot.slane %v13030_v48, 1  ;;  %v13049_v2 = vld [vmem:[#allocation2 + $0x310] sm:$0x3]  ;;  %17012 = vst [vmem:[#allocation105_spill] sm:$0xff] %v13058_v24 }
  0xac   :  { %10640 = vmatprep.mubr.msk.f32.mxu1 %vm33_vm1, %v12938_v16  ;;  %v629_v16 = vrot.slane %v13032_v57, 1  ;;  %v631_v42 = vrot.slane %v13049_v2, 1 }
  0xad   :  { %10546 = vmatmul.mubr.msk.f32.gmra.mxu0 %vm33_vm1, %v13016_v10 }
  0xae   :  { %10548 = vmatprep.mubr.msk.f32.mxu0 %vm33_vm1, %v13022_v46  ;;  %v13064_v33 = vsel %vm477_vm3, %v628_v54, %v629_v16  ;;  %v13073_v15 = vsel %vm477_vm3, %v629_v16, %v631_v42  ;;  %v1680_v54 = vrot.slane %v12204_v39, 2  ;;  %v1682_v16 = vrot.slane %v12212_v44, 2  ;;  %v206_v42 = vld [vmem:[%s16622_s0 + $0x1f8] sm:$0xff]  ;;  %v9234_v44 = vld [vmem:[%s16623_s1 + $0x14] sm:$0xf] }
  0xaf   :  { %10641 = vmatmul.mubr.msk.f32.gmra.mxu1 %vm33_vm1, %v12940_v56  ;;  %17013 = vst [vmem:[#allocation106_spill] sm:$0xff] %v13064_v33  ;;  %17014 = vst [vmem:[#allocation107_spill] sm:$0xff] %v13073_v15  ;;  %10952 = vmatprep.subr.msk.mxu1 %vm768_vm0, %v9234_v44 }
  0xb0   :  { %10643 = vmatprep.mubr.msk.f32.mxu1 %vm33_vm1, %v12961_v18  ;;  %271 = vst.msk [vmem:[#allocation2 + $0x339] sm:$0xff] %vm33_vm1, %v206_v42  ;;  %v1690_v42 = vrot.slane %v12230_v53, 2 }
  0xb1   :  { %10549 = vmatmul.mubr.msk.f32.gmra.mxu0 %vm33_vm1, %v13039_v11  ;;  %v13399_v11 = vld [vmem:[#allocation2 + $0x188] sm:$0xff] }
  0xb2   :  { %10551 = vmatprep.mubr.msk.f32.mxu0 %vm33_vm1, %v13045_v26  ;;  %v1685_v26 = vrot.slane %v12214_v45, 2 }
  0xb3   :  { %10644 = vmatmul.mubr.msk.f32.gmra.mxu1 %vm33_vm1, %v12963_v28 }
  0xb4   :  { %10646 = vmatprep.mubr.msk.f32.mxu1 %vm33_vm1, %v12984_v63 }
  0xb5   :  { %10552 = vmatmul.mubr.msk.f32.gmra.mxu0 %vm33_vm1, %v13058_v24  ;;  %v1684_v24 = vrot.slane %v12206_v40, 2 }
  0xb6   :  { %10554 = vmatprep.mubr.msk.f32.mxu0 %vm33_vm1, %v13064_v33  ;;  %v205_v33 = vld [vmem:[%s16622_s0 + $0x1f0] sm:$0xff] }
  0xb7   :  { %10647 = vmatmul.mubr.msk.f32.gmra.mxu1 %vm33_vm1, %v12986_v1  ;;  %270 = vst.msk [vmem:[#allocation2 + $0x331] sm:$0xff] %vm33_vm1, %v205_v33  ;;  %v1687_v33 = vrot.slane %v12226_v51, 2 }
  0xb8   :  { %10649 = vmatprep.mubr.msk.f32.mxu1 %vm33_vm1, %v13007_v22 }
  0xb9   :  { %10555 = vmatmul.mubr.msk.f32.gmra.mxu0 %vm33_vm1, %v13073_v15  ;;  %v13096_v15 = vsel %vm1673_vm4, %v1679_v47, %v1680_v54  ;;  %v13120_v47 = vld [vmem:[%s16623_s1 + $0x18] sm:$0xf]  ;;  %v13138_v51 = vsel %vm1673_vm4, %v1685_v26, %v1687_v33  ;;  %v1699_v33 = vrot.slane %v12281_v6, 2 }
  0xba   :  { %10660 = vmatprep.mubr.msk.f32.mxu0 %vm33_vm1, %v12372_v37  ;;  %v13114_v37 = vsel %vm1673_vm4, %v1680_v54, %v1682_v16  ;;  %17016 = vst [vmem:[#allocation109_spill] sm:$0xff] %v13138_v51  ;;  %v1694_v16 = vrot.slane %v12258_v61, 2 }
  0xbb   :  { %10650 = vmatmul.mubr.msk.f32.gmra.mxu1 %vm33_vm1, %v13009_v36 }
  0xbc   :  { %10652 = vmatprep.mubr.msk.f32.mxu1 %vm33_vm1, %v13030_v48 }
  0xbd   :  { %10661 = vmatmul.mubr.msk.f32.vlgmr.msra.gmra.mxu0 %vm33_vm1, %v12375_v41  ;;  %v13125_v41 = vsel %vm1673_vm4, %v1684_v24, %v1685_v26  ;;  %v1692_v24 = vrot.slane %v12252_v60, 2 }
  0xbe   :  { %10855 = vmatpush3.msk.msra.mxu0 %vm768_vm0, %v12618_v35  ;;  %10663 = vmatprep.mubr.msk.f32.mxu0 %vm33_vm1, %v13096_v15  ;;  %17015 = vst [vmem:[#allocation108_spill] sm:$0xff] %v13125_v41  ;;  %v1689_v35 = vrot.slane %v12228_v52, 2 }
  0xbf   :  { %10653 = vmatmul.mubr.msk.f32.gmra.mxu1 %vm33_vm1, %v13032_v57  ;;  %11050 = vmatprep.subr.msk.mxu0 %vm768_vm0, %v13120_v47  ;;  %v13155_v60 = vsel %vm1673_vm4, %v1690_v42, %v1692_v24  ;;  %v1709_v24 = vrot.slane %v12397_v58, 2 }
  0xc0   :  { %10655 = vmatprep.mubr.msk.f32.mxu1 %vm33_vm1, %v12189_v29  ;;  %v13144_v54 = vsel %vm1673_vm4, %v1689_v35, %v1690_v42  ;;  %v1695_v29 = vrot.slane %v12260_v62, 2  ;;  %17018 = vst [vmem:[#allocation111_spill] sm:$0xff] %v13155_v60 }
  0xc1   :  { %10664 = vmatmul.mubr.msk.f32.gmra.mxu0 %vm33_vm1, %v13114_v37  ;;  %17017 = vst [vmem:[#allocation110_spill] sm:$0xff] %v13144_v54 }
  0xc2   :  { %10666 = vmatprep.mubr.msk.f32.mxu0 %vm33_vm1, %v13125_v41  ;;  %v13161_v26 = vsel %vm1673_vm4, %v1694_v16, %v1695_v29 }
  0xc3   :  { %10656 = vmatmul.mubr.msk.f32.gmra.mxu1 %vm33_vm1, %v12196_v32  ;;  %v1697_v32 = vrot.slane %v12277_v5, 2  ;;  %17019 = vst [vmem:[#allocation112_spill] sm:$0xff] %v13161_v26  ;;  %v1702_v5 = vrot.slane %v12290_v9, 2 }
  0xc4   :  { %10758 = vmatprep.mubr.msk.f32.mxu1 %vm33_vm1, %v12202_v38  ;;  %v1700_v38 = vrot.slane %v12283_v7, 2 }
  0xc5   :  { %10667 = vmatmul.mubr.msk.f32.gmra.mxu0 %vm33_vm1, %v13138_v51 }
  0xc6   :  { %10669 = vmatprep.mubr.msk.f32.mxu0 %vm33_vm1, %v13144_v54  ;;  %v13179_v35 = vsel %vm1673_vm4, %v1699_v33, %v1700_v38  ;;  %v13190_v9 = vsel %vm1673_vm4, %v1700_v38, %v1702_v5  ;;  %v1719_v33 = vrot.slane %v12462_v30, 2  ;;  %v1724_v5 = vrot.slane %v12488_v55, 2 }
  0xc7   :  { %10759 = vmatmul.mubr.msk.f32.vlgmr.msra.gmra.mxu1 %vm33_vm1, %v12204_v39  ;;  %v13173_v39 = vsel %vm1673_vm4, %v1695_v29, %v1697_v32  ;;  %17021 = vst [vmem:[#allocation114_spill] sm:$0xff] %v13179_v35  ;;  %17022 = vst [vmem:[#allocation115_spill] sm:$0xff] %v13190_v9  ;;  %v1714_v29 = vrot.slane %v12439_v20, 2 }
  0xc8   :  { %10761 = vmatprep.mubr.msk.f32.mxu1 %vm33_vm1, %v12206_v40  ;;  %10953 = vmatpush3.msk.msra.mxu1 %vm768_vm0, %v9234_v44  ;;  %17020 = vst [vmem:[#allocation113_spill] sm:$0xff] %v13173_v39  ;;  %v1704_v40 = vrot.slane %v12300_v13, 2  ;;  %v1705_v44 = vrot.slane %v12302_v14, 2 }
  0xc9   :  { %10670 = vmatmul.mubr.msk.f32.gmra.mxu0 %vm33_vm1, %v13155_v60 }
  0xca   :  { %10672 = vmatprep.mubr.msk.f32.mxu0 %vm33_vm1, %v13161_v26  ;;  %v13196_v42 = vsel %vm1673_vm4, %v1704_v40, %v1705_v44 }
  0xcb   :  { %10762 = vmatmul.mubr.msk.f32.gmra.mxu1 %vm33_vm1, %v12214_v45  ;;  %v1707_v45 = vrot.slane %v12362_v34, 2  ;;  %17023 = vst [vmem:[#allocation116_spill] sm:$0xff] %v13196_v42 }
  0xcc   :  { %10764 = vmatprep.mubr.msk.f32.mxu1 %vm33_vm1, %v12228_v52  ;;  %v1710_v52 = vrot.slane %v12399_v59, 2 }
  0xcd   :  { %10673 = vmatmul.mubr.msk.f32.gmra.mxu0 %vm33_vm1, %v13173_v39  ;;  %v13207_v34 = vsel %vm1673_vm4, %v1705_v44, %v1707_v45  ;;  %v1729_v44 = vrot.slane %v12512_v25, 2 }
  0xce   :  { %10675 = vmatprep.mubr.msk.f32.mxu0 %vm33_vm1, %v13179_v35  ;;  %17024 = vst [vmem:[#allocation117_spill] sm:$0xff] %v13207_v34  ;;  %v13213_v16 = vsel %vm1673_vm4, %v1709_v24, %v1710_v52  ;;  %v1734_v24 = vrot.slane %v12610_v8, 2 }
  0xcf   :  { %10765 = vmatmul.mubr.msk.f32.gmra.mxu1 %vm33_vm1, %v12230_v53  ;;  %v1712_v53 = vrot.slane %v12435_v19, 2  ;;  %17025 = vst [vmem:[#allocation118_spill] sm:$0xff] %v13213_v16 }
  0xd0   :  { %10767 = vmatprep.mubr.msk.f32.mxu1 %vm33_vm1, %v12258_v61  ;;  %v1715_v61 = vrot.slane %v12441_v21, 2 }
  0xd1   :  { %10676 = vmatmul.mubr.msk.f32.gmra.mxu0 %vm33_vm1, %v13190_v9  ;;  %v13224_v19 = vsel %vm1673_vm4, %v1710_v52, %v1712_v53 }
  0xd2   :  { %10678 = vmatprep.mubr.msk.f32.mxu0 %vm33_vm1, %v13196_v42  ;;  %17026 = vst [vmem:[#allocation119_spill] sm:$0xff] %v13224_v19  ;;  %v13230_v32 = vsel %vm1673_vm4, %v1714_v29, %v1715_v61 }
  0xd3   :  { %10768 = vmatmul.mubr.msk.f32.gmra.mxu1 %vm33_vm1, %v12260_v62  ;;  %v1717_v62 = vrot.slane %v12458_v23, 2  ;;  %17027 = vst [vmem:[#allocation120_spill] sm:$0xff] %v13230_v32 }
  0xd4   :  { %10770 = vmatprep.mubr.msk.f32.mxu1 %vm33_vm1, %v12281_v6  ;;  %v1720_v6 = vrot.slane %v12464_v31, 2 }
  0xd5   :  { %10679 = vmatmul.mubr.msk.f32.gmra.mxu0 %vm33_vm1, %v13207_v34  ;;  %v13241_v23 = vsel %vm1673_vm4, %v1715_v61, %v1717_v62  ;;  %v17038_v61 = vld [vmem:[#allocation32_spill] sm:$0xff] }
  0xd6   :  { %10681 = vmatprep.mubr.msk.f32.mxu0 %vm33_vm1, %v13213_v16  ;;  %17028 = vst [vmem:[#allocation121_spill] sm:$0xff] %v13241_v23  ;;  %v13247_v38 = vsel %vm1673_vm4, %v1719_v33, %v1720_v6  ;;  %v1739_v62 = vrot.slane %v17038_v61, 2 }
  0xd7   :  { %10771 = vmatmul.mubr.msk.f32.gmra.mxu1 %vm33_vm1, %v12283_v7  ;;  %v1722_v7 = vrot.slane %v12481_v49, 2  ;;  %17029 = vst [vmem:[#allocation122_spill] sm:$0xff] %v13247_v38 }
  0xd8   :  { %10773 = vmatprep.mubr.msk.f32.mxu1 %vm33_vm1, %v12300_v13  ;;  %v1725_v13 = vrot.slane %v12490_v0, 2 }
  0xd9   :  { %10682 = vmatmul.mubr.msk.f32.gmra.mxu0 %vm33_vm1, %v13224_v19  ;;  %v13258_v49 = vsel %vm1673_vm4, %v1720_v6, %v1722_v7 }
  0xda   :  { %10684 = vmatprep.mubr.msk.f32.mxu0 %vm33_vm1, %v13230_v32  ;;  %17030 = vst [vmem:[#allocation123_spill] sm:$0xff] %v13258_v49  ;;  %v13264_v40 = vsel %vm1673_vm4, %v1724_v5, %v1725_v13 }
  0xdb   :  { %10774 = vmatmul.mubr.msk.f32.gmra.mxu1 %vm33_vm1, %v12302_v14  ;;  %v1727_v14 = vrot.slane %v12495_v3, 2  ;;  %17031 = vst [vmem:[#allocation124_spill] sm:$0xff] %v13264_v40 }
  0xdc   :  { %10776 = vmatprep.mubr.msk.f32.mxu1 %vm33_vm1, %v12397_v58  ;;  %v1730_v58 = vrot.slane %v12514_v27, 2 }
  0xdd   :  { %10685 = vmatmul.mubr.msk.f32.gmra.mxu0 %vm33_vm1, %v13241_v23  ;;  %v13275_v3 = vsel %vm1673_vm4, %v1725_v13, %v1727_v14  ;;  %v17043_v13 = vld [vmem:[#allocation37_spill] sm:$0xff] }
  0xde   :  { %10687 = vmatprep.mubr.msk.f32.mxu0 %vm33_vm1, %v13247_v38  ;;  %17032 = vst [vmem:[#allocation125_spill] sm:$0xff] %v13275_v3  ;;  %v13281_v45 = vsel %vm1673_vm4, %v1729_v44, %v1730_v58  ;;  %v1744_v14 = vrot.slane %v17043_v13, 2 }
  0xdf   :  { %10777 = vmatmul.mubr.msk.f32.gmra.mxu1 %vm33_vm1, %v12399_v59  ;;  %v1732_v59 = vrot.slane %v12600_v4, 2  ;;  %17033 = vst [vmem:[#allocation126_spill] sm:$0xff] %v13281_v45 }
  0xe0   :  { %10779 = vmatprep.mubr.msk.f32.mxu1 %vm33_vm1, %v12439_v20  ;;  %v17034_v20 = vld [vmem:[#allocation28_spill] sm:$0xff] }
  0xe1   :  { %10688 = vmatmul.mubr.msk.f32.gmra.mxu0 %vm33_vm1, %v13258_v49  ;;  %v1735_v52 = vrot.slane %v17034_v20, 2  ;;  %v13292_v4 = vsel %vm1673_vm4, %v1730_v58, %v1732_v59 }
  0xe2   :  { %10690 = vmatprep.mubr.msk.f32.mxu0 %vm33_vm1, %v13264_v40  ;;  %17035 = vst [vmem:[#allocation28_spill] sm:$0xff] %v13292_v4 }
  0xe3   :  { %10780 = vmatmul.mubr.msk.f32.gmra.mxu1 %vm33_vm1, %v12441_v21  ;;  %v17036_v21 = vld [vmem:[#allocation31_spill] sm:$0xff]  ;;  %v13298_v29 = vsel %vm1673_vm4, %v1734_v24, %v1735_v52  ;;  %v1749_v24 = vrot.slane %v12688_v17, 2 }
  0xe4   :  { %10782 = vmatprep.mubr.msk.f32.mxu1 %vm33_vm1, %v12462_v30  ;;  %v1737_v53 = vrot.slane %v17036_v21, 2  ;;  %17037 = vst [vmem:[#allocation31_spill] sm:$0xff] %v13298_v29  ;;  %v17039_v30 = vld [vmem:[#allocation33_spill] sm:$0xff] }
  0xe5   :  { %10691 = vmatmul.mubr.msk.f32.gmra.mxu0 %vm33_vm1, %v13275_v3  ;;  %v1740_v33 = vrot.slane %v17039_v30, 2 }
  0xe6   :  { %10693 = vmatprep.mubr.msk.f32.mxu0 %vm33_vm1, %v13281_v45  ;;  %v13309_v6 = vsel %vm1673_vm4, %v1735_v52, %v1737_v53 }
  0xe7   :  { %10783 = vmatmul.mubr.msk.f32.gmra.mxu1 %vm33_vm1, %v12464_v31  ;;  %17040 = vst [vmem:[#allocation32_spill] sm:$0xff] %v13309_v6  ;;  %v17041_v31 = vld [vmem:[#allocation36_spill] sm:$0xff]  ;;  %v13315_v5 = vsel %vm1673_vm4, %v1739_v62, %v1740_v33  ;;  %v17051_v62 = vld [vmem:[#allocation46_spill] sm:$0xff] }
  0xe8   :  { %10785 = vmatprep.mubr.msk.f32.mxu1 %vm33_vm1, %v12488_v55  ;;  %v1742_v7 = vrot.slane %v17041_v31, 2  ;;  %17042 = vst [vmem:[#allocation33_spill] sm:$0xff] %v13315_v5  ;;  %v1745_v55 = vrot.slane %v12667_v12, 2 }
  0xe9   :  { %10694 = vmatmul.mubr.msk.f32.gmra.mxu0 %vm33_vm1, %v13292_v4 }
  0xea   :  { %10696 = vmatprep.mubr.msk.f32.mxu0 %vm33_vm1, %v13298_v29  ;;  %v13326_v44 = vsel %vm1673_vm4, %v1740_v33, %v1742_v7  ;;  %v13332_v59 = vsel %vm1673_vm4, %v1744_v14, %v1745_v55  ;;  %v17052_v33 = vld [vmem:[#allocation47_spill] sm:$0xff]  ;;  %v17054_v7 = vld [vmem:[#allocation49_spill] sm:$0xff] }
  0xeb   :  { %10786 = vmatmul.mubr.msk.f32.gmra.mxu1 %vm33_vm1, %v12490_v0  ;;  %17044 = vst [vmem:[#allocation36_spill] sm:$0xff] %v13326_v44  ;;  %v17045_v0 = vld [vmem:[#allocation40_spill] sm:$0xff]  ;;  %17046 = vst [vmem:[#allocation37_spill] sm:$0xff] %v13332_v59  ;;  %v1760_v31 = vrot.slane %v17052_v33, 2  ;;  %v1762_v14 = vrot.slane %v17054_v7, 2  ;;  %v17063_v7 = vld [vmem:[#allocation57_spill] sm:$0xff] }
  0xec   :  { %10788 = vmatprep.mubr.msk.f32.mxu1 %vm33_vm1, %v12512_v25  ;;  %v1747_v58 = vrot.slane %v17045_v0, 2  ;;  %v1750_v25 = vrot.slane %v12690_v43, 2 }
  0xed   :  { %10697 = vmatmul.mubr.msk.f32.gmra.mxu0 %vm33_vm1, %v13309_v6 }
  0xee   :  { %10699 = vmatprep.mubr.msk.f32.mxu0 %vm33_vm1, %v13315_v5  ;;  %v13343_v52 = vsel %vm1673_vm4, %v1745_v55, %v1747_v58  ;;  %v13349_v53 = vsel %vm1673_vm4, %v1749_v24, %v1750_v25  ;;  %v17056_v55 = vld [vmem:[#allocation50_spill] sm:$0xff]  ;;  %v17057_v58 = vld [vmem:[#allocation51_spill] sm:$0xff] }
  0xef   :  { %10789 = vmatmul.mubr.msk.f32.gmra.mxu1 %vm33_vm1, %v12514_v27  ;;  %17047 = vst [vmem:[#allocation40_spill] sm:$0xff] %v13343_v52  ;;  %v17048_v27 = vld [vmem:[#allocation43_spill] sm:$0xff]  ;;  %v1764_v0 = vrot.slane %v17056_v55, 2  ;;  %v1765_v24 = vrot.slane %v17057_v58, 2 }
  0xf0   :  { %10791 = vmatprep.mubr.msk.f32.mxu1 %vm33_vm1, %v12610_v8  ;;  %v1752_v21 = vrot.slane %v17048_v27, 2  ;;  %17049 = vst [vmem:[#allocation43_spill] sm:$0xff] %v13349_v53  ;;  %v17060_v27 = vld [vmem:[#allocation54_spill] sm:$0xff]  ;;  %v10466_v46 = vpop.f32.mrf.mxu0 }
  0xf1   :  { %10700 = vmatmul.mubr.msk.f32.gmra.mxu0 %vm33_vm1, %v13326_v44  ;;  %v17075_v44 = vld [vmem:[#allocation67_spill] sm:$0xff] }
  0xf2   :  { %10702 = vmatprep.mubr.msk.f32.mxu0 %vm33_vm1, %v13332_v59  ;;  %v13358_v8 = vsel %vm1673_vm4, %v1750_v25, %v1752_v21  ;;  %v13382_v25 = vld [vmem:[#allocation2 + $0x180] sm:$0xff]  ;;  %v1767_v21 = vrot.slane %v17060_v27, 2  ;;  %v838_v27 = vpop.f32.mrf.mxu0 }
  0xf3   :  { %10792 = vmatmul.mubr.msk.f32.gmra.mxu1 %vm33_vm1, %v17034_v20  ;;  %17050 = vst [vmem:[#allocation127_spill] sm:$0xff] %v13358_v8  ;;  %v1759_v20 = vrot.slane %v17051_v62, 2 }
  0xf4   :  { %10794 = vmatprep.mubr.msk.f32.mxu1 %vm33_vm1, %v17038_v61  ;;  %v17053_v61 = vld [vmem:[#allocation52_spill] sm:$0xff] }
  0xf5   :  { %10703 = vmatmul.mubr.msk.f32.gmra.mxu0 %vm33_vm1, %v13343_v52 }
  0xf6   :  { %10705 = vmatprep.mubr.msk.f32.mxu0 %vm33_vm1, %v13349_v53 }
  0xf7   :  { %10795 = vmatmul.mubr.msk.f32.gmra.mxu1 %vm33_vm1, %v17039_v30  ;;  %v13374_v30 = vsel %vm1673_vm4, %v1759_v20, %v1760_v31  ;;  %v13393_v20 = vsel %vm1673_vm4, %v1764_v0, %v1765_v24 }
  0xf8   :  { %10797 = vmatprep.mubr.msk.f32.mxu1 %vm33_vm1, %v17043_v13  ;;  %17055 = vst [vmem:[#allocation46_spill] sm:$0xff] %v13374_v30  ;;  %v17058_v13 = vld [vmem:[#allocation55_spill] sm:$0xff]  ;;  %17061 = vst [vmem:[#allocation52_spill] sm:$0xff] %v13393_v20 }
  0xf9   :  { %10706 = vmatmul.mubr.msk.f32.gmra.mxu0 %vm33_vm1, %v13358_v8 }
  0xfa   :  { %10708 = vmatprep.mubr.msk.f32.mxu0 %vm33_vm1, %v17053_v61 }
  0xfb   :  { %10798 = vmatmul.mubr.msk.f32.gmra.mxu1 %vm33_vm1, %v12667_v12  ;;  %v13387_v12 = vsel %vm1673_vm4, %v1760_v31, %v1762_v14  ;;  %v17065_v31 = vld [vmem:[#allocation60_spill] sm:$0xff] }
  0xfc   :  { %10800 = vmatprep.mubr.msk.f32.mxu1 %vm33_vm1, %v12688_v17  ;;  %17059 = vst [vmem:[#allocation47_spill] sm:$0xff] %v13387_v12  ;;  %v17062_v17 = vld [vmem:[#allocation56_spill] sm:$0xff]  ;;  %v1772_v14 = vrot.slane %v17065_v31, 2 }
  0xfd   :  { %10709 = vmatmul.mubr.msk.f32.gmra.mxu0 %vm33_vm1, %v17058_v13  ;;  %v1769_v61 = vrot.slane %v17062_v17, 2  ;;  %v1770_v13 = vrot.slane %v17063_v7, 2 }
  0xfe   :  { %10711 = vmatprep.mubr.msk.f32.mxu0 %vm33_vm1, %v13374_v30  ;;  %v17068_v30 = vld [vmem:[#allocation61_spill] sm:$0xff] }
  0xff   :  { %10801 = vmatmul.mubr.msk.f32.gmra.mxu1 %vm33_vm1, %v12690_v43  ;;  %v13406_v43 = vsel %vm1673_vm4, %v1765_v24, %v1767_v21  ;;  %v13414_v10 = vsel %vm1673_vm4, %v1769_v61, %v1770_v13  ;;  %v1774_v8 = vrot.slane %v17068_v30, 2  ;;  %v13427_v31 = vsel %vm1673_vm4, %v1770_v13, %v1772_v14  ;;  %v17072_v61 = vld [vmem:[#allocation65_spill] sm:$0xff] }
 0x100   :  { %10803 = vmatprep.mubr.msk.f32.mxu1 %vm33_vm1, %v13382_v25  ;;  %17064 = vst [vmem:[#allocation49_spill] sm:$0xff] %v13406_v43  ;;  %17067 = vst [vmem:[#allocation51_spill] sm:$0xff] %v13414_v10 }
 0x101   :  { %10712 = vmatmul.mubr.msk.f32.gmra.mxu0 %vm33_vm1, %v13387_v12  ;;  %v17069_v12 = vld [vmem:[#allocation62_spill] sm:$0xff]  ;;  %17071 = vst [vmem:[#allocation54_spill] sm:$0xff] %v13427_v31 }
 0x102   :  { %10714 = vmatprep.mubr.msk.f32.mxu0 %vm33_vm1, %v13393_v20  ;;  %v1775_v53 = vrot.slane %v17069_v12, 2 }
 0x103   :  { %v13409_v0 = vpop.f32.mrf.mxu1  ;;  %10804 = vmatmul.mubr.msk.f32.gmra.mxu1 %vm33_vm1, %v13399_v11 }
 0x104   :  { %17066 = vst [vmem:[#allocation50_spill] sm:$0xff] %v13409_v0  ;;  %10806 = vmatprep.mubr.msk.f32.mxu1 %vm33_vm1, %v17051_v62  ;;  %v1777_v0 = vrot.slane %v17072_v61, 2  ;;  %v13433_v62 = vsel %vm1673_vm4, %v1774_v8, %v1775_v53 }
 0x105   :  { %v13420_v24 = vpop.f32.mrf.mxu1  ;;  %v10469_v21 = vpop.f32.mrf.mxu0  ;;  %10715 = vmatmul.mubr.msk.f32.gmra.mxu0 %vm33_vm1, %v13406_v43  ;;  %17073 = vst [vmem:[#allocation56_spill] sm:$0xff] %v13433_v62  ;;  %v1780_v43 = vrot.slane %v17075_v44, 2 }
 0x106   :  { %17070 = vst [vmem:[#allocation55_spill] sm:$0xff] %v13420_v24  ;;  %10717 = vmatprep.mubr.msk.f32.mxu0 %vm33_vm1, %v13414_v10  ;;  %v17074_v24 = vld [vmem:[#allocation66_spill] sm:$0xff]  ;;  %v13448_v8 = vsel %vm1673_vm4, %v1775_v53, %v1777_v0 }
 0x107   :  { %v10564_v20 = vpop.f32.mrf.mxu1  ;;  %10807 = vmatmul.mubr.msk.f32.gmra.mxu1 %vm33_vm1, %v17052_v33  ;;  %v848_v52 = vpop.f32.mrf.mxu0  ;;  %v1779_v59 = vrot.slane %v17074_v24, 2  ;;  %17078 = vst [vmem:[#allocation61_spill] sm:$0xff] %v13448_v8  ;;  %v17079_v33 = vld [vmem:[#allocation70_spill] sm:$0xff] }
 0x108   :  { %v13437_v5 = vadd.f32 %v10564_v20, %v10466_v46  ;;  %10809 = vmatprep.mubr.msk.f32.mxu1 %vm33_vm1, %v17056_v55  ;;  %v1782_v10 = vrot.slane %v17079_v33, 2 }
 0x109   :  { %v1354_v13 = vpop.f32.mrf.mxu1  ;;  %v10472_v14 = vpop.f32.mrf.mxu0  ;;  %10718 = vmatmul.mubr.msk.f32.gmra.mxu0 %vm33_vm1, %v13427_v31  ;;  %v13454_v20 = vsel %vm1673_vm4, %v1779_v59, %v1780_v43 }
 0x10a   :  { %17076 = vst [vmem:[#allocation57_spill] sm:$0xff] %v13437_v5  ;;  %v13443_v61 = vadd.f32 %v1354_v13, %v838_v27  ;;  %10720 = vmatprep.mubr.msk.f32.mxu0 %vm33_vm1, %v13433_v62  ;;  %17080 = vst [vmem:[#allocation62_spill] sm:$0xff] %v13454_v20  ;;  %v17081_v5 = vld [vmem:[#allocation71_spill] sm:$0xff]  ;;  %v17082_v27 = vld [vmem:[#allocation72_spill] sm:$0xff]  ;;  %v13469_v59 = vsel %vm1673_vm4, %v1780_v43, %v1782_v10 }
 0x10b   :  { %v10567_v46 = vpop.f32.mrf.mxu1  ;;  %10810 = vmatmul.mubr.msk.f32.gmra.mxu1 %vm33_vm1, %v17057_v58  ;;  %v858_v55 = vpop.f32.mrf.mxu0  ;;  %v1784_v31 = vrot.slane %v17081_v5, 2  ;;  %v1785_v13 = vrot.slane %v17082_v27, 2  ;;  %17085 = vst [vmem:[#allocation67_spill] sm:$0xff] %v13469_v59  ;;  %v17086_v58 = vld [vmem:[#allocation75_spill] sm:$0xff] }
 0x10c   :  { %17077 = vst [vmem:[#allocation60_spill] sm:$0xff] %v13443_v61  ;;  %v13458_v61 = vadd.f32 %v10567_v46, %v10469_v21  ;;  %10812 = vmatprep.mubr.msk.f32.mxu1 %vm33_vm1, %v17062_v17  ;;  %v1787_v62 = vrot.slane %v17086_v58, 2 }
 0x10d   :  { %v1364_v53 = vpop.f32.mrf.mxu1  ;;  %v10475_v0 = vpop.f32.mrf.mxu0  ;;  %10721 = vmatmul.mubr.msk.f32.gmra.mxu0 %vm33_vm1, %v13448_v8  ;;  %v13475_v46 = vsel %vm1673_vm4, %v1784_v31, %v1785_v13  ;;  %v17093_v31 = vld [vmem:[#allocation80_spill] sm:$0xff] }
 0x10e   :  { %17083 = vst [vmem:[#allocation65_spill] sm:$0xff] %v13458_v61  ;;  %v13464_v33 = vadd.f32 %v1364_v53, %v848_v52  ;;  %10723 = vmatprep.mubr.msk.f32.mxu0 %vm33_vm1, %v13454_v20  ;;  %17087 = vst [vmem:[#allocation70_spill] sm:$0xff] %v13475_v46  ;;  %v17088_v61 = vld [vmem:[#allocation76_spill] sm:$0xff]  ;;  %v17089_v52 = vld [vmem:[#allocation77_spill] sm:$0xff]  ;;  %v1792_v20 = vrot.slane %v17093_v31, 2 }
 0x10f   :  { %v10570_v21 = vpop.f32.mrf.mxu1  ;;  %10813 = vmatmul.mubr.msk.f32.gmra.mxu1 %vm33_vm1, %v17063_v7  ;;  %v868_v17 = vpop.f32.mrf.mxu0  ;;  %v1789_v8 = vrot.slane %v17088_v61, 2  ;;  %v1790_v53 = vrot.slane %v17089_v52, 2  ;;  %v13490_v7 = vsel %vm1673_vm4, %v1785_v13, %v1787_v62 }
 0x110   :  { %17084 = vst [vmem:[#allocation66_spill] sm:$0xff] %v13464_v33  ;;  %v13479_v33 = vadd.f32 %v10570_v21, %v10472_v14  ;;  %10815 = vmatprep.mubr.msk.f32.mxu1 %vm33_vm1, %v17068_v30  ;;  %17092 = vst [vmem:[#allocation75_spill] sm:$0xff] %v13490_v7 }
 0x111   :  { %v1374_v10 = vpop.f32.mrf.mxu1  ;;  %v10478_v43 = vpop.f32.mrf.mxu0  ;;  %10724 = vmatmul.mubr.msk.f32.gmra.mxu0 %vm33_vm1, %v13469_v59  ;;  %v13496_v21 = vsel %vm1673_vm4, %v1789_v8, %v1790_v53  ;;  %v17100_v8 = vld [vmem:[#allocation85_spill] sm:$0xff] }
 0x112   :  { %17090 = vst [vmem:[#allocation71_spill] sm:$0xff] %v13479_v33  ;;  %v13485_v58 = vadd.f32 %v1374_v10, %v858_v55  ;;  %10726 = vmatprep.mubr.msk.f32.mxu0 %vm33_vm1, %v13475_v46  ;;  %17094 = vst [vmem:[#allocation76_spill] sm:$0xff] %v13496_v21  ;;  %v17095_v33 = vld [vmem:[#allocation81_spill] sm:$0xff]  ;;  %v17096_v55 = vld [vmem:[#allocation82_spill] sm:$0xff]  ;;  %v1797_v46 = vrot.slane %v17100_v8, 2 }
 0x113   :  { %v10573_v14 = vpop.f32.mrf.mxu1  ;;  %10816 = vmatmul.mubr.msk.f32.gmra.mxu1 %vm33_vm1, %v17069_v12  ;;  %v878_v30 = vpop.f32.mrf.mxu0  ;;  %v1794_v59 = vrot.slane %v17095_v33, 2  ;;  %v1795_v10 = vrot.slane %v17096_v55, 2  ;;  %v13511_v12 = vsel %vm1673_vm4, %v1790_v53, %v1792_v20  ;;  %v17105_v8 = vld [vmem:[#allocation90_spill] sm:$0xff] }
 0x114   :  { %17091 = vst [vmem:[#allocation72_spill] sm:$0xff] %v13485_v58  ;;  %v13500_v58 = vadd.f32 %v10573_v14, %v10475_v0  ;;  %10818 = vmatprep.mubr.msk.f32.mxu1 %vm33_vm1, %v17074_v24  ;;  %17099 = vst [vmem:[#allocation81_spill] sm:$0xff] %v13511_v12 }
 0x115   :  { %v1384_v62 = vpop.f32.mrf.mxu1  ;;  %v10481_v13 = vpop.f32.mrf.mxu0  ;;  %10727 = vmatmul.mubr.msk.f32.gmra.mxu0 %vm33_vm1, %v13490_v7  ;;  %v13517_v14 = vsel %vm1673_vm4, %v1794_v59, %v1795_v10  ;;  %v13533_v59 = vsel %vm1673_vm4, %v1795_v10, %v1797_v46  ;;  %v17109_v10 = vld [vmem:[#allocation94_spill] sm:$0xff] }
 0x116   :  { %17097 = vst [vmem:[#allocation77_spill] sm:$0xff] %v13500_v58  ;;  %v13506_v31 = vadd.f32 %v1384_v62, %v868_v17  ;;  %10729 = vmatprep.mubr.msk.f32.mxu0 %vm33_vm1, %v13496_v21  ;;  %17101 = vst [vmem:[#allocation82_spill] sm:$0xff] %v13517_v14  ;;  %v17102_v58 = vld [vmem:[#allocation86_spill] sm:$0xff]  ;;  %v17103_v17 = vld [vmem:[#allocation87_spill] sm:$0xff] }
 0x117   :  { %v10576_v0 = vpop.f32.mrf.mxu1  ;;  %10819 = vmatmul.mubr.msk.f32.gmra.mxu1 %vm33_vm1, %v17075_v44  ;;  %v888_v24 = vpop.f32.mrf.mxu0  ;;  %v1799_v7 = vrot.slane %v17102_v58, 2  ;;  %v1800_v62 = vrot.slane %v17103_v17, 2  ;;  %v1802_v44 = vrot.slane %v17105_v8, 2  ;;  %17106 = vst [vmem:[#allocation86_spill] sm:$0xff] %v13533_v59  ;;  %v1805_v8 = vrot.slane %v12940_v56, 2 }
 0x118   :  { %17098 = vst [vmem:[#allocation80_spill] sm:$0xff] %v13506_v31  ;;  %v13521_v31 = vadd.f32 %v10576_v0, %v10478_v43  ;;  %10821 = vmatprep.mubr.msk.f32.mxu1 %vm33_vm1, %v17081_v5 }
 0x119   :  { %v1394_v20 = vpop.f32.mrf.mxu1  ;;  %v10484_v53 = vpop.f32.mrf.mxu0  ;;  %10730 = vmatmul.mubr.msk.f32.gmra.mxu0 %vm33_vm1, %v13511_v12  ;;  %v13538_v0 = vsel %vm1673_vm4, %v1799_v7, %v1800_v62  ;;  %v13554_v7 = vsel %vm1673_vm4, %v1800_v62, %v1802_v44  ;;  %v17112_v44 = vld [vmem:[#allocation97_spill] sm:$0xff] }
 0x11a   :  { %17104 = vst [vmem:[#allocation85_spill] sm:$0xff] %v13521_v31  ;;  %v13528_v21 = vadd.f32 %v1394_v20, %v878_v30  ;;  %10732 = vmatprep.mubr.msk.f32.mxu0 %vm33_vm1, %v13517_v14  ;;  %17107 = vst [vmem:[#allocation87_spill] sm:$0xff] %v13538_v0  ;;  %v17108_v31 = vld [vmem:[#allocation91_spill] sm:$0xff] }
 0x11b   :  { %v10579_v43 = vpop.f32.mrf.mxu1  ;;  %10822 = vmatmul.mubr.msk.f32.gmra.mxu1 %vm33_vm1, %v17082_v27  ;;  %v898_v5 = vpop.f32.mrf.mxu0  ;;  %v1804_v12 = vrot.slane %v17108_v31, 2  ;;  %v1807_v27 = vrot.slane %v17109_v10, 2  ;;  %17110 = vst [vmem:[#allocation90_spill] sm:$0xff] %v13554_v7  ;;  %v1810_v10 = vrot.slane %v12963_v28, 2 }
 0x11c   :  { %v13542_v30 = vadd.f32 %v10579_v43, %v10481_v13  ;;  %10824 = vmatprep.mubr.msk.f32.mxu1 %vm33_vm1, %v17088_v61 }
 0x11d   :  { %v1404_v20 = vpop.f32.mrf.mxu1  ;;  %v10487_v46 = vpop.f32.mrf.mxu0  ;;  %10733 = vmatmul.mubr.msk.f32.gmra.mxu0 %vm33_vm1, %v13533_v59  ;;  %v13559_v43 = vsel %vm1673_vm4, %v1804_v12, %v1805_v8  ;;  %v1809_v59 = vrot.slane %v12961_v18, 2  ;;  %v13575_v12 = vsel %vm1673_vm4, %v1805_v8, %v1807_v27  ;;  %v17115_v27 = vld [vmem:[#allocation100_spill] sm:$0xff] }
 0x11e   :  { %v13549_v14 = vadd.f32 %v1404_v20, %v888_v24  ;;  %10735 = vmatprep.mubr.msk.f32.mxu0 %vm33_vm1, %v13538_v0  ;;  %17111 = vst [vmem:[#allocation91_spill] sm:$0xff] %v13559_v43  ;;  %17113 = vst [vmem:[#allocation94_spill] sm:$0xff] %v13575_v12 }
 0x11f   :  { %v10582_v13 = vpop.f32.mrf.mxu1  ;;  %10825 = vmatmul.mubr.msk.f32.gmra.mxu1 %vm33_vm1, %v17089_v52  ;;  %v908_v61 = vpop.f32.mrf.mxu0  ;;  %v1812_v52 = vrot.slane %v17112_v44, 2  ;;  %v1815_v44 = vrot.slane %v12986_v1, 2 }
 0x120   :  { %v13563_v24 = vadd.f32 %v10582_v13, %v10484_v53  ;;  %10827 = vmatprep.mubr.msk.f32.mxu1 %vm33_vm1, %v17095_v33  ;;  %v13580_v13 = vsel %vm1673_vm4, %v1809_v59, %v1810_v10 }
 0x121   :  { %v1414_v20 = vpop.f32.mrf.mxu1  ;;  %v10490_v62 = vpop.f32.mrf.mxu0  ;;  %10736 = vmatmul.mubr.msk.f32.gmra.mxu0 %vm33_vm1, %v13554_v7  ;;  %17114 = vst [vmem:[#allocation97_spill] sm:$0xff] %v13580_v13  ;;  %v1814_v7 = vrot.slane %v12984_v63, 2  ;;  %v13596_v59 = vsel %vm1673_vm4, %v1810_v10, %v1812_v52 }
 0x122   :  { %v13570_v0 = vadd.f32 %v1414_v20, %v898_v5  ;;  %10738 = vmatprep.mubr.msk.f32.mxu0 %vm33_vm1, %v13559_v43  ;;  %17116 = vst [vmem:[#allocation100_spill] sm:$0xff] %v13596_v59 }
 0x123   :  { %v10585_v53 = vpop.f32.mrf.mxu1  ;;  %10828 = vmatmul.mubr.msk.f32.gmra.mxu1 %vm33_vm1, %v17096_v55  ;;  %v918_v33 = vpop.f32.mrf.mxu0  ;;  %v1817_v55 = vrot.slane %v17115_v27, 2  ;;  %v1820_v27 = vrot.slane %v13009_v36, 2 }
 0x124   :  { %v13584_v5 = vadd.f32 %v10585_v53, %v10487_v46  ;;  %10830 = vmatprep.mubr.msk.f32.mxu1 %vm33_vm1, %v17102_v58  ;;  %v13601_v53 = vsel %vm1673_vm4, %v1814_v7, %v1815_v44 }
 0x125   :  { %v1424_v20 = vpop.f32.mrf.mxu1  ;;  %v10493_v8 = vpop.f32.mrf.mxu0  ;;  %10739 = vmatmul.mubr.msk.f32.gmra.mxu0 %vm33_vm1, %v13575_v12  ;;  %17117 = vst [vmem:[#allocation128_spill] sm:$0xff] %v13601_v53  ;;  %v1819_v12 = vrot.slane %v13007_v22, 2  ;;  %v13617_v7 = vsel %vm1673_vm4, %v1815_v44, %v1817_v55 }
 0x126   :  { %v13591_v43 = vadd.f32 %v1424_v20, %v908_v61  ;;  %10741 = vmatprep.mubr.msk.f32.mxu0 %vm33_vm1, %v13580_v13  ;;  %17118 = vst [vmem:[#allocation129_spill] sm:$0xff] %v13617_v7  ;;  %v11707_v13 = vld [vmem:[#allocation2 + $0x320] sm:$0xff] }
 0x127   :  { %v10588_v46 = vpop.f32.mrf.mxu1  ;;  %10831 = vmatmul.mubr.msk.f32.gmra.mxu1 %vm33_vm1, %v17103_v17  ;;  %v928_v58 = vpop.f32.mrf.mxu0  ;;  %v1822_v17 = vrot.slane %v13026_v50, 2  ;;  %v1825_v50 = vrot.slane %v13032_v57, 2 }
 0x128   :  { %v13605_v61 = vadd.f32 %v10588_v46, %v10490_v62  ;;  %10833 = vmatprep.mubr.msk.f32.mxu1 %vm33_vm1, %v17108_v31  ;;  %v13622_v46 = vsel %vm1673_vm4, %v1819_v12, %v1820_v27 }
 0x129   :  { %v1434_v20 = vpop.f32.mrf.mxu1  ;;  %v10496_v10 = vpop.f32.mrf.mxu0  ;;  %10742 = vmatmul.mubr.msk.f32.gmra.mxu0 %vm33_vm1, %v13596_v59  ;;  %17119 = vst [vmem:[#allocation130_spill] sm:$0xff] %v13622_v46  ;;  %v1824_v59 = vrot.slane %v13030_v48, 2  ;;  %v13638_v12 = vsel %vm1673_vm4, %v1820_v27, %v1822_v17  ;;  %v11708_v17 = vld [vmem:[#allocation2 + $0x328] sm:$0x3] }
 0x12a   :  { %v13612_v52 = vadd.f32 %v1434_v20, %v918_v33  ;;  %10744 = vmatprep.mubr.msk.f32.mxu0 %vm33_vm1, %v13601_v53  ;;  %17120 = vst [vmem:[#allocation131_spill] sm:$0xff] %v13638_v12  ;;  %v11706_v53 = vld [vmem:[#allocation2 + $0x318] sm:$0xff] }
 0x12b   :  { %v10591_v62 = vpop.f32.mrf.mxu1  ;;  %10834 = vmatmul.mubr.msk.f32.gmra.mxu1 %vm33_vm1, %v12940_v56  ;;  %v938_v31 = vpop.f32.mrf.mxu0  ;;  %v1827_v56 = vrot.slane %v13049_v2, 2  ;;  %v1830_v2 = vrot.slane %v11707_v13, 2 }
 0x12c   :  { %v13626_v33 = vadd.f32 %v10591_v62, %v10493_v8  ;;  %10836 = vmatprep.mubr.msk.f32.mxu1 %vm33_vm1, %v12961_v18  ;;  %v13643_v62 = vsel %vm1673_vm4, %v1824_v59, %v1825_v50 }
 0x12d   :  { %v1444_v20 = vpop.f32.mrf.mxu1  ;;  %v10499_v44 = vpop.f32.mrf.mxu0  ;;  %10745 = vmatmul.mubr.msk.f32.gmra.mxu0 %vm33_vm1, %v13617_v7  ;;  %17121 = vst [vmem:[#allocation132_spill] sm:$0xff] %v13643_v62  ;;  %v1829_v7 = vrot.slane %v11706_v53, 2  ;;  %v13656_v59 = vsel %vm1673_vm4, %v1825_v50, %v1827_v56 }
 0x12e   :  { %v13633_v55 = vadd.f32 %v1444_v20, %v928_v58  ;;  %10747 = vmatprep.mubr.msk.f32.mxu0 %vm33_vm1, %v13622_v46  ;;  %17123 = vst [vmem:[#allocation134_spill] sm:$0xff] %v13656_v59 }
 0x12f   :  { %v10594_v8 = vpop.f32.mrf.mxu1  ;;  %10837 = vmatmul.mubr.msk.f32.gmra.mxu1 %vm33_vm1, %v12963_v28  ;;  %v948_v18 = vpop.f32.mrf.mxu0  ;;  %v1832_v28 = vrot.slane %v11708_v17, 2 }
 0x130   :  { %v13645_v58 = vadd.f32 %v10594_v8, %v10496_v10  ;;  %10839 = vmatprep.mubr.msk.f32.mxu1 %vm33_vm1, %v12984_v63  ;;  %v13661_v8 = vsel %vm1673_vm4, %v1829_v7, %v1830_v2 }
 0x131   :  { %v1454_v20 = vpop.f32.mrf.mxu1  ;;  %v10502_v27 = vpop.f32.mrf.mxu0  ;;  %10748 = vmatmul.mubr.msk.f32.gmra.mxu0 %vm33_vm1, %v13638_v12  ;;  %17124 = vst [vmem:[#allocation135_spill] sm:$0xff] %v13661_v8 }
 0x132   :  { %17122 = vst [vmem:[#allocation133_spill] sm:$0xff] %v13645_v58  ;;  %v13651_v46 = vadd.f32 %v1454_v20, %v938_v31  ;;  %10750 = vmatprep.mubr.msk.f32.mxu0 %vm33_vm1, %v13643_v62 }
 0x133   :  { %v10597_v10 = vpop.f32.mrf.mxu1  ;;  %10840 = vmatmul.mubr.msk.f32.gmra.mxu1 %vm33_vm1, %v12986_v1  ;;  %v958_v63 = vpop.f32.mrf.mxu0  ;;  %v13674_v1 = vsel %vm1673_vm4, %v1830_v2, %v1832_v28 }
 0x134   :  { %v13663_v58 = vadd.f32 %v10597_v10, %v10499_v44  ;;  %10842 = vmatprep.mubr.msk.f32.mxu1 %vm33_vm1, %v13007_v22  ;;  %17125 = vst [vmem:[#allocation136_spill] sm:$0xff] %v13674_v1  ;;  %v17126_v10 = vld [vmem:[#allocation9_spill] sm:$0xff] }
 0x135   :  { %v1464_v31 = vpop.f32.mrf.mxu1  ;;  %v10505_v20 = vpop.f32.mrf.mxu0  ;;  %10751 = vmatmul.mubr.msk.f32.gmra.mxu0 %vm33_vm1, %v13656_v59  ;;  %v17132_v59 = vld [vmem:[#allocation14_spill] sm:$0xff] }
 0x136   :  { %v13669_v50 = vadd.f32 %v1464_v31, %v948_v18  ;;  %10753 = vmatprep.mubr.msk.f32.mxu0 %vm33_vm1, %v13661_v8 }
 0x137   :  { %v10600_v7 = vpop.f32.mrf.mxu1  ;;  %10843 = vmatmul.mubr.msk.f32.gmra.mxu1 %vm33_vm1, %v13009_v36  ;;  %v968_v44 = vpop.f32.mrf.mxu0 }
 0x138   :  { %v13678_v56 = vadd.f32 %v10600_v7, %v10502_v27  ;;  %10845 = vmatprep.mubr.msk.f32.mxu1 %vm33_vm1, %v13030_v48  ;;  %v9366_v48 = vld [vmem:[%s16623_s1 + $0x1c] sm:$0xf]  ;;  %v13698_v7 = vld [vmem:[#allocation2 + $0x330] sm:$0xff] }
 0x139   :  { %v1474_v22 = vpop.f32.mrf.mxu1  ;;  %v10508_v17 = vpop.f32.mrf.mxu0  ;;  %10754 = vmatmul.mubr.msk.f32.gmra.mxu0 %vm33_vm1, %v13674_v1  ;;  %11148 = vmatprep.subr.msk.mxu1 %vm768_vm0, %v9366_v48  ;;  %v17131_v1 = vld [vmem:[#allocation13_spill] sm:$0xff] }
 0x13a   :  { %v13684_v18 = vadd.f32 %v1474_v22, %v958_v63  ;;  %10856 = vmatprep.mubr.msk.f32.mxu0 %vm33_vm1, %v17126_v10  ;;  %v17127_v63 = vld [vmem:[#allocation10_spill] sm:$0xff] }
 0x13b   :  { %v10603_v2 = vpop.f32.mrf.mxu1  ;;  %10846 = vmatmul.mubr.msk.f32.gmra.mxu1 %vm33_vm1, %v13032_v57  ;;  %v978_v36 = vpop.f32.mrf.mxu0  ;;  %v17128_v57 = vld [vmem:[#allocation11_spill] sm:$0xff] }
 0x13c   :  { %v13690_v27 = vadd.f32 %v10603_v2, %v10505_v20  ;;  %10848 = vmatprep.mubr.msk.f32.mxu1 %vm33_vm1, %v11706_v53  ;;  %v13710_v53 = vld [vmem:[%s16623_s1 + $0x20] sm:$0xf] }
 0x13d   :  { %v1484_v28 = vpop.f32.mrf.mxu1  ;;  %v10511_v31 = vpop.f32.mrf.mxu0  ;;  %10857 = vmatmul.mubr.msk.f32.vlgmr.msra.gmra.mxu0 %vm33_vm1, %v17127_v63  ;;  %17129 = vst [vmem:[#allocation9_spill] sm:$0xff] %v13710_v53  ;;  %v17130_v63 = vld [vmem:[#allocation12_spill] sm:$0xff] }
 0x13e   :  { %v13701_v22 = vadd.f32 %v1484_v28, %v968_v44  ;;  %11051 = vmatpush3.msk.msra.mxu0 %vm768_vm0, %v13120_v47  ;;  %10859 = vmatprep.mubr.msk.f32.mxu0 %vm33_vm1, %v17128_v57  ;;  %v13719_v47 = vld [vmem:[#allocation2 + $0x338] sm:$0xff] }
 0x13f   :  { %v10606_v20 = vpop.f32.mrf.mxu1  ;;  %10849 = vmatmul.mubr.msk.f32.gmra.mxu1 %vm33_vm1, %v11707_v13  ;;  %v988_v10 = vpop.f32.mrf.mxu0  ;;  %11246 = vmatprep.subr.msk.mxu0 %vm768_vm0, %v13710_v53 }
 0x140   :  { %v13715_v44 = vadd.f32 %v10606_v20, %v10508_v17  ;;  %10851 = vmatprep.mubr.msk.f32.mxu1 %vm33_vm1, %v13698_v7 }
 0x141   :  { %v1494_v2 = vpop.f32.mrf.mxu1  ;;  %v10514_v28 = vpop.f32.mrf.mxu0  ;;  %10860 = vmatmul.mubr.msk.f32.gmra.mxu0 %vm33_vm1, %v17130_v63 }
 0x142   :  { %v13723_v57 = vadd.f32 %v1494_v2, %v978_v36  ;;  %10862 = vmatprep.mubr.msk.f32.mxu0 %vm33_vm1, %v17131_v1  ;;  %v17133_v2 = vld [vmem:[#allocation15_spill] sm:$0xff] }
 0x143   :  { %v10609_v13 = vpop.f32.mrf.mxu1  ;;  %10852 = vmatmul.mubr.msk.f32.gmra.mxu1 %vm33_vm1, %v13719_v47  ;;  %v998_v17 = vpop.f32.mrf.mxu0 }
 0x144   :  { %v13729_v20 = vadd.f32 %v10609_v13, %v10511_v31  ;;  %10954 = vmatprep.mubr.msk.f32.mxu1 %vm33_vm1, %v13096_v15 }
 0x145   :  { %v1504_v53 = vpop.f32.mrf.mxu1  ;;  %v10517_v8 = vpop.f32.mrf.mxu0  ;;  %10863 = vmatmul.mubr.msk.f32.gmra.mxu0 %vm33_vm1, %v17132_v59  ;;  %v17134_v59 = vld [vmem:[#allocation16_spill] sm:$0xff] }
 0x146   :  { %v13735_v36 = vadd.f32 %v1504_v53, %v988_v10  ;;  %10865 = vmatprep.mubr.msk.f32.mxu0 %vm33_vm1, %v17133_v2  ;;  %v17135_v10 = vld [vmem:[#allocation17_spill] sm:$0xff] }
 0x147   :  { %v10612_v1 = vpop.f32.mrf.mxu1  ;;  %10955 = vmatmul.mubr.msk.f32.vlgmr.msra.gmra.mxu1 %vm33_vm1, %v13114_v37  ;;  %v1008_v63 = vpop.f32.mrf.mxu0 }
 0x148   :  { %v13741_v31 = vadd.f32 %v10612_v1, %v10514_v28  ;;  %10957 = vmatprep.mubr.msk.f32.mxu1 %vm33_vm1, %v13125_v41  ;;  %11149 = vmatpush3.msk.msra.mxu1 %vm768_vm0, %v9366_v48  ;;  %v17136_v41 = vld [vmem:[#allocation18_spill] sm:$0xff] }
 0x149   :  { %v1514_v15 = vpop.f32.mrf.mxu1  ;;  %v10520_v13 = vpop.f32.mrf.mxu0  ;;  %10866 = vmatmul.mubr.msk.f32.gmra.mxu0 %vm33_vm1, %v17134_v59  ;;  %v17138_v59 = vld [vmem:[#allocation20_spill] sm:$0xff] }
 0x14a   :  { %v13748_v53 = vadd.f32 %v1514_v15, %v998_v17  ;;  %10868 = vmatprep.mubr.msk.f32.mxu0 %vm33_vm1, %v17135_v10  ;;  %v17137_v15 = vld [vmem:[#allocation19_spill] sm:$0xff] }
 0x14b   :  { %v10615_v2 = vpop.f32.mrf.mxu1  ;;  %10958 = vmatmul.mubr.msk.f32.gmra.mxu1 %vm33_vm1, %v13138_v51  ;;  %v1018_v37 = vpop.f32.mrf.mxu0 }
 0x14c   :  { %v13754_v1 = vadd.f32 %v10615_v2, %v10517_v8  ;;  %10960 = vmatprep.mubr.msk.f32.mxu1 %vm33_vm1, %v13144_v54 }
 0x14d   :  { %v1524_v48 = vpop.f32.mrf.mxu1  ;;  %v10523_v28 = vpop.f32.mrf.mxu0  ;;  %10869 = vmatmul.mubr.msk.f32.gmra.mxu0 %vm33_vm1, %v17136_v41  ;;  %v17140_v41 = vld [vmem:[#allocation22_spill] sm:$0xff] }
 0x14e   :  { %v13760_v17 = vadd.f32 %v1524_v48, %v1008_v63  ;;  %10871 = vmatprep.mubr.msk.f32.mxu0 %vm33_vm1, %v17137_v15  ;;  %v17139_v48 = vld [vmem:[#allocation21_spill] sm:$0xff] }
 0x14f   :  { %v10618_v10 = vpop.f32.mrf.mxu1  ;;  %10961 = vmatmul.mubr.msk.f32.gmra.mxu1 %vm33_vm1, %v13155_v60  ;;  %v1028_v51 = vpop.f32.mrf.mxu0 }
 0x150   :  { %v13766_v8 = vadd.f32 %v10618_v10, %v10520_v13  ;;  %10963 = vmatprep.mubr.msk.f32.mxu1 %vm33_vm1, %v13161_v26 }
 0x151   :  { %v1534_v2 = vpop.f32.mrf.mxu1  ;;  %v10526_v54 = vpop.f32.mrf.mxu0  ;;  %10872 = vmatmul.mubr.msk.f32.gmra.mxu0 %vm33_vm1, %v17138_v59  ;;  %v17142_v59 = vld [vmem:[#allocation24_spill] sm:$0xff] }
 0x152   :  { %v13772_v63 = vadd.f32 %v1534_v2, %v1018_v37  ;;  %10874 = vmatprep.mubr.msk.f32.mxu0 %vm33_vm1, %v17139_v48  ;;  %v17141_v2 = vld [vmem:[#allocation23_spill] sm:$0xff] }
 0x153   :  { %v10621_v15 = vpop.f32.mrf.mxu1  ;;  %10964 = vmatmul.mubr.msk.f32.gmra.mxu1 %vm33_vm1, %v13173_v39  ;;  %v1038_v60 = vpop.f32.mrf.mxu0 }
 0x154   :  { %v13778_v13 = vadd.f32 %v10621_v15, %v10523_v28  ;;  %10966 = vmatprep.mubr.msk.f32.mxu1 %vm33_vm1, %v13179_v35 }
 0x155   :  { %v1544_v10 = vpop.f32.mrf.mxu1  ;;  %v10529_v26 = vpop.f32.mrf.mxu0  ;;  %10875 = vmatmul.mubr.msk.f32.gmra.mxu0 %vm33_vm1, %v17140_v41  ;;  %v17144_v41 = vld [vmem:[#allocation26_spill] sm:$0xff] }
 0x156   :  { %v13784_v37 = vadd.f32 %v1544_v10, %v1028_v51  ;;  %10877 = vmatprep.mubr.msk.f32.mxu0 %vm33_vm1, %v17141_v2  ;;  %v17143_v10 = vld [vmem:[#allocation25_spill] sm:$0xff] }
 0x157   :  { %v10624_v48 = vpop.f32.mrf.mxu1  ;;  %10967 = vmatmul.mubr.msk.f32.gmra.mxu1 %vm33_vm1, %v13190_v9  ;;  %v1048_v39 = vpop.f32.mrf.mxu0 }
 0x158   :  { %v13790_v28 = vadd.f32 %v10624_v48, %v10526_v54  ;;  %10969 = vmatprep.mubr.msk.f32.mxu1 %vm33_vm1, %v13196_v42 }
 0x159   :  { %v1554_v15 = vpop.f32.mrf.mxu1  ;;  %v10532_v35 = vpop.f32.mrf.mxu0  ;;  %10878 = vmatmul.mubr.msk.f32.gmra.mxu0 %vm33_vm1, %v17142_v59  ;;  %v17146_v59 = vld [vmem:[#allocation29_spill] sm:$0xff] }
 0x15a   :  { %v13796_v51 = vadd.f32 %v1554_v15, %v1038_v60  ;;  %10880 = vmatprep.mubr.msk.f32.mxu0 %vm33_vm1, %v17143_v10  ;;  %v17145_v15 = vld [vmem:[#allocation27_spill] sm:$0xff] }
 0x15b   :  { %v10627_v2 = vpop.f32.mrf.mxu1  ;;  %10970 = vmatmul.mubr.msk.f32.gmra.mxu1 %vm33_vm1, %v13207_v34  ;;  %v1058_v9 = vpop.f32.mrf.mxu0 }
 0x15c   :  { %v13802_v54 = vadd.f32 %v10627_v2, %v10529_v26  ;;  %10972 = vmatprep.mubr.msk.f32.mxu1 %vm33_vm1, %v13213_v16 }
 0x15d   :  { %v1564_v48 = vpop.f32.mrf.mxu1  ;;  %v10535_v42 = vpop.f32.mrf.mxu0  ;;  %10881 = vmatmul.mubr.msk.f32.gmra.mxu0 %vm33_vm1, %v17144_v41  ;;  %v17148_v41 = vld [vmem:[#allocation34_spill] sm:$0xff] }
 0x15e   :  { %v13808_v60 = vadd.f32 %v1564_v48, %v1048_v39  ;;  %10883 = vmatprep.mubr.msk.f32.mxu0 %vm33_vm1, %v17145_v15  ;;  %v17147_v48 = vld [vmem:[#allocation30_spill] sm:$0xff] }
 0x15f   :  { %v10630_v10 = vpop.f32.mrf.mxu1  ;;  %10973 = vmatmul.mubr.msk.f32.gmra.mxu1 %vm33_vm1, %v13224_v19  ;;  %v1068_v34 = vpop.f32.mrf.mxu0 }
 0x160   :  { %v13814_v26 = vadd.f32 %v10630_v10, %v10532_v35  ;;  %10975 = vmatprep.mubr.msk.f32.mxu1 %vm33_vm1, %v13230_v32 }
 0x161   :  { %v1574_v2 = vpop.f32.mrf.mxu1  ;;  %v10538_v16 = vpop.f32.mrf.mxu0  ;;  %10884 = vmatmul.mubr.msk.f32.gmra.mxu0 %vm33_vm1, %v17146_v59  ;;  %v17150_v59 = vld [vmem:[#allocation38_spill] sm:$0xff] }
 0x162   :  { %v13820_v39 = vadd.f32 %v1574_v2, %v1058_v9  ;;  %10886 = vmatprep.mubr.msk.f32.mxu0 %vm33_vm1, %v17147_v48  ;;  %v17149_v2 = vld [vmem:[#allocation35_spill] sm:$0xff] }
 0x163   :  { %v10633_v15 = vpop.f32.mrf.mxu1  ;;  %10976 = vmatmul.mubr.msk.f32.gmra.mxu1 %vm33_vm1, %v13241_v23  ;;  %v1078_v19 = vpop.f32.mrf.mxu0 }
 0x164   :  { %v13826_v35 = vadd.f32 %v10633_v15, %v10535_v42  ;;  %10978 = vmatprep.mubr.msk.f32.mxu1 %vm33_vm1, %v13247_v38 }
 0x165   :  { %v1584_v10 = vpop.f32.mrf.mxu1  ;;  %v10541_v32 = vpop.f32.mrf.mxu0  ;;  %10887 = vmatmul.mubr.msk.f32.gmra.mxu0 %vm33_vm1, %v17148_v41  ;;  %v17154_v41 = vld [vmem:[#allocation41_spill] sm:$0xff] }
 0x166   :  { %v13832_v9 = vadd.f32 %v1584_v10, %v1068_v34  ;;  %10889 = vmatprep.mubr.msk.f32.mxu0 %vm33_vm1, %v17149_v2  ;;  %v17152_v10 = vld [vmem:[#allocation39_spill] sm:$0xff] }
 0x167   :  { %v10636_v48 = vpop.f32.mrf.mxu1  ;;  %10979 = vmatmul.mubr.msk.f32.gmra.mxu1 %vm33_vm1, %v13258_v49  ;;  %v1088_v23 = vpop.f32.mrf.mxu0 }
 0x168   :  { %v13838_v42 = vadd.f32 %v10636_v48, %v10538_v16  ;;  %10981 = vmatprep.mubr.msk.f32.mxu1 %vm33_vm1, %v13264_v40 }
 0x169   :  { %v1594_v15 = vpop.f32.mrf.mxu1  ;;  %v10544_v38 = vpop.f32.mrf.mxu0  ;;  %10890 = vmatmul.mubr.msk.f32.gmra.mxu0 %vm33_vm1, %v17150_v59 }
 0x16a   :  { %v13844_v34 = vadd.f32 %v1594_v15, %v1078_v19  ;;  %10892 = vmatprep.mubr.msk.f32.mxu0 %vm33_vm1, %v17152_v10  ;;  %v17156_v15 = vld [vmem:[#allocation42_spill] sm:$0xff]  ;;  %v2884_v10 = vrot.slane %v13382_v25, 1 }
 0x16b   :  { %v10639_v2 = vpop.f32.mrf.mxu1  ;;  %10982 = vmatmul.mubr.msk.f32.gmra.mxu1 %vm33_vm1, %v13275_v3  ;;  %v1098_v49 = vpop.f32.mrf.mxu0  ;;  %v2885_v3 = vrot.slane %v13399_v11, 1 }
 0x16c   :  { %17151 = vst [vmem:[#allocation10_spill] sm:$0xff] %v13844_v34  ;;  %v13850_v16 = vadd.f32 %v10639_v2, %v10541_v32  ;;  %10984 = vmatprep.mubr.msk.f32.mxu1 %vm33_vm1, %v13281_v45  ;;  %v322_v2 = vld [vmem:[#allocation2 + $0x190] sm:$0x3] }
 0x16d   :  { %v1604_v48 = vpop.f32.mrf.mxu1  ;;  %v10547_v40 = vpop.f32.mrf.mxu0  ;;  %10893 = vmatmul.mubr.msk.f32.gmra.mxu0 %vm33_vm1, %v17154_v41  ;;  %v17157_v41 = vld [vmem:[#allocation44_spill] sm:$0xff] }
 0x16e   :  { %17153 = vst [vmem:[#allocation137_spill] sm:$0xff] %v13850_v16  ;;  %v13856_v19 = vadd.f32 %v1604_v48, %v1088_v23  ;;  %10895 = vmatprep.mubr.msk.f32.mxu0 %vm33_vm1, %v17156_v15  ;;  %v2887_v16 = vrot.slane %v322_v2, 1 }
 0x16f   :  { %v10642_v59 = vpop.f32.mrf.mxu1  ;;  %10985 = vmatmul.mubr.msk.f32.gmra.mxu1 %vm33_vm1, %v13292_v4  ;;  %v1108_v32 = vpop.f32.mrf.mxu0  ;;  %v17162_v4 = vld [vmem:[#allocation33_spill] sm:$0xff] }
 0x170   :  { %17155 = vst [vmem:[#allocation138_spill] sm:$0xff] %v13856_v19  ;;  %v13864_v45 = vadd.f32 %v10642_v59, %v10544_v38  ;;  %10987 = vmatprep.mubr.msk.f32.mxu1 %vm33_vm1, %v13298_v29  ;;  %v17159_v19 = vld [vmem:[#allocation45_spill] sm:$0xff]  ;;  %v13877_v59 = vsel %vm477_vm3, %v2884_v10, %v2885_v3 }
 0x171   :  { %v1614_v23 = vpop.f32.mrf.mxu1  ;;  %v10550_v48 = vpop.f32.mrf.mxu0  ;;  %10896 = vmatmul.mubr.msk.f32.gmra.mxu0 %vm33_vm1, %v17157_v41  ;;  %17160 = vst [vmem:[#allocation140_spill] sm:$0xff] %v13877_v59 }
 0x172   :  { %v13870_v15 = vadd.f32 %v1614_v23, %v1098_v49  ;;  %10898 = vmatprep.mubr.msk.f32.mxu0 %vm33_vm1, %v17159_v19  ;;  %v17163_v23 = vld [vmem:[#allocation48_spill] sm:$0xff] }
 0x173   :  { %v10645_v34 = vpop.f32.mrf.mxu1  ;;  %10988 = vmatmul.mubr.msk.f32.gmra.mxu1 %vm33_vm1, %v13309_v6  ;;  %v1118_v38 = vpop.f32.mrf.mxu0  ;;  %v13890_v6 = vsel %vm477_vm3, %v2885_v3, %v2887_v16  ;;  %v17170_v16 = vld [vmem:[#allocation53_spill] sm:$0xff] }
 0x174   :  { %17158 = vst [vmem:[#allocation139_spill] sm:$0xff] %v13870_v15  ;;  %v13879_v29 = vadd.f32 %v10645_v34, %v10547_v40  ;;  %10990 = vmatprep.mubr.msk.f32.mxu1 %vm33_vm1, %v17162_v4  ;;  %17165 = vst [vmem:[#allocation143_spill] sm:$0xff] %v13890_v6  ;;  %v17166_v15 = vld [vmem:[#allocation36_spill] sm:$0xff]  ;;  %v17168_v4 = vld [vmem:[#allocation37_spill] sm:$0xff] }
 0x175   :  { %v1624_v41 = vpop.f32.mrf.mxu1  ;;  %v10553_v49 = vpop.f32.mrf.mxu0  ;;  %10899 = vmatmul.mubr.msk.f32.gmra.mxu0 %vm33_vm1, %v17163_v23  ;;  %v3356_v23 = vrot.slane %v13382_v25, 2  ;;  %v17173_v25 = vld [vmem:[#allocation43_spill] sm:$0xff] }
 0x176   :  { %17161 = vst [vmem:[#allocation141_spill] sm:$0xff] %v13879_v29  ;;  %v13885_v19 = vadd.f32 %v1624_v41, %v1108_v32  ;;  %10901 = vmatprep.mubr.msk.f32.mxu0 %vm33_vm1, %v13877_v59  ;;  %v3357_v41 = vrot.slane %v13399_v11, 2  ;;  %v3359_v11 = vrot.slane %v322_v2, 2  ;;  %v17174_v29 = vld [vmem:[#allocation58_spill] sm:$0xff] }
 0x177   :  { %v10648_v10 = vpop.f32.mrf.mxu1  ;;  %10991 = vmatmul.mubr.msk.f32.gmra.mxu1 %vm33_vm1, %v17166_v15  ;;  %v1128_v40 = vpop.f32.mrf.mxu0 }
 0x178   :  { %17164 = vst [vmem:[#allocation142_spill] sm:$0xff] %v13885_v19  ;;  %v13894_v34 = vadd.f32 %v10648_v10, %v10550_v48  ;;  %10993 = vmatprep.mubr.msk.f32.mxu1 %vm33_vm1, %v17168_v4  ;;  %v17171_v48 = vld [vmem:[#allocation40_spill] sm:$0xff] }
 0x179   :  { %v1634_v32 = vpop.f32.mrf.mxu1  ;;  %v10556_v19 = vpop.f32.mrf.mxu0  ;;  %10902 = vmatmul.mubr.msk.f32.gmra.mxu0 %vm33_vm1, %v13890_v6 }
 0x17a   :  { %17167 = vst [vmem:[#allocation144_spill] sm:$0xff] %v13894_v34  ;;  %v13902_v3 = vadd.f32 %v1634_v32, %v1118_v38  ;;  %10904 = vmatprep.mubr.msk.f32.mxu0 %vm33_vm1, %v17170_v16  ;;  %v13915_v38 = vsel %vm1673_vm4, %v3356_v23, %v3357_v41  ;;  %v17176_v16 = vld [vmem:[#allocation57_spill] sm:$0xff] }
 0x17b   :  { %v10651_v15 = vpop.f32.mrf.mxu1  ;;  %10994 = vmatmul.mubr.msk.f32.gmra.mxu1 %vm33_vm1, %v17171_v48  ;;  %v1138_v10 = vpop.f32.mrf.mxu0  ;;  %17175 = vst [vmem:[#allocation58_spill] sm:$0xff] %v13915_v38  ;;  %v17177_v48 = vld [vmem:[#allocation59_spill] sm:$0xff] }
 0x17c   :  { %17169 = vst [vmem:[#allocation145_spill] sm:$0xff] %v13902_v3  ;;  %v13908_v4 = vadd.f32 %v10651_v15, %v10553_v49  ;;  %10996 = vmatprep.mubr.msk.f32.mxu1 %vm33_vm1, %v17173_v25  ;;  %v17178_v49 = vld [vmem:[#allocation127_spill] sm:$0xff] }
 0x17d   :  { %v1644_v59 = vpop.f32.mrf.mxu1  ;;  %v10662_v34 = vpop.f32.mrf.mxu0  ;;  %10905 = vmatmul.mubr.msk.f32.gmra.mxu0 %vm33_vm1, %v17174_v29  ;;  %v13930_v29 = vsel %vm1673_vm4, %v3357_v41, %v3359_v11  ;;  %v17187_v41 = vld [vmem:[#allocation66_spill] sm:$0xff] }
 0x17e   :  { %17172 = vst [vmem:[#allocation53_spill] sm:$0xff] %v13908_v4  ;;  %v13917_v32 = vadd.f32 %v1644_v59, %v1128_v40  ;;  %v2353_v6 = vadd.f32 %v10662_v34, %v17176_v16  ;;  %10907 = vmatprep.mubr.msk.f32.mxu0 %vm33_vm1, %v17177_v48  ;;  %v17180_v4 = vld [vmem:[#allocation60_spill] sm:$0xff]  ;;  %v17182_v40 = vld [vmem:[#allocation63_spill] sm:$0xff]  ;;  %v17184_v16 = vld [vmem:[#allocation65_spill] sm:$0xff] }
 0x17f   :  { %v10654_v15 = vpop.f32.mrf.mxu1  ;;  %10997 = vmatmul.mubr.msk.f32.gmra.mxu1 %vm33_vm1, %v17178_v49  ;;  %v2033_v2 = vpop.f32.mrf.mxu0  ;;  %17181 = vst [vmem:[#allocation60_spill] sm:$0xff] %v13930_v29  ;;  %v17185_v48 = vld [vmem:[#allocation64_spill] sm:$0xff] }
 0x180   :  { %v13924_v25 = vadd.f32 %v10654_v15, %v10556_v19  ;;  %v2352_v3 = vadd.f32 %v2033_v2, %v17180_v4  ;;  %10999 = vmatprep.mubr.msk.f32.mxu1 %vm33_vm1, %v13915_v38  ;;  %v17188_v15 = vld [vmem:[#allocation46_spill] sm:$0xff]  ;;  %v17192_v38 = vld [vmem:[#allocation69_spill] sm:$0xff] }
 0x181   :  { %v1654_v59 = vpop.f32.mrf.mxu1  ;;  %v10665_v23 = vpop.f32.mrf.mxu0  ;;  %10908 = vmatmul.mubr.msk.f32.gmra.mxu0 %vm33_vm1, %v17182_v40  ;;  %v17193_v40 = vld [vmem:[#allocation47_spill] sm:$0xff] }
 0x182   :  { %17179 = vst [vmem:[#allocation57_spill] sm:$0xff] %v13924_v25  ;;  %v13934_v34 = vadd.f32 %v1654_v59, %v1138_v10  ;;  %v2355_v49 = vadd.f32 %v10665_v23, %v17184_v16  ;;  %10910 = vmatprep.mubr.msk.f32.mxu0 %vm33_vm1, %v17185_v48  ;;  %v17190_v59 = vld [vmem:[#allocation68_spill] sm:$0xff]  ;;  %v17191_v23 = vld [vmem:[#allocation71_spill] sm:$0xff]  ;;  %v17200_v25 = vld [vmem:[#allocation74_spill] sm:$0xff] }
 0x183   :  { %v13939_v19 = vpop.f32.mrf.mxu1  ;;  %11000 = vmatmul.mubr.msk.f32.gmra.mxu1 %vm33_vm1, %v13930_v29  ;;  %v2043_v4 = vpop.f32.mrf.mxu0 }
 0x184   :  { %17183 = vst [vmem:[#allocation146_spill] sm:$0xff] %v13934_v34  ;;  %17186 = vst [vmem:[#allocation65_spill] sm:$0xff] %v13939_v19  ;;  %v2354_v11 = vadd.f32 %v2043_v4, %v17187_v41  ;;  %11002 = vmatprep.mubr.msk.f32.mxu1 %vm33_vm1, %v17188_v15  ;;  %v17195_v41 = vld [vmem:[#allocation72_spill] sm:$0xff] }
 0x185   :  { %v13946_v2 = vpop.f32.mrf.mxu1  ;;  %v10668_v10 = vpop.f32.mrf.mxu0  ;;  %10911 = vmatmul.mubr.msk.f32.gmra.mxu0 %vm33_vm1, %v17190_v59  ;;  %v17196_v34 = vld [vmem:[#allocation52_spill] sm:$0xff]  ;;  %v17197_v59 = vld [vmem:[#allocation73_spill] sm:$0xff] }
 0x186   :  { %17189 = vst [vmem:[#allocation66_spill] sm:$0xff] %v13946_v2  ;;  %v2357_v16 = vadd.f32 %v10668_v10, %v17191_v23  ;;  %10913 = vmatprep.mubr.msk.f32.mxu0 %vm33_vm1, %v17192_v38  ;;  %v17199_v23 = vld [vmem:[#allocation77_spill] sm:$0xff] }
 0x187   :  { %v10760_v48 = vpop.f32.mrf.mxu1  ;;  %11003 = vmatmul.mubr.msk.f32.gmra.mxu1 %vm33_vm1, %v17193_v40  ;;  %v2053_v29 = vpop.f32.mrf.mxu0 }
 0x188   :  { %v13955_v4 = vadd.f32 %v10760_v48, %v2353_v6  ;;  %v2356_v15 = vadd.f32 %v2053_v29, %v17195_v41  ;;  %11005 = vmatprep.mubr.msk.f32.mxu1 %vm33_vm1, %v17196_v34  ;;  %v17201_v6 = vld [vmem:[#allocation49_spill] sm:$0xff]  ;;  %v17202_v41 = vld [vmem:[#allocation80_spill] sm:$0xff] }
 0x189   :  { %v2499_v2 = vpop.f32.mrf.mxu1  ;;  %v10671_v19 = vpop.f32.mrf.mxu0  ;;  %10914 = vmatmul.mubr.msk.f32.gmra.mxu0 %vm33_vm1, %v17197_v59 }
 0x18a   :  { %17194 = vst [vmem:[#allocation46_spill] sm:$0xff] %v13955_v4  ;;  %v13962_v10 = vadd.f32 %v2499_v2, %v2352_v3  ;;  %v2359_v38 = vadd.f32 %v10671_v19, %v17199_v23  ;;  %10916 = vmatprep.mubr.msk.f32.mxu0 %vm33_vm1, %v17200_v25  ;;  %v17203_v4 = vld [vmem:[#allocation51_spill] sm:$0xff]  ;;  %v17204_v2 = vld [vmem:[#allocation78_spill] sm:$0xff]  ;;  %v17205_v23 = vld [vmem:[#allocation85_spill] sm:$0xff] }
 0x18b   :  { %v10763_v40 = vpop.f32.mrf.mxu1  ;;  %11006 = vmatmul.mubr.msk.f32.gmra.mxu1 %vm33_vm1, %v17201_v6  ;;  %v2063_v48 = vpop.f32.mrf.mxu0 }
 0x18c   :  { %17198 = vst [vmem:[#allocation71_spill] sm:$0xff] %v13962_v10  ;;  %v13969_v29 = vadd.f32 %v10763_v40, %v2355_v49  ;;  %v2358_v34 = vadd.f32 %v2063_v48, %v17202_v41  ;;  %11008 = vmatprep.mubr.msk.f32.mxu1 %vm33_vm1, %v17203_v4  ;;  %v17206_v10 = vld [vmem:[#allocation79_spill] sm:$0xff]  ;;  %v17207_v49 = vld [vmem:[#allocation54_spill] sm:$0xff]  ;;  %v17208_v4 = vld [vmem:[#allocation56_spill] sm:$0xff] }
 0x18d   :  { %v2509_v59 = vpop.f32.mrf.mxu1  ;;  %v10674_v3 = vpop.f32.mrf.mxu0  ;;  %10917 = vmatmul.mubr.msk.f32.gmra.mxu0 %vm33_vm1, %v17204_v2 }
 0x18e   :  { %v13976_v19 = vadd.f32 %v2509_v59, %v2354_v11  ;;  %v2361_v25 = vadd.f32 %v10674_v3, %v17205_v23  ;;  %10919 = vmatprep.mubr.msk.f32.mxu0 %vm33_vm1, %v17206_v10  ;;  %v17209_v59 = vld [vmem:[#allocation83_spill] sm:$0xff]  ;;  %v17210_v10 = vld [vmem:[#allocation84_spill] sm:$0xff] }
 0x18f   :  { %v10766_v6 = vpop.f32.mrf.mxu1  ;;  %11009 = vmatmul.mubr.msk.f32.gmra.mxu1 %vm33_vm1, %v17207_v49  ;;  %v2073_v40 = vpop.f32.mrf.mxu0 }
 0x190   :  { %v13983_v48 = vadd.f32 %v10766_v6, %v2357_v16  ;;  %v2360_v41 = vadd.f32 %v2073_v40, %v13528_v21  ;;  %11011 = vmatprep.mubr.msk.f32.mxu1 %vm33_vm1, %v17208_v4  ;;  %v17211_v16 = vld [vmem:[#allocation61_spill] sm:$0xff]  ;;  %v17212_v4 = vld [vmem:[#allocation62_spill] sm:$0xff] }
 0x191   :  { %v2519_v2 = vpop.f32.mrf.mxu1  ;;  %v10677_v11 = vpop.f32.mrf.mxu0  ;;  %10920 = vmatmul.mubr.msk.f32.gmra.mxu0 %vm33_vm1, %v17209_v59 }
 0x192   :  { %v13990_v3 = vadd.f32 %v2519_v2, %v2356_v15  ;;  %v2363_v23 = vadd.f32 %v10677_v11, %v13542_v30  ;;  %10922 = vmatprep.mubr.msk.f32.mxu0 %vm33_vm1, %v17210_v10  ;;  %v17213_v2 = vld [vmem:[#allocation88_spill] sm:$0xff]  ;;  %v17214_v10 = vld [vmem:[#allocation89_spill] sm:$0xff] }
 0x193   :  { %v10769_v49 = vpop.f32.mrf.mxu1  ;;  %11012 = vmatmul.mubr.msk.f32.gmra.mxu1 %vm33_vm1, %v17211_v16  ;;  %v2083_v21 = vpop.f32.mrf.mxu0 }
 0x194   :  { %v13997_v6 = vadd.f32 %v10769_v49, %v2359_v38  ;;  %v2362_v40 = vadd.f32 %v2083_v21, %v13549_v14  ;;  %11014 = vmatprep.mubr.msk.f32.mxu1 %vm33_vm1, %v17212_v4  ;;  %v17215_v38 = vld [vmem:[#allocation67_spill] sm:$0xff]  ;;  %v17216_v4 = vld [vmem:[#allocation70_spill] sm:$0xff] }
 0x195   :  { %v2529_v59 = vpop.f32.mrf.mxu1  ;;  %v10680_v15 = vpop.f32.mrf.mxu0  ;;  %10923 = vmatmul.mubr.msk.f32.gmra.mxu0 %vm33_vm1, %v17213_v2 }
 0x196   :  { %v14004_v30 = vadd.f32 %v2529_v59, %v2358_v34  ;;  %v2365_v11 = vadd.f32 %v10680_v15, %v13563_v24  ;;  %10925 = vmatprep.mubr.msk.f32.mxu0 %vm33_vm1, %v17214_v10  ;;  %v17217_v59 = vld [vmem:[#allocation92_spill] sm:$0xff]  ;;  %v17218_v10 = vld [vmem:[#allocation93_spill] sm:$0xff] }
 0x197   :  { %v10772_v16 = vpop.f32.mrf.mxu1  ;;  %11015 = vmatmul.mubr.msk.f32.gmra.mxu1 %vm33_vm1, %v17215_v38  ;;  %v2093_v14 = vpop.f32.mrf.mxu0 }
 0x198   :  { %v14011_v49 = vadd.f32 %v10772_v16, %v2361_v25  ;;  %v2364_v21 = vadd.f32 %v2093_v14, %v13570_v0  ;;  %11017 = vmatprep.mubr.msk.f32.mxu1 %vm33_vm1, %v17216_v4  ;;  %v17219_v25 = vld [vmem:[#allocation75_spill] sm:$0xff]  ;;  %v17220_v4 = vld [vmem:[#allocation76_spill] sm:$0xff] }
 0x199   :  { %v2539_v2 = vpop.f32.mrf.mxu1  ;;  %v10683_v34 = vpop.f32.mrf.mxu0  ;;  %10926 = vmatmul.mubr.msk.f32.gmra.mxu0 %vm33_vm1, %v17217_v59 }
 0x19a   :  { %v14018_v24 = vadd.f32 %v2539_v2, %v2360_v41  ;;  %v2367_v15 = vadd.f32 %v10683_v34, %v13584_v5  ;;  %10928 = vmatprep.mubr.msk.f32.mxu0 %vm33_vm1, %v17218_v10  ;;  %v17221_v2 = vld [vmem:[#allocation95_spill] sm:$0xff]  ;;  %v17222_v10 = vld [vmem:[#allocation96_spill] sm:$0xff] }
 0x19b   :  { %v10775_v38 = vpop.f32.mrf.mxu1  ;;  %11018 = vmatmul.mubr.msk.f32.gmra.mxu1 %vm33_vm1, %v17219_v25  ;;  %v2103_v0 = vpop.f32.mrf.mxu0 }
 0x19c   :  { %v14025_v16 = vadd.f32 %v10775_v38, %v2363_v23  ;;  %v2366_v14 = vadd.f32 %v2103_v0, %v13591_v43  ;;  %11020 = vmatprep.mubr.msk.f32.mxu1 %vm33_vm1, %v17220_v4  ;;  %v17223_v23 = vld [vmem:[#allocation81_spill] sm:$0xff]  ;;  %v17224_v4 = vld [vmem:[#allocation82_spill] sm:$0xff] }
 0x19d   :  { %v2549_v59 = vpop.f32.mrf.mxu1  ;;  %v10686_v41 = vpop.f32.mrf.mxu0  ;;  %10929 = vmatmul.mubr.msk.f32.gmra.mxu0 %vm33_vm1, %v17221_v2 }
 0x19e   :  { %v14032_v5 = vadd.f32 %v2549_v59, %v2362_v40  ;;  %v2369_v34 = vadd.f32 %v10686_v41, %v13605_v61  ;;  %10931 = vmatprep.mubr.msk.f32.mxu0 %vm33_vm1, %v17222_v10  ;;  %v17225_v59 = vld [vmem:[#allocation98_spill] sm:$0xff]  ;;  %v17227_v10 = vld [vmem:[#allocation99_spill] sm:$0xff] }
 0x19f   :  { %v10778_v25 = vpop.f32.mrf.mxu1  ;;  %11021 = vmatmul.mubr.msk.f32.gmra.mxu1 %vm33_vm1, %v17223_v23  ;;  %v2113_v43 = vpop.f32.mrf.mxu0 }
 0x1a0   :  { %v14039_v38 = vadd.f32 %v10778_v25, %v2365_v11  ;;  %v2368_v0 = vadd.f32 %v2113_v43, %v13612_v52  ;;  %11023 = vmatprep.mubr.msk.f32.mxu1 %vm33_vm1, %v17224_v4  ;;  %v17228_v11 = vld [vmem:[#allocation86_spill] sm:$0xff]  ;;  %v17229_v4 = vld [vmem:[#allocation87_spill] sm:$0xff] }
 0x1a1   :  { %v2559_v2 = vpop.f32.mrf.mxu1  ;;  %v10689_v40 = vpop.f32.mrf.mxu0  ;;  %10932 = vmatmul.mubr.msk.f32.gmra.mxu0 %vm33_vm1, %v17225_v59 }
 0x1a2   :  { %v14046_v61 = vadd.f32 %v2559_v2, %v2364_v21  ;;  %v2371_v41 = vadd.f32 %v10689_v40, %v13626_v33  ;;  %10934 = vmatprep.mubr.msk.f32.mxu0 %vm33_vm1, %v17227_v10  ;;  %v17230_v2 = vld [vmem:[#allocation101_spill] sm:$0xff] }
 0x1a3   :  { %v10781_v23 = vpop.f32.mrf.mxu1  ;;  %11024 = vmatmul.mubr.msk.f32.gmra.mxu1 %vm33_vm1, %v17228_v11  ;;  %v2123_v52 = vpop.f32.mrf.mxu0  ;;  %v17231_v40 = vld [vmem:[#allocation133_spill] sm:$0xff] }
 0x1a4   :  { %17226 = vst [vmem:[#allocation47_spill] sm:$0xff] %v14046_v61  ;;  %v14053_v25 = vadd.f32 %v10781_v23, %v2367_v15  ;;  %v2370_v43 = vadd.f32 %v2123_v52, %v13633_v55  ;;  %11026 = vmatprep.mubr.msk.f32.mxu1 %vm33_vm1, %v17229_v4  ;;  %v17232_v61 = vld [vmem:[#allocation102_spill] sm:$0xff]  ;;  %v17234_v4 = vld [vmem:[#allocation91_spill] sm:$0xff] }
 0x1a5   :  { %v2569_v59 = vpop.f32.mrf.mxu1  ;;  %v10692_v21 = vpop.f32.mrf.mxu0  ;;  %10935 = vmatmul.mubr.msk.f32.gmra.mxu0 %vm33_vm1, %v17230_v2  ;;  %v17233_v15 = vld [vmem:[#allocation90_spill] sm:$0xff] }
 0x1a6   :  { %v14060_v33 = vadd.f32 %v2569_v59, %v2366_v14  ;;  %v2373_v10 = vadd.f32 %v10692_v21, %v17231_v40  ;;  %10937 = vmatprep.mubr.msk.f32.mxu0 %vm33_vm1, %v17232_v61  ;;  %v17235_v59 = vld [vmem:[#allocation103_spill] sm:$0xff]  ;;  %v17236_v61 = vld [vmem:[#allocation104_spill] sm:$0xff] }
 0x1a7   :  { %v10784_v11 = vpop.f32.mrf.mxu1  ;;  %11027 = vmatmul.mubr.msk.f32.gmra.mxu1 %vm33_vm1, %v17233_v15  ;;  %v2133_v55 = vpop.f32.mrf.mxu0 }
 0x1a8   :  { %v14067_v23 = vadd.f32 %v10784_v11, %v2369_v34  ;;  %v2372_v52 = vadd.f32 %v2133_v55, %v13651_v46  ;;  %11029 = vmatprep.mubr.msk.f32.mxu1 %vm33_vm1, %v17234_v4  ;;  %v17237_v34 = vld [vmem:[#allocation94_spill] sm:$0xff]  ;;  %v17239_v4 = vld [vmem:[#allocation97_spill] sm:$0xff] }
 0x1a9   :  { %v2579_v2 = vpop.f32.mrf.mxu1  ;;  %v10695_v14 = vpop.f32.mrf.mxu0  ;;  %10938 = vmatmul.mubr.msk.f32.gmra.mxu0 %vm33_vm1, %v17235_v59 }
 0x1aa   :  { %v14074_v21 = vadd.f32 %v2579_v2, %v2368_v0  ;;  %v2375_v40 = vadd.f32 %v10695_v14, %v13663_v58  ;;  %10940 = vmatprep.mubr.msk.f32.mxu0 %vm33_vm1, %v17236_v61  ;;  %v17240_v2 = vld [vmem:[#allocation105_spill] sm:$0xff]  ;;  %v17242_v61 = vld [vmem:[#allocation106_spill] sm:$0xff] }
 0x1ab   :  { %v10787_v15 = vpop.f32.mrf.mxu1  ;;  %11030 = vmatmul.mubr.msk.f32.gmra.mxu1 %vm33_vm1, %v17237_v34  ;;  %v2143_v46 = vpop.f32.mrf.mxu0  ;;  %v17243_v34 = vld [vmem:[#allocation100_spill] sm:$0xff] }
 0x1ac   :  { %v14081_v11 = vadd.f32 %v10787_v15, %v2371_v41  ;;  %v2374_v55 = vadd.f32 %v2143_v46, %v13669_v50  ;;  %11032 = vmatprep.mubr.msk.f32.mxu1 %vm33_vm1, %v17239_v4  ;;  %v2889_v41 = vrot.slane %v13698_v7, 1  ;;  %v2890_v46 = vrot.slane %v13719_v47, 1  ;;  %v14097_v4 = vld [vmem:[#allocation2 + $0x340] sm:$0x3] }
 0x1ad   :  { %v2589_v59 = vpop.f32.mrf.mxu1  ;;  %v10698_v0 = vpop.f32.mrf.mxu0  ;;  %10941 = vmatmul.mubr.msk.f32.gmra.mxu0 %vm33_vm1, %v17240_v2 }
 0x1ae   :  { %17238 = vst [vmem:[#allocation72_spill] sm:$0xff] %v14081_v11  ;;  %v14088_v58 = vadd.f32 %v2589_v59, %v2370_v43  ;;  %v2377_v14 = vadd.f32 %v10698_v0, %v13678_v56  ;;  %10943 = vmatprep.mubr.msk.f32.mxu0 %vm33_vm1, %v17242_v61  ;;  %v17245_v59 = vld [vmem:[#allocation128_spill] sm:$0xff]  ;;  %v17246_v61 = vld [vmem:[#allocation107_spill] sm:$0xff] }
 0x1af   :  { %v10790_v15 = vpop.f32.mrf.mxu1  ;;  %11033 = vmatmul.mubr.msk.f32.gmra.mxu1 %vm33_vm1, %v17243_v34  ;;  %v2153_v50 = vpop.f32.mrf.mxu0 }
 0x1b0   :  { %17241 = vst [vmem:[#allocation77_spill] sm:$0xff] %v14088_v58  ;;  %v14099_v11 = vadd.f32 %v10790_v15, %v2373_v10  ;;  %v2376_v43 = vadd.f32 %v2153_v50, %v13684_v18  ;;  %11035 = vmatprep.mubr.msk.f32.mxu1 %vm33_vm1, %v17245_v59  ;;  %v17247_v58 = vld [vmem:[#allocation7_spill] sm:$0xff]  ;;  %v2892_v10 = vrot.slane %v14097_v4, 1  ;;  %v14115_v50 = vsel %vm477_vm3, %v2889_v41, %v2890_v46 }
 0x1b1   :  { %v2599_v56 = vpop.f32.mrf.mxu1  ;;  %v10701_v0 = vpop.f32.mrf.mxu0  ;;  %10944 = vmatmul.mubr.msk.f32.gmra.mxu0 %vm33_vm1, %v17246_v61 }
 0x1b2   :  { %17244 = vst [vmem:[#allocation80_spill] sm:$0xff] %v14099_v11  ;;  %v14106_v2 = vadd.f32 %v2599_v56, %v2372_v52  ;;  %v2379_v34 = vadd.f32 %v10701_v0, %v13690_v27  ;;  %10946 = vmatprep.mubr.msk.f32.mxu0 %vm33_vm1, %v17247_v58  ;;  %v17248_v11 = vld [vmem:[#allocation129_spill] sm:$0xff]  ;;  %v17249_v56 = vld [vmem:[#allocation130_spill] sm:$0xff]  ;;  %v17250_v58 = vld [vmem:[#allocation8_spill] sm:$0xff] }
 0x1b3   :  { %v10793_v15 = vpop.f32.mrf.mxu1  ;;  %11036 = vmatmul.mubr.msk.f32.gmra.mxu1 %vm33_vm1, %v17248_v11  ;;  %v2163_v18 = vpop.f32.mrf.mxu0 }
 0x1b4   :  { %v14117_v59 = vadd.f32 %v10793_v15, %v2375_v40  ;;  %v2378_v52 = vadd.f32 %v2163_v18, %v13701_v22  ;;  %11038 = vmatprep.mubr.msk.f32.mxu1 %vm33_vm1, %v17249_v56  ;;  %v14130_v40 = vsel %vm477_vm3, %v2890_v46, %v2892_v10  ;;  %v3362_v46 = vrot.slane %v13719_v47, 2  ;;  %v17285_v56 = vld [vmem:[#allocation30_spill] sm:$0xff] }
 0x1b5   :  { %v2609_v27 = vpop.f32.mrf.mxu1  ;;  %v10704_v0 = vpop.f32.mrf.mxu0  ;;  %10947 = vmatmul.mubr.msk.f32.gmra.mxu0 %vm33_vm1, %v17250_v58  ;;  %v3364_v47 = vrot.slane %v14097_v4, 2  ;;  %v17255_v4 = vld [vmem:[#allocation136_spill] sm:$0xff] }
 0x1b6   :  { %v14124_v61 = vadd.f32 %v2609_v27, %v2374_v55  ;;  %v2381_v11 = vadd.f32 %v10704_v0, %v13715_v44  ;;  %10949 = vmatprep.mubr.msk.f32.mxu0 %vm33_vm1, %v14115_v50  ;;  %v3361_v44 = vrot.slane %v13698_v7, 2 }
 0x1b7   :  { %v10796_v41 = vpop.f32.mrf.mxu1  ;;  %11039 = vmatmul.mubr.msk.f32.gmra.mxu1 %vm33_vm1, %v13638_v12  ;;  %v2173_v22 = vpop.f32.mrf.mxu0  ;;  %v17252_v12 = vld [vmem:[#allocation135_spill] sm:$0xff] }
 0x1b8   :  { %v14134_v15 = vadd.f32 %v10796_v41, %v2377_v14  ;;  %v2380_v18 = vadd.f32 %v2173_v22, %v13723_v57  ;;  %11041 = vmatprep.mubr.msk.f32.mxu1 %vm33_vm1, %v13643_v62  ;;  %v11709_v14 = vld [vmem:[#allocation2 + $0x30] sm:$0xff]  ;;  %v17251_v41 = vld [vmem:[#allocation134_spill] sm:$0xff] }
 0x1b9   :  { %v2619_v55 = vpop.f32.mrf.mxu1  ;;  %v10707_v27 = vpop.f32.mrf.mxu0  ;;  %10950 = vmatmul.mubr.msk.f32.gmra.mxu0 %vm33_vm1, %v14130_v40 }
 0x1ba   :  { %v14143_v10 = vadd.f32 %v2619_v55, %v2376_v43  ;;  %v2383_v0 = vadd.f32 %v10707_v27, %v13729_v20  ;;  %11052 = vmatprep.mubr.msk.f32.mxu0 %vm33_vm1, %v11709_v14  ;;  %v11710_v20 = vld [vmem:[#allocation2 + $0x38] sm:$0xff]  ;;  %v14157_v27 = vsel %vm1673_vm4, %v3361_v44, %v3362_v46 }
 0x1bb   :  { %v10799_v57 = vpop.f32.mrf.mxu1  ;;  %11042 = vmatmul.mubr.msk.f32.gmra.mxu1 %vm33_vm1, %v17251_v41  ;;  %v2183_v22 = vpop.f32.mrf.mxu0  ;;  %17253 = vst [vmem:[#allocation85_spill] sm:$0xff] %v14157_v27 }
 0x1bc   :  { %v14149_v7 = vadd.f32 %v10799_v57, %v2379_v34  ;;  %v2382_v62 = vadd.f32 %v2183_v22, %v13735_v36  ;;  %11044 = vmatprep.mubr.msk.f32.mxu1 %vm33_vm1, %v17252_v12  ;;  %v17254_v57 = vld [vmem:[#allocation9_spill] sm:$0xff]  ;;  %v11711_v36 = vld [vmem:[#allocation2 + $0x48] sm:$0xff] }
 0x1bd   :  { %v2629_v43 = vpop.f32.mrf.mxu1  ;;  %v10710_v55 = vpop.f32.mrf.mxu0  ;;  %11053 = vmatmul.mubr.msk.f32.vlgmr.msra.gmra.mxu0 %vm33_vm1, %v11710_v20 }
 0x1be   :  { %v14159_v14 = vadd.f32 %v2629_v43, %v2378_v52  ;;  %v2385_v34 = vadd.f32 %v10710_v55, %v13741_v31  ;;  %11247 = vmatpush3.msk.msra.mxu0 %vm768_vm0, %v17254_v57  ;;  %11055 = vmatprep.mubr.msk.f32.mxu0 %vm33_vm1, %v11711_v36  ;;  %v14173_v31 = vsel %vm1673_vm4, %v3362_v46, %v3364_v47  ;;  %v11712_v55 = vld [vmem:[#allocation2 + $0x50] sm:$0xff]  ;;  %v11713_v36 = vld [vmem:[#allocation2 + $0x60] sm:$0xff] }
 0x1bf   :  { %v10802_v22 = vpop.f32.mrf.mxu1  ;;  %11045 = vmatmul.mubr.msk.f32.gmra.mxu1 %vm33_vm1, %v17255_v4  ;;  %v2193_v12 = vpop.f32.mrf.mxu0  ;;  %17256 = vst [vmem:[#allocation133_spill] sm:$0xff] %v14173_v31  ;;  %v17257_v47 = vld [vmem:[#allocation11_spill] sm:$0xff] }
 0x1c0   :  { %v14167_v41 = vadd.f32 %v10802_v22, %v2381_v11  ;;  %v2384_v44 = vadd.f32 %v2193_v12, %v13748_v53  ;;  %11047 = vmatprep.mubr.msk.f32.mxu1 %vm33_vm1, %v14157_v27  ;;  %v11729_v27 = vld [vmem:[#allocation2 + $0x120] sm:$0xff] }
 0x1c1   :  { %v2639_v52 = vpop.f32.mrf.mxu1  ;;  %v10713_v43 = vpop.f32.mrf.mxu0  ;;  %11056 = vmatmul.mubr.msk.f32.gmra.mxu0 %vm33_vm1, %v11712_v55  ;;  %v11715_v55 = vld [vmem:[#allocation2 + $0x78] sm:$0xff]  ;;  %v17280_v4 = vld [vmem:[#allocation27_spill] sm:$0xff] }
 0x1c2   :  { %v14176_v20 = vadd.f32 %v2639_v52, %v2380_v18  ;;  %v2387_v57 = vadd.f32 %v10713_v43, %v13754_v1  ;;  %11058 = vmatprep.mubr.msk.f32.mxu0 %vm33_vm1, %v11713_v36  ;;  %v11714_v52 = vld [vmem:[#allocation2 + $0x68] sm:$0xff] }
 0x1c3   :  { %v10805_v11 = vpop.f32.mrf.mxu1  ;;  %11048 = vmatmul.mubr.msk.f32.gmra.mxu1 %vm33_vm1, %v14173_v31  ;;  %v2203_v12 = vpop.f32.mrf.mxu0  ;;  %v17274_v31 = vld [vmem:[#allocation25_spill] sm:$0xff] }
 0x1c4   :  { %v14182_v53 = vadd.f32 %v10805_v11, %v2383_v0  ;;  %v2386_v46 = vadd.f32 %v2203_v12, %v13760_v17  ;;  %11150 = vmatprep.mubr.msk.f32.mxu1 %vm33_vm1, %v17257_v47  ;;  %v17258_v0 = vld [vmem:[#allocation12_spill] sm:$0xff]  ;;  %v17259_v47 = vld [vmem:[#allocation13_spill] sm:$0xff] }
 0x1c5   :  { %v2649_v22 = vpop.f32.mrf.mxu1  ;;  %v10716_v18 = vpop.f32.mrf.mxu0  ;;  %11059 = vmatmul.mubr.msk.f32.gmra.mxu0 %vm33_vm1, %v11714_v52 }
 0x1c6   :  { %v14188_v1 = vadd.f32 %v2649_v22, %v2382_v62  ;;  %v2389_v43 = vadd.f32 %v10716_v18, %v13766_v8  ;;  %11061 = vmatprep.mubr.msk.f32.mxu0 %vm33_vm1, %v11715_v55  ;;  %v11716_v22 = vld [vmem:[#allocation2 + $0x80] sm:$0xff]  ;;  %v11717_v55 = vld [vmem:[#allocation2 + $0x90] sm:$0xff] }
 0x1c7   :  { %v10808_v36 = vpop.f32.mrf.mxu1  ;;  %11151 = vmatmul.mubr.msk.f32.vlgmr.msra.gmra.mxu1 %vm33_vm1, %v17258_v0  ;;  %v2213_v17 = vpop.f32.mrf.mxu0 }
 0x1c8   :  { %v14194_v11 = vadd.f32 %v10808_v36, %v2385_v34  ;;  %v2388_v12 = vadd.f32 %v2213_v17, %v13772_v63  ;;  %11153 = vmatprep.mubr.msk.f32.mxu1 %vm33_vm1, %v17259_v47  ;;  %v17260_v34 = vld [vmem:[#allocation14_spill] sm:$0xff]  ;;  %v17261_v47 = vld [vmem:[#allocation15_spill] sm:$0xff] }
 0x1c9   :  { %v2659_v52 = vpop.f32.mrf.mxu1  ;;  %v10719_v62 = vpop.f32.mrf.mxu0  ;;  %11062 = vmatmul.mubr.msk.f32.gmra.mxu0 %vm33_vm1, %v11716_v22 }
 0x1ca   :  { %v14200_v8 = vadd.f32 %v2659_v52, %v2384_v44  ;;  %v2391_v18 = vadd.f32 %v10719_v62, %v13778_v13  ;;  %11064 = vmatprep.mubr.msk.f32.mxu0 %vm33_vm1, %v11717_v55  ;;  %v11718_v52 = vld [vmem:[#allocation2 + $0x98] sm:$0xff]  ;;  %v11719_v55 = vld [vmem:[#allocation2 + $0xa8] sm:$0xff] }
 0x1cb   :  { %v10811_v0 = vpop.f32.mrf.mxu1  ;;  %11154 = vmatmul.mubr.msk.f32.gmra.mxu1 %vm33_vm1, %v17260_v34  ;;  %v2223_v63 = vpop.f32.mrf.mxu0 }
 0x1cc   :  { %v14206_v36 = vadd.f32 %v10811_v0, %v2387_v57  ;;  %v2390_v17 = vadd.f32 %v2223_v63, %v13784_v37  ;;  %11156 = vmatprep.mubr.msk.f32.mxu1 %vm33_vm1, %v17261_v47  ;;  %v17262_v57 = vld [vmem:[#allocation16_spill] sm:$0xff]  ;;  %v17263_v47 = vld [vmem:[#allocation17_spill] sm:$0xff] }
 0x1cd   :  { %v2669_v22 = vpop.f32.mrf.mxu1  ;;  %v10722_v44 = vpop.f32.mrf.mxu0  ;;  %11065 = vmatmul.mubr.msk.f32.gmra.mxu0 %vm33_vm1, %v11718_v52 }
 0x1ce   :  { %v14212_v13 = vadd.f32 %v2669_v22, %v2386_v46  ;;  %v2393_v62 = vadd.f32 %v10722_v44, %v13790_v28  ;;  %11067 = vmatprep.mubr.msk.f32.mxu0 %vm33_vm1, %v11719_v55  ;;  %v11720_v22 = vld [vmem:[#allocation2 + $0xb0] sm:$0xff]  ;;  %v11721_v55 = vld [vmem:[#allocation2 + $0xc0] sm:$0xff] }
 0x1cf   :  { %v10814_v34 = vpop.f32.mrf.mxu1  ;;  %11157 = vmatmul.mubr.msk.f32.gmra.mxu1 %vm33_vm1, %v17262_v57  ;;  %v2233_v37 = vpop.f32.mrf.mxu0 }
 0x1d0   :  { %v14218_v0 = vadd.f32 %v10814_v34, %v2389_v43  ;;  %v2392_v63 = vadd.f32 %v2233_v37, %v13796_v51  ;;  %11159 = vmatprep.mubr.msk.f32.mxu1 %vm33_vm1, %v17263_v47  ;;  %v17264_v43 = vld [vmem:[#allocation18_spill] sm:$0xff]  ;;  %v17265_v47 = vld [vmem:[#allocation19_spill] sm:$0xff] }
 0x1d1   :  { %v2679_v52 = vpop.f32.mrf.mxu1  ;;  %v10725_v46 = vpop.f32.mrf.mxu0  ;;  %11068 = vmatmul.mubr.msk.f32.gmra.mxu0 %vm33_vm1, %v11720_v22 }
 0x1d2   :  { %v14224_v28 = vadd.f32 %v2679_v52, %v2388_v12  ;;  %v2395_v44 = vadd.f32 %v10725_v46, %v13802_v54  ;;  %11070 = vmatprep.mubr.msk.f32.mxu0 %vm33_vm1, %v11721_v55  ;;  %v11722_v52 = vld [vmem:[#allocation2 + $0xc8] sm:$0xff]  ;;  %v11723_v55 = vld [vmem:[#allocation2 + $0xd8] sm:$0xff] }
 0x1d3   :  { %v10817_v57 = vpop.f32.mrf.mxu1  ;;  %11160 = vmatmul.mubr.msk.f32.gmra.mxu1 %vm33_vm1, %v17264_v43  ;;  %v2243_v51 = vpop.f32.mrf.mxu0 }
 0x1d4   :  { %v14230_v34 = vadd.f32 %v10817_v57, %v2391_v18  ;;  %v2394_v37 = vadd.f32 %v2243_v51, %v13808_v60  ;;  %11162 = vmatprep.mubr.msk.f32.mxu1 %vm33_vm1, %v17265_v47  ;;  %v17266_v18 = vld [vmem:[#allocation20_spill] sm:$0xff]  ;;  %v17267_v47 = vld [vmem:[#allocation21_spill] sm:$0xff] }
 0x1d5   :  { %v2689_v22 = vpop.f32.mrf.mxu1  ;;  %v10728_v12 = vpop.f32.mrf.mxu0  ;;  %11071 = vmatmul.mubr.msk.f32.gmra.mxu0 %vm33_vm1, %v11722_v52 }
 0x1d6   :  { %v14236_v54 = vadd.f32 %v2689_v22, %v2390_v17  ;;  %v2397_v46 = vadd.f32 %v10728_v12, %v13814_v26  ;;  %11073 = vmatprep.mubr.msk.f32.mxu0 %vm33_vm1, %v11723_v55  ;;  %v11724_v22 = vld [vmem:[#allocation2 + $0xe0] sm:$0xff]  ;;  %v11725_v55 = vld [vmem:[#allocation2 + $0xf0] sm:$0xff] }
 0x1d7   :  { %v10820_v43 = vpop.f32.mrf.mxu1  ;;  %11163 = vmatmul.mubr.msk.f32.gmra.mxu1 %vm33_vm1, %v17266_v18  ;;  %v2253_v60 = vpop.f32.mrf.mxu0 }
 0x1d8   :  { %v14242_v57 = vadd.f32 %v10820_v43, %v2393_v62  ;;  %v2396_v51 = vadd.f32 %v2253_v60, %v13820_v39  ;;  %11165 = vmatprep.mubr.msk.f32.mxu1 %vm33_vm1, %v17267_v47  ;;  %v17268_v62 = vld [vmem:[#allocation22_spill] sm:$0xff]  ;;  %v17269_v47 = vld [vmem:[#allocation23_spill] sm:$0xff] }
 0x1d9   :  { %v2699_v52 = vpop.f32.mrf.mxu1  ;;  %v10731_v17 = vpop.f32.mrf.mxu0  ;;  %11074 = vmatmul.mubr.msk.f32.gmra.mxu0 %vm33_vm1, %v11724_v22 }
 0x1da   :  { %v14248_v26 = vadd.f32 %v2699_v52, %v2392_v63  ;;  %v2399_v12 = vadd.f32 %v10731_v17, %v13826_v35  ;;  %11076 = vmatprep.mubr.msk.f32.mxu0 %vm33_vm1, %v11725_v55  ;;  %v11726_v52 = vld [vmem:[#allocation2 + $0xf8] sm:$0xff]  ;;  %v11727_v55 = vld [vmem:[#allocation2 + $0x108] sm:$0xff] }
 0x1db   :  { %v10823_v18 = vpop.f32.mrf.mxu1  ;;  %11166 = vmatmul.mubr.msk.f32.gmra.mxu1 %vm33_vm1, %v17268_v62  ;;  %v2263_v39 = vpop.f32.mrf.mxu0 }
 0x1dc   :  { %v14254_v43 = vadd.f32 %v10823_v18, %v2395_v44  ;;  %v2398_v60 = vadd.f32 %v2263_v39, %v13832_v9  ;;  %11168 = vmatprep.mubr.msk.f32.mxu1 %vm33_vm1, %v17269_v47  ;;  %v17271_v44 = vld [vmem:[#allocation24_spill] sm:$0xff]  ;;  %v17273_v39 = vld [vmem:[#allocation10_spill] sm:$0xff] }
 0x1dd   :  { %v2709_v22 = vpop.f32.mrf.mxu1  ;;  %v10734_v63 = vpop.f32.mrf.mxu0  ;;  %11077 = vmatmul.mubr.msk.f32.gmra.mxu0 %vm33_vm1, %v11726_v52 }
 0x1de   :  { %v14260_v35 = vadd.f32 %v2709_v22, %v2394_v37  ;;  %v2401_v17 = vadd.f32 %v10734_v63, %v13838_v42  ;;  %11079 = vmatprep.mubr.msk.f32.mxu0 %vm33_vm1, %v11727_v55  ;;  %v11728_v22 = vld [vmem:[#allocation2 + $0x110] sm:$0xff] }
 0x1df   :  { %v10826_v62 = vpop.f32.mrf.mxu1  ;;  %11169 = vmatmul.mubr.msk.f32.gmra.mxu1 %vm33_vm1, %v17271_v44  ;;  %v2273_v9 = vpop.f32.mrf.mxu0  ;;  %v17276_v63 = vld [vmem:[#allocation137_spill] sm:$0xff] }
 0x1e0   :  { %17270 = vst [vmem:[#allocation8_spill] sm:$0xff] %v14260_v35  ;;  %v14266_v18 = vadd.f32 %v10826_v62, %v2397_v46  ;;  %v2400_v47 = vadd.f32 %v2273_v9, %v17273_v39  ;;  %11171 = vmatprep.mubr.msk.f32.mxu1 %vm33_vm1, %v17274_v31  ;;  %v17277_v46 = vld [vmem:[#allocation26_spill] sm:$0xff] }
 0x1e1   :  { %v2719_v52 = vpop.f32.mrf.mxu1  ;;  %v10737_v37 = vpop.f32.mrf.mxu0  ;;  %11080 = vmatmul.mubr.msk.f32.gmra.mxu0 %vm33_vm1, %v11728_v22  ;;  %v17279_v31 = vld [vmem:[#allocation138_spill] sm:$0xff] }
 0x1e2   :  { %17272 = vst [vmem:[#allocation9_spill] sm:$0xff] %v14266_v18  ;;  %v14272_v42 = vadd.f32 %v2719_v52, %v2396_v51  ;;  %v2403_v55 = vadd.f32 %v10737_v37, %v17276_v63  ;;  %11082 = vmatprep.mubr.msk.f32.mxu0 %vm33_vm1, %v11729_v27  ;;  %v11730_v52 = vld [vmem:[#allocation2 + $0x128] sm:$0xff]  ;;  %v11731_v63 = vld [vmem:[#allocation2 + $0x138] sm:$0xff] }
 0x1e3   :  { %v10829_v44 = vpop.f32.mrf.mxu1  ;;  %11172 = vmatmul.mubr.msk.f32.gmra.mxu1 %vm33_vm1, %v17277_v46  ;;  %v2283_v62 = vpop.f32.mrf.mxu0 }
 0x1e4   :  { %17275 = vst [vmem:[#allocation11_spill] sm:$0xff] %v14272_v42  ;;  %v14278_v9 = vadd.f32 %v10829_v44, %v2399_v12  ;;  %v2402_v39 = vadd.f32 %v2283_v62, %v17279_v31  ;;  %11174 = vmatprep.mubr.msk.f32.mxu1 %vm33_vm1, %v17280_v4  ;;  %v17282_v12 = vld [vmem:[#allocation29_spill] sm:$0xff]  ;;  %v17284_v4 = vld [vmem:[#allocation139_spill] sm:$0xff] }
 0x1e5   :  { %v2729_v22 = vpop.f32.mrf.mxu1  ;;  %v10740_v51 = vpop.f32.mrf.mxu0  ;;  %11083 = vmatmul.mubr.msk.f32.gmra.mxu0 %vm33_vm1, %v11730_v52  ;;  %v17314_v42 = vld [vmem:[#allocation55_spill] sm:$0xff] }
 0x1e6   :  { %17278 = vst [vmem:[#allocation12_spill] sm:$0xff] %v14278_v9  ;;  %v14284_v37 = vadd.f32 %v2729_v22, %v2398_v60  ;;  %v2405_v27 = vadd.f32 %v10740_v51, %v13864_v45  ;;  %11085 = vmatprep.mubr.msk.f32.mxu0 %vm33_vm1, %v11731_v63  ;;  %v11732_v22 = vld [vmem:[#allocation2 + $0x140] sm:$0xff]  ;;  %v17287_v51 = vld [vmem:[#allocation141_spill] sm:$0xff]  ;;  %v14354_v9 = vld [vmem:[#allocation2 + $0x1a8] sm:$0x3] }
 0x1e7   :  { %v10832_v46 = vpop.f32.mrf.mxu1  ;;  %11175 = vmatmul.mubr.msk.f32.gmra.mxu1 %vm33_vm1, %v17282_v12  ;;  %v2293_v44 = vpop.f32.mrf.mxu0  ;;  %17313 = vst [vmem:[#allocation10_spill] sm:$0xff] %v14354_v9  ;;  %v4299_v35 = vrot.slane %v14354_v9, 1 }
 0x1e8   :  { %17281 = vst [vmem:[#allocation13_spill] sm:$0xff] %v14284_v37  ;;  %v14290_v62 = vadd.f32 %v10832_v46, %v2401_v17  ;;  %v2404_v31 = vadd.f32 %v2293_v44, %v17284_v4  ;;  %11177 = vmatprep.mubr.msk.f32.mxu1 %vm33_vm1, %v17285_v56  ;;  %v11733_v37 = vld [vmem:[#allocation2 + $0x150] sm:$0xff]  ;;  %v17288_v17 = vld [vmem:[#allocation34_spill] sm:$0xff] }
 0x1e9   :  { %v2739_v52 = vpop.f32.mrf.mxu1  ;;  %v10743_v60 = vpop.f32.mrf.mxu0  ;;  %11086 = vmatmul.mubr.msk.f32.gmra.mxu0 %vm33_vm1, %v11732_v22  ;;  %v17290_v56 = vld [vmem:[#allocation142_spill] sm:$0xff] }
 0x1ea   :  { %17283 = vst [vmem:[#allocation14_spill] sm:$0xff] %v14290_v62  ;;  %v14296_v45 = vadd.f32 %v2739_v52, %v2400_v47  ;;  %v2407_v63 = vadd.f32 %v10743_v60, %v17287_v51  ;;  %11088 = vmatprep.mubr.msk.f32.mxu0 %vm33_vm1, %v11733_v37  ;;  %v17291_v62 = vld [vmem:[#allocation35_spill] sm:$0xff]  ;;  %v11734_v52 = vld [vmem:[#allocation2 + $0x158] sm:$0xff]  ;;  %v17293_v37 = vld [vmem:[#allocation144_spill] sm:$0xff] }
 0x1eb   :  { %v10835_v12 = vpop.f32.mrf.mxu1  ;;  %11178 = vmatmul.mubr.msk.f32.gmra.mxu1 %vm33_vm1, %v17288_v17  ;;  %v2303_v46 = vpop.f32.mrf.mxu0 }
 0x1ec   :  { %17286 = vst [vmem:[#allocation15_spill] sm:$0xff] %v14296_v45  ;;  %v14302_v44 = vadd.f32 %v10835_v12, %v2403_v55  ;;  %v2406_v4 = vadd.f32 %v2303_v46, %v17290_v56  ;;  %11180 = vmatprep.mubr.msk.f32.mxu1 %vm33_vm1, %v17291_v62  ;;  %v11735_v45 = vld [vmem:[#allocation2 + $0x168] sm:$0xff]  ;;  %v17294_v55 = vld [vmem:[#allocation38_spill] sm:$0xff]  ;;  %v17296_v62 = vld [vmem:[#allocation145_spill] sm:$0xff] }
 0x1ed   :  { %v2749_v22 = vpop.f32.mrf.mxu1  ;;  %v10746_v47 = vpop.f32.mrf.mxu0  ;;  %11089 = vmatmul.mubr.msk.f32.gmra.mxu0 %vm33_vm1, %v11734_v52 }
 0x1ee   :  { %17289 = vst [vmem:[#allocation16_spill] sm:$0xff] %v14302_v44  ;;  %v14308_v60 = vadd.f32 %v2749_v22, %v2402_v39  ;;  %v2409_v51 = vadd.f32 %v10746_v47, %v17293_v37  ;;  %11091 = vmatprep.mubr.msk.f32.mxu0 %vm33_vm1, %v11735_v45  ;;  %v17297_v44 = vld [vmem:[#allocation39_spill] sm:$0xff]  ;;  %v11736_v22 = vld [vmem:[#allocation2 + $0x170] sm:$0xff] }
 0x1ef   :  { %v10838_v17 = vpop.f32.mrf.mxu1  ;;  %11181 = vmatmul.mubr.msk.f32.gmra.mxu1 %vm33_vm1, %v17294_v55  ;;  %v2313_v12 = vpop.f32.mrf.mxu0  ;;  %v17299_v45 = vld [vmem:[#allocation53_spill] sm:$0xff] }
 0x1f0   :  { %17292 = vst [vmem:[#allocation17_spill] sm:$0xff] %v14308_v60  ;;  %v14314_v46 = vadd.f32 %v10838_v17, %v2405_v27  ;;  %v2408_v56 = vadd.f32 %v2313_v12, %v17296_v62  ;;  %11183 = vmatprep.mubr.msk.f32.mxu1 %vm33_vm1, %v17297_v44  ;;  %v11737_v60 = vld [vmem:[#allocation2 + $0x180] sm:$0xff]  ;;  %v17300_v27 = vld [vmem:[#allocation41_spill] sm:$0xff] }
 0x1f1   :  { %v2759_v52 = vpop.f32.mrf.mxu1  ;;  %v10749_v39 = vpop.f32.mrf.mxu0  ;;  %11092 = vmatmul.mubr.msk.f32.gmra.mxu0 %vm33_vm1, %v11736_v22  ;;  %v14326_v12 = vld [vmem:[#allocation2 + $0x198] sm:$0xff] }
 0x1f2   :  { %17295 = vst [vmem:[#allocation18_spill] sm:$0xff] %v14314_v46  ;;  %v14320_v47 = vadd.f32 %v2759_v52, %v2404_v31  ;;  %v2411_v37 = vadd.f32 %v10749_v39, %v17299_v45  ;;  %11094 = vmatprep.mubr.msk.f32.mxu0 %vm33_vm1, %v11737_v60  ;;  %17301 = vst [vmem:[#allocation20_spill] sm:$0xff] %v14326_v12  ;;  %v17303_v46 = vld [vmem:[#allocation42_spill] sm:$0xff]  ;;  %v11738_v39 = vld [vmem:[#allocation2 + $0x188] sm:$0xff] }
 0x1f3   :  { %v10841_v55 = vpop.f32.mrf.mxu1  ;;  %11184 = vmatmul.mubr.msk.f32.gmra.mxu1 %vm33_vm1, %v17300_v27  ;;  %v2323_v17 = vpop.f32.mrf.mxu0  ;;  %v17305_v22 = vld [vmem:[#allocation57_spill] sm:$0xff]  ;;  %v14339_v27 = vld [vmem:[#allocation2 + $0x1a0] sm:$0xff] }
 0x1f4   :  { %17298 = vst [vmem:[#allocation19_spill] sm:$0xff] %v14320_v47  ;;  %v14328_v44 = vadd.f32 %v10841_v55, %v2407_v63  ;;  %v2410_v62 = vadd.f32 %v2323_v17, %v13917_v32  ;;  %11186 = vmatprep.mubr.msk.f32.mxu1 %vm33_vm1, %v17303_v46  ;;  %17306 = vst [vmem:[#allocation23_spill] sm:$0xff] %v14339_v27  ;;  %v17307_v55 = vld [vmem:[#allocation44_spill] sm:$0xff]  ;;  %v17308_v46 = vld [vmem:[#allocation50_spill] sm:$0xff] }
 0x1f5   :  { %v2769_v31 = vpop.f32.mrf.mxu1  ;;  %v10752_v52 = vpop.f32.mrf.mxu0  ;;  %11095 = vmatmul.mubr.msk.f32.gmra.mxu0 %vm33_vm1, %v11738_v39  ;;  %v17309_v17 = vld [vmem:[#allocation65_spill] sm:$0xff]  ;;  %v17311_v39 = vld [vmem:[#allocation146_spill] sm:$0xff] }
 0x1f6   :  { %17302 = vst [vmem:[#allocation21_spill] sm:$0xff] %v14328_v44  ;;  %v14334_v60 = vadd.f32 %v2769_v31, %v2406_v4  ;;  %v2413_v45 = vadd.f32 %v10752_v52, %v17305_v22  ;;  %11097 = vmatprep.mubr.msk.f32.mxu0 %vm33_vm1, %v14326_v12  ;;  %v1670_v44 = vadd.f32 %v17309_v17, %v17308_v46  ;;  %v17312_v31 = vld [vmem:[#allocation45_spill] sm:$0xff]  ;;  %v4296_v22 = vrot.slane %v14326_v12, 1  ;;  %v17315_v46 = vld [vmem:[#allocation66_spill] sm:$0xff] }
 0x1f7   :  { %v10844_v63 = vpop.f32.mrf.mxu1  ;;  %11187 = vmatmul.mubr.msk.f32.gmra.mxu1 %vm33_vm1, %v17307_v55  ;;  %v2333_v32 = vpop.f32.mrf.mxu0  ;;  %v4297_v55 = vrot.slane %v14339_v27, 1  ;;  %v11739_v17 = vld [vmem:[#allocation2 + $0x1e0] sm:$0xff] }
 0x1f8   :  { %17304 = vst [vmem:[#allocation22_spill] sm:$0xff] %v14334_v60  ;;  %v14345_v47 = vadd.f32 %v10844_v63, %v2409_v51  ;;  %v2412_v4 = vadd.f32 %v2333_v32, %v17311_v39  ;;  %11189 = vmatprep.mubr.msk.f32.mxu1 %vm33_vm1, %v17312_v31  ;;  %v1665_v51 = vadd.f32 %v17315_v46, %v17314_v42  ;;  %v17316_v31 = vld [vmem:[#allocation48_spill] sm:$0xff]  ;;  %v17318_v46 = vld [vmem:[#allocation46_spill] sm:$0xff] }
 0x1f9   :  { %v2779_v52 = vpop.f32.mrf.mxu1  ;;  %v10755_v60 = vpop.f32.mrf.mxu0  ;;  %11098 = vmatmul.mubr.msk.f32.gmra.mxu0 %vm33_vm1, %v14339_v27  ;;  %v17317_v27 = vld [vmem:[#allocation140_spill] sm:$0xff] }
 0x1fa   :  { %17310 = vst [vmem:[#allocation24_spill] sm:$0xff] %v14345_v47  ;;  %v14358_v63 = vadd.f32 %v2779_v52, %v2408_v56  ;;  %v2415_v32 = vadd.f32 %v10755_v60, %v1670_v44  ;;  %11100 = vmatprep.mubr.msk.f32.mxu0 %vm33_vm1, %v11739_v17  ;;  %v11740_v52 = vld [vmem:[#allocation2 + $0x1e8] sm:$0xff]  ;;  %v4298_v44 = vsel %vm477_vm3, %v4296_v22, %v4297_v55 }
 0x1fb   :  { %v10847_v39 = vpop.f32.mrf.mxu1  ;;  %11190 = vmatmul.mubr.msk.f32.gmra.mxu1 %vm33_vm1, %v17316_v31  ;;  %v2343_v12 = vpop.f32.mrf.mxu0  ;;  %v11741_v31 = vld [vmem:[#allocation2 + $0x1f8] sm:$0xff]  ;;  %v4300_v22 = vsel %vm477_vm3, %v4297_v55, %v4299_v35  ;;  %v17321_v55 = vld [vmem:[#allocation59_spill] sm:$0xff] }
 0x1fc   :  { %v14363_v47 = vadd.f32 %v10847_v39, %v2411_v37  ;;  %v2414_v18 = vadd.f32 %v2343_v12, %v1665_v51  ;;  %11192 = vmatprep.mubr.msk.f32.mxu1 %vm33_vm1, %v17317_v27  ;;  %v17319_v12 = vld [vmem:[#allocation143_spill] sm:$0xff] }
 0x1fd   :  { %v2789_v42 = vpop.f32.mrf.mxu1  ;;  %v10858_v56 = vpop.f32.mrf.mxu0  ;;  %11101 = vmatmul.mubr.msk.f32.gmra.mxu0 %vm33_vm1, %v11740_v52  ;;  %v17320_v39 = vld [vmem:[#allocation71_spill] sm:$0xff] }
 0x1fe   :  { %v14370_v60 = vadd.f32 %v2789_v42, %v2410_v62  ;;  %v3293_v17 = vadd.f32 %v10858_v56, %v17318_v46  ;;  %11103 = vmatprep.mubr.msk.f32.mxu0 %vm33_vm1, %v11741_v31  ;;  %v11742_v52 = vld [vmem:[#allocation2 + $0x200] sm:$0xff]  ;;  %v11743_v31 = vld [vmem:[#allocation2 + $0x210] sm:$0xff] }
 0x1ff   :  { %v10850_v37 = vpop.f32.mrf.mxu1  ;;  %11193 = vmatmul.mubr.msk.f32.gmra.mxu1 %vm33_vm1, %v17319_v12  ;;  %v2973_v27 = vpop.f32.mrf.mxu0 }
 0x200   :  { %v14376_v51 = vadd.f32 %v10850_v37, %v2413_v45  ;;  %v3292_v9 = vadd.f32 %v2973_v27, %v17320_v39  ;;  %11195 = vmatprep.mubr.msk.f32.mxu1 %vm33_vm1, %v4298_v44 }
 0x201   :  { %v2799_v62 = vpop.f32.mrf.mxu1  ;;  %v10861_v42 = vpop.f32.mrf.mxu0  ;;  %11104 = vmatmul.mubr.msk.f32.gmra.mxu0 %vm33_vm1, %v11742_v52 }
 0x202   :  { %v14382_v56 = vadd.f32 %v2799_v62, %v2412_v4  ;;  %v3295_v46 = vadd.f32 %v10861_v42, %v13969_v29  ;;  %11106 = vmatprep.mubr.msk.f32.mxu0 %vm33_vm1, %v11743_v31  ;;  %v11744_v4 = vld [vmem:[#allocation2 + $0x218] sm:$0xff]  ;;  %v11745_v62 = vld [vmem:[#allocation2 + $0x228] sm:$0xff] }
 0x203   :  { %v10853_v45 = vpop.f32.mrf.mxu1  ;;  %11196 = vmatmul.mubr.msk.f32.gmra.mxu1 %vm33_vm1, %v4300_v22  ;;  %v2983_v37 = vpop.f32.mrf.mxu0  ;;  %v17323_v31 = vld [vmem:[#allocation64_spill] sm:$0xff] }
 0x204   :  { %v14387_v12 = vadd.f32 %v10853_v45, %v2415_v32  ;;  %v3294_v35 = vadd.f32 %v2983_v37, %v13976_v19  ;;  %11198 = vmatprep.mubr.msk.f32.mxu1 %vm33_vm1, %v17321_v55  ;;  %v17322_v32 = vld [vmem:[#allocation63_spill] sm:$0xff]  ;;  %v11746_v37 = vld [vmem:[#allocation2 + $0x230] sm:$0xff] }
 0x205   :  { %v2809_v44 = vpop.f32.mrf.mxu1  ;;  %v10864_v27 = vpop.f32.mrf.mxu0  ;;  %11107 = vmatmul.mubr.msk.f32.gmra.mxu0 %vm33_vm1, %v11744_v4 }
 0x206   :  { %v14393_v29 = vadd.f32 %v2809_v44, %v2414_v18  ;;  %v3297_v39 = vadd.f32 %v10864_v27, %v13983_v48  ;;  %11109 = vmatprep.mubr.msk.f32.mxu0 %vm33_vm1, %v11745_v62  ;;  %v11747_v44 = vld [vmem:[#allocation2 + $0x240] sm:$0xff] }
 0x207   :  { %v10956_v22 = vpop.f32.mrf.mxu1  ;;  %11199 = vmatmul.mubr.msk.f32.gmra.mxu1 %vm33_vm1, %v17322_v32  ;;  %v2993_v19 = vpop.f32.mrf.mxu0 }
 0x208   :  { %v14399_v42 = vadd.f32 %v10956_v22, %v3293_v17  ;;  %v3296_v52 = vadd.f32 %v2993_v19, %v13990_v3  ;;  %11201 = vmatprep.mubr.msk.f32.mxu1 %vm33_vm1, %v17323_v31  ;;  %v17324_v17 = vld [vmem:[#allocation68_spill] sm:$0xff]  ;;  %v17325_v22 = vld [vmem:[#allocation69_spill] sm:$0xff] }
 0x209   :  { %v3445_v45 = vpop.f32.mrf.mxu1  ;;  %v10867_v18 = vpop.f32.mrf.mxu0  ;;  %11110 = vmatmul.mubr.msk.f32.gmra.mxu0 %vm33_vm1, %v11746_v37  ;;  %v11748_v19 = vld [vmem:[#allocation2 + $0x248] sm:$0xff] }
 0x20a   :  { %v14405_v48 = vadd.f32 %v3445_v45, %v3292_v9  ;;  %v3299_v55 = vadd.f32 %v10867_v18, %v13997_v6  ;;  %11112 = vmatprep.mubr.msk.f32.mxu0 %vm33_vm1, %v11747_v44  ;;  %v11749_v45 = vld [vmem:[#allocation2 + $0x258] sm:$0xff] }
 0x20b   :  { %v10959_v27 = vpop.f32.mrf.mxu1  ;;  %11202 = vmatmul.mubr.msk.f32.gmra.mxu1 %vm33_vm1, %v17324_v17  ;;  %v3003_v3 = vpop.f32.mrf.mxu0 }
 0x20c   :  { %v14411_v4 = vadd.f32 %v10959_v27, %v3295_v46  ;;  %v3298_v62 = vadd.f32 %v3003_v3, %v14004_v30  ;;  %11204 = vmatprep.mubr.msk.f32.mxu1 %vm33_vm1, %v17325_v22  ;;  %v17326_v46 = vld [vmem:[#allocation73_spill] sm:$0xff]  ;;  %v17327_v27 = vld [vmem:[#allocation74_spill] sm:$0xff] }
 0x20d   :  { %v3455_v32 = vpop.f32.mrf.mxu1  ;;  %v10870_v9 = vpop.f32.mrf.mxu0  ;;  %11113 = vmatmul.mubr.msk.f32.gmra.mxu0 %vm33_vm1, %v11748_v19  ;;  %v11750_v3 = vld [vmem:[#allocation2 + $0x260] sm:$0xff] }
 0x20e   :  { %v14417_v6 = vadd.f32 %v3455_v32, %v3294_v35  ;;  %v3301_v31 = vadd.f32 %v10870_v9, %v14011_v49  ;;  %11115 = vmatprep.mubr.msk.f32.mxu0 %vm33_vm1, %v11749_v45  ;;  %v11751_v32 = vld [vmem:[#allocation2 + $0x270] sm:$0xff] }
 0x20f   :  { %v10962_v18 = vpop.f32.mrf.mxu1  ;;  %11205 = vmatmul.mubr.msk.f32.gmra.mxu1 %vm33_vm1, %v17326_v46  ;;  %v3013_v30 = vpop.f32.mrf.mxu0 }
 0x210   :  { %v14423_v37 = vadd.f32 %v10962_v18, %v3297_v39  ;;  %v3300_v44 = vadd.f32 %v3013_v30, %v14018_v24  ;;  %11207 = vmatprep.mubr.msk.f32.mxu1 %vm33_vm1, %v17327_v27  ;;  %v17328_v39 = vld [vmem:[#allocation78_spill] sm:$0xff]  ;;  %v17329_v18 = vld [vmem:[#allocation79_spill] sm:$0xff] }
 0x211   :  { %v3465_v17 = vpop.f32.mrf.mxu1  ;;  %v10873_v35 = vpop.f32.mrf.mxu0  ;;  %11116 = vmatmul.mubr.msk.f32.gmra.mxu0 %vm33_vm1, %v11750_v3  ;;  %v11752_v30 = vld [vmem:[#allocation2 + $0x278] sm:$0xff] }
 0x212   :  { %v14429_v49 = vadd.f32 %v3465_v17, %v3296_v52  ;;  %v3303_v22 = vadd.f32 %v10873_v35, %v14025_v16  ;;  %11118 = vmatprep.mubr.msk.f32.mxu0 %vm33_vm1, %v11751_v32  ;;  %v11753_v17 = vld [vmem:[#allocation2 + $0x288] sm:$0xff] }
 0x213   :  { %v10965_v9 = vpop.f32.mrf.mxu1  ;;  %11208 = vmatmul.mubr.msk.f32.gmra.mxu1 %vm33_vm1, %v17328_v39  ;;  %v3023_v24 = vpop.f32.mrf.mxu0  ;;  %v17331_v32 = vld [vmem:[#allocation47_spill] sm:$0xff]  ;;  %v17332_v39 = vld [vmem:[#allocation84_spill] sm:$0xff] }
 0x214   :  { %v14435_v19 = vadd.f32 %v10965_v9, %v3299_v55  ;;  %v3302_v45 = vadd.f32 %v3023_v24, %v14032_v5  ;;  %11210 = vmatprep.mubr.msk.f32.mxu1 %vm33_vm1, %v17329_v18  ;;  %v17330_v55 = vld [vmem:[#allocation83_spill] sm:$0xff]  ;;  %v11754_v18 = vld [vmem:[#allocation2 + $0x290] sm:$0xff] }
 0x215   :  { %v3475_v46 = vpop.f32.mrf.mxu1  ;;  %v10876_v52 = vpop.f32.mrf.mxu0  ;;  %11119 = vmatmul.mubr.msk.f32.gmra.mxu0 %vm33_vm1, %v11752_v30 }
 0x216   :  { %v14441_v16 = vadd.f32 %v3475_v46, %v3298_v62  ;;  %v3305_v27 = vadd.f32 %v10876_v52, %v14039_v38  ;;  %11121 = vmatprep.mubr.msk.f32.mxu0 %vm33_vm1, %v11753_v17  ;;  %v11755_v52 = vld [vmem:[#allocation2 + $0x2a0] sm:$0xff] }
 0x217   :  { %v10968_v35 = vpop.f32.mrf.mxu1  ;;  %11211 = vmatmul.mubr.msk.f32.gmra.mxu1 %vm33_vm1, %v17330_v55  ;;  %v3033_v5 = vpop.f32.mrf.mxu0 }
 0x218   :  { %v14447_v3 = vadd.f32 %v10968_v35, %v3301_v31  ;;  %v3304_v9 = vadd.f32 %v3033_v5, %v17331_v32  ;;  %11213 = vmatprep.mubr.msk.f32.mxu1 %vm33_vm1, %v17332_v39  ;;  %v17333_v31 = vld [vmem:[#allocation88_spill] sm:$0xff]  ;;  %v17334_v5 = vld [vmem:[#allocation89_spill] sm:$0xff] }
 0x219   :  { %v3485_v24 = vpop.f32.mrf.mxu1  ;;  %v10879_v62 = vpop.f32.mrf.mxu0  ;;  %11122 = vmatmul.mubr.msk.f32.gmra.mxu0 %vm33_vm1, %v11754_v18  ;;  %v11756_v39 = vld [vmem:[#allocation2 + $0x2a8] sm:$0xff] }
 0x21a   :  { %v14453_v38 = vadd.f32 %v3485_v24, %v3300_v44  ;;  %v3307_v46 = vadd.f32 %v10879_v62, %v14053_v25  ;;  %11124 = vmatprep.mubr.msk.f32.mxu0 %vm33_vm1, %v11755_v52  ;;  %v11757_v62 = vld [vmem:[#allocation2 + $0x2b8] sm:$0xff] }
 0x21b   :  { %v10971_v30 = vpop.f32.mrf.mxu1  ;;  %11214 = vmatmul.mubr.msk.f32.gmra.mxu1 %vm33_vm1, %v17333_v31  ;;  %v3043_v17 = vpop.f32.mrf.mxu0  ;;  %v17337_v31 = vld [vmem:[#allocation93_spill] sm:$0xff] }
 0x21c   :  { %v14459_v35 = vadd.f32 %v10971_v30, %v3303_v22  ;;  %v3306_v55 = vadd.f32 %v3043_v17, %v14060_v33  ;;  %11216 = vmatprep.mubr.msk.f32.mxu1 %vm33_vm1, %v17334_v5  ;;  %v17335_v22 = vld [vmem:[#allocation92_spill] sm:$0xff]  ;;  %v11758_v5 = vld [vmem:[#allocation2 + $0x2c0] sm:$0xff] }
 0x21d   :  { %v3495_v32 = vpop.f32.mrf.mxu1  ;;  %v10882_v44 = vpop.f32.mrf.mxu0  ;;  %11125 = vmatmul.mubr.msk.f32.gmra.mxu0 %vm33_vm1, %v11756_v39  ;;  %v11759_v39 = vld [vmem:[#allocation2 + $0x2d0] sm:$0xff] }
 0x21e   :  { %v14465_v25 = vadd.f32 %v3495_v32, %v3302_v45  ;;  %v3309_v24 = vadd.f32 %v10882_v44, %v14067_v23  ;;  %11127 = vmatprep.mubr.msk.f32.mxu0 %vm33_vm1, %v11757_v62  ;;  %v17338_v32 = vld [vmem:[#allocation72_spill] sm:$0xff]  ;;  %v17339_v62 = vld [vmem:[#allocation95_spill] sm:$0xff] }
 0x21f   :  { %v10974_v18 = vpop.f32.mrf.mxu1  ;;  %11217 = vmatmul.mubr.msk.f32.gmra.mxu1 %vm33_vm1, %v17335_v22  ;;  %v3053_v33 = vpop.f32.mrf.mxu0  ;;  %v17340_v22 = vld [vmem:[#allocation77_spill] sm:$0xff] }
 0x220   :  { %v14471_v52 = vadd.f32 %v10974_v18, %v3305_v27  ;;  %v14474_v30 = vadd.f32 %v3053_v33, %v14074_v21  ;;  %11219 = vmatprep.mubr.msk.f32.mxu1 %vm33_vm1, %v17337_v31  ;;  %v17342_v31 = vld [vmem:[#allocation96_spill] sm:$0xff] }
 0x221   :  { %v3505_v45 = vpop.f32.mrf.mxu1  ;;  %v10885_v17 = vpop.f32.mrf.mxu0  ;;  %11128 = vmatmul.mubr.msk.f32.gmra.mxu0 %vm33_vm1, %v11758_v5  ;;  %v11760_v5 = vld [vmem:[#allocation2 + $0x2d8] sm:$0xff] }
 0x222   :  { %17336 = vst [vmem:[#allocation25_spill] sm:$0xff] %v14474_v30  ;;  %v14479_v23 = vadd.f32 %v3505_v45, %v3304_v9  ;;  %v3311_v44 = vadd.f32 %v10885_v17, %v17338_v32  ;;  %11130 = vmatprep.mubr.msk.f32.mxu0 %vm33_vm1, %v11759_v39  ;;  %v17343_v32 = vld [vmem:[#allocation80_spill] sm:$0xff] }
 0x223   :  { %v10977_v27 = vpop.f32.mrf.mxu1  ;;  %11220 = vmatmul.mubr.msk.f32.gmra.mxu1 %vm33_vm1, %v17339_v62  ;;  %v3063_v21 = vpop.f32.mrf.mxu0  ;;  %v11761_v30 = vld [vmem:[#allocation2 + $0x2e8] sm:$0xff] }
 0x224   :  { %v14485_v18 = vadd.f32 %v10977_v27, %v3307_v46  ;;  %v14488_v33 = vadd.f32 %v3063_v21, %v17340_v22  ;;  %11222 = vmatprep.mubr.msk.f32.mxu1 %vm33_vm1, %v17342_v31  ;;  %v17344_v27 = vld [vmem:[#allocation98_spill] sm:$0xff]  ;;  %v17346_v31 = vld [vmem:[#allocation99_spill] sm:$0xff] }
 0x225   :  { %v3515_v9 = vpop.f32.mrf.mxu1  ;;  %v10888_v45 = vpop.f32.mrf.mxu0  ;;  %11131 = vmatmul.mubr.msk.f32.gmra.mxu0 %vm33_vm1, %v11760_v5  ;;  %v11763_v5 = vld [vmem:[#allocation2 + $0x300] sm:$0xff] }
 0x226   :  { %17341 = vst [vmem:[#allocation137_spill] sm:$0xff] %v14488_v33  ;;  %v14493_v17 = vadd.f32 %v3515_v9, %v3306_v55  ;;  %v3313_v39 = vadd.f32 %v10888_v45, %v17343_v32  ;;  %11133 = vmatprep.mubr.msk.f32.mxu0 %vm33_vm1, %v11761_v30  ;;  %v11762_v45 = vld [vmem:[#allocation2 + $0x2f0] sm:$0xff]  ;;  %v17463_v33 = vld [vmem:[#allocation90_spill] sm:$0xff] }
 0x227   :  { %v10980_v46 = vpop.f32.mrf.mxu1  ;;  %11223 = vmatmul.mubr.msk.f32.gmra.mxu1 %vm33_vm1, %v17344_v27  ;;  %v3073_v62 = vpop.f32.mrf.mxu0 }
 0x228   :  { %v14499_v21 = vadd.f32 %v10980_v46, %v3309_v24  ;;  %v14502_v22 = vadd.f32 %v3073_v62, %v14106_v2  ;;  %11225 = vmatprep.mubr.msk.f32.mxu1 %vm33_vm1, %v17346_v31  ;;  %v17348_v24 = vld [vmem:[#allocation101_spill] sm:$0xff]  ;;  %v17350_v62 = vld [vmem:[#allocation102_spill] sm:$0xff] }
 0x229   :  { %v14506_v55 = vpop.f32.mrf.mxu1  ;;  %v10891_v9 = vpop.f32.mrf.mxu0  ;;  %11134 = vmatmul.mubr.msk.f32.gmra.mxu0 %vm33_vm1, %v11762_v45 }
 0x22a   :  { %17345 = vst [vmem:[#allocation26_spill] sm:$0xff] %v14502_v22  ;;  %17347 = vst [vmem:[#allocation138_spill] sm:$0xff] %v14506_v55  ;;  %v3315_v30 = vadd.f32 %v10891_v9, %v14117_v59  ;;  %11136 = vmatprep.mubr.msk.f32.mxu0 %vm33_vm1, %v11763_v5  ;;  %v11764_v59 = vld [vmem:[#allocation2 + $0x308] sm:$0xff]  ;;  %v11765_v5 = vld [vmem:[#allocation2 + $0x318] sm:$0xff] }
 0x22b   :  { %v10983_v32 = vpop.f32.mrf.mxu1  ;;  %11226 = vmatmul.mubr.msk.f32.gmra.mxu1 %vm33_vm1, %v17348_v24  ;;  %v3083_v2 = vpop.f32.mrf.mxu0 }
 0x22c   :  { %v14513_v46 = vadd.f32 %v10983_v32, %v3311_v44  ;;  %v14516_v27 = vadd.f32 %v3083_v2, %v14124_v61  ;;  %11228 = vmatprep.mubr.msk.f32.mxu1 %vm33_vm1, %v17350_v62  ;;  %v17352_v44 = vld [vmem:[#allocation103_spill] sm:$0xff]  ;;  %v17354_v62 = vld [vmem:[#allocation104_spill] sm:$0xff] }
 0x22d   :  { %v14520_v31 = vpop.f32.mrf.mxu1  ;;  %v10894_v45 = vpop.f32.mrf.mxu0  ;;  %11137 = vmatmul.mubr.msk.f32.gmra.mxu0 %vm33_vm1, %v11764_v59 }
 0x22e   :  { %17349 = vst [vmem:[#allocation27_spill] sm:$0xff] %v14516_v27  ;;  %17351 = vst [vmem:[#allocation29_spill] sm:$0xff] %v14520_v31  ;;  %v3317_v9 = vadd.f32 %v10894_v45, %v14134_v15  ;;  %11139 = vmatprep.mubr.msk.f32.mxu0 %vm33_vm1, %v11765_v5  ;;  %v11766_v15 = vld [vmem:[#allocation2 + $0x320] sm:$0xff]  ;;  %v11767_v5 = vld [vmem:[#allocation2 + $0x330] sm:$0xff] }
 0x22f   :  { %v10986_v24 = vpop.f32.mrf.mxu1  ;;  %11229 = vmatmul.mubr.msk.f32.gmra.mxu1 %vm33_vm1, %v17352_v44  ;;  %v3093_v61 = vpop.f32.mrf.mxu0 }
 0x230   :  { %v14527_v32 = vadd.f32 %v10986_v24, %v3313_v39  ;;  %v14530_v2 = vadd.f32 %v3093_v61, %v14143_v10  ;;  %11231 = vmatprep.mubr.msk.f32.mxu1 %vm33_vm1, %v17354_v62  ;;  %v17356_v39 = vld [vmem:[#allocation105_spill] sm:$0xff]  ;;  %v14541_v24 = vld [vmem:[#allocation2 + $0x348] sm:$0xff] }
 0x231   :  { %v14534_v27 = vpop.f32.mrf.mxu1  ;;  %v10897_v59 = vpop.f32.mrf.mxu0  ;;  %11140 = vmatmul.mubr.msk.f32.gmra.mxu0 %vm33_vm1, %v11766_v15 }
 0x232   :  { %17353 = vst [vmem:[#allocation139_spill] sm:$0xff] %v14530_v2  ;;  %17355 = vst [vmem:[#allocation30_spill] sm:$0xff] %v14534_v27  ;;  %v3319_v45 = vadd.f32 %v10897_v59, %v14149_v7  ;;  %11142 = vmatprep.mubr.msk.f32.mxu0 %vm33_vm1, %v11767_v5  ;;  %v17358_v2 = vld [vmem:[#allocation106_spill] sm:$0xff] }
 0x233   :  { %v10989_v44 = vpop.f32.mrf.mxu1  ;;  %11232 = vmatmul.mubr.msk.f32.gmra.mxu1 %vm33_vm1, %v17356_v39  ;;  %v3103_v10 = vpop.f32.mrf.mxu0  ;;  %v11768_v59 = vld [vmem:[#allocation2 + $0x338] sm:$0xff]  ;;  %v14556_v39 = vld [vmem:[#allocation2 + $0x350] sm:$0xff] }
 0x234   :  { %v14543_v61 = vadd.f32 %v10989_v44, %v3315_v30  ;;  %v14546_v62 = vadd.f32 %v3103_v10, %v14159_v14  ;;  %11234 = vmatprep.mubr.msk.f32.mxu1 %vm33_vm1, %v17358_v2  ;;  %v17360_v44 = vld [vmem:[#allocation107_spill] sm:$0xff] }
 0x235   :  { %v14550_v15 = vpop.f32.mrf.mxu1  ;;  %v10900_v7 = vpop.f32.mrf.mxu0  ;;  %11143 = vmatmul.mubr.msk.f32.gmra.mxu0 %vm33_vm1, %v11768_v59 }
 0x236   :  { %17357 = vst [vmem:[#allocation141_spill] sm:$0xff] %v14546_v62  ;;  %17359 = vst [vmem:[#allocation34_spill] sm:$0xff] %v14550_v15  ;;  %v3321_v5 = vadd.f32 %v10900_v7, %v14167_v41  ;;  %11145 = vmatprep.mubr.msk.f32.mxu0 %vm33_vm1, %v14541_v24  ;;  %v17362_v62 = vld [vmem:[#allocation7_spill] sm:$0xff]  ;;  %v4301_v41 = vrot.slane %v14541_v24, 1  ;;  %v4302_v15 = vrot.slane %v14556_v39, 1 }
 0x237   :  { %v10992_v30 = vpop.f32.mrf.mxu1  ;;  %11235 = vmatmul.mubr.msk.f32.gmra.mxu1 %vm33_vm1, %v17360_v44  ;;  %v3113_v14 = vpop.f32.mrf.mxu0  ;;  %v14573_v44 = vld [vmem:[#allocation2 + $0x358] sm:$0x3] }
 0x238   :  { %v14560_v10 = vadd.f32 %v10992_v30, %v3317_v9  ;;  %v14563_v2 = vadd.f32 %v3113_v14, %v14176_v20  ;;  %11237 = vmatprep.mubr.msk.f32.mxu1 %vm33_vm1, %v17362_v62  ;;  %v17364_v30 = vld [vmem:[#allocation108_spill] sm:$0xff] }
 0x239   :  { %v14567_v59 = vpop.f32.mrf.mxu1  ;;  %v10903_v7 = vpop.f32.mrf.mxu0  ;;  %11146 = vmatmul.mubr.msk.f32.gmra.mxu0 %vm33_vm1, %v14556_v39 }
 0x23a   :  { %17361 = vst [vmem:[#allocation142_spill] sm:$0xff] %v14563_v2  ;;  %17363 = vst [vmem:[#allocation35_spill] sm:$0xff] %v14567_v59  ;;  %v3323_v9 = vadd.f32 %v10903_v7, %v14182_v53  ;;  %11248 = vmatprep.mubr.msk.f32.mxu0 %vm33_vm1, %v17364_v30  ;;  %v4304_v59 = vrot.slane %v14573_v44, 1  ;;  %v17367_v7 = vld [vmem:[#allocation109_spill] sm:$0xff]  ;;  %v4303_v30 = vsel %vm477_vm3, %v4301_v41, %v4302_v15 }
 0x23b   :  { %v10995_v20 = vpop.f32.mrf.mxu1  ;;  %11238 = vmatmul.mubr.msk.f32.gmra.mxu1 %vm33_vm1, %v17250_v58  ;;  %v3123_v62 = vpop.f32.mrf.mxu0 }
 0x23c   :  { %v14580_v14 = vadd.f32 %v10995_v20, %v3319_v45  ;;  %v14583_v2 = vadd.f32 %v3123_v62, %v14188_v1  ;;  %11240 = vmatprep.mubr.msk.f32.mxu1 %vm33_vm1, %v14115_v50  ;;  %v17368_v45 = vld [vmem:[#allocation110_spill] sm:$0xff] }
 0x23d   :  { %v14588_v27 = vpop.f32.mrf.mxu1  ;;  %v10906_v53 = vpop.f32.mrf.mxu0  ;;  %11249 = vmatmul.mubr.msk.f32.vlgmr.msra.gmra.mxu0 %vm33_vm1, %v17367_v7  ;;  %v4305_v7 = vsel %vm477_vm3, %v4302_v15, %v4304_v59 }
 0x23e   :  { %17365 = vst [vmem:[#allocation144_spill] sm:$0xff] %v14583_v2  ;;  %17366 = vst [vmem:[#allocation38_spill] sm:$0xff] %v14588_v27  ;;  %v3325_v58 = vadd.f32 %v10906_v53, %v14194_v11  ;;  %11251 = vmatprep.mubr.msk.f32.mxu0 %vm33_vm1, %v17368_v45  ;;  %v17371_v53 = vld [vmem:[#allocation111_spill] sm:$0xff]  ;;  %v17372_v2 = vld [vmem:[#allocation112_spill] sm:$0xff] }
 0x23f   :  { %v10998_v1 = vpop.f32.mrf.mxu1  ;;  %11241 = vmatmul.mubr.msk.f32.gmra.mxu1 %vm33_vm1, %v14130_v40  ;;  %v3133_v50 = vpop.f32.mrf.mxu0  ;;  %v17430_v27 = vld [vmem:[#allocation43_spill] sm:$0xff] }
 0x240   :  { %v14598_v20 = vadd.f32 %v10998_v1, %v3321_v5  ;;  %v14601_v62 = vadd.f32 %v3133_v50, %v14200_v8  ;;  %11243 = vmatprep.mubr.msk.f32.mxu1 %vm33_vm1, %v4303_v30  ;;  %v17375_v1 = vld [vmem:[#allocation113_spill] sm:$0xff]  ;;  %v17376_v50 = vld [vmem:[#allocation114_spill] sm:$0xff] }
 0x241   :  { %v14605_v41 = vpop.f32.mrf.mxu1  ;;  %v10909_v11 = vpop.f32.mrf.mxu0  ;;  %11252 = vmatmul.mubr.msk.f32.gmra.mxu0 %vm33_vm1, %v17371_v53 }
 0x242   :  { %17369 = vst [vmem:[#allocation145_spill] sm:$0xff] %v14601_v62  ;;  %17370 = vst [vmem:[#allocation39_spill] sm:$0xff] %v14605_v41  ;;  %v3327_v45 = vadd.f32 %v10909_v11, %v14206_v36  ;;  %11254 = vmatprep.mubr.msk.f32.mxu0 %vm33_vm1, %v17372_v2  ;;  %v17412_v62 = vld [vmem:[#allocation31_spill] sm:$0xff]  ;;  %v17424_v41 = vld [vmem:[#allocation37_spill] sm:$0xff] }
 0x243   :  { %v11001_v40 = vpop.f32.mrf.mxu1  ;;  %11244 = vmatmul.mubr.msk.f32.gmra.mxu1 %vm33_vm1, %v4305_v7  ;;  %v3143_v8 = vpop.f32.mrf.mxu0 }
 0x244   :  { %v14613_v5 = vadd.f32 %v11001_v40, %v3323_v9  ;;  %v14616_v30 = vadd.f32 %v3143_v8, %v14212_v13  ;;  %v17379_v40 = vld [vmem:[#allocation115_spill] sm:$0xff] }
 0x245   :  { %v14618_v15 = vpop.f32.mrf.mxu1  ;;  %v10912_v59 = vpop.f32.mrf.mxu0  ;;  %11255 = vmatmul.mubr.msk.f32.gmra.mxu0 %vm33_vm1, %v17375_v1  ;;  %v17380_v1 = vld [vmem:[#allocation116_spill] sm:$0xff] }
 0x246   :  { %17373 = vst [vmem:[#allocation53_spill] sm:$0xff] %v14616_v30  ;;  %17374 = vst [vmem:[#allocation41_spill] sm:$0xff] %v14618_v15  ;;  %v3329_v36 = vadd.f32 %v10912_v59, %v14218_v0  ;;  %11257 = vmatprep.mubr.msk.f32.mxu0 %vm33_vm1, %v17376_v50  ;;  %v17400_v30 = vld [vmem:[#allocation124_spill] sm:$0xff]  ;;  %v17418_v15 = vld [vmem:[#allocation33_spill] sm:$0xff] }
 0x247   :  { %v11004_v2 = vpop.f32.mrf.mxu1  ;;  %v3153_v11 = vpop.f32.mrf.mxu0 }
 0x248   :  { %v14625_v7 = vadd.f32 %v11004_v2, %v3325_v58  ;;  %v14628_v9 = vadd.f32 %v3153_v11, %v14224_v28  ;;  %v17383_v11 = vld [vmem:[#allocation117_spill] sm:$0xff] }
 0x249   :  { %v14630_v13 = vpop.f32.mrf.mxu1  ;;  %v10915_v53 = vpop.f32.mrf.mxu0  ;;  %11258 = vmatmul.mubr.msk.f32.gmra.mxu0 %vm33_vm1, %v17379_v40 }
 0x24a   :  { %17377 = vst [vmem:[#allocation42_spill] sm:$0xff] %v14628_v9  ;;  %17378 = vst [vmem:[#allocation57_spill] sm:$0xff] %v14630_v13  ;;  %v3331_v8 = vadd.f32 %v10915_v53, %v14230_v34  ;;  %11260 = vmatprep.mubr.msk.f32.mxu0 %vm33_vm1, %v17380_v1  ;;  %v17384_v9 = vld [vmem:[#allocation118_spill] sm:$0xff] }
 0x24b   :  { %v11007_v0 = vpop.f32.mrf.mxu1  ;;  %v3163_v59 = vpop.f32.mrf.mxu0  ;;  %v17406_v13 = vld [vmem:[#allocation126_spill] sm:$0xff] }
 0x24c   :  { %v14637_v50 = vadd.f32 %v11007_v0, %v3327_v45  ;;  %v14640_v58 = vadd.f32 %v3163_v59, %v14236_v54  ;;  %v17387_v59 = vld [vmem:[#allocation119_spill] sm:$0xff] }
 0x24d   :  { %v14642_v28 = vpop.f32.mrf.mxu1  ;;  %v10918_v2 = vpop.f32.mrf.mxu0  ;;  %11261 = vmatmul.mubr.msk.f32.gmra.mxu0 %vm33_vm1, %v17383_v11 }
 0x24e   :  { %17381 = vst [vmem:[#allocation44_spill] sm:$0xff] %v14640_v58  ;;  %17382 = vst [vmem:[#allocation50_spill] sm:$0xff] %v14642_v28  ;;  %v3333_v40 = vadd.f32 %v10918_v2, %v14242_v57  ;;  %11263 = vmatprep.mubr.msk.f32.mxu0 %vm33_vm1, %v17384_v9  ;;  %v17388_v58 = vld [vmem:[#allocation120_spill] sm:$0xff]  ;;  %v17394_v28 = vld [vmem:[#allocation122_spill] sm:$0xff] }
 0x24f   :  { %v11010_v34 = vpop.f32.mrf.mxu1  ;;  %v3173_v53 = vpop.f32.mrf.mxu0 }
 0x250   :  { %v14649_v1 = vadd.f32 %v11010_v34, %v3329_v36  ;;  %v14652_v45 = vadd.f32 %v3173_v53, %v14248_v26  ;;  %v17389_v36 = vld [vmem:[#allocation8_spill] sm:$0xff] }
 0x251   :  { %v14654_v54 = vpop.f32.mrf.mxu1  ;;  %v10921_v0 = vpop.f32.mrf.mxu0  ;;  %11264 = vmatmul.mubr.msk.f32.gmra.mxu0 %vm33_vm1, %v17387_v59 }
 0x252   :  { %17385 = vst [vmem:[#allocation65_spill] sm:$0xff] %v14652_v45  ;;  %17386 = vst [vmem:[#allocation146_spill] sm:$0xff] %v14654_v54  ;;  %v3335_v11 = vadd.f32 %v10921_v0, %v14254_v43  ;;  %11266 = vmatprep.mubr.msk.f32.mxu0 %vm33_vm1, %v17388_v58  ;;  %v17392_v45 = vld [vmem:[#allocation121_spill] sm:$0xff] }
 0x253   :  { %v11013_v57 = vpop.f32.mrf.mxu1  ;;  %v3183_v9 = vpop.f32.mrf.mxu0  ;;  %v17393_v54 = vld [vmem:[#allocation9_spill] sm:$0xff] }
 0x254   :  { %v14661_v2 = vadd.f32 %v11013_v57, %v3331_v8  ;;  %v14664_v34 = vadd.f32 %v3183_v9, %v17389_v36  ;;  %v17395_v8 = vld [vmem:[#allocation11_spill] sm:$0xff] }
 0x255   :  { %v14666_v26 = vpop.f32.mrf.mxu1  ;;  %v10924_v53 = vpop.f32.mrf.mxu0  ;;  %11267 = vmatmul.mubr.msk.f32.gmra.mxu0 %vm33_vm1, %v17392_v45 }
 0x256   :  { %17390 = vst [vmem:[#allocation45_spill] sm:$0xff] %v14664_v34  ;;  %17391 = vst [vmem:[#allocation55_spill] sm:$0xff] %v14666_v26  ;;  %v3337_v59 = vadd.f32 %v10924_v53, %v17393_v54  ;;  %11269 = vmatprep.mubr.msk.f32.mxu0 %vm33_vm1, %v17394_v28  ;;  %v17398_v34 = vld [vmem:[#allocation123_spill] sm:$0xff]  ;;  %v17399_v26 = vld [vmem:[#allocation12_spill] sm:$0xff] }
 0x257   :  { %v11016_v43 = vpop.f32.mrf.mxu1  ;;  %v3193_v58 = vpop.f32.mrf.mxu0 }
 0x258   :  { %v14673_v0 = vadd.f32 %v11016_v43, %v3333_v40  ;;  %v14676_v57 = vadd.f32 %v3193_v58, %v17395_v8  ;;  %v17401_v40 = vld [vmem:[#allocation13_spill] sm:$0xff] }
 0x259   :  { %v14678_v9 = vpop.f32.mrf.mxu1  ;;  %v10927_v36 = vpop.f32.mrf.mxu0  ;;  %11270 = vmatmul.mubr.msk.f32.gmra.mxu0 %vm33_vm1, %v17398_v34 }
 0x25a   :  { %17396 = vst [vmem:[#allocation66_spill] sm:$0xff] %v14676_v57  ;;  %17397 = vst [vmem:[#allocation48_spill] sm:$0xff] %v14678_v9  ;;  %v3339_v45 = vadd.f32 %v10927_v36, %v17399_v26  ;;  %11272 = vmatprep.mubr.msk.f32.mxu0 %vm33_vm1, %v17400_v30  ;;  %v17404_v57 = vld [vmem:[#allocation125_spill] sm:$0xff]  ;;  %v17405_v9 = vld [vmem:[#allocation14_spill] sm:$0xff] }
 0x25b   :  { %v11019_v54 = vpop.f32.mrf.mxu1  ;;  %v3203_v28 = vpop.f32.mrf.mxu0 }
 0x25c   :  { %v14685_v53 = vadd.f32 %v11019_v54, %v3335_v11  ;;  %v14688_v43 = vadd.f32 %v3203_v28, %v17401_v40  ;;  %v17407_v11 = vld [vmem:[#allocation15_spill] sm:$0xff] }
 0x25d   :  { %v14690_v58 = vpop.f32.mrf.mxu1  ;;  %v10930_v8 = vpop.f32.mrf.mxu0  ;;  %11273 = vmatmul.mubr.msk.f32.gmra.mxu0 %vm33_vm1, %v17404_v57 }
 0x25e   :  { %17402 = vst [vmem:[#allocation140_spill] sm:$0xff] %v14688_v43  ;;  %17403 = vst [vmem:[#allocation46_spill] sm:$0xff] %v14690_v58  ;;  %v3341_v34 = vadd.f32 %v10930_v8, %v17405_v9  ;;  %11275 = vmatprep.mubr.msk.f32.mxu0 %vm33_vm1, %v17406_v13  ;;  %v17410_v43 = vld [vmem:[#allocation28_spill] sm:$0xff] }
 0x25f   :  { %v11022_v26 = vpop.f32.mrf.mxu1  ;;  %v3213_v30 = vpop.f32.mrf.mxu0  ;;  %v17411_v58 = vld [vmem:[#allocation16_spill] sm:$0xff] }
 0x260   :  { %v14697_v36 = vadd.f32 %v11022_v26, %v3337_v59  ;;  %v14700_v54 = vadd.f32 %v3213_v30, %v17407_v11  ;;  %v17413_v59 = vld [vmem:[#allocation17_spill] sm:$0xff] }
 0x261   :  { %v14702_v28 = vpop.f32.mrf.mxu1  ;;  %v10933_v40 = vpop.f32.mrf.mxu0  ;;  %11276 = vmatmul.mubr.msk.f32.gmra.mxu0 %vm33_vm1, %v17410_v43 }
 0x262   :  { %17408 = vst [vmem:[#allocation143_spill] sm:$0xff] %v14700_v54  ;;  %17409 = vst [vmem:[#allocation71_spill] sm:$0xff] %v14702_v28  ;;  %v3343_v57 = vadd.f32 %v10933_v40, %v17411_v58  ;;  %11278 = vmatprep.mubr.msk.f32.mxu0 %vm33_vm1, %v17412_v62  ;;  %v17416_v54 = vld [vmem:[#allocation32_spill] sm:$0xff]  ;;  %v17417_v28 = vld [vmem:[#allocation18_spill] sm:$0xff] }
 0x263   :  { %v11025_v9 = vpop.f32.mrf.mxu1  ;;  %v3223_v13 = vpop.f32.mrf.mxu0 }
 0x264   :  { %v14709_v8 = vadd.f32 %v11025_v9, %v3339_v45  ;;  %v14712_v26 = vadd.f32 %v3223_v13, %v17413_v59  ;;  %v17419_v45 = vld [vmem:[#allocation19_spill] sm:$0xff] }
 0x265   :  { %v14714_v30 = vpop.f32.mrf.mxu1  ;;  %v10936_v11 = vpop.f32.mrf.mxu0  ;;  %11279 = vmatmul.mubr.msk.f32.gmra.mxu0 %vm33_vm1, %v17416_v54 }
 0x266   :  { %17414 = vst [vmem:[#allocation59_spill] sm:$0xff] %v14712_v26  ;;  %17415 = vst [vmem:[#allocation63_spill] sm:$0xff] %v14714_v30  ;;  %v3345_v43 = vadd.f32 %v10936_v11, %v17417_v28  ;;  %11281 = vmatprep.mubr.msk.f32.mxu0 %vm33_vm1, %v17418_v15  ;;  %v17422_v26 = vld [vmem:[#allocation36_spill] sm:$0xff]  ;;  %v17423_v30 = vld [vmem:[#allocation21_spill] sm:$0xff] }
 0x267   :  { %v11028_v58 = vpop.f32.mrf.mxu1  ;;  %v3233_v62 = vpop.f32.mrf.mxu0 }
 0x268   :  { %v14721_v40 = vadd.f32 %v11028_v58, %v3341_v34  ;;  %v14724_v9 = vadd.f32 %v3233_v62, %v17419_v45  ;;  %v17425_v34 = vld [vmem:[#allocation22_spill] sm:$0xff] }
 0x269   :  { %v14726_v13 = vpop.f32.mrf.mxu1  ;;  %v10939_v59 = vpop.f32.mrf.mxu0  ;;  %11282 = vmatmul.mubr.msk.f32.gmra.mxu0 %vm33_vm1, %v17422_v26 }
 0x26a   :  { %17420 = vst [vmem:[#allocation64_spill] sm:$0xff] %v14724_v9  ;;  %17421 = vst [vmem:[#allocation68_spill] sm:$0xff] %v14726_v13  ;;  %v3347_v54 = vadd.f32 %v10939_v59, %v17423_v30  ;;  %11284 = vmatprep.mubr.msk.f32.mxu0 %vm33_vm1, %v17424_v41  ;;  %v17428_v9 = vld [vmem:[#allocation40_spill] sm:$0xff] }
 0x26b   :  { %v11031_v28 = vpop.f32.mrf.mxu1  ;;  %v3243_v15 = vpop.f32.mrf.mxu0  ;;  %v17429_v13 = vld [vmem:[#allocation24_spill] sm:$0xff] }
 0x26c   :  { %v14733_v11 = vadd.f32 %v11031_v28, %v3343_v57  ;;  %v14736_v58 = vadd.f32 %v3243_v15, %v17425_v34  ;;  %v17431_v30 = vld [vmem:[#allocation20_spill] sm:$0xff]  ;;  %v17432_v57 = vld [vmem:[#allocation23_spill] sm:$0xff] }
 0x26d   :  { %v14738_v62 = vpop.f32.mrf.mxu1  ;;  %v10942_v45 = vpop.f32.mrf.mxu0  ;;  %11285 = vmatmul.mubr.msk.f32.gmra.mxu0 %vm33_vm1, %v17428_v9  ;;  %v4768_v41 = vrot.slane %v17431_v30, 2  ;;  %v4769_v28 = vrot.slane %v17432_v57, 2  ;;  %v9499_v9 = vld [vmem:[%s16625_s3 + $0x8] sm:$0xff]  ;;  %v17436_v30 = vld [vmem:[#allocation58_spill] sm:$0xff] }
 0x26e   :  { %17426 = vst [vmem:[#allocation69_spill] sm:$0xff] %v14736_v58  ;;  %17427 = vst [vmem:[#allocation73_spill] sm:$0xff] %v14738_v62  ;;  %v3349_v26 = vadd.f32 %v10942_v45, %v17429_v13  ;;  %11287 = vmatprep.mubr.msk.f32.mxu0 %vm33_vm1, %v17430_v27  ;;  %v17435_v45 = vld [vmem:[#allocation127_spill] sm:$0xff]  ;;  %11344 = vmatprep.subr.mxu1 %v9499_v9  ;;  %v17440_v62 = vld [vmem:[#allocation60_spill] sm:$0xff] }
 0x26f   :  { %v11034_v59 = vpop.f32.mrf.mxu1  ;;  %v3253_v22 = vpop.f32.mrf.mxu0  ;;  %11345 = vmatpush3.msra.mxu1 %v9499_v9  ;;  %v4770_v57 = vsel %vm1673_vm4, %v4768_v41, %v4769_v28 }
 0x270   :  { %v14747_v31 = vadd.f32 %v11034_v59, %v3345_v43  ;;  %v14750_v15 = vadd.f32 %v3253_v22, %v14358_v63  ;;  %v17437_v43 = vld [vmem:[#allocation10_spill] sm:$0xff] }
 0x271   :  { %v14755_v34 = vpop.f32.mrf.mxu1  ;;  %v10945_v13 = vpop.f32.mrf.mxu0  ;;  %11288 = vmatmul.mubr.msk.f32.gmra.mxu0 %vm33_vm1, %v17435_v45  ;;  %v4771_v59 = vrot.slane %v17437_v43, 2 }
 0x272   :  { %17433 = vst [vmem:[#allocation74_spill] sm:$0xff] %v14750_v15  ;;  %17434 = vst [vmem:[#allocation78_spill] sm:$0xff] %v14755_v34  ;;  %v3351_v27 = vadd.f32 %v10945_v13, %v14363_v47  ;;  %11290 = vmatprep.mubr.msk.f32.mxu0 %vm33_vm1, %v17436_v30 }
 0x273   :  { %v11037_v63 = vpop.f32.mrf.mxu1  ;;  %v3263_v22 = vpop.f32.mrf.mxu0  ;;  %v4772_v9 = vsel %vm1673_vm4, %v4769_v28, %v4771_v59 }
 0x274   :  { %v14764_v15 = vadd.f32 %v11037_v63, %v3347_v54  ;;  %v14767_v58 = vadd.f32 %v3263_v22, %v14370_v60  ;;  %v17443_v63 = vld [vmem:[#allocation52_spill] sm:$0xff] }
 0x275   :  { %v14769_v34 = vpop.f32.mrf.mxu1  ;;  %v10948_v45 = vpop.f32.mrf.mxu0  ;;  %11291 = vmatmul.mubr.msk.f32.gmra.mxu0 %vm33_vm1, %v17440_v62 }
 0x276   :  { %17438 = vst [vmem:[#allocation79_spill] sm:$0xff] %v14767_v58  ;;  %17439 = vst [vmem:[#allocation83_spill] sm:$0xff] %v14769_v34  ;;  %v3353_v47 = vadd.f32 %v10948_v45, %v14376_v51  ;;  %11293 = vmatprep.mubr.msk.f32.mxu0 %vm33_vm1, %v4770_v57  ;;  %v17446_v57 = vld [vmem:[#allocation49_spill] sm:$0xff] }
 0x277   :  { %v11040_v13 = vpop.f32.mrf.mxu1  ;;  %v3273_v30 = vpop.f32.mrf.mxu0 }
 0x278   :  { %v14776_v41 = vadd.f32 %v11040_v13, %v3349_v26  ;;  %v14779_v54 = vadd.f32 %v3273_v30, %v14382_v56 }
 0x279   :  { %v14781_v60 = vpop.f32.mrf.mxu1  ;;  %v10951_v43 = vpop.f32.mrf.mxu0  ;;  %11294 = vmatmul.mubr.msk.f32.gmra.mxu0 %vm33_vm1, %v4772_v9 }
 0x27a   :  { %17441 = vst [vmem:[#allocation47_spill] sm:$0xff] %v14779_v54  ;;  %17442 = vst [vmem:[#allocation84_spill] sm:$0xff] %v14781_v60  ;;  %v3355_v62 = vadd.f32 %v10951_v43, %v14387_v12  ;;  %11296 = vmatprep.mubr.msk.f32.mxu0 %vm33_vm1, %v17443_v63  ;;  %v17447_v12 = vld [vmem:[#allocation51_spill] sm:$0xff]  ;;  %v17449_v63 = vld [vmem:[#allocation54_spill] sm:$0xff] }
 0x27b   :  { %v11043_v51 = vpop.f32.mrf.mxu1  ;;  %v3283_v22 = vpop.f32.mrf.mxu0 }
 0x27c   :  { %v14787_v28 = vadd.f32 %v11043_v51, %v3351_v27  ;;  %v14790_v26 = vadd.f32 %v3283_v22, %v14393_v29 }
 0x27d   :  { %v14792_v59 = vpop.f32.mrf.mxu1  ;;  %v11054_v56 = vpop.f32.mrf.mxu0  ;;  %11297 = vmatmul.mubr.msk.f32.gmra.mxu0 %vm33_vm1, %v17446_v57 }
 0x27e   :  { %17444 = vst [vmem:[#allocation88_spill] sm:$0xff] %v14790_v26  ;;  %17445 = vst [vmem:[#allocation89_spill] sm:$0xff] %v14792_v59  ;;  %v14797_v45 = vadd.f32 %v11054_v56, %v14399_v42  ;;  %11299 = vmatprep.mubr.msk.f32.mxu0 %vm33_vm1, %v17447_v12  ;;  %v17450_v42 = vld [vmem:[#allocation56_spill] sm:$0xff] }
 0x27f   :  { %v11046_v9 = vpop.f32.mrf.mxu1  ;;  %v3911_v13 = vpop.f32.mrf.mxu0 }
 0x280   :  { %v14801_v30 = vadd.f32 %v11046_v9, %v3353_v47  ;;  %v14804_v27 = vadd.f32 %v3911_v13, %v14405_v48  ;;  %v17452_v9 = vld [vmem:[#allocation61_spill] sm:$0xff] }
 0x281   :  { %v14806_v29 = vpop.f32.mrf.mxu1  ;;  %v11057_v43 = vpop.f32.mrf.mxu0  ;;  %11300 = vmatmul.mubr.msk.f32.gmra.mxu0 %vm33_vm1, %v17449_v63 }
 0x282   :  { %17448 = vst [vmem:[#allocation92_spill] sm:$0xff] %v14806_v29  ;;  %v14811_v51 = vadd.f32 %v11057_v43, %v14411_v4  ;;  %11302 = vmatprep.mubr.msk.f32.mxu0 %vm33_vm1, %v17450_v42  ;;  %v17453_v4 = vld [vmem:[#allocation62_spill] sm:$0xff]  ;;  %v17459_v29 = vld [vmem:[#allocation81_spill] sm:$0xff] }
 0x283   :  { %v11049_v22 = vpop.f32.mrf.mxu1  ;;  %v3921_v56 = vpop.f32.mrf.mxu0 }
 0x284   :  { %v14815_v57 = vadd.f32 %v11049_v22, %v3355_v62  ;;  %v14818_v47 = vadd.f32 %v3921_v56, %v14417_v6  ;;  %v17454_v22 = vld [vmem:[#allocation67_spill] sm:$0xff]  ;;  %v17455_v56 = vmov 0.0  }
 0x285   :  { %v14820_v48 = vpop.f32.mrf.mxu1  ;;  %v11060_v12 = vpop.f32.mrf.mxu0  ;;  %11303 = vmatmul.mubr.msk.f32.gmra.mxu0 %vm33_vm1, %v17452_v9  ;;  %5411 = vst.msk [vmem:[#allocation3 + $0x10] sm:$0xff] %vm5407_vm5, %v17455_v56  ;;  %5408 = vst.msk [vmem:[#allocation3] sm:$0xff] %vm5407_vm5, %v17455_v56 }
 0x286   :  { %17451 = vst [vmem:[#allocation93_spill] sm:$0xff] %v14820_v48  ;;  %v14825_v13 = vadd.f32 %v11060_v12, %v14423_v37  ;;  %11305 = vmatprep.mubr.msk.f32.mxu0 %vm33_vm1, %v17453_v4  ;;  %5412 = vst.msk [vmem:[#allocation3 + $0x18] sm:$0x3] %vm5409_vm6, %v17455_v56  ;;  %v17457_v48 = vld [vmem:[#allocation75_spill] sm:$0xff] }
 0x287   :  { %v14829_v43 = vpop.f32.mrf.mxu1  ;;  %v3931_v63 = vpop.f32.mrf.mxu0  ;;  %5410 = vst.msk [vmem:[#allocation3 + $0x8] sm:$0x3] %vm5409_vm6, %v17455_v56  ;;  %5414 = vst.msk [vmem:[#allocation3 + $0x28] sm:$0x3] %vm5409_vm6, %v17455_v56 }
 0x288   :  { %v14832_v62 = vadd.f32 %v3931_v63, %v14429_v49  ;;  %5413 = vst.msk [vmem:[#allocation3 + $0x20] sm:$0xff] %vm5407_vm5, %v17455_v56  ;;  %5415 = vst.msk [vmem:[#allocation3 + $0x30] sm:$0xff] %vm5407_vm5, %v17455_v56  ;;  %v17456_v49 = vld [vmem:[#allocation70_spill] sm:$0xff] }
 0x289   :  { %v14834_v6 = vpop.f32.mrf.mxu1  ;;  %v11063_v42 = vpop.f32.mrf.mxu0  ;;  %11306 = vmatmul.mubr.msk.f32.gmra.mxu0 %vm33_vm1, %v17454_v22  ;;  %5416 = vst.msk [vmem:[#allocation3 + $0x38] sm:$0x3] %vm5409_vm6, %v17455_v56  ;;  %5418 = vst.msk [vmem:[#allocation3 + $0x48] sm:$0x3] %vm5409_vm6, %v17455_v56 }
 0x28a   :  { %5417 = vst.msk [vmem:[#allocation3 + $0x40] sm:$0xff] %vm5407_vm5, %v17455_v56  ;;  %5419 = vst.msk [vmem:[#allocation3 + $0x50] sm:$0xff] %vm5407_vm5, %v17455_v56  ;;  %v14919_v37 = vadd.f32 %v11063_v42, %v14435_v19  ;;  %11308 = vmatprep.mubr.msk.f32.mxu0 %vm33_vm1, %v17456_v49  ;;  %v17458_v19 = vld [vmem:[#allocation76_spill] sm:$0xff] }
 0x28b   :  { %5420 = vst.msk [vmem:[#allocation3 + $0x58] sm:$0x3] %vm5409_vm6, %v17455_v56  ;;  %5422 = vst.msk [vmem:[#allocation3 + $0x68] sm:$0x3] %vm5409_vm6, %v17455_v56  ;;  %v14923_v12 = vpop.f32.mrf.mxu1  ;;  %v3941_v9 = vpop.f32.mrf.mxu0 }
 0x28c   :  { %5421 = vst.msk [vmem:[#allocation3 + $0x60] sm:$0xff] %vm5407_vm5, %v17455_v56  ;;  %5423 = vst.msk [vmem:[#allocation3 + $0x70] sm:$0xff] %vm5407_vm5, %v17455_v56  ;;  %v14926_v4 = vadd.f32 %v3941_v9, %v14441_v16 }
 0x28d   :  { %5424 = vst.msk [vmem:[#allocation3 + $0x78] sm:$0x3] %vm5409_vm6, %v17455_v56  ;;  %5426 = vst.msk [vmem:[#allocation3 + $0x88] sm:$0x3] %vm5409_vm6, %v17455_v56  ;;  %v14928_v63 = vpop.f32.mrf.mxu1  ;;  %v11066_v22 = vpop.f32.mrf.mxu0  ;;  %11309 = vmatmul.mubr.msk.f32.gmra.mxu0 %vm33_vm1, %v17457_v48 }
 0x28e   :  { %5425 = vst.msk [vmem:[#allocation3 + $0x80] sm:$0xff] %vm5407_vm5, %v17455_v56  ;;  %5427 = vst.msk [vmem:[#allocation3 + $0x90] sm:$0xff] %vm5407_vm5, %v17455_v56  ;;  %11311 = vmatprep.mubr.msk.f32.mxu0 %vm33_vm1, %v17458_v19  ;;  %v5711_v58 = vld [vmem:[#allocation3 + $0x8] sm:$0x3] }
 0x28f   :  { %5428 = vst.msk [vmem:[#allocation3 + $0x98] sm:$0x3] %vm5409_vm6, %v17455_v56  ;;  %5430 = vst.msk [vmem:[#allocation3 + $0xa8] sm:$0x3] %vm5409_vm6, %v17455_v56  ;;  %v14937_v42 = vpop.f32.mrf.mxu1  ;;  %v3951_v49 = vpop.f32.mrf.mxu0 }
 0x290   :  { %5429 = vst.msk [vmem:[#allocation3 + $0xa0] sm:$0xff] %vm5407_vm5, %v17455_v56  ;;  %5431 = vst.msk [vmem:[#allocation3 + $0xb0] sm:$0xff] %vm5407_vm5, %v17455_v56  ;;  %v14940_v26 = vadd.f32 %v3951_v49, %v14453_v38  ;;  %v17461_v49 = vld [vmem:[#allocation86_spill] sm:$0xff] }
 0x291   :  { %5432 = vst.msk [vmem:[#allocation3 + $0xb8] sm:$0x3] %vm5409_vm6, %v17455_v56  ;;  %5434 = vst.msk [vmem:[#allocation3 + $0xc8] sm:$0x3] %vm5409_vm6, %v17455_v56  ;;  %v14942_v16 = vpop.f32.mrf.mxu1  ;;  %v11069_v9 = vpop.f32.mrf.mxu0  ;;  %11312 = vmatmul.mubr.msk.f32.gmra.mxu0 %vm33_vm1, %v17459_v29  ;;  %v17462_v29 = vld [vmem:[#allocation87_spill] sm:$0xff] }
 0x292   :  { %5433 = vst.msk [vmem:[#allocation3 + $0xc0] sm:$0xff] %vm5407_vm5, %v17455_v56  ;;  %5435 = vst.msk [vmem:[#allocation3 + $0xd0] sm:$0xff] %vm5407_vm5, %v17455_v56  ;;  %v14947_v48 = vadd.f32 %v11069_v9, %v14459_v35 }
 0x293   :  { %5436 = vst.msk [vmem:[#allocation3 + $0xd8] sm:$0x3] %vm5409_vm6, %v17455_v56  ;;  %5438 = vst.msk [vmem:[#allocation3 + $0xe8] sm:$0x3] %vm5409_vm6, %v17455_v56  ;;  %v3961_v19 = vpop.f32.mrf.mxu0 }
 0x294   :  { %5437 = vst.msk [vmem:[#allocation3 + $0xe0] sm:$0xff] %vm5407_vm5, %v17455_v56  ;;  %5439 = vst.msk [vmem:[#allocation3 + $0xf0] sm:$0xff] %vm5407_vm5, %v17455_v56  ;;  %v14954_v54 = vadd.f32 %v3961_v19, %v14465_v25  ;;  %v5784_v19 = vrot.slane %v5711_v58, 1 }
 0x295   :  { %5440 = vst.msk [vmem:[#allocation3 + $0xf8] sm:$0x3] %vm5409_vm6, %v17455_v56  ;;  %5442 = vst.msk [vmem:[#allocation3 + $0x108] sm:$0x3] %vm5409_vm6, %v17455_v56  ;;  %v11072_v38 = vpop.f32.mrf.mxu0 }
 0x296   :  { %5441 = vst.msk [vmem:[#allocation3 + $0x100] sm:$0xff] %vm5407_vm5, %v17455_v56  ;;  %5443 = vst.msk [vmem:[#allocation3 + $0x110] sm:$0xff] %vm5407_vm5, %v17455_v56  ;;  %v14959_v59 = vadd.f32 %v11072_v38, %v14471_v52  ;;  %v17464_v38 = vld [vmem:[#allocation91_spill] sm:$0xff] }
 0x297   :  { %5444 = vst.msk [vmem:[#allocation3 + $0x118] sm:$0x3] %vm5409_vm6, %v17455_v56  ;;  %5446 = vst.msk [vmem:[#allocation3 + $0x128] sm:$0x3] %vm5409_vm6, %v17455_v56  ;;  %v3971_v9 = vpop.f32.mrf.mxu0 }
 0x298   :  { %5445 = vst.msk [vmem:[#allocation3 + $0x120] sm:$0xff] %vm5407_vm5, %v17455_v56  ;;  %5447 = vst.msk [vmem:[#allocation3 + $0x130] sm:$0xff] %vm5407_vm5, %v17455_v56  ;;  %v14966_v60 = vadd.f32 %v3971_v9, %v14479_v23  ;;  %v17465_v9 = vld [vmem:[#allocation94_spill] sm:$0xff] }
 0x299   :  { %5448 = vst.msk [vmem:[#allocation3 + $0x138] sm:$0x3] %vm5409_vm6, %v17455_v56  ;;  %v14933_v56 = vadd.f32 %v11066_v22, %v14447_v3  ;;  %v17460_v3 = vld [vmem:[#allocation82_spill] sm:$0xff]  ;;  %v14951_v22 = vpop.f32.mrf.mxu1  ;;  %v11075_v34 = vpop.f32.mrf.mxu0 }
 0x29a   :  { %11314 = vmatprep.mubr.msk.f32.mxu0 %vm33_vm1, %v17460_v3  ;;  %v5710_v3 = vld [vmem:[#allocation3] sm:$0xff]  ;;  %v14971_v52 = vadd.f32 %v11075_v34, %v14485_v18 }
 0x29b   :  { %11315 = vmatmul.mubr.msk.f32.gmra.mxu0 %vm33_vm1, %v17461_v49  ;;  %v14963_v35 = vpop.f32.mrf.mxu1  ;;  %v5783_v25 = vrot.slane %v5710_v3, 1  ;;  %v3981_v55 = vpop.f32.mrf.mxu0 }
 0x29c   :  { %11317 = vmatprep.mubr.msk.f32.mxu0 %vm33_vm1, %v17462_v29  ;;  %v14980_v23 = vadd.f32 %v3981_v55, %v14493_v17  ;;  %v9566_v17 = vld [vmem:[%s16625_s3 + $0x20] sm:$0xff] }
 0x29d   :  { %v5785_v49 = vsel %vm477_vm3, %v5783_v25, %v5784_v19  ;;  %v14976_v29 = vpop.f32.mrf.mxu1  ;;  %v11078_v58 = vpop.f32.mrf.mxu0  ;;  %v17467_v19 = vld [vmem:[#allocation100_spill] sm:$0xff]  ;;  %11448 = vmatprep.subr.mxu0 %v9566_v17 }
 0x29e   :  { %11346 = vmatprep.mubr.msk.f32.mxu1 %vm5407_vm5, %v5785_v49  ;;  %v14985_v18 = vadd.f32 %v11078_v58, %v14499_v21  ;;  %v17469_v21 = vld [vmem:[#allocation128_spill] sm:$0xff]  ;;  %11449 = vmatpush3.msra.mxu0 %v9566_v17 }
 0x29f   :  { %11318 = vmatmul.mubr.msk.f32.gmra.mxu0 %vm33_vm1, %v17463_v33  ;;  %v17466_v33 = vld [vmem:[#allocation97_spill] sm:$0xff]  ;;  %v14989_v34 = vpop.f32.mrf.mxu1  ;;  %v14991_v3 = vpop.f32.mrf.mxu0 }
 0x2a0   :  { %11320 = vmatprep.mubr.msk.f32.mxu0 %vm33_vm1, %v17464_v38 }
 0x2a1   :  { %v11081_v25 = vpop.f32.mrf.mxu0  ;;  %v15003_v38 = vpop.f32.mrf.mxu1 }
 0x2a2   :  { %v14999_v55 = vadd.f32 %v11081_v25, %v14513_v46 }
 0x2a3   :  { %11321 = vmatmul.mubr.msk.f32.gmra.mxu0 %vm33_vm1, %v17465_v9  ;;  %v15005_v49 = vpop.f32.mrf.mxu0  ;;  %v17471_v9 = vld [vmem:[#allocation129_spill] sm:$0xff]  ;;  %v15014_v46 = vpop.f32.mrf.mxu1 }
 0x2a4   :  { %11323 = vmatprep.mubr.msk.f32.mxu0 %vm33_vm1, %v17466_v33  ;;  %17468 = vst [vmem:[#allocation72_spill] sm:$0xff] %v14999_v55  ;;  %17470 = vst [vmem:[#allocation95_spill] sm:$0xff] %v15005_v49  ;;  %v17475_v55 = vld [vmem:[#allocation131_spill] sm:$0xff]  ;;  %v17477_v49 = vld [vmem:[#allocation132_spill] sm:$0xff] }
 0x2a5   :  { %v11084_v58 = vpop.f32.mrf.mxu0 }
 0x2a6   :  { %v15010_v33 = vadd.f32 %v11084_v58, %v14527_v32 }
 0x2a7   :  { %11324 = vmatmul.mubr.msk.f32.gmra.mxu0 %vm33_vm1, %v17467_v19  ;;  %v17473_v19 = vld [vmem:[#allocation130_spill] sm:$0xff]  ;;  %v15016_v25 = vpop.f32.mrf.mxu0 }
 0x2a8   :  { %11326 = vmatprep.mubr.msk.f32.mxu0 %vm33_vm1, %v17469_v21  ;;  %17472 = vst [vmem:[#allocation77_spill] sm:$0xff] %v15010_v33  ;;  %17474 = vst [vmem:[#allocation96_spill] sm:$0xff] %v15016_v25  ;;  %v17481_v25 = vld [vmem:[#allocation135_spill] sm:$0xff] }
 0x2a9   :  { %v11087_v21 = vpop.f32.mrf.mxu0 }
 0x2aa   :  { %v15021_v17 = vadd.f32 %v11087_v21, %v14543_v61  ;;  %v4773_v61 = vrot.slane %v14541_v24, 2 }
 0x2ab   :  { %11327 = vmatmul.mubr.msk.f32.gmra.mxu0 %vm33_vm1, %v17471_v9  ;;  %v15025_v9 = vpop.f32.mrf.mxu1  ;;  %v15027_v32 = vpop.f32.mrf.mxu0 }
 0x2ac   :  { %11329 = vmatprep.mubr.msk.f32.mxu0 %vm33_vm1, %v17473_v19  ;;  %17476 = vst [vmem:[#allocation80_spill] sm:$0xff] %v15021_v17  ;;  %17478 = vst [vmem:[#allocation98_spill] sm:$0xff] %v15027_v32  ;;  %v17479_v19 = vld [vmem:[#allocation134_spill] sm:$0xff]  ;;  %v17483_v32 = vld [vmem:[#allocation136_spill] sm:$0xff] }
 0x2ad   :  { %v11090_v58 = vpop.f32.mrf.mxu0 }
 0x2ae   :  { %v15032_v33 = vadd.f32 %v11090_v58, %v14560_v10  ;;  %v17485_v10 = vld [vmem:[#allocation85_spill] sm:$0xff] }
 0x2af   :  { %11330 = vmatmul.mubr.msk.f32.gmra.mxu0 %vm33_vm1, %v17475_v55  ;;  %v15037_v55 = vpop.f32.mrf.mxu1  ;;  %v15039_v21 = vpop.f32.mrf.mxu0 }
 0x2b0   :  { %11332 = vmatprep.mubr.msk.f32.mxu0 %vm33_vm1, %v17477_v49  ;;  %17480 = vst [vmem:[#allocation99_spill] sm:$0xff] %v15032_v33  ;;  %17482 = vst [vmem:[#allocation101_spill] sm:$0xff] %v15039_v21  ;;  %v4774_v49 = vrot.slane %v14556_v39, 2  ;;  %v17486_v39 = vld [vmem:[#allocation133_spill] sm:$0xff] }
 0x2b1   :  { %v11093_v17 = vpop.f32.mrf.mxu0  ;;  %v15050_v58 = vpop.f32.mrf.mxu1 }
 0x2b2   :  { %v4775_v33 = vsel %vm1673_vm4, %v4773_v61, %v4774_v49 }
 0x2b3   :  { %11333 = vmatmul.mubr.msk.f32.gmra.mxu0 %vm33_vm1, %v17479_v19  ;;  %v15045_v19 = vadd.f32 %v11093_v17, %v14580_v14  ;;  %v15052_v24 = vpop.f32.mrf.mxu0  ;;  %v15062_v17 = vpop.f32.mrf.mxu1 }
 0x2b4   :  { %11335 = vmatprep.mubr.msk.f32.mxu0 %vm33_vm1, %v17481_v25  ;;  %v4776_v25 = vrot.slane %v14573_v44, 2 }
 0x2b5   :  { %17484 = vst [vmem:[#allocation102_spill] sm:$0xff] %v15045_v19  ;;  %v11096_v21 = vpop.f32.mrf.mxu0  ;;  %v15070_v19 = vpop.f32.mrf.mxu1 }
 0x2b6   :  { %v4777_v14 = vsel %vm1673_vm4, %v4774_v49, %v4776_v25 }
 0x2b7   :  { %11336 = vmatmul.mubr.msk.f32.gmra.mxu0 %vm33_vm1, %v17483_v32  ;;  %v15058_v32 = vadd.f32 %v11096_v21, %v14598_v20  ;;  %v15064_v44 = vpop.f32.mrf.mxu0 }
 0x2b8   :  { %11338 = vmatprep.mubr.msk.f32.mxu0 %vm33_vm1, %v17485_v10 }
 0x2b9   :  { %17487 = vst [vmem:[#allocation103_spill] sm:$0xff] %v15058_v32  ;;  %v11099_v10 = vpop.f32.mrf.mxu0 }
 0x2ba   :  { %v15068_v61 = vadd.f32 %v11099_v10, %v14613_v5 }
 0x2bb   :  { %11339 = vmatmul.mubr.msk.f32.gmra.mxu0 %vm33_vm1, %v17486_v39  ;;  %v15072_v39 = vpop.f32.mrf.mxu0 }
 0x2bc   :  { %11341 = vmatprep.mubr.msk.f32.mxu0 %vm33_vm1, %v4775_v33  ;;  %17488 = vst [vmem:[#allocation104_spill] sm:$0xff] %v15068_v61  ;;  %17489 = vst [vmem:[#allocation105_spill] sm:$0xff] %v15072_v39  ;;  %v15077_v33 = vpop.f32.mrf.mxu1 }
 0x2bd   :  { %v11102_v20 = vpop.f32.mrf.mxu0 }
 0x2be   :  { %v15075_v21 = vadd.f32 %v11102_v20, %v14625_v7 }
 0x2bf   :  { %11342 = vmatmul.mubr.msk.f32.gmra.mxu0 %vm33_vm1, %v4777_v14  ;;  %v15079_v49 = vpop.f32.mrf.mxu0  ;;  %v15084_v14 = vpop.f32.mrf.mxu1 }
 0x2c0   :  { %17490 = vst [vmem:[#allocation106_spill] sm:$0xff] %v15075_v21  ;;  %17491 = vst [vmem:[#allocation107_spill] sm:$0xff] %v15079_v49 }
 0x2c1   :  { %v11105_v25 = vpop.f32.mrf.mxu0  ;;  %v15091_v39 = vpop.f32.mrf.mxu1 }
 0x2c2   :  { %v15082_v32 = vadd.f32 %v11105_v25, %v14637_v50 }
 0x2c3   :  { %v15086_v5 = vpop.f32.mrf.mxu0  ;;  %v15098_v49 = vpop.f32.mrf.mxu1 }
 0x2c4   :  { %17492 = vst [vmem:[#allocation7_spill] sm:$0xff] %v15082_v32  ;;  %17493 = vst [vmem:[#allocation108_spill] sm:$0xff] %v15086_v5 }
 0x2c5   :  { %v11108_v10 = vpop.f32.mrf.mxu0  ;;  %v15105_v5 = vpop.f32.mrf.mxu1 }
 0x2c6   :  { %v15089_v61 = vadd.f32 %v11108_v10, %v14649_v1 }
 0x2c7   :  { %v15093_v7 = vpop.f32.mrf.mxu0 }
 0x2c8   :  { %17494 = vst [vmem:[#allocation109_spill] sm:$0xff] %v15089_v61  ;;  %17495 = vst [vmem:[#allocation110_spill] sm:$0xff] %v15093_v7  ;;  %v15112_v7 = vpop.f32.mrf.mxu1 }
 0x2c9   :  { %v11111_v20 = vpop.f32.mrf.mxu0 }
 0x2ca   :  { %v15096_v21 = vadd.f32 %v11111_v20, %v14661_v2 }
 0x2cb   :  { %v15100_v50 = vpop.f32.mrf.mxu0 }
 0x2cc   :  { %17496 = vst [vmem:[#allocation111_spill] sm:$0xff] %v15096_v21  ;;  %17497 = vst [vmem:[#allocation112_spill] sm:$0xff] %v15100_v50  ;;  %v15119_v50 = vpop.f32.mrf.mxu1 }
 0x2cd   :  { %v11114_v25 = vpop.f32.mrf.mxu0 }
 0x2ce   :  { %v15103_v32 = vadd.f32 %v11114_v25, %v14673_v0 }
 0x2cf   :  { %v15107_v1 = vpop.f32.mrf.mxu0 }
 0x2d0   :  { %17498 = vst [vmem:[#allocation113_spill] sm:$0xff] %v15103_v32  ;;  %17499 = vst [vmem:[#allocation114_spill] sm:$0xff] %v15107_v1  ;;  %v15126_v1 = vpop.f32.mrf.mxu1 }
 0x2d1   :  { %v11117_v10 = vpop.f32.mrf.mxu0 }
 0x2d2   :  { %v15110_v61 = vadd.f32 %v11117_v10, %v14685_v53 }
 0x2d3   :  { %v15114_v2 = vpop.f32.mrf.mxu0 }
 0x2d4   :  { %17500 = vst [vmem:[#allocation115_spill] sm:$0xff] %v15110_v61  ;;  %17501 = vst [vmem:[#allocation116_spill] sm:$0xff] %v15114_v2  ;;  %v15133_v2 = vpop.f32.mrf.mxu1 }
 0x2d5   :  { %v11120_v20 = vpop.f32.mrf.mxu0 }
 0x2d6   :  { %v15117_v21 = vadd.f32 %v11120_v20, %v14697_v36 }
 0x2d7   :  { %v15121_v0 = vpop.f32.mrf.mxu0 }
 0x2d8   :  { %17502 = vst [vmem:[#allocation117_spill] sm:$0xff] %v15117_v21  ;;  %17503 = vst [vmem:[#allocation118_spill] sm:$0xff] %v15121_v0  ;;  %v15140_v0 = vpop.f32.mrf.mxu1 }
 0x2d9   :  { %v11123_v25 = vpop.f32.mrf.mxu0 }
 0x2da   :  { %v15124_v32 = vadd.f32 %v11123_v25, %v14709_v8 }
 0x2db   :  { %v15128_v53 = vpop.f32.mrf.mxu0 }
 0x2dc   :  { %17504 = vst [vmem:[#allocation119_spill] sm:$0xff] %v15124_v32  ;;  %17505 = vst [vmem:[#allocation120_spill] sm:$0xff] %v15128_v53  ;;  %v15147_v53 = vpop.f32.mrf.mxu1 }
 0x2dd   :  { %v11126_v10 = vpop.f32.mrf.mxu0 }
 0x2de   :  { %v15131_v61 = vadd.f32 %v11126_v10, %v14721_v40 }
 0x2df   :  { %v15135_v36 = vpop.f32.mrf.mxu0 }
 0x2e0   :  { %17506 = vst [vmem:[#allocation8_spill] sm:$0xff] %v15131_v61  ;;  %17507 = vst [vmem:[#allocation121_spill] sm:$0xff] %v15135_v36  ;;  %v15154_v36 = vpop.f32.mrf.mxu1 }
 0x2e1   :  { %v11129_v20 = vpop.f32.mrf.mxu0 }
 0x2e2   :  { %v15138_v21 = vadd.f32 %v11129_v20, %v14733_v11 }
 0x2e3   :  { %v15142_v8 = vpop.f32.mrf.mxu0 }
 0x2e4   :  { %17508 = vst [vmem:[#allocation9_spill] sm:$0xff] %v15138_v21  ;;  %17509 = vst [vmem:[#allocation122_spill] sm:$0xff] %v15142_v8  ;;  %v15161_v8 = vpop.f32.mrf.mxu1 }
 0x2e5   :  { %v11132_v25 = vpop.f32.mrf.mxu0 }
 0x2e6   :  { %v15145_v32 = vadd.f32 %v11132_v25, %v14747_v31 }
 0x2e7   :  { %v15149_v40 = vpop.f32.mrf.mxu0 }
 0x2e8   :  { %17510 = vst [vmem:[#allocation11_spill] sm:$0xff] %v15145_v32  ;;  %17511 = vst [vmem:[#allocation123_spill] sm:$0xff] %v15149_v40  ;;  %v15168_v40 = vpop.f32.mrf.mxu1 }
 0x2e9   :  { %v11135_v10 = vpop.f32.mrf.mxu0 }
 0x2ea   :  { %v15152_v61 = vadd.f32 %v11135_v10, %v14764_v15 }
 0x2eb   :  { %v15156_v11 = vpop.f32.mrf.mxu0 }
 0x2ec   :  { %17512 = vst [vmem:[#allocation12_spill] sm:$0xff] %v15152_v61  ;;  %17513 = vst [vmem:[#allocation124_spill] sm:$0xff] %v15156_v11  ;;  %v15175_v11 = vpop.f32.mrf.mxu1 }
 0x2ed   :  { %v11138_v20 = vpop.f32.mrf.mxu0  ;;  %17519 = vst [vmem:[#allocation28_spill] sm:$0xff] %v15175_v11  ;;  %v4709_v11 = vadd.f32 %v14937_v42, %v14825_v13 }
 0x2ee   :  { %v15159_v21 = vadd.f32 %v11138_v20, %v14776_v41  ;;  %v15182_v20 = vld [vmem:[%s16625_s3] sm:$0xff] }
 0x2ef   :  { %v15163_v31 = vpop.f32.mrf.mxu0  ;;  %11370 = vmatprep.subr.mxu1 %v15182_v20 }
 0x2f0   :  { %17514 = vst [vmem:[#allocation13_spill] sm:$0xff] %v15159_v21  ;;  %17515 = vst [vmem:[#allocation125_spill] sm:$0xff] %v15163_v31  ;;  %v15201_v31 = vld [vmem:[%s16624_s2] ss:$0 sm:$0xff] }
 0x2f1   :  { %v11141_v25 = vpop.f32.mrf.mxu0 }
 0x2f2   :  { %v15166_v32 = vadd.f32 %v11141_v25, %v14787_v28  ;;  %v15188_v25 = vpop.f32.mrf.mxu1 }
 0x2f3   :  { %v15170_v15 = vpop.f32.mrf.mxu0  ;;  %17522 = vst [vmem:[#allocation17_spill] sm:$0xff] %v15188_v25 }
 0x2f4   :  { %17516 = vst [vmem:[#allocation14_spill] sm:$0xff] %v15166_v32  ;;  %17517 = vst [vmem:[#allocation126_spill] sm:$0xff] %v15170_v15  ;;  %v15196_v15 = vpop.f32.mrf.mxu1 }
 0x2f5   :  { %v11144_v10 = vpop.f32.mrf.mxu0  ;;  %17524 = vst [vmem:[#allocation18_spill] sm:$0xff] %v15196_v15 }
 0x2f6   :  { %v15173_v61 = vadd.f32 %v11144_v10, %v14801_v30  ;;  %v4705_v30 = vadd.f32 %v14829_v43, %v14797_v45  ;;  %v4706_v45 = vadd.f32 %v14928_v63, %v14818_v47 }
 0x2f7   :  { %v15177_v41 = vpop.f32.mrf.mxu0 }
 0x2f8   :  { %17518 = vst [vmem:[#allocation15_spill] sm:$0xff] %v15173_v61  ;;  %17520 = vst [vmem:[#allocation16_spill] sm:$0xff] %v15177_v41  ;;  %v4704_v61 = vadd.f32 %v14834_v6, %v14804_v27  ;;  %v15208_v6 = vpop.f32.mrf.mxu1 }
 0x2f9   :  { %v11147_v21 = vpop.f32.mrf.mxu0  ;;  %17525 = vst [vmem:[#allocation33_spill] sm:$0xff] %v15208_v6 }
 0x2fa   :  { %v15186_v28 = vadd.f32 %v11147_v21, %v14815_v57  ;;  %v4707_v21 = vadd.f32 %v14923_v12, %v14811_v51  ;;  %v4708_v12 = vadd.f32 %v14942_v16, %v14832_v62  ;;  %v4710_v62 = vadd.f32 %v14963_v35, %v14926_v4 }
 0x2fb   :  { %v15190_v32 = vpop.f32.mrf.mxu0 }
 0x2fc   :  { %17521 = vst [vmem:[#allocation31_spill] sm:$0xff] %v15186_v28  ;;  %17523 = vst [vmem:[#allocation32_spill] sm:$0xff] %v15190_v32 }
 0x2fd   :  { %v11250_v10 = vpop.f32.mrf.mxu0 }
 0x2fe   :  { %v5177_v41 = vadd.f32 %v11250_v10, %v4705_v30 }
 0x2ff   :  { %v4857_v57 = vpop.f32.mrf.mxu0 }
 0x300   :  { %v5176_v28 = vadd.f32 %v4857_v57, %v4704_v61  ;;  %v5248_v43 = vadd.f32 %v15201_v31, %v5177_v41 }
 0x301   :  { %v11253_v32 = vpop.f32.mrf.mxu0 }
 0x302   :  { %v5179_v27 = vadd.f32 %v11253_v32, %v4707_v21  ;;  %v5247_v10 = vadd.f32 %v15201_v31, %v5176_v28  ;;  %v5312_v61 = vmax.f32 %v5248_v43, 0.0  ;;  %v15217_v32 = vpop.f32.mrf.mxu1 }
 0x303   :  { %v4867_v30 = vpop.f32.mrf.mxu0 }
 0x304   :  { %v5250_v15 = vadd.f32 %v15201_v31, %v5179_v27  ;;  %v5178_v25 = vadd.f32 %v4867_v30, %v4706_v45  ;;  %v5311_v21 = vmax.f32 %v5247_v10, 0.0  ;;  %v4711_v45 = vadd.f32 %v14951_v22, %v14919_v37 }
 0x305   :  { %v11256_v51 = vpop.f32.mrf.mxu0 }
 0x306   :  { %v5314_v47 = vmax.f32 %v5250_v15, 0.0  ;;  %v5249_v63 = vadd.f32 %v15201_v31, %v5178_v25  ;;  %v5181_v41 = vadd.f32 %v11256_v51, %v4709_v11  ;;  %v4713_v11 = vadd.f32 %v14976_v29, %v14933_v56  ;;  %v15225_v15 = vpop.f32.mrf.mxu1 }
 0x307   :  { %v4877_v57 = vpop.f32.mrf.mxu0 }
 0x308   :  { %v5376_v28 = vmax.f32 %v5312_v61, %v5314_v47  ;;  %v5313_v6 = vmax.f32 %v5249_v63, 0.0  ;;  %v5180_v27 = vadd.f32 %v4877_v57, %v4708_v12  ;;  %v5252_v25 = vadd.f32 %v15201_v31, %v5181_v41  ;;  %v15237_v61 = vpop.f32.mrf.mxu1 }
 0x309   :  { %v11259_v13 = vpop.f32.mrf.mxu0 }
 0x30a   :  { %v5598_v42 = vrot.slane %v5376_v28, 1  ;;  %v5375_v16 = vmax.f32 %v5311_v21, %v5313_v6  ;;  %v5183_v43 = vadd.f32 %v11259_v13, %v4711_v45  ;;  %v5251_v10 = vadd.f32 %v15201_v31, %v5180_v27 }
 0x30b   :  { %v4887_v30 = vpop.f32.mrf.mxu0  ;;  %v4712_v6 = vadd.f32 %v14989_v34, %v14940_v26  ;;  %v5316_v47 = vmax.f32 %v5252_v25, 0.0  ;;  %v4715_v26 = vadd.f32 %v15003_v38, %v14947_v48  ;;  %v4714_v45 = vadd.f32 %v15014_v46, %v14954_v54  ;;  %v15248_v38 = vpop.f32.mrf.mxu1 }
 0x30c   :  { %v5630_v37 = vmax.f32 %v5376_v28, %v5598_v42  ;;  %v5465_v22 = vrot.slane %v5375_v16, 1  ;;  %v5182_v51 = vadd.f32 %v4887_v30, %v4710_v62  ;;  %v5254_v4 = vadd.f32 %v15201_v31, %v5183_v43 }
 0x30d   :  { %v11262_v35 = vpop.f32.mrf.mxu0  ;;  %v5315_v34 = vmax.f32 %v5251_v10, 0.0  ;;  %v4717_v54 = vadd.f32 %v15025_v9, %v14959_v59  ;;  %v4716_v46 = vadd.f32 %v15037_v55, %v14966_v60 }
 0x30e   :  { %5646 = vst.msk [vmem:[#allocation3 + $0x15] sm:$0x1] %vm5514_vm7, %v5630_v37  ;;  %v5497_v56 = vmax.f32 %v5375_v16, %v5465_v22  ;;  %v5253_v29 = vadd.f32 %v15201_v31, %v5182_v51  ;;  %v5185_v12 = vadd.f32 %v11262_v35, %v4713_v11  ;;  %v5318_v63 = vmax.f32 %v5254_v4, 0.0 }
 0x30f   :  { %5662 = vst.msk [vmem:[#allocation3 + $0x14] sm:$0x4] %vm5531_vm8, %v5630_v37  ;;  %v4897_v41 = vpop.f32.mrf.mxu0 }
 0x310   :  { %5678 = vst.msk [vmem:[#allocation3 + $0x13] sm:$0x10] %vm5548_vm9, %v5630_v37  ;;  %5549 = vst.msk [vmem:[#allocation3 + $0xf] sm:$0x10] %vm5548_vm9, %v5497_v56  ;;  %v5317_v57 = vmax.f32 %v5253_v29, 0.0  ;;  %v5184_v21 = vadd.f32 %v4897_v41, %v4712_v6  ;;  %v5378_v28 = vmax.f32 %v5316_v47, %v5318_v63  ;;  %v5256_v62 = vadd.f32 %v15201_v31, %v5185_v12  ;;  %v17526_v29 = vld [vmem:[#allocation25_spill] sm:$0xff]  ;;  %v15265_v63 = vpop.f32.mrf.mxu1 }
 0x311   :  { %5694 = vst.msk [vmem:[#allocation3 + $0x12] sm:$0x40] %vm5565_vm10, %v5630_v37  ;;  %5566 = vst.msk [vmem:[#allocation3 + $0xe] sm:$0x40] %vm5565_vm10, %v5497_v56  ;;  %v11265_v27 = vpop.f32.mrf.mxu0  ;;  %v15255_v37 = vld [vmem:[%s16625_s3 + $0x30] sm:$0xff]  ;;  %v17527_v12 = vld [vmem:[#allocation138_spill] sm:$0xff] }
 0x312   :  { %5515 = vst.msk [vmem:[#allocation3 + $0x11] sm:$0x1] %vm5514_vm7, %v5497_v56  ;;  %v5377_v13 = vmax.f32 %v5315_v34, %v5317_v57  ;;  %v5187_v48 = vadd.f32 %v11265_v27, %v4715_v26  ;;  %v5599_v42 = vrot.slane %v5378_v28, 1  ;;  %v5255_v25 = vadd.f32 %v15201_v31, %v5184_v21  ;;  %11500 = vmatprep.subr.mxu0 %v15255_v37 }
 0x313   :  { %5532 = vst.msk [vmem:[#allocation3 + $0x10] sm:$0x4] %vm5531_vm8, %v5497_v56  ;;  %v4907_v16 = vpop.f32.mrf.mxu0  ;;  %v5320_v4 = vmax.f32 %v5256_v62, 0.0  ;;  %v3780_v47 = vadd.f32 %v17527_v12, %v17526_v29  ;;  %v4719_v57 = vadd.f32 %v15050_v58, %v14971_v52  ;;  %v17531_v12 = vld [vmem:[#allocation72_spill] sm:$0xff] }
 0x314   :  { %v5466_v11 = vrot.slane %v5377_v13, 1  ;;  %v5258_v43 = vadd.f32 %v15201_v31, %v5187_v48  ;;  %v5186_v30 = vadd.f32 %v4907_v16, %v4714_v45  ;;  %v5631_v22 = vmax.f32 %v5378_v28, %v5599_v42  ;;  %v15282_v16 = vpop.f32.mrf.mxu1 }
 0x315   :  { %v11268_v10 = vpop.f32.mrf.mxu0  ;;  %v5319_v55 = vmax.f32 %v5255_v25, 0.0  ;;  %v4246_v45 = vadd.f32 %v14991_v3, %v3780_v47  ;;  %v4721_v42 = vadd.f32 %v15070_v19, %v14985_v18  ;;  %v9532_v3 = vld [vmem:[%s16625_s3 + $0x10] sm:$0xff] }
 0x316   :  { %v5498_v51 = vmax.f32 %v5377_v13, %v5466_v11  ;;  %v5322_v35 = vmax.f32 %v5258_v43, 0.0  ;;  %v5257_v6 = vadd.f32 %v15201_v31, %v5186_v30  ;;  %5647 = vst.msk [vmem:[#allocation3 + $0x25] sm:$0x1] %vm5514_vm7, %v5631_v22  ;;  %v5189_v60 = vadd.f32 %v11268_v10, %v4717_v54  ;;  %v17528_v18 = vld [vmem:[#allocation137_spill] sm:$0xff] }
 0x317   :  { %5663 = vst.msk [vmem:[#allocation3 + $0x24] sm:$0x4] %vm5531_vm8, %v5631_v22  ;;  %v4917_v59 = vpop.f32.mrf.mxu0  ;;  %v4718_v13 = vadd.f32 %v15062_v17, %v14980_v23  ;;  %v17529_v19 = vld [vmem:[#allocation29_spill] sm:$0xff]  ;;  %v4720_v10 = vadd.f32 %v15077_v33, %v4246_v45  ;;  %v15305_v33 = vpop.f32.mrf.mxu1 }
 0x318   :  { %v5713_v56 = vld [vmem:[#allocation3 + $0x18] sm:$0x3]  ;;  %5679 = vst.msk [vmem:[#allocation3 + $0x23] sm:$0x10] %vm5548_vm9, %v5631_v22  ;;  %5550 = vst.msk [vmem:[#allocation3 + $0x1f] sm:$0x10] %vm5548_vm9, %v5498_v51  ;;  %v5380_v41 = vmax.f32 %v5320_v4, %v5322_v35  ;;  %v5188_v34 = vadd.f32 %v4917_v59, %v4716_v46  ;;  %v5260_v11 = vadd.f32 %v15201_v31, %v5189_v60 }
 0x319   :  { %5695 = vst.msk [vmem:[#allocation3 + $0x22] sm:$0x40] %vm5565_vm10, %v5631_v22  ;;  %5567 = vst.msk [vmem:[#allocation3 + $0x1e] sm:$0x40] %vm5565_vm10, %v5498_v51  ;;  %v5321_v26 = vmax.f32 %v5257_v6, 0.0  ;;  %v11271_v21 = vpop.f32.mrf.mxu0  ;;  %v5787_v27 = vrot.slane %v5713_v56, 1  ;;  %v3782_v54 = vadd.f32 %v17529_v19, %v17528_v18 }
 0x31a   :  { %v5712_v9 = vld [vmem:[#allocation3 + $0x10] sm:$0xff]  ;;  %5516 = vst.msk [vmem:[#allocation3 + $0x21] sm:$0x1] %vm5514_vm7, %v5498_v51  ;;  %v5600_v62 = vrot.slane %v5380_v41, 1  ;;  %v5191_v25 = vadd.f32 %v11271_v21, %v4719_v57  ;;  %v5259_v23 = vadd.f32 %v15201_v31, %v5188_v34  ;;  %v17530_v56 = vld [vmem:[#allocation95_spill] sm:$0xff]  ;;  %v5324_v47 = vmax.f32 %v5260_v11, 0.0 }
 0x31b   :  { %5533 = vst.msk [vmem:[#allocation3 + $0x20] sm:$0x4] %vm5531_vm8, %v5498_v51  ;;  %v5786_v28 = vrot.slane %v5712_v9, 1  ;;  %v5379_v48 = vmax.f32 %v5319_v55, %v5321_v26  ;;  %v4927_v43 = vpop.f32.mrf.mxu0  ;;  %v4248_v29 = vadd.f32 %v17530_v56, %v3782_v54  ;;  %v17532_v57 = vld [vmem:[#allocation26_spill] sm:$0xff]  ;;  %v17534_v11 = vld [vmem:[#allocation96_spill] sm:$0xff] }
 0x31c   :  { %v5632_v58 = vmax.f32 %v5380_v41, %v5600_v62  ;;  %v5190_v17 = vadd.f32 %v4927_v43, %v4718_v13  ;;  %v5262_v46 = vadd.f32 %v15201_v31, %v5191_v25  ;;  %v5323_v55 = vmax.f32 %v5259_v23, 0.0  ;;  %v15316_v43 = vpop.f32.mrf.mxu1  ;;  %v17536_v19 = vld [vmem:[#allocation34_spill] sm:$0xff] }
 0x31d   :  { %v5788_v52 = vsel %vm477_vm3, %v5786_v28, %v5787_v27  ;;  %v5467_v30 = vrot.slane %v5379_v48, 1  ;;  %v11274_v22 = vpop.f32.mrf.mxu0  ;;  %v4722_v13 = vadd.f32 %v15091_v39, %v4248_v29  ;;  %v17535_v39 = vld [vmem:[#allocation27_spill] sm:$0xff] }
 0x31e   :  { %11347 = vmatmul.mubr.msk.f32.vlgmr.msra.gmra.mxu1 %vm5407_vm5, %v5788_v52  ;;  %11450 = vmatprep.mubr.msk.f32.mxu0 %vm5407_vm5, %v5788_v52  ;;  %5648 = vst.msk [vmem:[#allocation3 + $0x35] sm:$0x1] %vm5514_vm7, %v5632_v58  ;;  %v5261_v4 = vadd.f32 %v15201_v31, %v5190_v17  ;;  %v5193_v35 = vadd.f32 %v11274_v22, %v4721_v42  ;;  %v5326_v60 = vmax.f32 %v5262_v46, 0.0  ;;  %v17537_v46 = vld [vmem:[#allocation77_spill] sm:$0xff] }
 0x31f   :  { %11371 = vmatpush3.msra.mxu1 %v15182_v20  ;;  %5664 = vst.msk [vmem:[#allocation3 + $0x34] sm:$0x4] %vm5531_vm8, %v5632_v58  ;;  %v5499_v51 = vmax.f32 %v5379_v48, %v5467_v30  ;;  %v4723_v20 = vadd.f32 %v15084_v14, %v17531_v12  ;;  %v4937_v59 = vpop.f32.mrf.mxu0  ;;  %v17533_v14 = vld [vmem:[#allocation30_spill] sm:$0xff]  ;;  %v3786_v54 = vadd.f32 %v17536_v19, %v17535_v39 }
 0x320   :  { %5680 = vst.msk [vmem:[#allocation3 + $0x33] sm:$0x10] %vm5548_vm9, %v5632_v58  ;;  %v5715_v6 = vld [vmem:[#allocation3 + $0x28] sm:$0x3]  ;;  %11396 = vmatprep.subr.mxu1 %v9532_v3  ;;  %v5325_v41 = vmax.f32 %v5261_v4, 0.0  ;;  %v5192_v26 = vadd.f32 %v4937_v59, %v4720_v10  ;;  %v3784_v21 = vadd.f32 %v17533_v14, %v17532_v57  ;;  %v5382_v28 = vmax.f32 %v5324_v47, %v5326_v60  ;;  %v17540_v59 = vld [vmem:[#allocation98_spill] sm:$0xff] }
 0x321   :  { %5696 = vst.msk [vmem:[#allocation3 + $0x32] sm:$0x40] %vm5565_vm10, %v5632_v58  ;;  %5568 = vst.msk [vmem:[#allocation3 + $0x2e] sm:$0x40] %vm5565_vm10, %v5499_v51  ;;  %v11277_v27 = vpop.f32.mrf.mxu0  ;;  %v5790_v45 = vrot.slane %v5715_v6, 1  ;;  %v5264_v48 = vadd.f32 %v15201_v31, %v5193_v35  ;;  %v4725_v22 = vadd.f32 %v15098_v49, %v17537_v46  ;;  %v17539_v47 = vld [vmem:[#allocation35_spill] sm:$0xff] }
 0x322   :  { %v5714_v9 = vld [vmem:[#allocation3 + $0x20] sm:$0xff]  ;;  %5517 = vst.msk [vmem:[#allocation3 + $0x31] sm:$0x1] %vm5514_vm7, %v5499_v51  ;;  %v5381_v62 = vmax.f32 %v5323_v55, %v5325_v41  ;;  %v5195_v42 = vadd.f32 %v11277_v27, %v4723_v20  ;;  %v4250_v25 = vadd.f32 %v17534_v11, %v3784_v21  ;;  %v5601_v52 = vrot.slane %v5382_v28, 1  ;;  %v15337_v55 = vpop.f32.mrf.mxu1  ;;  %v17541_v14 = vld [vmem:[#allocation80_spill] sm:$0xff] }
 0x323   :  { %5534 = vst.msk [vmem:[#allocation3 + $0x30] sm:$0x4] %vm5531_vm8, %v5499_v51  ;;  %v5789_v34 = vrot.slane %v5714_v9, 1  ;;  %v4947_v3 = vpop.f32.mrf.mxu0  ;;  %v5263_v23 = vadd.f32 %v15201_v31, %v5192_v26  ;;  %v5328_v6 = vmax.f32 %v5264_v48, 0.0  ;;  %v17538_v20 = vld [vmem:[#allocation139_spill] sm:$0xff]  ;;  %v4252_v9 = vadd.f32 %v17540_v59, %v3786_v54 }
 0x324   :  { %5551 = vst.msk [vmem:[#allocation3 + $0x2f] sm:$0x10] %vm5548_vm9, %v5499_v51  ;;  %v5468_v30 = vrot.slane %v5381_v62, 1  ;;  %v5266_v17 = vadd.f32 %v15201_v31, %v5195_v42  ;;  %v5194_v18 = vadd.f32 %v4947_v3, %v4722_v13  ;;  %v4724_v10 = vadd.f32 %v15105_v5, %v4250_v25  ;;  %v17542_v13 = vld [vmem:[#allocation101_spill] sm:$0xff]  ;;  %v17543_v25 = vld [vmem:[#allocation99_spill] sm:$0xff]  ;;  %v15353_v3 = vpop.f32.mrf.mxu1 }
 0x325   :  { %v15319_v58 = vsel %vm477_vm3, %v5789_v34, %v5790_v45  ;;  %v5633_v51 = vmax.f32 %v5382_v28, %v5601_v52  ;;  %v11280_v4 = vpop.f32.mrf.mxu0  ;;  %v3788_v60 = vadd.f32 %v17539_v47, %v17538_v20  ;;  %v5327_v41 = vmax.f32 %v5263_v23, 0.0 }
 0x326   :  { %11349 = vmatprep.mubr.msk.f32.mxu1 %vm5407_vm5, %v15319_v58  ;;  %11451 = vmatmul.mubr.msk.f32.vlgmr.msra.gmra.mxu0 %vm5407_vm5, %v15319_v58  ;;  %v5500_v35 = vmax.f32 %v5381_v62, %v5468_v30  ;;  %v5330_v56 = vmax.f32 %v5266_v17, 0.0  ;;  %v5265_v29 = vadd.f32 %v15201_v31, %v5194_v18  ;;  %v5197_v49 = vadd.f32 %v11280_v4, %v4725_v22  ;;  %v15376_v47 = vpop.f32.mrf.mxu1 }
 0x327   :  { %11501 = vmatpush3.msra.mxu0 %v15255_v37  ;;  %5649 = vst.msk [vmem:[#allocation3 + $0x45] sm:$0x1] %vm5514_vm7, %v5633_v51  ;;  %v4957_v5 = vpop.f32.mrf.mxu0  ;;  %v4727_v21 = vadd.f32 %v15112_v7, %v17541_v14  ;;  %v4254_v62 = vadd.f32 %v17542_v13, %v3788_v60  ;;  %v4726_v48 = vadd.f32 %v15119_v50, %v4252_v9  ;;  %v17544_v50 = vld [vmem:[#allocation141_spill] sm:$0xff] }
 0x328   :  { %v5717_v12 = vld [vmem:[#allocation3 + $0x38] sm:$0x3]  ;;  %5665 = vst.msk [vmem:[#allocation3 + $0x44] sm:$0x4] %vm5531_vm8, %v5633_v51  ;;  %5535 = vst.msk [vmem:[#allocation3 + $0x40] sm:$0x4] %vm5531_vm8, %v5500_v35  ;;  %v5384_v26 = vmax.f32 %v5328_v6, %v5330_v56  ;;  %v5196_v57 = vadd.f32 %v4957_v5, %v4724_v10  ;;  %v4729_v52 = vadd.f32 %v15126_v1, %v17543_v25 }
 0x329   :  { %5681 = vst.msk [vmem:[#allocation3 + $0x43] sm:$0x10] %vm5548_vm9, %v5633_v51  ;;  %5552 = vst.msk [vmem:[#allocation3 + $0x3f] sm:$0x10] %vm5548_vm9, %v5500_v35  ;;  %v5329_v34 = vmax.f32 %v5265_v29, 0.0  ;;  %v11283_v28 = vpop.f32.mrf.mxu0  ;;  %v5793_v45 = vrot.slane %v5717_v12, 1  ;;  %v5268_v30 = vadd.f32 %v15201_v31, %v5197_v49 }
 0x32a   :  { %5697 = vst.msk [vmem:[#allocation3 + $0x42] sm:$0x40] %vm5565_vm10, %v5633_v51  ;;  %5569 = vst.msk [vmem:[#allocation3 + $0x3e] sm:$0x40] %vm5565_vm10, %v5500_v35  ;;  %v5602_v42 = vrot.slane %v5384_v26, 1  ;;  %v5199_v23 = vadd.f32 %v11283_v28, %v4727_v21  ;;  %v5267_v19 = vadd.f32 %v15201_v31, %v5196_v57  ;;  %v17545_v1 = vld [vmem:[#allocation38_spill] sm:$0xff]  ;;  %v4728_v51 = vadd.f32 %v15133_v2, %v4254_v62  ;;  %v15390_v62 = vpop.f32.mrf.mxu1 }
 0x32b   :  { %v5716_v37 = vld [vmem:[#allocation3 + $0x30] sm:$0xff]  ;;  %5518 = vst.msk [vmem:[#allocation3 + $0x41] sm:$0x1] %vm5514_vm7, %v5500_v35  ;;  %v5383_v11 = vmax.f32 %v5327_v41, %v5329_v34  ;;  %v4967_v17 = vpop.f32.mrf.mxu0  ;;  %v3790_v46 = vadd.f32 %v17545_v1, %v17544_v50  ;;  %v17546_v12 = vld [vmem:[#allocation102_spill] sm:$0xff]  ;;  %v5332_v2 = vmax.f32 %v5268_v30, 0.0  ;;  %v17548_v41 = vld [vmem:[#allocation39_spill] sm:$0xff] }
 0x32c   :  { %v5792_v27 = vrot.slane %v5716_v37, 1  ;;  %v5634_v18 = vmax.f32 %v5384_v26, %v5602_v42  ;;  %v5198_v54 = vadd.f32 %v4967_v17, %v4726_v48  ;;  %v5270_v22 = vadd.f32 %v15201_v31, %v5199_v23  ;;  %v17547_v37 = vld [vmem:[#allocation142_spill] sm:$0xff]  ;;  %v17550_v17 = vld [vmem:[#allocation41_spill] sm:$0xff] }
 0x32d   :  { %v5469_v39 = vrot.slane %v5383_v11, 1  ;;  %v11286_v10 = vpop.f32.mrf.mxu0  ;;  %v4256_v29 = vadd.f32 %v15052_v24, %v3790_v46  ;;  %v4731_v20 = vadd.f32 %v15140_v0, %v17546_v12  ;;  %v5331_v49 = vmax.f32 %v5267_v19, 0.0 }
 0x32e   :  { %v15357_v7 = vsel %vm477_vm3, %v5792_v27, %v5793_v45  ;;  %5650 = vst.msk [vmem:[#allocation3 + $0x55] sm:$0x1] %vm5514_vm7, %v5634_v18  ;;  %v5269_v35 = vadd.f32 %v15201_v31, %v5198_v54  ;;  %v5201_v6 = vadd.f32 %v11286_v10, %v4729_v52  ;;  %v5334_v60 = vmax.f32 %v5270_v22, 0.0 }
 0x32f   :  { %11350 = vmatmul.mubr.msk.f32.gmra.mxu1 %vm5407_vm5, %v15357_v7  ;;  %11453 = vmatprep.mubr.msk.f32.mxu0 %vm5407_vm5, %v15357_v7  ;;  %5666 = vst.msk [vmem:[#allocation3 + $0x54] sm:$0x4] %vm5531_vm8, %v5634_v18  ;;  %v5501_v4 = vmax.f32 %v5383_v11, %v5469_v39  ;;  %v4977_v59 = vpop.f32.mrf.mxu0  ;;  %v3792_v26 = vadd.f32 %v17548_v41, %v17547_v37  ;;  %v17551_v39 = vld [vmem:[#allocation103_spill] sm:$0xff] }
 0x330   :  { %5682 = vst.msk [vmem:[#allocation3 + $0x53] sm:$0x10] %vm5548_vm9, %v5634_v18  ;;  %v5333_v24 = vmax.f32 %v5269_v35, 0.0  ;;  %v5200_v5 = vadd.f32 %v4977_v59, %v4728_v51  ;;  %v5386_v34 = vmax.f32 %v5332_v2, %v5334_v60  ;;  %v4730_v21 = vadd.f32 %v15147_v53, %v4256_v29  ;;  %v17549_v53 = vld [vmem:[#allocation144_spill] sm:$0xff]  ;;  %v17552_v35 = vld [vmem:[#allocation145_spill] sm:$0xff] }
 0x331   :  { %5698 = vst.msk [vmem:[#allocation3 + $0x52] sm:$0x40] %vm5565_vm10, %v5634_v18  ;;  %v5719_v56 = vld [vmem:[#allocation3 + $0x48] sm:$0x3]  ;;  %5570 = vst.msk [vmem:[#allocation3 + $0x4e] sm:$0x40] %vm5565_vm10, %v5501_v4  ;;  %v11289_v57 = vpop.f32.mrf.mxu0  ;;  %v5272_v27 = vadd.f32 %v15201_v31, %v5201_v6  ;;  %v4258_v13 = vadd.f32 %v15064_v44, %v3792_v26  ;;  %v3794_v18 = vadd.f32 %v17550_v17, %v17549_v53 }
 0x332   :  { %v15378_v9 = vld [vmem:[#allocation3 + $0x40] sm:$0xff]  ;;  %5519 = vst.msk [vmem:[#allocation3 + $0x51] sm:$0x1] %vm5514_vm7, %v5501_v4  ;;  %v5796_v14 = vrot.slane %v5719_v56, 1  ;;  %v5385_v28 = vmax.f32 %v5331_v49, %v5333_v24  ;;  %v5203_v45 = vadd.f32 %v11289_v57, %v4731_v20  ;;  %v5603_v48 = vrot.slane %v5386_v34, 1  ;;  %v17553_v6 = vld [vmem:[#allocation57_spill] sm:$0xff]  ;;  %v15416_v20 = vpop.f32.mrf.mxu1 }
 0x333   :  { %5536 = vst.msk [vmem:[#allocation3 + $0x50] sm:$0x4] %vm5531_vm8, %v5501_v4  ;;  %v5795_v0 = vrot.slane %v15378_v9, 1  ;;  %v4987_v42 = vpop.f32.mrf.mxu0  ;;  %v5271_v52 = vadd.f32 %v15201_v31, %v5200_v5  ;;  %v15404_v44 = vld [vmem:[%s16625_s3 + $0x40] sm:$0xff]  ;;  %v4733_v19 = vadd.f32 %v15154_v36, %v17551_v39  ;;  %v4732_v54 = vadd.f32 %v15161_v8, %v4258_v13  ;;  %v17554_v29 = vld [vmem:[#allocation105_spill] sm:$0xff]  ;;  %v17555_v5 = vld [vmem:[#allocation104_spill] sm:$0xff] }
 0x334   :  { %5553 = vst.msk [vmem:[#allocation3 + $0x4f] sm:$0x10] %vm5548_vm9, %v5501_v4  ;;  %v5470_v25 = vrot.slane %v5385_v28, 1  ;;  %v5274_v30 = vadd.f32 %v15201_v31, %v5203_v45  ;;  %v5202_v23 = vadd.f32 %v4987_v42, %v4730_v21  ;;  %v5635_v50 = vmax.f32 %v5386_v34, %v5603_v48  ;;  %11552 = vmatprep.subr.mxu0 %v15404_v44  ;;  %v17556_v34 = vld [vmem:[#allocation107_spill] sm:$0xff]  ;;  %v17558_v45 = vld [vmem:[#allocation106_spill] sm:$0xff]  ;;  %v17559_v13 = vld [vmem:[#allocation17_spill] sm:$0xff]  ;;  %v15435_v42 = vpop.f32.mrf.mxu1 }
 0x335   :  { %v15393_v11 = vsel %vm477_vm3, %v5795_v0, %v5796_v14  ;;  %v11292_v1 = vpop.f32.mrf.mxu0  ;;  %v5336_v22 = vmax.f32 %v5272_v27, 0.0  ;;  %v3796_v56 = vadd.f32 %v17553_v6, %v17552_v35  ;;  %v4260_v12 = vadd.f32 %v17554_v29, %v3794_v18  ;;  %v17557_v14 = vld [vmem:[#allocation28_spill] sm:$0xff]  ;;  %v17560_v39 = vld [vmem:[#allocation53_spill] sm:$0xff]  ;;  %v17564_v29 = vld [vmem:[#allocation7_spill] sm:$0xff] }
 0x336   :  { %11352 = vmatprep.mubr.msk.f32.mxu1 %vm5407_vm5, %v15393_v11  ;;  %11454 = vmatmul.mubr.msk.f32.gmra.mxu0 %vm5407_vm5, %v15393_v11  ;;  %v5502_v46 = vmax.f32 %v5385_v28, %v5470_v25  ;;  %v5338_v10 = vmax.f32 %v5274_v30, 0.0  ;;  %v5273_v51 = vadd.f32 %v15201_v31, %v5202_v23  ;;  %5651 = vst.msk [vmem:[#allocation3 + $0x65] sm:$0x1] %vm5514_vm7, %v5635_v50  ;;  %v5335_v60 = vmax.f32 %v5271_v52, 0.0  ;;  %v17563_v6 = vld [vmem:[#allocation108_spill] sm:$0xff] }
 0x337   :  { %5667 = vst.msk [vmem:[#allocation3 + $0x64] sm:$0x4] %vm5531_vm8, %v5635_v50  ;;  %v5205_v36 = vadd.f32 %v11292_v1, %v4733_v19  ;;  %v4997_v8 = vpop.f32.mrf.mxu0  ;;  %v4735_v0 = vadd.f32 %v15168_v40, %v17555_v5  ;;  %v4262_v57 = vadd.f32 %v17556_v34, %v3796_v56  ;;  %v4734_v21 = vadd.f32 %v17557_v14, %v4260_v12  ;;  %v17561_v19 = vld [vmem:[#allocation50_spill] sm:$0xff]  ;;  %v17565_v12 = vld [vmem:[#allocation33_spill] sm:$0xff]  ;;  %v17568_v14 = vld [vmem:[#allocation44_spill] sm:$0xff] }
 0x338   :  { %v5721_v4 = vld [vmem:[#allocation3 + $0x58] sm:$0x3]  ;;  %5683 = vst.msk [vmem:[#allocation3 + $0x63] sm:$0x10] %vm5548_vm9, %v5635_v50  ;;  %5554 = vst.msk [vmem:[#allocation3 + $0x5f] sm:$0x10] %vm5548_vm9, %v5502_v46  ;;  %v5388_v59 = vmax.f32 %v5336_v22, %v5338_v10  ;;  %v5204_v24 = vadd.f32 %v4997_v8, %v4732_v54  ;;  %v4737_v48 = vadd.f32 %v17559_v13, %v17558_v45  ;;  %v15460_v8 = vpop.f32.mrf.mxu1 }
 0x339   :  { %5699 = vst.msk [vmem:[#allocation3 + $0x62] sm:$0x40] %vm5565_vm10, %v5635_v50  ;;  %5571 = vst.msk [vmem:[#allocation3 + $0x5e] sm:$0x40] %vm5565_vm10, %v5502_v46  ;;  %v5337_v49 = vmax.f32 %v5273_v51, 0.0  ;;  %v11295_v37 = vpop.f32.mrf.mxu0  ;;  %v5799_v26 = vrot.slane %v5721_v4, 1  ;;  %v5276_v25 = vadd.f32 %v15201_v31, %v5205_v36  ;;  %v3798_v54 = vadd.f32 %v17561_v19, %v17560_v39 }
 0x33a   :  { %5520 = vst.msk [vmem:[#allocation3 + $0x61] sm:$0x1] %vm5514_vm7, %v5502_v46  ;;  %v5604_v28 = vrot.slane %v5388_v59, 1  ;;  %v5207_v52 = vadd.f32 %v11295_v37, %v4735_v0  ;;  %v5275_v17 = vadd.f32 %v15201_v31, %v5204_v24  ;;  %v4739_v36 = vadd.f32 %v17565_v12, %v17564_v29  ;;  %v17567_v34 = vld [vmem:[#allocation146_spill] sm:$0xff]  ;;  %v17571_v39 = vld [vmem:[#allocation109_spill] sm:$0xff] }
 0x33b   :  { %v15422_v2 = vld [vmem:[#allocation3 + $0x50] sm:$0xff]  ;;  %5537 = vst.msk [vmem:[#allocation3 + $0x60] sm:$0x4] %vm5531_vm8, %v5502_v46  ;;  %v5387_v27 = vmax.f32 %v5335_v60, %v5337_v49  ;;  %v5007_v30 = vpop.f32.mrf.mxu0  ;;  %v17562_v46 = vld [vmem:[#allocation18_spill] sm:$0xff]  ;;  %v4264_v56 = vadd.f32 %v17563_v6, %v3798_v54  ;;  %v5340_v60 = vmax.f32 %v5276_v25, 0.0  ;;  %v4741_v19 = vadd.f32 %v15225_v15, %v17571_v39  ;;  %v15483_v54 = vpop.f32.mrf.mxu1 }
 0x33c   :  { %v5798_v41 = vrot.slane %v15422_v2, 1  ;;  %v5636_v23 = vmax.f32 %v5388_v59, %v5604_v28  ;;  %v5206_v18 = vadd.f32 %v5007_v30, %v4734_v21  ;;  %v5278_v50 = vadd.f32 %v15201_v31, %v5207_v52  ;;  %v17569_v21 = vld [vmem:[#allocation55_spill] sm:$0xff] }
 0x33d   :  { %v5471_v53 = vrot.slane %v5387_v27, 1  ;;  %v11298_v1 = vpop.f32.mrf.mxu0  ;;  %v4736_v22 = vadd.f32 %v17562_v46, %v4262_v57  ;;  %v5339_v5 = vmax.f32 %v5275_v17, 0.0  ;;  %v3802_v28 = vadd.f32 %v17569_v21, %v17568_v14  ;;  %v17570_v17 = vld [vmem:[#allocation110_spill] sm:$0xff] }
 0x33e   :  { %v15439_v40 = vsel %vm477_vm3, %v5798_v41, %v5799_v26  ;;  %5652 = vst.msk [vmem:[#allocation3 + $0x75] sm:$0x1] %vm5514_vm7, %v5636_v23  ;;  %v5277_v51 = vadd.f32 %v15201_v31, %v5206_v18  ;;  %v5209_v4 = vadd.f32 %v11298_v1, %v4737_v48  ;;  %v5342_v59 = vmax.f32 %v5278_v50, 0.0  ;;  %v17566_v26 = vld [vmem:[#allocation42_spill] sm:$0xff] }
 0x33f   :  { %11353 = vmatmul.mubr.msk.f32.gmra.mxu1 %vm5407_vm5, %v15439_v40  ;;  %11456 = vmatprep.mubr.msk.f32.mxu0 %vm5407_vm5, %v15439_v40  ;;  %5668 = vst.msk [vmem:[#allocation3 + $0x74] sm:$0x4] %vm5531_vm8, %v5636_v23  ;;  %v5503_v10 = vmax.f32 %v5387_v27, %v5471_v53  ;;  %v5017_v49 = vpop.f32.mrf.mxu0  ;;  %v3800_v57 = vadd.f32 %v17567_v34, %v17566_v26  ;;  %v15478_v53 = vld [vmem:[#allocation3 + $0xa8] sm:$0x3]  ;;  %v15503_v34 = vpop.f32.mrf.mxu1 }
 0x340   :  { %5684 = vst.msk [vmem:[#allocation3 + $0x73] sm:$0x10] %vm5548_vm9, %v5636_v23  ;;  %v15455_v35 = vld [vmem:[#allocation3 + $0x68] sm:$0x3]  ;;  %v5341_v0 = vmax.f32 %v5277_v51, 0.0  ;;  %v5208_v37 = vadd.f32 %v5017_v49, %v4736_v22  ;;  %v5390_v27 = vmax.f32 %v5340_v60, %v5342_v59  ;;  %v4738_v48 = vadd.f32 %v15217_v32, %v4264_v56 }
 0x341   :  { %5700 = vst.msk [vmem:[#allocation3 + $0x72] sm:$0x40] %vm5565_vm10, %v5636_v23  ;;  %5572 = vst.msk [vmem:[#allocation3 + $0x6e] sm:$0x40] %vm5565_vm10, %v5503_v10  ;;  %v11301_v45 = vpop.f32.mrf.mxu0  ;;  %v5802_v13 = vrot.slane %v15455_v35, 1  ;;  %v5280_v52 = vadd.f32 %v15201_v31, %v5209_v4  ;;  %v15476_v23 = vld [vmem:[#allocation3 + $0xa0] sm:$0xff]  ;;  %v4266_v18 = vadd.f32 %v17570_v17, %v3800_v57 }
 0x342   :  { %v15462_v24 = vld [vmem:[#allocation3 + $0x60] sm:$0xff]  ;;  %5521 = vst.msk [vmem:[#allocation3 + $0x71] sm:$0x1] %vm5514_vm7, %v5503_v10  ;;  %v5389_v25 = vmax.f32 %v5339_v5, %v5341_v0  ;;  %v5211_v30 = vadd.f32 %v11301_v45, %v4739_v36  ;;  %v5605_v50 = vrot.slane %v5390_v27, 1  ;;  %v5279_v22 = vadd.f32 %v15201_v31, %v5208_v37  ;;  %v17572_v5 = vld [vmem:[#allocation65_spill] sm:$0xff]  ;;  %v17573_v0 = vld [vmem:[#allocation48_spill] sm:$0xff] }
 0x343   :  { %5538 = vst.msk [vmem:[#allocation3 + $0x70] sm:$0x4] %vm5531_vm8, %v5503_v10  ;;  %v5801_v41 = vrot.slane %v15462_v24, 1  ;;  %v5027_v1 = vpop.f32.mrf.mxu0  ;;  %v4740_v15 = vadd.f32 %v15237_v61, %v4266_v18  ;;  %v5807_v56 = vrot.slane %v15476_v23, 1  ;;  %v5808_v29 = vrot.slane %v15478_v53, 1 }
 0x344   :  { %5555 = vst.msk [vmem:[#allocation3 + $0x6f] sm:$0x10] %vm5548_vm9, %v5503_v10  ;;  %v5472_v32 = vrot.slane %v5389_v25, 1  ;;  %v5282_v10 = vadd.f32 %v15201_v31, %v5211_v30  ;;  %v5210_v51 = vadd.f32 %v5027_v1, %v4738_v48  ;;  %v5637_v4 = vmax.f32 %v5390_v27, %v5605_v50 }
 0x345   :  { %v15486_v46 = vsel %vm477_vm3, %v5801_v41, %v5802_v13  ;;  %v11304_v6 = vpop.f32.mrf.mxu0  ;;  %v5344_v36 = vmax.f32 %v5280_v52, 0.0  ;;  %v3804_v37 = vadd.f32 %v17573_v0, %v17572_v5  ;;  %v17574_v41 = vld [vmem:[#allocation112_spill] sm:$0xff]  ;;  %v5343_v21 = vmax.f32 %v5279_v22, 0.0  ;;  %v17575_v13 = vld [vmem:[#allocation114_spill] sm:$0xff] }
 0x346   :  { %11355 = vmatprep.mubr.msk.f32.mxu1 %vm5407_vm5, %v15486_v46  ;;  %11457 = vmatmul.mubr.msk.f32.gmra.mxu0 %vm5407_vm5, %v15486_v46  ;;  %v5504_v12 = vmax.f32 %v5389_v25, %v5472_v32  ;;  %v5346_v60 = vmax.f32 %v5282_v10, 0.0  ;;  %v5281_v59 = vadd.f32 %v15201_v31, %v5210_v51  ;;  %v4268_v26 = vadd.f32 %v17574_v41, %v3802_v28  ;;  %v17576_v25 = vld [vmem:[#allocation111_spill] sm:$0xff]  ;;  %v17577_v32 = vld [vmem:[#allocation113_spill] sm:$0xff]  ;;  %v15524_v10 = vpop.f32.mrf.mxu1 }
 0x347   :  { %5653 = vst.msk [vmem:[#allocation3 + $0x85] sm:$0x1] %vm5514_vm7, %v5637_v4  ;;  %v5213_v61 = vadd.f32 %v11304_v6, %v4741_v19  ;;  %v5037_v57 = vpop.f32.mrf.mxu0  ;;  %v4270_v48 = vadd.f32 %v17575_v13, %v3804_v37  ;;  %v4743_v52 = vadd.f32 %v15248_v38, %v17576_v25  ;;  %v5809_v1 = vsel %vm477_vm3, %v5807_v56, %v5808_v29  ;;  %v17579_v56 = vld [vmem:[#allocation46_spill] sm:$0xff] }
 0x348   :  { %v15498_v49 = vld [vmem:[#allocation3 + $0x78] sm:$0x3]  ;;  %5669 = vst.msk [vmem:[#allocation3 + $0x84] sm:$0x4] %vm5531_vm8, %v5637_v4  ;;  %5539 = vst.msk [vmem:[#allocation3 + $0x80] sm:$0x4] %vm5531_vm8, %v5504_v12  ;;  %v5392_v28 = vmax.f32 %v5344_v36, %v5346_v60  ;;  %v5212_v45 = vadd.f32 %v5037_v57, %v4740_v15  ;;  %v4742_v39 = vadd.f32 %v15265_v63, %v4268_v26 }
 0x349   :  { %5685 = vst.msk [vmem:[#allocation3 + $0x83] sm:$0x10] %vm5548_vm9, %v5637_v4  ;;  %5556 = vst.msk [vmem:[#allocation3 + $0x7f] sm:$0x10] %vm5548_vm9, %v5504_v12  ;;  %v5345_v27 = vmax.f32 %v5281_v59, 0.0  ;;  %v11307_v30 = vpop.f32.mrf.mxu0  ;;  %v5805_v18 = vrot.slane %v15498_v49, 1  ;;  %v4745_v22 = vadd.f32 %v15282_v16, %v17577_v32  ;;  %v5284_v51 = vadd.f32 %v15201_v31, %v5213_v61 }
 0x34a   :  { %5701 = vst.msk [vmem:[#allocation3 + $0x82] sm:$0x40] %vm5565_vm10, %v5637_v4  ;;  %5573 = vst.msk [vmem:[#allocation3 + $0x7e] sm:$0x40] %vm5565_vm10, %v5504_v12  ;;  %v5606_v19 = vrot.slane %v5392_v28, 1  ;;  %v5215_v15 = vadd.f32 %v11307_v30, %v4743_v52  ;;  %v5283_v63 = vadd.f32 %v15201_v31, %v5212_v45  ;;  %v17578_v16 = vld [vmem:[#allocation45_spill] sm:$0xff]  ;;  %v4744_v5 = vadd.f32 %v15305_v33, %v4270_v48  ;;  %v15550_v33 = vpop.f32.mrf.mxu1 }
 0x34b   :  { %v15509_v14 = vld [vmem:[#allocation3 + $0x70] sm:$0xff]  ;;  %5522 = vst.msk [vmem:[#allocation3 + $0x81] sm:$0x1] %vm5514_vm7, %v5504_v12  ;;  %v5391_v50 = vmax.f32 %v5343_v21, %v5345_v27  ;;  %v5047_v38 = vpop.f32.mrf.mxu0  ;;  %v3806_v29 = vadd.f32 %v17579_v56, %v17578_v16  ;;  %v17581_v21 = vld [vmem:[#allocation115_spill] sm:$0xff]  ;;  %v5348_v27 = vmax.f32 %v5284_v51, 0.0 }
 0x34c   :  { %v5804_v17 = vrot.slane %v15509_v14, 1  ;;  %v5638_v6 = vmax.f32 %v5392_v28, %v5606_v19  ;;  %v5214_v36 = vadd.f32 %v5047_v38, %v4742_v39  ;;  %v5286_v60 = vadd.f32 %v15201_v31, %v5215_v15  ;;  %v17580_v61 = vld [vmem:[#allocation116_spill] sm:$0xff]  ;;  %v17584_v38 = vld [vmem:[#allocation118_spill] sm:$0xff] }
 0x34d   :  { %v5473_v12 = vrot.slane %v5391_v50, 1  ;;  %v11310_v59 = vpop.f32.mrf.mxu0  ;;  %v4272_v57 = vadd.f32 %v17580_v61, %v3806_v29  ;;  %v4747_v28 = vadd.f32 %v15316_v43, %v17581_v21  ;;  %v5347_v25 = vmax.f32 %v5283_v63, 0.0 }
 0x34e   :  { %v15528_v4 = vsel %vm477_vm3, %v5804_v17, %v5805_v18  ;;  %5654 = vst.msk [vmem:[#allocation3 + $0xb5] sm:$0x1] %vm5514_vm7, %v5638_v6  ;;  %v5285_v37 = vadd.f32 %v15201_v31, %v5214_v36  ;;  %v5217_v41 = vadd.f32 %v11310_v59, %v4745_v22  ;;  %v5350_v45 = vmax.f32 %v5286_v60, 0.0  ;;  %v17582_v17 = vld [vmem:[#allocation66_spill] sm:$0xff]  ;;  %v17583_v18 = vld [vmem:[#allocation71_spill] sm:$0xff] }
 0x34f   :  { %11356 = vmatmul.mubr.msk.f32.gmra.mxu1 %vm5407_vm5, %v15528_v4  ;;  %11459 = vmatprep.mubr.msk.f32.mxu0 %vm5407_vm5, %v15528_v4  ;;  %5670 = vst.msk [vmem:[#allocation3 + $0xb4] sm:$0x4] %vm5531_vm8, %v5638_v6  ;;  %v5505_v0 = vmax.f32 %v5391_v50, %v5473_v12  ;;  %v5057_v13 = vpop.f32.mrf.mxu0  ;;  %v3808_v39 = vadd.f32 %v17583_v18, %v17582_v17  ;;  %v15565_v12 = vpop.f32.mrf.mxu1  ;;  %v17590_v17 = vld [vmem:[#allocation120_spill] sm:$0xff] }
 0x350   :  { %11358 = vmatprep.mubr.msk.f32.mxu1 %vm5407_vm5, %v5809_v1  ;;  %5686 = vst.msk [vmem:[#allocation3 + $0xb3] sm:$0x10] %vm5548_vm9, %v5638_v6  ;;  %v5349_v52 = vmax.f32 %v5285_v37, 0.0  ;;  %v5216_v30 = vadd.f32 %v5057_v13, %v4744_v5  ;;  %v5394_v19 = vmax.f32 %v5348_v27, %v5350_v45  ;;  %v4746_v32 = vadd.f32 %v15337_v55, %v4272_v57  ;;  %v17585_v55 = vld [vmem:[#allocation140_spill] sm:$0xff]  ;;  %v17586_v5 = vld [vmem:[#allocation63_spill] sm:$0xff]  ;;  %v17587_v37 = vld [vmem:[#allocation117_spill] sm:$0xff] }
 0x351   :  { %5702 = vst.msk [vmem:[#allocation3 + $0xb2] sm:$0x40] %vm5565_vm10, %v5638_v6  ;;  %v15545_v26 = vld [vmem:[#allocation3 + $0x88] sm:$0x3]  ;;  %5574 = vst.msk [vmem:[#allocation3 + $0xae] sm:$0x40] %vm5565_vm10, %v5505_v0  ;;  %v11313_v50 = vpop.f32.mrf.mxu0  ;;  %v5288_v51 = vadd.f32 %v15201_v31, %v5217_v41  ;;  %v4274_v6 = vadd.f32 %v17584_v38, %v3808_v39  ;;  %v4749_v41 = vadd.f32 %v15353_v3, %v17587_v37  ;;  %v15585_v39 = vpop.f32.mrf.mxu1 }
 0x352   :  { %v15552_v48 = vld [vmem:[#allocation3 + $0x80] sm:$0xff]  ;;  %5523 = vst.msk [vmem:[#allocation3 + $0xb1] sm:$0x1] %vm5514_vm7, %v5505_v0  ;;  %v6602_v1 = vrot.slane %v15545_v26, 1  ;;  %v5393_v22 = vmax.f32 %v5347_v25, %v5349_v52  ;;  %v5219_v15 = vadd.f32 %v11313_v50, %v4747_v28  ;;  %v5607_v63 = vrot.slane %v5394_v19, 1 }
 0x353   :  { %5540 = vst.msk [vmem:[#allocation3 + $0xb0] sm:$0x4] %vm5531_vm8, %v5505_v0  ;;  %v6601_v43 = vrot.slane %v15552_v48, 1  ;;  %v5067_v36 = vpop.f32.mrf.mxu0  ;;  %v5287_v29 = vadd.f32 %v15201_v31, %v5216_v30  ;;  %v4748_v61 = vadd.f32 %v15376_v47, %v4274_v6  ;;  %v5352_v27 = vmax.f32 %v5288_v51, 0.0  ;;  %v17588_v52 = vld [vmem:[#allocation143_spill] sm:$0xff]  ;;  %v17589_v30 = vld [vmem:[#allocation68_spill] sm:$0xff] }
 0x354   :  { %5557 = vst.msk [vmem:[#allocation3 + $0xaf] sm:$0x10] %vm5548_vm9, %v5505_v0  ;;  %v5474_v56 = vrot.slane %v5393_v22, 1  ;;  %v5290_v60 = vadd.f32 %v15201_v31, %v5219_v15  ;;  %v5218_v59 = vadd.f32 %v5067_v36, %v4746_v32  ;;  %v3810_v0 = vadd.f32 %v17586_v5, %v17585_v55  ;;  %v17591_v51 = vld [vmem:[#allocation119_spill] sm:$0xff]  ;;  %v17592_v36 = vld [vmem:[#allocation121_spill] sm:$0xff]  ;;  %v17593_v5 = vld [vmem:[#allocation8_spill] sm:$0xff] }
 0x355   :  { %v15568_v16 = vsel %vm477_vm3, %v6601_v43, %v6602_v1  ;;  %v5639_v57 = vmax.f32 %v5394_v19, %v5607_v63  ;;  %v3812_v43 = vadd.f32 %v17589_v30, %v17588_v52  ;;  %v5351_v50 = vmax.f32 %v5287_v29, 0.0 }
 0x356   :  { %11460 = vmatmul.mubr.msk.f32.gmra.mxu0 %vm5407_vm5, %v15568_v16  ;;  %v5506_v28 = vmax.f32 %v5393_v22, %v5474_v56  ;;  %v5354_v45 = vmax.f32 %v5290_v60, 0.0  ;;  %v5289_v13 = vadd.f32 %v15201_v31, %v5218_v59  ;;  %v4276_v18 = vadd.f32 %v17590_v17, %v3810_v0  ;;  %v15605_v0 = vpop.f32.mrf.mxu1 }
 0x357   :  { %5655 = vst.msk [vmem:[#allocation3 + $0xc5] sm:$0x1] %vm5514_vm7, %v5639_v57  ;;  %v4751_v15 = vadd.f32 %v15390_v62, %v17591_v51  ;;  %v4278_v56 = vadd.f32 %v17592_v36, %v3812_v43  ;;  %v4753_v29 = vadd.f32 %v15435_v42, %v17593_v5 }
 0x358   :  { %v15580_v25 = vld [vmem:[#allocation3 + $0xb8] sm:$0x3]  ;;  %5671 = vst.msk [vmem:[#allocation3 + $0xc4] sm:$0x4] %vm5531_vm8, %v5639_v57  ;;  %5541 = vst.msk [vmem:[#allocation3 + $0xc0] sm:$0x4] %vm5531_vm8, %v5506_v28  ;;  %v5396_v1 = vmax.f32 %v5352_v27, %v5354_v45  ;;  %v4750_v60 = vadd.f32 %v15416_v20, %v4276_v18 }
 0x359   :  { %5687 = vst.msk [vmem:[#allocation3 + $0xc3] sm:$0x10] %vm5548_vm9, %v5639_v57  ;;  %5558 = vst.msk [vmem:[#allocation3 + $0xbf] sm:$0x10] %vm5548_vm9, %v5506_v28  ;;  %v5353_v32 = vmax.f32 %v5289_v13, 0.0  ;;  %v5811_v63 = vrot.slane %v15580_v25, 1  ;;  %v4752_v43 = vadd.f32 %v15460_v8, %v4278_v56  ;;  %v15631_v8 = vpop.f32.mrf.mxu1 }
 0x35a   :  { %5703 = vst.msk [vmem:[#allocation3 + $0xc2] sm:$0x40] %vm5565_vm10, %v5639_v57  ;;  %5575 = vst.msk [vmem:[#allocation3 + $0xbe] sm:$0x40] %vm5565_vm10, %v5506_v28  ;;  %v5608_v59 = vrot.slane %v5396_v1, 1  ;;  %v17594_v20 = vld [vmem:[#allocation59_spill] sm:$0xff] }
 0x35b   :  { %v11316_v21 = vpop.f32.mrf.mxu0  ;;  %v15591_v19 = vld [vmem:[#allocation3 + $0xb0] sm:$0xff]  ;;  %5524 = vst.msk [vmem:[#allocation3 + $0xc1] sm:$0x1] %vm5514_vm7, %v5506_v28  ;;  %v5395_v55 = vmax.f32 %v5351_v50, %v5353_v32  ;;  %v15617_v13 = vld [vmem:[%s16624_s2] ss:$0 sm:$0xff] }
 0x35c   :  { %v5221_v3 = vadd.f32 %v11316_v21, %v4749_v41  ;;  %v5810_v6 = vrot.slane %v15591_v19, 1  ;;  %v5640_v57 = vmax.f32 %v5396_v1, %v5608_v59  ;;  %v17595_v45 = vld [vmem:[#allocation73_spill] sm:$0xff]  ;;  %v17598_v56 = vld [vmem:[#allocation64_spill] sm:$0xff] }
 0x35d   :  { %v5077_v47 = vpop.f32.mrf.mxu0  ;;  %v5475_v21 = vrot.slane %v5395_v55, 1  ;;  %v3814_v42 = vadd.f32 %v17595_v45, %v17594_v20  ;;  %v17597_v1 = vld [vmem:[#allocation9_spill] sm:$0xff] }
 0x35e   :  { %v5220_v22 = vadd.f32 %v5077_v47, %v4748_v61  ;;  %v5292_v37 = vadd.f32 %v15201_v31, %v5221_v3  ;;  %v5812_v61 = vsel %vm477_vm3, %v5810_v6, %v5811_v63  ;;  %5656 = vst.msk [vmem:[#allocation3 + $0xd5] sm:$0x1] %vm5514_vm7, %v5640_v57  ;;  %v17596_v47 = vld [vmem:[#allocation122_spill] sm:$0xff]  ;;  %v4755_v32 = vadd.f32 %v15483_v54, %v17597_v1 }
 0x35f   :  { %v11319_v38 = vpop.f32.mrf.mxu0  ;;  %11359 = vmatmul.mubr.msk.f32.gmra.mxu1 %vm5407_vm5, %v5812_v61  ;;  %11462 = vmatprep.mubr.msk.f32.mxu0 %vm5407_vm5, %v5812_v61  ;;  %5672 = vst.msk [vmem:[#allocation3 + $0xd4] sm:$0x4] %vm5531_vm8, %v5640_v57  ;;  %v4280_v50 = vadd.f32 %v17596_v47, %v3814_v42 }
 0x360   :  { %v5223_v41 = vadd.f32 %v11319_v38, %v4751_v15  ;;  %v5291_v28 = vadd.f32 %v15201_v31, %v5220_v22  ;;  %5688 = vst.msk [vmem:[#allocation3 + $0xd3] sm:$0x10] %vm5548_vm9, %v5640_v57  ;;  %v5507_v31 = vmax.f32 %v5395_v55, %v5475_v21  ;;  %v5356_v22 = vmax.f32 %v5292_v37, 0.0 }
 0x361   :  { %v5087_v62 = vpop.f32.mrf.mxu0  ;;  %5704 = vst.msk [vmem:[#allocation3 + $0xd2] sm:$0x40] %vm5565_vm10, %v5640_v57  ;;  %v15626_v3 = vld [vmem:[#allocation3 + $0xc8] sm:$0x3]  ;;  %v4754_v37 = vadd.f32 %v15503_v34, %v4280_v50  ;;  %v17601_v34 = vld [vmem:[#allocation69_spill] sm:$0xff] }
 0x362   :  { %v5222_v27 = vadd.f32 %v5087_v62, %v4750_v60  ;;  %v5294_v52 = vadd.f32 %v15617_v13, %v5223_v41  ;;  %v15633_v38 = vld [vmem:[#allocation3 + $0xc0] sm:$0xff]  ;;  %5525 = vst.msk [vmem:[#allocation3 + $0xd1] sm:$0x1] %vm5514_vm7, %v5507_v31  ;;  %v5355_v6 = vmax.f32 %v5291_v28, 0.0  ;;  %v15646_v28 = vpop.f32.mrf.mxu1 }
 0x363   :  { %v11322_v30 = vpop.f32.mrf.mxu0  ;;  %5542 = vst.msk [vmem:[#allocation3 + $0xd0] sm:$0x4] %vm5531_vm8, %v5507_v31  ;;  %v5813_v54 = vrot.slane %v15633_v38, 1  ;;  %v17599_v60 = vld [vmem:[#allocation78_spill] sm:$0xff]  ;;  %v17600_v57 = vld [vmem:[#allocation123_spill] sm:$0xff] }
 0x364   :  { %v5293_v17 = vadd.f32 %v15617_v13, %v5222_v27  ;;  %v5225_v18 = vadd.f32 %v11322_v30, %v4753_v29  ;;  %v5358_v51 = vmax.f32 %v5294_v52, 0.0  ;;  %5559 = vst.msk [vmem:[#allocation3 + $0xcf] sm:$0x10] %vm5548_vm9, %v5507_v31  ;;  %v3816_v59 = vadd.f32 %v17599_v60, %v17598_v56  ;;  %v17606_v60 = vld [vmem:[#allocation124_spill] sm:$0xff] }
 0x365   :  { %v5097_v15 = vpop.f32.mrf.mxu0  ;;  %5576 = vst.msk [vmem:[#allocation3 + $0xce] sm:$0x40] %vm5565_vm10, %v5507_v31  ;;  %v5814_v29 = vrot.slane %v15626_v3, 1  ;;  %v17602_v31 = vld [vmem:[#allocation83_spill] sm:$0xff] }
 0x366   :  { %v5357_v63 = vmax.f32 %v5293_v17, 0.0  ;;  %v5224_v36 = vadd.f32 %v5097_v15, %v4752_v43  ;;  %v5398_v55 = vmax.f32 %v5356_v22, %v5358_v51  ;;  %v5296_v62 = vadd.f32 %v15617_v13, %v5225_v18  ;;  %v17603_v18 = vld [vmem:[#allocation11_spill] sm:$0xff] }
 0x367   :  { %v11325_v5 = vpop.f32.mrf.mxu0  ;;  %v4282_v21 = vadd.f32 %v17600_v57, %v3816_v59  ;;  %v15649_v45 = vsel %vm477_vm3, %v5813_v54, %v5814_v29  ;;  %v3818_v17 = vadd.f32 %v17602_v31, %v17601_v34  ;;  %v4757_v47 = vadd.f32 %v15524_v10, %v17603_v18  ;;  %v17605_v54 = vld [vmem:[#allocation84_spill] sm:$0xff] }
 0x368   :  { %v5397_v41 = vmax.f32 %v5355_v6, %v5357_v63  ;;  %v5227_v61 = vadd.f32 %v11325_v5, %v4755_v32  ;;  %v5609_v27 = vrot.slane %v5398_v55, 1  ;;  %v5295_v52 = vadd.f32 %v15617_v13, %v5224_v36  ;;  %11361 = vmatprep.mubr.msk.f32.mxu1 %vm5407_vm5, %v15649_v45  ;;  %11463 = vmatmul.mubr.msk.f32.gmra.mxu0 %vm5407_vm5, %v15649_v45  ;;  %v15663_v63 = vld [vmem:[#allocation3 + $0xd8] sm:$0x3]  ;;  %v17604_v36 = vld [vmem:[#allocation74_spill] sm:$0xff]  ;;  %v15668_v5 = vpop.f32.mrf.mxu1 }
 0x369   :  { %v5107_v20 = vpop.f32.mrf.mxu0  ;;  %v4756_v50 = vadd.f32 %v15550_v33, %v4282_v21  ;;  %v5360_v51 = vmax.f32 %v5296_v62, 0.0  ;;  %v3820_v56 = vadd.f32 %v17605_v54, %v17604_v36  ;;  %v4284_v59 = vadd.f32 %v17606_v60, %v3818_v17  ;;  %v17609_v17 = vld [vmem:[#allocation13_spill] sm:$0xff] }
 0x36a   :  { %v5476_v42 = vrot.slane %v5397_v41, 1  ;;  %v5298_v30 = vadd.f32 %v15617_v13, %v5227_v61  ;;  %v5226_v43 = vadd.f32 %v5107_v20, %v4754_v37  ;;  %v5641_v1 = vmax.f32 %v5398_v55, %v5609_v27  ;;  %v17607_v61 = vld [vmem:[#allocation12_spill] sm:$0xff]  ;;  %v11242_v18 = vpop.f32.mrf.mxu1 }
 0x36b   :  { %v11328_v32 = vpop.f32.mrf.mxu0  ;;  %v5359_v29 = vmax.f32 %v5295_v52, 0.0  ;;  %v4759_v57 = vadd.f32 %v15565_v12, %v17607_v61  ;;  %v5817_v20 = vrot.slane %v15663_v63, 1  ;;  %v4761_v52 = vadd.f32 %v15605_v0, %v17609_v17  ;;  %v17611_v0 = vld [vmem:[#allocation89_spill] sm:$0xff] }
 0x36c   :  { %v5508_v22 = vmax.f32 %v5397_v41, %v5476_v42  ;;  %v5362_v15 = vmax.f32 %v5298_v30, 0.0  ;;  %v5297_v6 = vadd.f32 %v15617_v13, %v5226_v43  ;;  %5657 = vst.msk [vmem:[#allocation3 + $0xe5] sm:$0x1] %vm5514_vm7, %v5641_v1  ;;  %v5229_v10 = vadd.f32 %v11328_v32, %v4757_v47  ;;  %v15674_v55 = vld [vmem:[#allocation3 + $0xd0] sm:$0xff] }
 0x36d   :  { %5673 = vst.msk [vmem:[#allocation3 + $0xe4] sm:$0x4] %vm5531_vm8, %v5641_v1  ;;  %v5117_v33 = vpop.f32.mrf.mxu0  ;;  %v5816_v27 = vrot.slane %v15674_v55, 1  ;;  %v17608_v42 = vld [vmem:[#allocation125_spill] sm:$0xff]  ;;  %v4758_v43 = vadd.f32 %v15585_v39, %v4284_v59  ;;  %v17610_v39 = vld [vmem:[#allocation79_spill] sm:$0xff] }
 0x36e   :  { %5689 = vst.msk [vmem:[#allocation3 + $0xe3] sm:$0x10] %vm5548_vm9, %v5641_v1  ;;  %5560 = vst.msk [vmem:[#allocation3 + $0xdf] sm:$0x10] %vm5548_vm9, %v5508_v22  ;;  %v5400_v37 = vmax.f32 %v5360_v51, %v5362_v15  ;;  %v5361_v41 = vmax.f32 %v5297_v6, 0.0  ;;  %v5228_v62 = vadd.f32 %v5117_v33, %v4756_v50  ;;  %v4286_v30 = vadd.f32 %v17608_v42, %v3820_v56 }
 0x36f   :  { %5705 = vst.msk [vmem:[#allocation3 + $0xe2] sm:$0x40] %vm5565_vm10, %v5641_v1  ;;  %5577 = vst.msk [vmem:[#allocation3 + $0xde] sm:$0x40] %vm5565_vm10, %v5508_v22  ;;  %v11331_v21 = vpop.f32.mrf.mxu0  ;;  %v5300_v47 = vadd.f32 %v15617_v13, %v5229_v10  ;;  %v15690_v12 = vsel %vm477_vm3, %v5816_v27, %v5817_v20  ;;  %v3822_v6 = vadd.f32 %v17611_v0, %v17610_v39 }
 0x370   :  { %5526 = vst.msk [vmem:[#allocation3 + $0xe1] sm:$0x1] %vm5514_vm7, %v5508_v22  ;;  %v5610_v34 = vrot.slane %v5400_v37, 1  ;;  %v5399_v31 = vmax.f32 %v5359_v29, %v5361_v41  ;;  %v5231_v50 = vadd.f32 %v11331_v21, %v4759_v57  ;;  %v5299_v51 = vadd.f32 %v15617_v13, %v5228_v62  ;;  %11362 = vmatmul.mubr.msk.f32.gmra.mxu1 %vm5407_vm5, %v15690_v12  ;;  %v17612_v29 = vld [vmem:[#allocation126_spill] sm:$0xff] }
 0x371   :  { %5543 = vst.msk [vmem:[#allocation3 + $0xe0] sm:$0x4] %vm5531_vm8, %v5508_v22  ;;  %v5127_v1 = vpop.f32.mrf.mxu0  ;;  %11465 = vmatprep.mubr.msk.f32.mxu0 %vm5407_vm5, %v15690_v12  ;;  %v4760_v56 = vadd.f32 %v15631_v8, %v4286_v30  ;;  %v17613_v41 = vld [vmem:[#allocation14_spill] sm:$0xff]  ;;  %v4685_v8 = vpop.f32.mrf.mxu1  ;;  %v5364_v61 = vmax.f32 %v5300_v47, 0.0 }
 0x372   :  { %v5642_v32 = vmax.f32 %v5400_v37, %v5610_v34  ;;  %v5477_v22 = vrot.slane %v5399_v31, 1  ;;  %v5230_v15 = vadd.f32 %v5127_v1, %v4758_v43  ;;  %v5302_v36 = vadd.f32 %v15617_v13, %v5231_v50  ;;  %v17615_v34 = vld [vmem:[#allocation92_spill] sm:$0xff] }
 0x373   :  { %v11334_v54 = vpop.f32.mrf.mxu0  ;;  %v4288_v37 = vadd.f32 %v17612_v29, %v3822_v6  ;;  %v4763_v62 = vadd.f32 %v15646_v28, %v17613_v41  ;;  %v5363_v20 = vmax.f32 %v5299_v51, 0.0  ;;  %v17614_v28 = vld [vmem:[#allocation47_spill] sm:$0xff]  ;;  %v11245_v51 = vpop.f32.mrf.mxu1 }
 0x374   :  { %5658 = vst.msk [vmem:[#allocation3 + $0xf5] sm:$0x1] %vm5514_vm7, %v5642_v32  ;;  %v5509_v60 = vmax.f32 %v5399_v31, %v5477_v22  ;;  %v5301_v59 = vadd.f32 %v15617_v13, %v5230_v15  ;;  %v5233_v10 = vadd.f32 %v11334_v54, %v4761_v52  ;;  %v5366_v57 = vmax.f32 %v5302_v36, 0.0  ;;  %v17616_v15 = vld [vmem:[#allocation16_spill] sm:$0xff] }
 0x375   :  { %5674 = vst.msk [vmem:[#allocation3 + $0xf4] sm:$0x4] %vm5531_vm8, %v5642_v32  ;;  %v5137_v21 = vpop.f32.mrf.mxu0  ;;  %v3824_v31 = vadd.f32 %v17615_v34, %v17614_v28  ;;  %v4762_v50 = vadd.f32 %v15668_v5, %v4288_v37  ;;  %v17617_v5 = vld [vmem:[#allocation88_spill] sm:$0xff]  ;;  %v17619_v37 = vld [vmem:[#allocation15_spill] sm:$0xff] }
 0x376   :  { %5690 = vst.msk [vmem:[#allocation3 + $0xf3] sm:$0x10] %vm5548_vm9, %v5642_v32  ;;  %v15706_v33 = vld [vmem:[#allocation3 + $0xe8] sm:$0x3]  ;;  %5561 = vst.msk [vmem:[#allocation3 + $0xef] sm:$0x10] %vm5548_vm9, %v5509_v60  ;;  %v5232_v30 = vadd.f32 %v5137_v21, %v4760_v56  ;;  %v5402_v17 = vmax.f32 %v5364_v61, %v5366_v57  ;;  %v4765_v41 = vadd.f32 %v11242_v18, %v17619_v37 }
 0x377   :  { %5706 = vst.msk [vmem:[#allocation3 + $0xf2] sm:$0x40] %vm5565_vm10, %v5642_v32  ;;  %5578 = vst.msk [vmem:[#allocation3 + $0xee] sm:$0x40] %vm5565_vm10, %v5509_v60  ;;  %v5365_v42 = vmax.f32 %v5301_v59, 0.0  ;;  %v11337_v52 = vpop.f32.mrf.mxu0  ;;  %v5820_v47 = vrot.slane %v15706_v33, 1  ;;  %v5304_v32 = vadd.f32 %v15617_v13, %v5233_v10  ;;  %v4290_v39 = vadd.f32 %v17616_v15, %v3824_v31  ;;  %v4695_v31 = vpop.f32.mrf.mxu1 }
 0x378   :  { %v15711_v27 = vld [vmem:[#allocation3 + $0xe0] sm:$0xff]  ;;  %5527 = vst.msk [vmem:[#allocation3 + $0xf1] sm:$0x1] %vm5514_vm7, %v5509_v60  ;;  %v5235_v22 = vadd.f32 %v11337_v52, %v4763_v62  ;;  %v5611_v0 = vrot.slane %v5402_v17, 1  ;;  %v5303_v56 = vadd.f32 %v15617_v13, %v5232_v30  ;;  %v17618_v10 = vld [vmem:[#allocation93_spill] sm:$0xff]  ;;  %v17620_v28 = vld [vmem:[#allocation32_spill] sm:$0xff] }
 0x379   :  { %5544 = vst.msk [vmem:[#allocation3 + $0xf0] sm:$0x4] %vm5531_vm8, %v5509_v60  ;;  %v5819_v43 = vrot.slane %v15711_v27, 1  ;;  %v5401_v1 = vmax.f32 %v5363_v20, %v5365_v42  ;;  %v5147_v6 = vpop.f32.mrf.mxu0  ;;  %v3826_v29 = vadd.f32 %v17618_v10, %v17617_v5  ;;  %v4764_v62 = vadd.f32 %v4685_v8, %v4290_v39 }
 0x37a   :  { %v5306_v60 = vadd.f32 %v15617_v13, %v5235_v22  ;;  %v5234_v59 = vadd.f32 %v5147_v6, %v4762_v50  ;;  %v5643_v61 = vmax.f32 %v5402_v17, %v5611_v0  ;;  %v5368_v20 = vmax.f32 %v5304_v32, 0.0  ;;  %v17621_v32 = vld [vmem:[#allocation31_spill] sm:$0xff] }
 0x37b   :  { %v15725_v36 = vsel %vm477_vm3, %v5819_v43, %v5820_v47  ;;  %v5478_v54 = vrot.slane %v5401_v1, 1  ;;  %v11340_v57 = vpop.f32.mrf.mxu0  ;;  %v4292_v34 = vadd.f32 %v17620_v28, %v3826_v29  ;;  %v5367_v52 = vmax.f32 %v5303_v56, 0.0 }
 0x37c   :  { %11364 = vmatprep.mubr.msk.f32.mxu1 %vm5407_vm5, %v15725_v36  ;;  %11466 = vmatmul.mubr.msk.f32.gmra.mxu0 %vm5407_vm5, %v15725_v36  ;;  %v5370_v42 = vmax.f32 %v5306_v60, 0.0  ;;  %v5305_v30 = vadd.f32 %v15617_v13, %v5234_v59  ;;  %5659 = vst.msk [vmem:[#allocation3 + $0x105] sm:$0x1] %vm5514_vm7, %v5643_v61  ;;  %v5237_v18 = vadd.f32 %v11340_v57, %v4765_v41 }
 0x37d   :  { %v5510_v21 = vmax.f32 %v5401_v1, %v5478_v54  ;;  %5675 = vst.msk [vmem:[#allocation3 + $0x104] sm:$0x4] %vm5531_vm8, %v5643_v61  ;;  %v5157_v8 = vpop.f32.mrf.mxu0  ;;  %v4767_v22 = vadd.f32 %v11245_v51, %v17621_v32  ;;  %v4766_v6 = vadd.f32 %v4695_v31, %v4292_v34 }
 0x37e   :  { %v15737_v43 = vld [vmem:[#allocation3 + $0xf8] sm:$0x3]  ;;  %5691 = vst.msk [vmem:[#allocation3 + $0x103] sm:$0x10] %vm5548_vm9, %v5643_v61  ;;  %v5404_v47 = vmax.f32 %v5368_v20, %v5370_v42  ;;  %v5369_v50 = vmax.f32 %v5305_v30, 0.0  ;;  %v5236_v1 = vadd.f32 %v5157_v8, %v4764_v62  ;;  %v5308_v59 = vadd.f32 %v15617_v13, %v5237_v18 }
 0x37f   :  { %5707 = vst.msk [vmem:[#allocation3 + $0x102] sm:$0x40] %vm5565_vm10, %v5643_v61  ;;  %5579 = vst.msk [vmem:[#allocation3 + $0xfe] sm:$0x40] %vm5565_vm10, %v5510_v21  ;;  %v11343_v15 = vpop.f32.mrf.mxu0  ;;  %v5823_v0 = vrot.slane %v15737_v43, 1 }
 0x380   :  { %v15744_v17 = vld [vmem:[#allocation3 + $0xf0] sm:$0xff]  ;;  %5528 = vst.msk [vmem:[#allocation3 + $0x101] sm:$0x1] %vm5514_vm7, %v5510_v21  ;;  %v5612_v54 = vrot.slane %v5404_v47, 1  ;;  %v5403_v60 = vmax.f32 %v5367_v52, %v5369_v50  ;;  %v5239_v5 = vadd.f32 %v11343_v15, %v4767_v22  ;;  %v5307_v41 = vadd.f32 %v15617_v13, %v5236_v1 }
 0x381   :  { %5545 = vst.msk [vmem:[#allocation3 + $0x100] sm:$0x4] %vm5531_vm8, %v5510_v21  ;;  %v5822_v39 = vrot.slane %v15744_v17, 1  ;;  %v5167_v10 = vpop.f32.mrf.mxu0  ;;  %v5372_v20 = vmax.f32 %v5308_v59, 0.0  ;;  %v9549_v59 = vld [vmem:[%s16625_s3 + $0x18] sm:$0xff] }
 0x382   :  { %5562 = vst.msk [vmem:[#allocation3 + $0xff] sm:$0x10] %vm5548_vm9, %v5510_v21  ;;  %v5644_v56 = vmax.f32 %v5404_v47, %v5612_v54  ;;  %v5479_v37 = vrot.slane %v5403_v60, 1  ;;  %v5238_v51 = vadd.f32 %v5167_v10, %v4766_v6  ;;  %v5310_v62 = vadd.f32 %v15617_v13, %v5239_v5  ;;  %v11770_v54 = vld [vmem:[#allocation3] sm:$0xff]  ;;  %v15812_v5 = vld [vmem:[#allocation3 + $0x10] sm:$0xff] }
 0x383   :  { %v15755_v29 = vsel %vm477_vm3, %v5822_v39, %v5823_v0  ;;  %v5371_v28 = vmax.f32 %v5307_v41, 0.0 }
 0x384   :  { %11365 = vmatmul.mubr.msk.f32.gmra.mxu1 %vm5407_vm5, %v15755_v29  ;;  %11468 = vmatprep.mubr.msk.f32.mxu0 %vm5407_vm5, %v15755_v29  ;;  %5660 = vst.msk [vmem:[#allocation3 + $0x115] sm:$0x1] %vm5514_vm7, %v5644_v56  ;;  %v5511_v61 = vmax.f32 %v5403_v60, %v5479_v37  ;;  %v5309_v57 = vadd.f32 %v15617_v13, %v5238_v51  ;;  %v5374_v42 = vmax.f32 %v5310_v62, 0.0  ;;  %v15821_v37 = vld [vmem:[#allocation3 + $0x20] sm:$0xff] }
 0x385   :  { %5676 = vst.msk [vmem:[#allocation3 + $0x114] sm:$0x4] %vm5531_vm8, %v5644_v56 }
 0x386   :  { %5692 = vst.msk [vmem:[#allocation3 + $0x113] sm:$0x10] %vm5548_vm9, %v5644_v56  ;;  %v15768_v21 = vld [vmem:[#allocation3 + $0x108] sm:$0x3]  ;;  %5563 = vst.msk [vmem:[#allocation3 + $0x10f] sm:$0x10] %vm5548_vm9, %v5511_v61  ;;  %v5406_v18 = vmax.f32 %v5372_v20, %v5374_v42 }
 0x387   :  { %5708 = vst.msk [vmem:[#allocation3 + $0x112] sm:$0x40] %vm5565_vm10, %v5644_v56  ;;  %5580 = vst.msk [vmem:[#allocation3 + $0x10e] sm:$0x40] %vm5565_vm10, %v5511_v61  ;;  %v5373_v34 = vmax.f32 %v5309_v57, 0.0  ;;  %v5826_v13 = vrot.slane %v15768_v21, 1 }
 0x388   :  { %5529 = vst.msk [vmem:[#allocation3 + $0x111] sm:$0x1] %vm5514_vm7, %v5511_v61  ;;  %v5613_v47 = vrot.slane %v5406_v18, 1  ;;  %v11772_v56 = vld [vmem:[%s16625_s3 + $0x10] sm:$0xff]  ;;  %v15846_v57 = vld [vmem:[#allocation3 + $0x40] sm:$0xff] }
 0x389   :  { %v15770_v30 = vld [vmem:[#allocation3 + $0x100] sm:$0xff]  ;;  %5546 = vst.msk [vmem:[#allocation3 + $0x110] sm:$0x4] %vm5531_vm8, %v5511_v61  ;;  %v5405_v8 = vmax.f32 %v5371_v28, %v5373_v34  ;;  %v15830_v61 = vld [vmem:[#allocation3 + $0x30] sm:$0xff]  ;;  %v11776_v20 = vld [vmem:[#allocation3 + $0x8] sm:$0x3] }
 0x38a   :  { %v5825_v31 = vrot.slane %v15770_v30, 1  ;;  %v5645_v1 = vmax.f32 %v5406_v18, %v5613_v47  ;;  %v6188_v42 = vrot.slane %v11776_v20, 2  ;;  %v6190_v34 = vrot.slane %v15812_v5, 2 }
 0x38b   :  { %v5480_v50 = vrot.slane %v5405_v8, 1 }
 0x38c   :  { %v15779_v52 = vsel %vm477_vm3, %v5825_v31, %v5826_v13  ;;  %5661 = vst.msk [vmem:[#allocation3 + $0x125] sm:$0x1] %vm5514_vm7, %v5645_v1  ;;  %v6193_v31 = vrot.slane %v15821_v37, 2  ;;  %v11777_v13 = vld [vmem:[#allocation3 + $0x18] sm:$0x3] }
 0x38d   :  { %11367 = vmatprep.mubr.msk.f32.mxu1 %vm5407_vm5, %v15779_v52  ;;  %11469 = vmatmul.mubr.msk.f32.gmra.mxu0 %vm5407_vm5, %v15779_v52  ;;  %v5512_v22 = vmax.f32 %v5405_v8, %v5480_v50  ;;  %5677 = vst.msk [vmem:[#allocation3 + $0x124] sm:$0x4] %vm5531_vm8, %v5645_v1  ;;  %v6191_v18 = vrot.slane %v11777_v13, 2  ;;  %v11778_v8 = vld [vmem:[#allocation3 + $0x28] sm:$0x3] }
 0x38e   :  { %v15785_v32 = vld [vmem:[#allocation3 + $0x118] sm:$0x3]  ;;  %5693 = vst.msk [vmem:[#allocation3 + $0x123] sm:$0x10] %vm5548_vm9, %v5645_v1  ;;  %v6194_v47 = vrot.slane %v11778_v8, 2  ;;  %v6211_v8 = vrot.slane %v15476_v23, 2 }
 0x38f   :  { %5709 = vst.msk [vmem:[#allocation3 + $0x122] sm:$0x40] %vm5565_vm10, %v5645_v1  ;;  %5581 = vst.msk [vmem:[#allocation3 + $0x11e] sm:$0x40] %vm5565_vm10, %v5512_v22  ;;  %v5829_v0 = vrot.slane %v15785_v32, 1  ;;  %v15897_v50 = vsel %vm1673_vm4, %v6190_v34, %v6191_v18  ;;  %v6196_v1 = vrot.slane %v15830_v61, 2 }
 0x390   :  { %v15791_v15 = vld [vmem:[#allocation3 + $0x110] sm:$0xff]  ;;  %5530 = vst.msk [vmem:[#allocation3 + $0x121] sm:$0x1] %vm5514_vm7, %v5512_v22  ;;  %v6205_v34 = vrot.slane %v15462_v24, 2  ;;  %v6206_v18 = vrot.slane %v15455_v35, 2  ;;  %v6209_v35 = vrot.slane %v15498_v49, 2 }
 0x391   :  { %5547 = vst.msk [vmem:[#allocation3 + $0x120] sm:$0x4] %vm5531_vm8, %v5512_v22  ;;  %v5828_v39 = vrot.slane %v15791_v15, 1 }
 0x392   :  { %5564 = vst.msk [vmem:[#allocation3 + $0x11f] sm:$0x10] %vm5548_vm9, %v5512_v22  ;;  %v15903_v22 = vld [vmem:[%s16625_s3 + $0x28] sm:$0xff] }
 0x393   :  { %v15800_v6 = vsel %vm477_vm3, %v5828_v39, %v5829_v0  ;;  %v15910_v39 = vsel %vm1673_vm4, %v6193_v31, %v6194_v47  ;;  %v6199_v0 = vrot.slane %v15846_v57, 2  ;;  %v11782_v31 = vld [vmem:[#allocation3 + $0x58] sm:$0x3]  ;;  %v6212_v47 = vrot.slane %v15478_v53, 2 }
 0x394   :  { %11368 = vmatmul.mubr.msk.f32.gmra.mxu1 %vm5407_vm5, %v15800_v6  ;;  %11471 = vmatprep.mubr.msk.f32.mxu0 %vm5407_vm5, %v15800_v6  ;;  %v6203_v13 = vrot.slane %v11782_v31, 2  ;;  %v15958_v53 = vld [vmem:[#allocation3 + $0x98] sm:$0x3]  ;;  %v6218_v31 = vrot.slane %v15626_v3, 2  ;;  %v6223_v3 = vrot.slane %v15711_v27, 2 }
 0x395   :  { %11372 = vmatprep.mubr.msk.f32.mxu1 %vm5407_vm5, %v11770_v54 }
 0x396   :  { %v15807_v60 = vld [vmem:[#allocation3 + $0x128] sm:$0x3] }
 0x397   :  { %v6605_v51 = vrot.slane %v15807_v60, 1 }
 0x398   :  { %11373 = vmatmul.mubr.msk.f32.vlgmr.msra.gmra.mxu1 %vm5407_vm5, %v15812_v5 }
 0x399   :  { %v15816_v10 = vld [vmem:[#allocation3 + $0x120] sm:$0xff]  ;;  %11397 = vmatpush3.msra.mxu1 %v11772_v56  ;;  %11375 = vmatprep.mubr.msk.f32.mxu1 %vm5407_vm5, %v15821_v37 }
 0x39a   :  { %v6604_v41 = vrot.slane %v15816_v10, 1  ;;  %11422 = vmatprep.subr.mxu1 %v9549_v59 }
 0x39c   :  { %v15828_v62 = vsel %vm477_vm3, %v6604_v41, %v6605_v51  ;;  %11376 = vmatmul.mubr.msk.f32.gmra.mxu1 %vm5407_vm5, %v15830_v61  ;;  %v15915_v41 = vld [vmem:[#allocation3 + $0x130] sm:$0xff]  ;;  %v11780_v51 = vld [vmem:[#allocation3 + $0x48] sm:$0x3] }
 0x39d   :  { %11472 = vmatmul.mubr.msk.f32.gmra.mxu0 %vm5407_vm5, %v15828_v62  ;;  %11378 = vmatprep.mubr.msk.f32.mxu1 %vm5407_vm5, %v15378_v9  ;;  %v17622_v9 = vmov 0.0  }
 0x39e   :  { %11502 = vmatprep.mubr.msk.f32.mxu0 %vm5407_vm5, %v15821_v37 }
 0x3a0   :  { %11379 = vmatmul.mubr.msk.f32.gmra.mxu1 %vm5407_vm5, %v15422_v2 }
 0x3a1   :  { %11503 = vmatmul.mubr.msk.f32.vlgmr.msra.gmra.mxu0 %vm5407_vm5, %v15830_v61  ;;  %11381 = vmatprep.mubr.msk.f32.mxu1 %vm5407_vm5, %v15462_v24 }
 0x3a2   :  { %11505 = vmatprep.mubr.msk.f32.mxu0 %vm5407_vm5, %v15846_v57  ;;  %11553 = vmatpush3.msra.mxu0 %v15404_v44  ;;  %v15868_v44 = vld [vmem:[#allocation3 + $0x90] sm:$0xff] }
 0x3a3   :  { %11634 = vmatprep.subr.mxu0 %v17622_v9  ;;  %v7291_v49 = vrot.slane %v15868_v44, 2 }
 0x3a4   :  { %11382 = vmatmul.mubr.msk.f32.gmra.mxu1 %vm5407_vm5, %v15509_v14 }
 0x3a5   :  { %11506 = vmatmul.mubr.msk.f32.gmra.mxu0 %vm5407_vm5, %v15422_v2  ;;  %11384 = vmatprep.mubr.msk.f32.mxu1 %vm5407_vm5, %v15476_v23  ;;  %v6187_v2 = vrot.slane %v11770_v54, 2  ;;  %v11779_v54 = vld [vmem:[#allocation3 + $0x38] sm:$0x3]  ;;  %v6213_v23 = vsel %vm1673_vm4, %v6211_v8, %v6212_v47  ;;  %v6220_v8 = vrot.slane %v15674_v55, 2 }
 0x3a6   :  { %11508 = vmatprep.mubr.msk.f32.mxu0 %vm5407_vm5, %v15462_v24  ;;  %v6197_v56 = vrot.slane %v11779_v54, 2  ;;  %v15950_v24 = vsel %vm1673_vm4, %v6205_v34, %v6206_v18  ;;  %v7292_v34 = vrot.slane %v15958_v53, 2 }
 0x3a7   :  { %v6189_v28 = vsel %vm1673_vm4, %v6187_v2, %v6188_v42  ;;  %v6200_v2 = vrot.slane %v11780_v51, 2  ;;  %v15923_v42 = vld [vmem:[#allocation3 + $0x50] sm:$0xff]  ;;  %v6217_v51 = vrot.slane %v15633_v38, 2 }
 0x3a8   :  { %11385 = vmatmul.mubr.msk.f32.gmra.mxu1 %vm5407_vm5, %v15591_v19  ;;  %v15921_v20 = vsel %vm1673_vm4, %v6196_v1, %v6197_v56  ;;  %v6214_v56 = vrot.slane %v15591_v19, 2 }
 0x3a9   :  { %11509 = vmatmul.mubr.msk.f32.gmra.mxu0 %vm5407_vm5, %v15509_v14  ;;  %11387 = vmatprep.mubr.msk.f32.mxu1 %vm5407_vm5, %v15633_v38  ;;  %v15987_v47 = vsel %vm1673_vm4, %v6217_v51, %v6218_v31  ;;  %v6233_v31 = vrot.slane %v15785_v32, 2  ;;  %v6778_v32 = vrot.slane %v15807_v60, 2  ;;  %v11783_v60 = vld [vmem:[#allocation3 + $0x60] sm:$0xff] }
 0x3aa   :  { %11511 = vmatprep.mubr.msk.f32.mxu0 %vm5407_vm5, %v15552_v48 }
 0x3ac   :  { %11388 = vmatmul.mubr.msk.f32.gmra.mxu1 %vm5407_vm5, %v15674_v55 }
 0x3ad   :  { %11512 = vmatmul.mubr.msk.f32.gmra.mxu0 %vm5407_vm5, %v15868_v44  ;;  %11390 = vmatprep.mubr.msk.f32.mxu1 %vm5407_vm5, %v15711_v27 }
 0x3ae   :  { %11514 = vmatprep.mubr.msk.f32.mxu0 %vm5407_vm5, %v15633_v38 }
 0x3b0   :  { %11391 = vmatmul.mubr.msk.f32.gmra.mxu1 %vm5407_vm5, %v15744_v17 }
 0x3b1   :  { %11515 = vmatmul.mubr.msk.f32.gmra.mxu0 %vm5407_vm5, %v15674_v55  ;;  %11393 = vmatprep.mubr.msk.f32.mxu1 %vm5407_vm5, %v15770_v30 }
 0x3b2   :  { %11517 = vmatprep.mubr.msk.f32.mxu0 %vm5407_vm5, %v15711_v27 }
 0x3b4   :  { %11394 = vmatmul.mubr.msk.f32.gmra.mxu1 %vm5407_vm5, %v15791_v15 }
 0x3b5   :  { %11518 = vmatmul.mubr.msk.f32.gmra.mxu0 %vm5407_vm5, %v15744_v17  ;;  %11398 = vmatprep.mubr.msk.f32.mxu1 %vm5407_vm5, %v6189_v28  ;;  %v15931_v28 = vsel %vm1673_vm4, %v6199_v0, %v6200_v2  ;;  %v6208_v0 = vrot.slane %v15509_v14, 2  ;;  %v6774_v2 = vrot.slane %v15552_v48, 2 }
 0x3b6   :  { %11520 = vmatprep.mubr.msk.f32.mxu0 %vm5407_vm5, %v15770_v30 }
 0x3b7   :  { %v15961_v54 = vsel %vm1673_vm4, %v6208_v0, %v6209_v35  ;;  %v7293_v0 = vsel %vm1673_vm4, %v7291_v49, %v7292_v34  ;;  %v6224_v35 = vrot.slane %v15706_v33, 2  ;;  %v6230_v33 = vrot.slane %v15768_v21, 2  ;;  %v16026_v21 = vld [vmem:[#allocation3 + $0x138] sm:$0x3] }
 0x3b8   :  { %11399 = vmatmul.mubr.msk.f32.vlgmr.msra.gmra.mxu1 %vm5407_vm5, %v15897_v50 }
 0x3b9   :  { %11521 = vmatmul.mubr.msk.f32.gmra.mxu0 %vm5407_vm5, %v15791_v15  ;;  %11423 = vmatpush3.msra.mxu1 %v9549_v59  ;;  %v6202_v59 = vrot.slane %v15923_v42, 2  ;;  %v6225_v51 = vsel %vm1673_vm4, %v6223_v3, %v6224_v35  ;;  %v7295_v3 = vrot.slane %v16026_v21, 2 }
 0x3ba   :  { %11401 = vmatprep.mubr.msk.f32.mxu1 %vm5407_vm5, %v15910_v39  ;;  %11523 = vmatprep.mubr.msk.f32.mxu0 %vm5407_vm5, %v15816_v10 }
 0x3bb   :  { %11474 = vmatprep.subr.mxu1 %v15903_v22  ;;  %v15942_v1 = vsel %vm1673_vm4, %v6202_v59, %v6203_v13  ;;  %v6215_v59 = vrot.slane %v15580_v25, 2  ;;  %v6775_v13 = vrot.slane %v15545_v26, 2  ;;  %v6221_v26 = vrot.slane %v15663_v63, 2 }
 0x3bc   :  { %11402 = vmatmul.mubr.msk.f32.gmra.mxu1 %vm5407_vm5, %v15921_v20  ;;  %v6227_v63 = vrot.slane %v15737_v43, 2 }
 0x3bd   :  { %11524 = vmatmul.mubr.msk.f32.gmra.mxu0 %vm5407_vm5, %v15915_v41  ;;  %11404 = vmatprep.mubr.msk.f32.mxu1 %vm5407_vm5, %v15931_v28  ;;  %v15979_v18 = vsel %vm1673_vm4, %v6214_v56, %v6215_v59  ;;  %v15990_v25 = vsel %vm1673_vm4, %v6774_v2, %v6775_v13  ;;  %v6226_v56 = vrot.slane %v15744_v17, 2  ;;  %v6229_v2 = vrot.slane %v15770_v30, 2 }
 0x3be   :  { %11554 = vmatprep.mubr.msk.f32.mxu0 %vm5407_vm5, %v15910_v39  ;;  %v6232_v59 = vrot.slane %v15791_v15, 2  ;;  %v7294_v13 = vrot.slane %v15915_v41, 2 }
 0x3bf   :  { %v6228_v49 = vsel %vm1673_vm4, %v6226_v56, %v6227_v63  ;;  %v6231_v34 = vsel %vm1673_vm4, %v6229_v2, %v6230_v33 }
 0x3c0   :  { %11405 = vmatmul.mubr.msk.f32.gmra.mxu1 %vm5407_vm5, %v15942_v1  ;;  %v6234_v43 = vsel %vm1673_vm4, %v6232_v59, %v6233_v31 }
 0x3c1   :  { %11555 = vmatmul.mubr.msk.f32.vlgmr.msra.gmra.mxu0 %vm5407_vm5, %v15921_v20  ;;  %11407 = vmatprep.mubr.msk.f32.mxu1 %vm5407_vm5, %v15950_v24 }
 0x3c2   :  { %11557 = vmatprep.mubr.msk.f32.mxu0 %vm5407_vm5, %v15931_v28 }
 0x3c4   :  { %11408 = vmatmul.mubr.msk.f32.gmra.mxu1 %vm5407_vm5, %v15961_v54 }
 0x3c5   :  { %11558 = vmatmul.mubr.msk.f32.gmra.mxu0 %vm5407_vm5, %v15942_v1  ;;  %11410 = vmatprep.mubr.msk.f32.mxu1 %vm5407_vm5, %v6213_v23  ;;  %v16001_v23 = vsel %vm1673_vm4, %v6220_v8, %v6221_v26  ;;  %v6777_v8 = vrot.slane %v15816_v10, 2  ;;  %v9617_v26 = vld [vmem:[%s16625_s3 + $0x38] sm:$0xff]  ;;  %s11784_s3 = scalar_lea.vmem %s8898_s27, 32 }
 0x3c6   :  { %11560 = vmatprep.mubr.msk.f32.mxu0 %vm5407_vm5, %v15950_v24  ;;  %p11785_p0 = scmp.ne.s32.totalorder %s8898_s27, %s11784_s3  ;;  %p11790_p2 = scmp.lt.s32.totalorder %s11784_s3, %s11784_s3 }
 0x3c8   :  { %11411 = vmatmul.mubr.msk.f32.gmra.mxu1 %vm5407_vm5, %v15979_v18  ;;  %p11791_p3 = por %p11790_p2, %p11789_p1 }
 0x3c9   :  { %11561 = vmatmul.mubr.msk.f32.gmra.mxu0 %vm5407_vm5, %v15961_v54  ;;  %11413 = vmatprep.mubr.msk.f32.mxu1 %vm5407_vm5, %v15987_v47 }
 0x3ca   :  { %11563 = vmatprep.mubr.msk.f32.mxu0 %vm5407_vm5, %v15990_v25  ;;  %p11792_p4 = pnand %p11791_p3, %p11785_p0 }
 0x3cc   :  { %11414 = vmatmul.mubr.msk.f32.gmra.mxu1 %vm5407_vm5, %v16001_v23 }
 0x3cd   :  { %11564 = vmatmul.mubr.msk.f32.gmra.mxu0 %vm5407_vm5, %v7293_v0  ;;  %11416 = vmatprep.mubr.msk.f32.mxu1 %vm5407_vm5, %v6225_v51  ;;  %v7296_v0 = vsel %vm1673_vm4, %v7294_v13, %v7295_v3 }
 0x3ce   :  { %11566 = vmatprep.mubr.msk.f32.mxu0 %vm5407_vm5, %v15987_v47 }
 0x3d0   :  { %11417 = vmatmul.mubr.msk.f32.gmra.mxu1 %vm5407_vm5, %v6228_v49 }
 0x3d1   :  { %11567 = vmatmul.mubr.msk.f32.gmra.mxu0 %vm5407_vm5, %v16001_v23  ;;  %11419 = vmatprep.mubr.msk.f32.mxu1 %vm5407_vm5, %v6231_v34 }
 0x3d2   :  { %11569 = vmatprep.mubr.msk.f32.mxu0 %vm5407_vm5, %v6225_v51 }
 0x3d4   :  { %11420 = vmatmul.mubr.msk.f32.gmra.mxu1 %vm5407_vm5, %v6234_v43 }
 0x3d5   :  { %11570 = vmatmul.mubr.msk.f32.gmra.mxu0 %vm5407_vm5, %v6228_v49  ;;  %11424 = vmatprep.mubr.msk.f32.mxu1 %vm5407_vm5, %v15812_v5  ;;  %v6779_v5 = vsel %vm1673_vm4, %v6777_v8, %v6778_v32 }
 0x3d6   :  { %11572 = vmatprep.mubr.msk.f32.mxu0 %vm5407_vm5, %v6231_v34 }
 0x3d8   :  { %11425 = vmatmul.mubr.msk.f32.vlgmr.msra.gmra.mxu1 %vm5407_vm5, %v15821_v37 }
 0x3d9   :  { %11573 = vmatmul.mubr.msk.f32.gmra.mxu0 %vm5407_vm5, %v6234_v43  ;;  %11475 = vmatpush3.msra.mxu1 %v15903_v22 }
 0x3da   :  { %11427 = vmatprep.mubr.msk.f32.mxu1 %vm5407_vm5, %v15830_v61  ;;  %11575 = vmatprep.mubr.msk.f32.mxu0 %vm5407_vm5, %v6779_v5 }
 0x3db   :  { %11526 = vmatprep.subr.mxu1 %v9617_v26 }
 0x3dc   :  { %11428 = vmatmul.mubr.msk.f32.gmra.mxu1 %vm5407_vm5, %v15846_v57 }
 0x3dd   :  { %11576 = vmatmul.mubr.msk.f32.gmra.mxu0 %vm5407_vm5, %v7296_v0  ;;  %11430 = vmatprep.mubr.msk.f32.mxu1 %vm5407_vm5, %v15923_v42 }
 0x3de   :  { %11638 = vmatprep.mubr.msk.f32.mxu0 %vm11807_vm11, %v17622_v9 }
 0x3e0   :  { %11431 = vmatmul.mubr.msk.f32.gmra.mxu1 %vm5407_vm5, %v11783_v60  ;;  %v7521_v60 = vld [vmem:[%s16627_s5 + $0x10] sm:$0xff] }
 0x3e1   :  { %11433 = vmatprep.mubr.msk.f32.mxu1 %vm5407_vm5, %v15509_v14  ;;  %v7118_v14 = vrot.slane %v15868_v44, 1 }
 0x3e4   :  { %11434 = vmatmul.mubr.msk.f32.gmra.mxu1 %vm5407_vm5, %v15552_v48  ;;  %v7119_v48 = vrot.slane %v15958_v53, 1 }
 0x3e5   :  { %11436 = vmatprep.mubr.msk.f32.mxu1 %vm5407_vm5, %v15591_v19 }
 0x3e8   :  { %11437 = vmatmul.mubr.msk.f32.gmra.mxu1 %vm5407_vm5, %v15633_v38 }
 0x3e9   :  { %11439 = vmatprep.mubr.msk.f32.mxu1 %vm5407_vm5, %v15674_v55 }
 0x3ec   :  { %11440 = vmatmul.mubr.msk.f32.gmra.mxu1 %vm5407_vm5, %v15711_v27 }
 0x3ed   :  { %11442 = vmatprep.mubr.msk.f32.mxu1 %vm5407_vm5, %v15744_v17 }
 0x3f0   :  { %11443 = vmatmul.mubr.msk.f32.gmra.mxu1 %vm5407_vm5, %v15770_v30 }
 0x3f1   :  { %11445 = vmatprep.mubr.msk.f32.mxu1 %vm5407_vm5, %v15791_v15 }
 0x3f4   :  { %11446 = vmatmul.mubr.msk.f32.gmra.mxu1 %vm5407_vm5, %v15816_v10 }
 0x3f5   :  { %11476 = vmatprep.mubr.msk.f32.mxu1 %vm5407_vm5, %v15897_v50 }
 0x3f8   :  { %11477 = vmatmul.mubr.msk.f32.vlgmr.msra.gmra.mxu1 %vm5407_vm5, %v15910_v39 }
 0x3f9   :  { %11527 = vmatpush3.msra.mxu1 %v9617_v26  ;;  %11479 = vmatprep.mubr.msk.f32.mxu1 %vm5407_vm5, %v15921_v20 }
 0x3fa   :  { %11578 = vmatprep.subr.mxu1 %v17622_v9 }
 0x3fc   :  { %11480 = vmatmul.mubr.msk.f32.gmra.mxu1 %vm5407_vm5, %v15931_v28 }
 0x3fd   :  { %11482 = vmatprep.mubr.msk.f32.mxu1 %vm5407_vm5, %v15942_v1 }
 0x400   :  { %11483 = vmatmul.mubr.msk.f32.gmra.mxu1 %vm5407_vm5, %v15950_v24 }
 0x401   :  { %11485 = vmatprep.mubr.msk.f32.mxu1 %vm5407_vm5, %v15961_v54 }
 0x404   :  { %11486 = vmatmul.mubr.msk.f32.gmra.mxu1 %vm5407_vm5, %v15990_v25 }
 0x405   :  { %11488 = vmatprep.mubr.msk.f32.mxu1 %vm5407_vm5, %v15979_v18 }
 0x408   :  { %11489 = vmatmul.mubr.msk.f32.gmra.mxu1 %vm5407_vm5, %v15987_v47  ;;  %v7522_v47 = vld [vmem:[%s16627_s5 + $0x18] sm:$0xff] }
 0x409   :  { %11491 = vmatprep.mubr.msk.f32.mxu1 %vm5407_vm5, %v16001_v23 }
 0x40c   :  { %11492 = vmatmul.mubr.msk.f32.gmra.mxu1 %vm5407_vm5, %v6225_v51 }
 0x40d   :  { %11494 = vmatprep.mubr.msk.f32.mxu1 %vm5407_vm5, %v6228_v49 }
 0x410   :  { %11495 = vmatmul.mubr.msk.f32.gmra.mxu1 %vm5407_vm5, %v6231_v34 }
 0x411   :  { %11497 = vmatprep.mubr.msk.f32.mxu1 %vm5407_vm5, %v6234_v43 }
 0x414   :  { %11498 = vmatmul.mubr.msk.f32.gmra.mxu1 %vm5407_vm5, %v6779_v5 }
 0x415   :  { %11528 = vmatprep.mubr.msk.f32.mxu1 %vm5407_vm5, %v15319_v58  ;;  %v7120_v58 = vsel %vm477_vm3, %v7118_v14, %v7119_v48 }
 0x418   :  { %11529 = vmatmul.mubr.msk.f32.vlgmr.msra.gmra.mxu1 %vm5407_vm5, %v15357_v7  ;;  %v16125_v7 = vpop.f32.mrf.mxu1 }
 0x419   :  { %11531 = vmatprep.mubr.msk.f32.mxu1 %vm5407_vm5, %v15393_v11  ;;  %v7121_v11 = vrot.slane %v15915_v41, 1  ;;  %11579 = vmatpush3.msra.mxu1 %v7522_v47 }
 0x41a   :  { %11580 = vmatprep.subr.mxu1 %v17622_v9 }
 0x41b   :  { %11581 = vmatpush3.msra.mxu1 %v7521_v60 }
 0x41c   :  { %11532 = vmatmul.mubr.msk.f32.gmra.mxu1 %vm5407_vm5, %v15439_v40  ;;  %v7122_v40 = vrot.slane %v16026_v21, 1  ;;  %11585 = vmatprep.subr.mxu1 %v17622_v9 }
 0x41d   :  { %11534 = vmatprep.mubr.msk.f32.mxu1 %vm5407_vm5, %v15486_v46  ;;  %v16133_v46 = vpop.f32.mrf.mxu1 }
 0x420   :  { %11535 = vmatmul.mubr.msk.f32.gmra.mxu1 %vm5407_vm5, %v15528_v4  ;;  %v16135_v4 = vpop.f32.mrf.mxu1 }
 0x421   :  { %11537 = vmatprep.mubr.msk.f32.mxu1 %vm5407_vm5, %v15568_v16  ;;  %v7123_v16 = vsel %vm477_vm3, %v7121_v11, %v7122_v40 }
 0x422   :  { %v16142_v19 = vpop.f32.mrf.mxu1 }
 0x424   :  { %11538 = vmatmul.mubr.msk.f32.gmra.mxu1 %vm5407_vm5, %v7120_v58  ;;  %v16145_v38 = vpop.f32.mrf.mxu1 }
 0x425   :  { %11540 = vmatprep.mubr.msk.f32.mxu1 %vm5407_vm5, %v15649_v45 }
 0x426   :  { %v16147_v45 = vpop.f32.mrf.mxu1 }
 0x428   :  { %11541 = vmatmul.mubr.msk.f32.gmra.mxu1 %vm5407_vm5, %v15690_v12  ;;  %v16149_v55 = vpop.f32.mrf.mxu1 }
 0x429   :  { %11543 = vmatprep.mubr.msk.f32.mxu1 %vm5407_vm5, %v15725_v36 }
 0x42a   :  { %v16151_v12 = vpop.f32.mrf.mxu1 }
 0x42c   :  { %11544 = vmatmul.mubr.msk.f32.gmra.mxu1 %vm5407_vm5, %v15755_v29  ;;  %v16153_v27 = vpop.f32.mrf.mxu1  ;;  %v16155_v29 = vpop.f32.mrf.mxu0 }
 0x42d   :  { %11546 = vmatprep.mubr.msk.f32.mxu1 %vm5407_vm5, %v15779_v52 }
 0x42e   :  { %v5971_v36 = vpop.f32.mrf.mxu1  ;;  %v16157_v52 = vpop.f32.mrf.mxu0 }
 0x430   :  { %11547 = vmatmul.mubr.msk.f32.gmra.mxu1 %vm5407_vm5, %v15800_v6  ;;  %v11363_v17 = vpop.f32.mrf.mxu1  ;;  %v16159_v6 = vpop.f32.mrf.mxu0 }
 0x431   :  { %11549 = vmatprep.mubr.msk.f32.mxu1 %vm5407_vm5, %v15828_v62 }
 0x432   :  { %v5981_v30 = vpop.f32.mrf.mxu1  ;;  %v16161_v37 = vpop.f32.mrf.mxu0 }
 0x434   :  { %11550 = vmatmul.mubr.msk.f32.gmra.mxu1 %vm5407_vm5, %v7123_v16  ;;  %v16163_v61 = vpop.f32.mrf.mxu0 }
 0x435   :  { %11582 = vmatprep.mubr.msk.f32.mxu1 %vm11807_vm11, %v17622_v9 }
 0x436   :  { %v16165_v50 = vpop.f32.mrf.mxu0 }
 0x438   :  { %v16167_v39 = vpop.f32.mrf.mxu0 }
 0x43a   :  { %v16169_v42 = vpop.f32.mrf.mxu0 }
 0x43c   :  { %v16171_v1 = vpop.f32.mrf.mxu0 }
 0x43e   :  { %v16173_v54 = vpop.f32.mrf.mxu0 }
 0x440   :  { %v16178_v25 = vpop.f32.mrf.mxu0 }
 0x442   :  { %v16181_v51 = vpop.f32.mrf.mxu0 }
 0x444   :  { %v11366_v15 = vpop.f32.mrf.mxu1 }
 0x446   :  { %v5991_v10 = vpop.f32.mrf.mxu1 }
 0x44d   :  { %v16183_v33 = vpop.f32.mrf.mxu0 }
 0x44e   :  { %17623 = vst [vmem:[#allocation19_spill] sm:$0xff] %v16183_v33 }
 0x44f   :  { %v16185_v43 = vpop.f32.mrf.mxu0 }
 0x450   :  { %17624 = vst [vmem:[#allocation36_spill] sm:$0xff] %v16185_v43 }
 0x454   :  { %v11369_v62 = vpop.f32.mrf.mxu1 }
 0x456   :  { %v6001_v57 = vpop.f32.mrf.mxu1 }
 0x458   :  { %v11374_v44 = vpop.f32.mrf.mxu1 }
 0x459   :  { %v6114_v5 = vadd.f32 %v11374_v44, %v16125_v7 }
 0x45a   :  { %v6108_v22 = vpop.f32.mrf.mxu1 }
 0x45b   :  { %v6109_v58 = vadd.f32 %v6108_v22, %v16133_v46 }
 0x45c   :  { %v11377_v41 = vpop.f32.mrf.mxu1 }
 0x45d   :  { %v16187_v8 = vpop.f32.mrf.mxu0  ;;  %v6124_v16 = vadd.f32 %v11377_v41, %v16135_v4  ;;  %v8162_v41 = vld [vmem:[%s16627_s5 + $0x88] sm:$0xff] }
 0x45e   :  { %v6118_v20 = vpop.f32.mrf.mxu1  ;;  %17625 = vst [vmem:[#allocation21_spill] sm:$0xff] %v16187_v8  ;;  %11635 = vmatpush3.msra.mxu0 %v8162_v41 }
 0x45f   :  { %v16193_v14 = vpop.f32.mrf.mxu0  ;;  %11636 = vmatprep.subr.mxu0 %v17622_v9 }
 0x460   :  { %v11380_v28 = vpop.f32.mrf.mxu1 }
 0x462   :  { %v6128_v24 = vpop.f32.mrf.mxu1 }
 0x463   :  { %v6129_v44 = vadd.f32 %v6128_v24, %v16147_v45 }
 0x464   :  { %v11383_v53 = vpop.f32.mrf.mxu1 }
 0x466   :  { %v6138_v18 = vpop.f32.mrf.mxu1 }
 0x467   :  { %v6139_v45 = vadd.f32 %v6138_v18, %v16151_v12 }
 0x468   :  { %v11386_v35 = vpop.f32.mrf.mxu1 }
 0x46a   :  { %v6148_v23 = vpop.f32.mrf.mxu1 }
 0x46b   :  { %v6149_v56 = vadd.f32 %v6148_v23, %v5971_v36  ;;  %v6144_v23 = vadd.f32 %v11383_v53, %v16149_v55 }
 0x46c   :  { %v11389_v2 = vpop.f32.mrf.mxu1 }
 0x46d   :  { %v6164_v63 = vadd.f32 %v11389_v2, %v11363_v17  ;;  %v16198_v17 = vpop.f32.mrf.mxu0 }
 0x46e   :  { %v6158_v49 = vpop.f32.mrf.mxu1 }
 0x46f   :  { %v6159_v59 = vadd.f32 %v6158_v49, %v5981_v30  ;;  %v6119_v30 = vadd.f32 %v6118_v20, %v16142_v19  ;;  %v6154_v49 = vadd.f32 %v11386_v35, %v16153_v27 }
 0x470   :  { %v11392_v34 = vpop.f32.mrf.mxu1 }
 0x471   :  { %v6174_v31 = vadd.f32 %v11392_v34, %v11366_v15 }
 0x472   :  { %v6168_v21 = vpop.f32.mrf.mxu1 }
 0x473   :  { %v6169_v13 = vadd.f32 %v6168_v21, %v5991_v10  ;;  %v6134_v10 = vadd.f32 %v11380_v28, %v16145_v38  ;;  %v8161_v38 = vld [vmem:[%s16627_s5 + $0x80] sm:$0xff] }
 0x474   :  { %v11395_v3 = vpop.f32.mrf.mxu1  ;;  %11637 = vmatpush3.msra.mxu0 %v8161_v38 }
 0x475   :  { %v6184_v32 = vadd.f32 %v11395_v3, %v11369_v62  ;;  %11648 = vmatprep.subr.mxu0 %v17622_v9 }
 0x476   :  { %v6178_v26 = vpop.f32.mrf.mxu1 }
 0x477   :  { %v6179_v0 = vadd.f32 %v6178_v26, %v6001_v57  ;;  %v16206_v57 = vpop.f32.mrf.mxu0 }
 0x478   :  { %v11400_v48 = vpop.f32.mrf.mxu1 }
 0x479   :  { %v6415_v11 = vadd.f32 %v11400_v48, %v6114_v5  ;;  %v16217_v20 = vpop.f32.mrf.mxu0 }
 0x47a   :  { %v6335_v40 = vpop.f32.mrf.mxu1 }
 0x47b   :  { %v6414_v36 = vadd.f32 %v6335_v40, %v6109_v58  ;;  %v16222_v53 = vpop.f32.mrf.mxu0 }
 0x47c   :  { %v11403_v7 = vpop.f32.mrf.mxu1 }
 0x47d   :  { %v6417_v46 = vadd.f32 %v11403_v7, %v6124_v16  ;;  %v16228_v5 = vpop.f32.mrf.mxu0 }
 0x47e   :  { %v6345_v15 = vpop.f32.mrf.mxu1 }
 0x47f   :  { %v6416_v62 = vadd.f32 %v6345_v15, %v6119_v30  ;;  %v16230_v58 = vpop.f32.mrf.mxu0 }
 0x480   :  { %v11406_v4 = vpop.f32.mrf.mxu1 }
 0x481   :  { %v6419_v22 = vadd.f32 %v11406_v4, %v6134_v10  ;;  %v16236_v7 = vpop.f32.mrf.mxu0 }
 0x482   :  { %v6355_v47 = vpop.f32.mrf.mxu1 }
 0x483   :  { %v6418_v19 = vadd.f32 %v6355_v47, %v6129_v44  ;;  %v16238_v4 = vpop.f32.mrf.mxu0 }
 0x484   :  { %v11409_v28 = vpop.f32.mrf.mxu1 }
 0x485   :  { %v6421_v24 = vadd.f32 %v11409_v28, %v6144_v23  ;;  %v16240_v47 = vpop.f32.mrf.mxu0 }
 0x486   :  { %v6365_v2 = vpop.f32.mrf.mxu1  ;;  %17626 = vst [vmem:[#allocation37_spill] sm:$0xff] %v16240_v47 }
 0x487   :  { %v6420_v55 = vadd.f32 %v6365_v2, %v6139_v45 }
 0x488   :  { %v11412_v34 = vpop.f32.mrf.mxu1 }
 0x489   :  { %v16224_v21 = vadd.f32 %v11412_v34, %v6154_v49 }
 0x48a   :  { %v6375_v3 = vpop.f32.mrf.mxu1 }
 0x48b   :  { %v16226_v26 = vadd.f32 %v6375_v3, %v6149_v56 }
 0x48c   :  { %v11415_v60 = vpop.f32.mrf.mxu1 }
 0x48d   :  { %v6425_v48 = vadd.f32 %v11415_v60, %v6164_v63 }
 0x48e   :  { %v6385_v12 = vpop.f32.mrf.mxu1 }
 0x48f   :  { %v6424_v18 = vadd.f32 %v6385_v12, %v6159_v59 }
 0x490   :  { %v11418_v40 = vpop.f32.mrf.mxu1 }
 0x491   :  { %v16232_v16 = vadd.f32 %v11418_v40, %v6174_v31 }
 0x492   :  { %v6395_v27 = vpop.f32.mrf.mxu1 }
 0x493   :  { %v16234_v35 = vadd.f32 %v6395_v27, %v6169_v13  ;;  %v16242_v13 = vpop.f32.mrf.mxu0 }
 0x494   :  { %v11421_v30 = vpop.f32.mrf.mxu1  ;;  %17627 = vst [vmem:[#allocation22_spill] sm:$0xff] %v16242_v13 }
 0x495   :  { %v6429_v15 = vadd.f32 %v11421_v30, %v6184_v32 }
 0x496   :  { %v6405_v56 = vpop.f32.mrf.mxu1 }
 0x497   :  { %v6428_v10 = vadd.f32 %v6405_v56, %v6179_v0  ;;  %v16246_v0 = vpop.f32.mrf.mxu0 }
 0x498   :  { %v11426_v44 = vpop.f32.mrf.mxu1  ;;  %17628 = vst [vmem:[#allocation40_spill] sm:$0xff] %v16246_v0 }
 0x499   :  { %v6584_v63 = vadd.f32 %v11426_v44, %v6415_v11  ;;  %v16252_v60 = vpop.f32.mrf.mxu0 }
 0x49a   :  { %v6504_v41 = vpop.f32.mrf.mxu1  ;;  %17629 = vst [vmem:[#allocation24_spill] sm:$0xff] %v16252_v60 }
 0x49b   :  { %v6583_v59 = vadd.f32 %v6504_v41, %v6414_v36 }
 0x49c   :  { %v11429_v23 = vpop.f32.mrf.mxu1 }
 0x49d   :  { %v6586_v31 = vadd.f32 %v11429_v23, %v6417_v46 }
 0x49e   :  { %v6514_v38 = vpop.f32.mrf.mxu1 }
 0x49f   :  { %v6585_v28 = vadd.f32 %v6514_v38, %v6416_v62  ;;  %v16254_v62 = vpop.f32.mrf.mxu0 }
 0x4a0   :  { %v11432_v45 = vpop.f32.mrf.mxu1  ;;  %17630 = vst [vmem:[#allocation43_spill] sm:$0xff] %v16254_v62 }
 0x4a1   :  { %v6588_v2 = vadd.f32 %v11432_v45, %v6419_v22  ;;  %v16260_v30 = vpop.f32.mrf.mxu0  ;;  %v6760_v33 = vadd.f32 %v16161_v37, %v6585_v28 }
 0x4a2   :  { %v6524_v49 = vpop.f32.mrf.mxu1  ;;  %17631 = vst [vmem:[#allocation20_spill] sm:$0xff] %v16260_v30 }
 0x4a3   :  { %v16244_v32 = vadd.f32 %v6524_v49, %v6418_v19 }
 0x4a4   :  { %v11435_v34 = vpop.f32.mrf.mxu1 }
 0x4a5   :  { %v16248_v3 = vadd.f32 %v11435_v34, %v6421_v24  ;;  %v6761_v34 = vadd.f32 %v16159_v6, %v6586_v31 }
 0x4a6   :  { %v6534_v11 = vpop.f32.mrf.mxu1 }
 0x4a7   :  { %v16250_v36 = vadd.f32 %v6534_v11, %v6420_v55  ;;  %v16266_v55 = vpop.f32.mrf.mxu0 }
 0x4a8   :  { %v11438_v46 = vpop.f32.mrf.mxu1  ;;  %17632 = vst [vmem:[#allocation23_spill] sm:$0xff] %v16266_v55 }
 0x4a9   :  { %v16270_v45 = vpop.f32.mrf.mxu0 }
 0x4aa   :  { %v6544_v12 = vpop.f32.mrf.mxu1  ;;  %17634 = vst [vmem:[#allocation58_spill] sm:$0xff] %v16270_v45 }
 0x4ab   :  { %v11556_v11 = vpop.f32.mrf.mxu0 }
 0x4ac   :  { %v11441_v40 = vpop.f32.mrf.mxu1 }
 0x4ad   :  { %v16256_v27 = vadd.f32 %v11441_v40, %v6425_v48  ;;  %v7369_v30 = vpop.f32.mrf.mxu0 }
 0x4ae   :  { %v6554_v22 = vpop.f32.mrf.mxu1 }
 0x4af   :  { %v16258_v19 = vadd.f32 %v6554_v22, %v6424_v18  ;;  %v11559_v62 = vpop.f32.mrf.mxu0 }
 0x4b0   :  { %v16262_v56 = vpop.f32.mrf.mxu1 }
 0x4b1   :  { %v7379_v45 = vpop.f32.mrf.mxu0 }
 0x4b2   :  { %v16264_v24 = vpop.f32.mrf.mxu1 }
 0x4b4   :  { %v11447_v44 = vpop.f32.mrf.mxu1 }
 0x4b5   :  { %v16268_v41 = vadd.f32 %v11447_v44, %v6429_v15 }
 0x4b6   :  { %v6574_v23 = vpop.f32.mrf.mxu1 }
 0x4b7   :  { %17633 = vst [vmem:[#allocation127_spill] sm:$0xff] %v16268_v41  ;;  %v6597_v38 = vadd.f32 %v6574_v23, %v6428_v10 }
 0x4b8   :  { %v11478_v48 = vpop.f32.mrf.mxu1 }
 0x4b9   :  { %v16273_v49 = vadd.f32 %v16193_v14, %v6597_v38  ;;  %v11562_v14 = vpop.f32.mrf.mxu0 }
 0x4ba   :  { %v6852_v18 = vpop.f32.mrf.mxu1 }
 0x4bb   :  { %17635 = vst [vmem:[#allocation10_spill] sm:$0xff] %v16273_v49  ;;  %v16283_v31 = vpop.f32.mrf.mxu0  ;;  %v6758_v49 = vadd.f32 %v16157_v52, %v6583_v59  ;;  %v16306_v59 = vld [vmem:[%s16626_s4] ss:$0 sm:$0xff] }
 0x4bc   :  { %v11481_v40 = vpop.f32.mrf.mxu1 }
 0x4bd   :  { %v6934_v22 = vadd.f32 %v11481_v40, %v6761_v34  ;;  %v16291_v13 = vpop.f32.mrf.mxu0  ;;  %v6931_v41 = vadd.f32 %v6852_v18, %v6758_v49 }
 0x4be   :  { %v6862_v9 = vpop.f32.mrf.mxu1 }
 0x4bf   :  { %v7103_v55 = vadd.f32 %v16217_v20, %v6934_v22  ;;  %v6759_v20 = vadd.f32 %v16155_v29, %v6584_v63  ;;  %v6933_v29 = vadd.f32 %v6862_v9, %v6760_v33  ;;  %v6763_v63 = vadd.f32 %v16163_v61, %v6588_v2 }
 0x4c0   :  { %v11484_v15 = vpop.f32.mrf.mxu1  ;;  %v7100_v52 = vadd.f32 %v16206_v57, %v6931_v41  ;;  %v6591_v9 = vadd.f32 %v6544_v12, %v16226_v26  ;;  %v6762_v61 = vadd.f32 %v16165_v50, %v16244_v32  ;;  %v6765_v33 = vadd.f32 %v16167_v39, %v16248_v3 }
 0x4c1   :  { %v6932_v22 = vadd.f32 %v11478_v48, %v6759_v20  ;;  %v6936_v18 = vadd.f32 %v11484_v15, %v6763_v63 }
 0x4c2   :  { %v6872_v44 = vpop.f32.mrf.mxu1 }
 0x4c3   :  { %v7101_v47 = vadd.f32 %v16198_v17, %v6932_v22  ;;  %v6592_v17 = vadd.f32 %v11438_v46, %v16224_v21  ;;  %v6935_v15 = vadd.f32 %v6872_v44, %v6762_v61  ;;  %v6764_v21 = vadd.f32 %v16169_v42, %v16250_v36 }
 0x4c4   :  { %v11487_v10 = vpop.f32.mrf.mxu1  ;;  %v7105_v32 = vadd.f32 %v16228_v5, %v6936_v18 }
 0x4c5   :  { %v6767_v3 = vadd.f32 %v16171_v1, %v6592_v17 }
 0x4c6   :  { %v6882_v23 = vpop.f32.mrf.mxu1 }
 0x4c7   :  { %v6937_v5 = vadd.f32 %v6882_v23, %v6764_v21  ;;  %v17644_v21 = vld [vmem:[#allocation22_spill] sm:$0xff] }
 0x4c8   :  { %v11490_v60 = vpop.f32.mrf.mxu1 }
 0x4ca   :  { %v16277_v0 = vpop.f32.mrf.mxu1 }
 0x4cc   :  { %v16279_v38 = vpop.f32.mrf.mxu1 }
 0x4ce   :  { %v16281_v6 = vpop.f32.mrf.mxu1 }
 0x4cf   :  { %17636 = vst [vmem:[#allocation60_spill] sm:$0xff] %v16281_v6  ;;  %v16299_v6 = vpop.f32.mrf.mxu0 }
 0x4d0   :  { %v16285_v34 = vpop.f32.mrf.mxu1 }
 0x4d1   :  { %17637 = vst [vmem:[#allocation52_spill] sm:$0xff] %v16285_v34  ;;  %v16308_v28 = vpop.f32.mrf.mxu0 }
 0x4d2   :  { %v16288_v40 = vpop.f32.mrf.mxu1 }
 0x4d3   :  { %v16322_v39 = vpop.f32.mrf.mxu0 }
 0x4d4   :  { %v16293_v8 = vpop.f32.mrf.mxu1 }
 0x4d6   :  { %v16295_v43 = vpop.f32.mrf.mxu1 }
 0x4d8   :  { %v11530_v34 = vpop.f32.mrf.mxu1 }
 0x4d9   :  { %v7276_v48 = vadd.f32 %v11530_v34, %v7101_v47  ;;  %v6938_v34 = vadd.f32 %v11487_v10, %v6765_v33  ;;  %v17640_v33 = vld [vmem:[#allocation19_spill] sm:$0xff] }
 0x4da   :  { %v7196_v49 = vpop.f32.mrf.mxu1 }
 0x4db   :  { %v7449_v20 = vadd.f32 %v11556_v11, %v7276_v48  ;;  %v7275_v37 = vadd.f32 %v7196_v49, %v7100_v52  ;;  %v7102_v11 = vadd.f32 %v16222_v53, %v6933_v29  ;;  %v6769_v53 = vadd.f32 %v16178_v25, %v16256_v27  ;;  %v11571_v52 = vpop.f32.mrf.mxu0 }
 0x4dc   :  { %v11533_v57 = vpop.f32.mrf.mxu1  ;;  %v7104_v29 = vadd.f32 %v16230_v58, %v6935_v15  ;;  %v7107_v1 = vadd.f32 %v16236_v7, %v6938_v34  ;;  %v6595_v49 = vadd.f32 %v16264_v24, %v16234_v35  ;;  %v17638_v35 = vld [vmem:[#allocation60_spill] sm:$0xff]  ;;  %v17643_v15 = vld [vmem:[#allocation21_spill] sm:$0xff] }
 0x4dd   :  { %v7472_v47 = vadd.f32 %v16306_v59, %v7449_v20  ;;  %v7448_v2 = vadd.f32 %v7369_v30, %v7275_v37  ;;  %v7278_v41 = vadd.f32 %v11533_v57, %v7103_v55  ;;  %v6766_v30 = vadd.f32 %v16173_v54, %v6591_v9  ;;  %v7419_v61 = vpop.f32.mrf.mxu0  ;;  %v17641_v57 = vld [vmem:[#allocation36_spill] sm:$0xff] }
 0x4de   :  { %v7206_v46 = vpop.f32.mrf.mxu1  ;;  %v6940_v54 = vadd.f32 %v11490_v60, %v6767_v3  ;;  %v6942_v58 = vadd.f32 %v16279_v38, %v6769_v53  ;;  %v7106_v37 = vadd.f32 %v16238_v4, %v6937_v5  ;;  %v17646_v53 = vld [vmem:[#allocation52_spill] sm:$0xff] }
 0x4df   :  { %v7471_v26 = vadd.f32 %v16306_v59, %v7448_v2  ;;  %v7451_v12 = vadd.f32 %v11559_v62, %v7278_v41  ;;  %v7277_v50 = vadd.f32 %v7206_v46, %v7102_v11  ;;  %v7488_v55 = vmax.f32 %v7472_v47, 0.0 }
 0x4e0   :  { %v11536_v44 = vpop.f32.mrf.mxu1  ;;  %v6596_v62 = vadd.f32 %v16262_v56, %v16232_v16  ;;  %v6768_v16 = vadd.f32 %v16181_v51, %v16258_v19  ;;  %v17639_v51 = vld [vmem:[#allocation37_spill] sm:$0xff]  ;;  %v6770_v47 = vadd.f32 %v17641_v57, %v6595_v49  ;;  %v17648_v49 = vld [vmem:[#allocation10_spill] sm:$0xff] }
 0x4e1   :  { %v7487_v10 = vmax.f32 %v7471_v26, 0.0  ;;  %v7474_v42 = vadd.f32 %v16306_v59, %v7451_v12  ;;  %v7450_v36 = vadd.f32 %v7379_v45, %v7277_v50  ;;  %v7280_v22 = vadd.f32 %v11536_v44, %v7105_v32  ;;  %v17645_v26 = vld [vmem:[#allocation40_spill] sm:$0xff] }
 0x4e2   :  { %v7216_v63 = vpop.f32.mrf.mxu1  ;;  %v6939_v45 = vadd.f32 %v16277_v0, %v6766_v30  ;;  %v6941_v24 = vadd.f32 %v17638_v35, %v6768_v16  ;;  %v7109_v19 = vadd.f32 %v17639_v51, %v6940_v54  ;;  %v6771_v38 = vadd.f32 %v17640_v33, %v6596_v62  ;;  %v17651_v33 = vld [vmem:[#allocation23_spill] sm:$0xff] }
 0x4e3   :  { %v7503_v48 = vmax.f32 %v7487_v10, %v7488_v55  ;;  %v7473_v25 = vadd.f32 %v16306_v59, %v7450_v36  ;;  %v7453_v27 = vadd.f32 %v11562_v14, %v7280_v22  ;;  %v7279_v56 = vadd.f32 %v7216_v63, %v7104_v29  ;;  %v11574_v22 = vpop.f32.mrf.mxu0 }
 0x4e4   :  { %v11539_v23 = vpop.f32.mrf.mxu1  ;;  %v7490_v18 = vmax.f32 %v7474_v42, 0.0  ;;  %v7108_v46 = vadd.f32 %v17644_v21, %v6939_v45  ;;  %v7111_v12 = vadd.f32 %v17645_v26, %v6942_v58  ;;  %v6944_v55 = vadd.f32 %v17646_v53, %v6771_v38  ;;  %v17647_v42 = vld [vmem:[#allocation24_spill] sm:$0xff] }
 0x4e5   :  { %v7489_v7 = vmax.f32 %v7473_v25, 0.0  ;;  %v7282_v60 = vadd.f32 %v11539_v23, %v7107_v1  ;;  %v7476_v20 = vadd.f32 %v16306_v59, %v7453_v27  ;;  %v7452_v14 = vadd.f32 %v16283_v31, %v7279_v56  ;;  %v17642_v31 = vld [vmem:[#allocation127_spill] sm:$0xff] }
 0x4e6   :  { %v7226_v17 = vpop.f32.mrf.mxu1  ;;  %v6773_v4 = vadd.f32 %v17643_v15, %v17642_v31  ;;  %v7110_v36 = vadd.f32 %v17647_v42, %v6941_v24  ;;  %v6943_v62 = vadd.f32 %v16288_v40, %v6770_v47  ;;  %v7513_v5 = vrot.slane %v7503_v48, 1 }
 0x4e7   :  { %v7504_v0 = vmax.f32 %v7489_v7, %v7490_v18  ;;  %v7455_v9 = vadd.f32 %v16291_v13, %v7282_v60  ;;  %v7475_v2 = vadd.f32 %v16306_v59, %v7452_v14  ;;  %v7281_v41 = vadd.f32 %v7226_v17, %v7106_v37  ;;  %v17649_v7 = vld [vmem:[#allocation43_spill] sm:$0xff] }
 0x4e8   :  { %v11542_v11 = vpop.f32.mrf.mxu1  ;;  %v7492_v13 = vmax.f32 %v7476_v20, 0.0  ;;  %v6946_v54 = vadd.f32 %v16293_v8, %v6773_v4  ;;  %v7113_v60 = vadd.f32 %v17649_v7, %v6944_v55  ;;  %v7429_v20 = vpop.f32.mrf.mxu0  ;;  %v16367_v8 = vmax.f32 %v7503_v48, %v7513_v5  ;;  %v17652_v48 = vld [vmem:[#allocation58_spill] sm:$0xff] }
 0x4e9   :  { %v7284_v34 = vadd.f32 %v11542_v11, %v7109_v19  ;;  %v7491_v50 = vmax.f32 %v7475_v2, 0.0  ;;  %v7478_v32 = vadd.f32 %v16306_v59, %v7455_v9  ;;  %v7454_v3 = vadd.f32 %v16299_v6, %v7281_v41 }
 0x4ea   :  { %v7236_v30 = vpop.f32.mrf.mxu1  ;;  %v7834_v45 = vrot.slane %v7504_v0, 1  ;;  %v7115_v38 = vadd.f32 %v17651_v33, %v6946_v54  ;;  %v11577_v47 = vpop.f32.mrf.mxu0 }
 0x4eb   :  { %v7457_v44 = vadd.f32 %v16308_v28, %v7284_v34  ;;  %v7283_v10 = vadd.f32 %v7236_v30, %v7108_v46  ;;  %v7505_v29 = vmax.f32 %v7491_v50, %v7492_v13  ;;  %v7477_v63 = vadd.f32 %v16306_v59, %v7454_v3 }
 0x4ec   :  { %v11545_v1 = vpop.f32.mrf.mxu1  ;;  %v6945_v28 = vadd.f32 %v16295_v43, %v17648_v49  ;;  %v7494_v16 = vmax.f32 %v7478_v32, 0.0  ;;  %v16372_v9 = vmax.f32 %v7504_v0, %v7834_v45  ;;  %v7525_v34 = vrot.slane %v16367_v8, 2  ;;  %v7439_v32 = vpop.f32.mrf.mxu0 }
 0x4ed   :  { %v7480_v6 = vadd.f32 %v16306_v59, %v7457_v44  ;;  %v7456_v25 = vadd.f32 %v16322_v39, %v7283_v10  ;;  %v7286_v27 = vadd.f32 %v11545_v1, %v7111_v12  ;;  %v7493_v56 = vmax.f32 %v7477_v63, 0.0 }
 0x4ee   :  { %v7246_v23 = vpop.f32.mrf.mxu1  ;;  %v7114_v57 = vadd.f32 %v17652_v48, %v6945_v28  ;;  %v8155_v2 = vrot.slane %v7505_v29, 1  ;;  %v7678_v0 = vrot.slane %v16367_v8, 4  ;;  %v7756_v3 = vrot.slane %v16367_v8, 6  ;;  %v7676_v48 = vld [vmem:[%s16627_s5 + $0x20] sm:$0xff] }
 0x4ef   :  { %v7479_v40 = vadd.f32 %v16306_v59, %v7456_v25  ;;  %v7459_v58 = vadd.f32 %v11571_v52, %v7286_v27  ;;  %v7285_v18 = vadd.f32 %v7246_v23, %v7110_v36  ;;  %v16369_v14 = vmax.f32 %v7493_v56, %v7494_v16  ;;  %v17650_v52 = vld [vmem:[#allocation20_spill] sm:$0xff] }
 0x4f0   :  { %v7496_v39 = vmax.f32 %v7480_v6, 0.0  ;;  %v11548_v37 = vpop.f32.mrf.mxu1  ;;  %v7112_v51 = vadd.f32 %v17650_v52, %v6943_v62  ;;  %v7921_v30 = vrot.slane %v16372_v9, 2  ;;  %v7999_v53 = vrot.slane %v16372_v9, 4 }
 0x4f1   :  { %v7495_v17 = vmax.f32 %v7479_v40, 0.0  ;;  %v7482_v43 = vadd.f32 %v16306_v59, %v7459_v58  ;;  %v7458_v35 = vadd.f32 %v7419_v61, %v7285_v18  ;;  %v7288_v24 = vadd.f32 %v11548_v37, %v7113_v60  ;;  %v7519_v18 = vld [vmem:[%s16627_s5] sm:$0xff] }
 0x4f2   :  { %v7256_v19 = vpop.f32.mrf.mxu1  ;;  %v16384_v55 = vmax.f32 %v7505_v29, %v8155_v2  ;;  %v8476_v36 = vrot.slane %v16369_v14, 1  ;;  %v7520_v29 = vld [vmem:[%s16627_s5 + $0x8] sm:$0xff] }
 0x4f3   :  { %v7507_v41 = vmax.f32 %v7495_v17, %v7496_v39  ;;  %v7481_v11 = vadd.f32 %v16306_v59, %v7458_v35  ;;  %v7461_v31 = vadd.f32 %v11574_v22, %v7288_v24  ;;  %v7498_v15 = vmax.f32 %v7482_v43, 0.0  ;;  %v7677_v35 = vld [vmem:[%s16627_s5 + $0x28] sm:$0xff] }
 0x4f4   :  { %v7287_v4 = vadd.f32 %v7256_v19, %v7112_v51  ;;  %v11551_v61 = vpop.f32.mrf.mxu1  ;;  %v8480_v17 = vmax.f32 %v16369_v14, %v8476_v36  ;;  %v8077_v24 = vrot.slane %v16372_v9, 6  ;;  %v8242_v2 = vrot.slane %v16384_v55, 2 }
 0x4f5   :  { %v7514_v21 = vrot.slane %v7507_v41, 1  ;;  %v7497_v46 = vmax.f32 %v7481_v11, 0.0  ;;  %v7484_v26 = vadd.f32 %v16306_v59, %v7461_v31  ;;  %v7290_v12 = vadd.f32 %v11551_v61, %v7115_v38 }
 0x4f6   :  { %v7460_v13 = vadd.f32 %v7429_v20, %v7287_v4  ;;  %v7266_v50 = vpop.f32.mrf.mxu1 }
 0x4f7   :  { %v7518_v44 = vmax.f32 %v7507_v41, %v7514_v21  ;;  %v7508_v10 = vmax.f32 %v7497_v46, %v7498_v15  ;;  %v7289_v42 = vadd.f32 %v7266_v50, %v7114_v57  ;;  %v7500_v22 = vmax.f32 %v7484_v26, 0.0  ;;  %v7755_v41 = vld [vmem:[%s16627_s5 + $0x38] sm:$0xff]  ;;  %v7754_v26 = vld [vmem:[%s16627_s5 + $0x30] sm:$0xff] }
 0x4f8   :  { %v7483_v62 = vadd.f32 %v16306_v59, %v7460_v13  ;;  %v7463_v5 = vadd.f32 %v11577_v47, %v7290_v12  ;;  %v8320_v47 = vrot.slane %v16384_v55, 4  ;;  %v8398_v21 = vrot.slane %v16384_v55, 6 }
 0x4f9   :  { %v7835_v63 = vrot.slane %v7508_v10, 1  ;;  %v7462_v1 = vadd.f32 %v7439_v32, %v7289_v42  ;;  %v7526_v54 = vrot.slane %v7518_v44, 1  ;;  %v7602_v6 = vrot.slane %v7518_v44, 7 }
 0x4fa   :  { %v7499_v25 = vmax.f32 %v7483_v62, 0.0  ;;  %v7486_v27 = vadd.f32 %v16306_v59, %v7463_v5  ;;  %v7679_v49 = vrot.slane %v7518_v44, 3  ;;  %v7757_v28 = vrot.slane %v7518_v44, 5  ;;  %v7841_v62 = vld [vmem:[%s16627_s5 + $0x48] sm:$0xff] }
 0x4fb   :  { %v7839_v45 = vmax.f32 %v7508_v10, %v7835_v63  ;;  %v7485_v16 = vadd.f32 %v16306_v59, %v7462_v1  ;;  %v7528_v56 = vsel %vm7527_vm12, %v7526_v54, %v7525_v34  ;;  %v7603_v23 = vsel %vm7527_vm12, %v7602_v6, %v16367_v8  ;;  %v8319_v34 = vld [vmem:[%s16627_s5 + $0xa8] sm:$0xff]  ;;  %v7840_v1 = vld [vmem:[%s16627_s5 + $0x40] sm:$0xff]  ;;  %v7920_v6 = vld [vmem:[%s16627_s5 + $0x58] sm:$0xff] }
 0x4fc   :  { %v7509_v40 = vmax.f32 %v7499_v25, %v7500_v22  ;;  %v7502_v58 = vmax.f32 %v7486_v27, 0.0  ;;  %11583 = vmatmul.mubr.msk.f32.vlgmr.msra.gmra.mxu1 %vm7529_vm13, %v7528_v56  ;;  %v7680_v7 = vsel %vm7527_vm12, %v7679_v49, %v7678_v0  ;;  %v16402_v60 = vsel %vm7527_vm12, %v7757_v28, %v7756_v3  ;;  %v8483_v63 = vld [vmem:[%s16627_s5 + $0xc8] sm:$0xff]  ;;  %v8482_v54 = vld [vmem:[%s16627_s5 + $0xc0] sm:$0xff]  ;;  %v7919_v27 = vld [vmem:[%s16627_s5 + $0x50] sm:$0xff] }
 0x4fd   :  { %v7501_v20 = vmax.f32 %v7485_v16, 0.0  ;;  %11586 = vmatpush3.msra.mxu1 %v7520_v29  ;;  %v17653_v59 = vmov 0.0   ;;  %v7844_v39 = vrot.slane %v7839_v45, 7  ;;  %v7922_v8 = vrot.slane %v7839_v45, 1  ;;  %v8640_v25 = vld [vmem:[%s16627_s5 + $0xe8] sm:$0xff]  ;;  %v8639_v29 = vld [vmem:[%s16627_s5 + $0xe0] sm:$0xff] }
 0x4fe   :  { %11589 = vmatprep.mubr.msk.f32.mxu1 %vm11807_vm11, %v17653_v59  ;;  %v8000_v37 = vrot.slane %v7839_v45, 3  ;;  %v8156_v43 = vrot.slane %v7509_v40, 1  ;;  %11587 = vmatprep.subr.mxu1 %v17653_v59  ;;  %v8078_v52 = vrot.slane %v7839_v45, 5  ;;  %v8641_v0 = vrot.slane %v8480_v17, 4  ;;  %v7998_v49 = vld [vmem:[%s16627_s5 + $0x68] sm:$0xff]  ;;  %v7997_v28 = vld [vmem:[%s16627_s5 + $0x60] sm:$0xff] }
 0x4ff   :  { %v7510_v51 = vmax.f32 %v7501_v20, %v7502_v58  ;;  %11588 = vmatpush3.msra.mxu1 %v7519_v18  ;;  %v16414_v19 = vsel %vm7527_vm12, %v7844_v39, %v16372_v9  ;;  %v16417_v33 = vsel %vm7527_vm12, %v7922_v8, %v7921_v30  ;;  %v8563_v50 = vrot.slane %v8480_v17, 2  ;;  %v8076_v45 = vld [vmem:[%s16627_s5 + $0x78] sm:$0xff]  ;;  %v8075_v16 = vld [vmem:[%s16627_s5 + $0x70] sm:$0xff] }
 0x500   :  { %v16420_v14 = vsel %vm7527_vm12, %v8000_v37, %v7999_v53  ;;  %v8160_v38 = vmax.f32 %v7509_v40, %v8156_v43  ;;  %11592 = vmatprep.subr.mxu1 %v17653_v59  ;;  %11590 = vmatmul.mubr.msk.f32.vlgmr.msra.gmra.mxu1 %vm7529_vm13, %v7603_v23  ;;  %v16428_v57 = vsel %vm7527_vm12, %v8078_v52, %v8077_v24  ;;  %v8719_v44 = vrot.slane %v8480_v17, 6  ;;  %v8241_v56 = vld [vmem:[%s16627_s5 + $0x98] sm:$0xff]  ;;  %v8240_v23 = vld [vmem:[%s16627_s5 + $0x90] sm:$0xff]  ;;  %v8805_v37 = vld [vmem:[%s16629_s7 + $0x8] sm:$0xff] }
 0x501   :  { %v8477_v9 = vrot.slane %v7510_v51, 1  ;;  %11593 = vmatpush3.msra.mxu1 %v7677_v35  ;;  %11596 = vmatprep.mubr.msk.f32.mxu1 %vm11807_vm11, %v17653_v59  ;;  %v8397_v40 = vld [vmem:[%s16627_s5 + $0xb8] sm:$0xff]  ;;  %v8396_v58 = vld [vmem:[%s16627_s5 + $0xb0] sm:$0xff] }
 0x502   :  { %11594 = vmatprep.subr.mxu1 %v17653_v59  ;;  %v8165_v11 = vrot.slane %v8160_v38, 7  ;;  %v8321_v31 = vrot.slane %v8160_v38, 3  ;;  %v8243_v15 = vrot.slane %v8160_v38, 1  ;;  %v8399_v4 = vrot.slane %v8160_v38, 5  ;;  %v8562_v18 = vld [vmem:[%s16627_s5 + $0xd8] sm:$0xff]  ;;  %v8717_v20 = vld [vmem:[%s16627_s5 + $0xf0] sm:$0xff] }
 0x503   :  { %v8481_v61 = vmax.f32 %v7510_v51, %v8477_v9  ;;  %11595 = vmatpush3.msra.mxu1 %v7676_v48  ;;  %v8807_v39 = vld [vmem:[%s16629_s7 + $0x18] sm:$0xff]  ;;  %v8806_v8 = vld [vmem:[%s16629_s7 + $0x10] sm:$0xff] }
 0x504   :  { %11599 = vmatprep.subr.mxu1 %v17653_v59  ;;  %11597 = vmatmul.mubr.msk.f32.vlgmr.msra.gmra.mxu1 %vm7529_vm13, %v7680_v7  ;;  %v8166_v46 = vsel %vm7527_vm12, %v8165_v11, %v16384_v55  ;;  %v8322_v12 = vsel %vm7527_vm12, %v8321_v31, %v8320_v47  ;;  %v16451_v13 = vsel %vm7527_vm12, %v8243_v15, %v8242_v2  ;;  %v8318_v55 = vld [vmem:[%s16627_s5 + $0xa0] sm:$0xff]  ;;  %v8561_v7 = vld [vmem:[%s16627_s5 + $0xd0] sm:$0xff] }
 0x505   :  { %11600 = vmatpush3.msra.mxu1 %v7755_v41  ;;  %11639 = vmatmul.mubr.msk.f32.vlgmr.msra.gmra.mxu0 %vm7529_vm13, %v8166_v46  ;;  %v8486_v32 = vrot.slane %v8481_v61, 7  ;;  %v8642_v3 = vrot.slane %v8481_v61, 3  ;;  %v16455_v30 = vsel %vm7527_vm12, %v8399_v4, %v8398_v21  ;;  %v8564_v53 = vrot.slane %v8481_v61, 1 }
 0x506   :  { %11601 = vmatprep.subr.mxu1 %v17653_v59  ;;  %11649 = vmatpush3.msra.mxu0 %v8319_v34  ;;  %v8720_v10 = vrot.slane %v8481_v61, 5 }
 0x507   :  { %11602 = vmatpush3.msra.mxu1 %v7754_v26  ;;  %11650 = vmatprep.subr.mxu0 %v17653_v59  ;;  %v8487_v42 = vsel %vm7527_vm12, %v8486_v32, %v8480_v17  ;;  %v8643_v36 = vsel %vm7527_vm12, %v8642_v3, %v8641_v0  ;;  %v16465_v22 = vsel %vm7527_vm12, %v8564_v53, %v8563_v50  ;;  %v8804_v17 = vld [vmem:[%s16629_s7] sm:$0xff] }
 0x508   :  { %11603 = vmatprep.mubr.msk.f32.mxu1 %vm11807_vm11, %v17653_v59  ;;  %11606 = vmatprep.subr.mxu1 %v17653_v59  ;;  %v16474_v5 = vsel %vm7527_vm12, %v8720_v10, %v8719_v44 }
 0x509   :  { %11651 = vmatpush3.msra.mxu0 %v8318_v55  ;;  %11652 = vmatprep.mubr.msk.f32.mxu0 %vm11807_vm11, %v17653_v59 }
 0x50a   :  { %11604 = vmatmul.mubr.msk.f32.vlgmr.msra.gmra.mxu1 %vm7529_vm13, %v16402_v60  ;;  %11653 = vmatmul.mubr.msk.f32.vlgmr.msra.gmra.mxu0 %vm7529_vm13, %v8322_v12  ;;  %v8718_v60 = vld [vmem:[%s16627_s5 + $0xf8] sm:$0xff] }
 0x50b   :  { %11607 = vmatpush3.msra.mxu1 %v7841_v62  ;;  %11662 = vmatprep.subr.mxu0 %v17653_v59 }
 0x50c   :  { %11608 = vmatprep.subr.mxu1 %v17653_v59  ;;  %11663 = vmatpush3.msra.mxu0 %v8483_v63 }
 0x50d   :  { %11609 = vmatpush3.msra.mxu1 %v7840_v1  ;;  %11664 = vmatprep.subr.mxu0 %v17653_v59 }
 0x50e   :  { %11610 = vmatprep.mubr.msk.f32.mxu1 %vm11807_vm11, %v17653_v59  ;;  %11613 = vmatprep.subr.mxu1 %v17653_v59 }
 0x50f   :  { %11665 = vmatpush3.msra.mxu0 %v8482_v54  ;;  %11666 = vmatprep.mubr.msk.f32.mxu0 %vm11807_vm11, %v17653_v59 }
 0x510   :  { %11611 = vmatmul.mubr.msk.f32.vlgmr.msra.gmra.mxu1 %vm7529_vm13, %v16414_v19  ;;  %11667 = vmatmul.mubr.msk.f32.vlgmr.msra.gmra.mxu0 %vm7529_vm13, %v8487_v42 }
 0x511   :  { %11614 = vmatpush3.msra.mxu1 %v7920_v6  ;;  %11676 = vmatprep.subr.mxu0 %v17653_v59 }
 0x512   :  { %11615 = vmatprep.subr.mxu1 %v17653_v59  ;;  %11677 = vmatpush3.msra.mxu0 %v8640_v25  ;;  %v9668_v25 = vld [vmem:[%s16628_s6] ss:$0 sm:$0xff] }
 0x513   :  { %11616 = vmatpush3.msra.mxu1 %v7919_v27  ;;  %11678 = vmatprep.subr.mxu0 %v17653_v59 }
 0x514   :  { %11617 = vmatprep.mubr.msk.f32.mxu1 %vm11807_vm11, %v17653_v59  ;;  %11620 = vmatprep.subr.mxu1 %v17653_v59 }
 0x515   :  { %11679 = vmatpush3.msra.mxu0 %v8639_v29  ;;  %11680 = vmatprep.mubr.msk.f32.mxu0 %vm11807_vm11, %v17653_v59 }
 0x516   :  { %11618 = vmatmul.mubr.msk.f32.vlgmr.msra.gmra.mxu1 %vm7529_vm13, %v16417_v33  ;;  %11681 = vmatmul.mubr.msk.f32.vlgmr.msra.gmra.mxu0 %vm7529_vm13, %v8643_v36 }
 0x517   :  { %11621 = vmatpush3.msra.mxu1 %v7998_v49  ;;  %11624 = vmatprep.mubr.msk.f32.mxu1 %vm11807_vm11, %v17653_v59 }
 0x518   :  { %11622 = vmatprep.subr.mxu1 %v17653_v59  ;;  %11690 = vmatprep.subr.mxu0 %v17653_v59 }
 0x519   :  { %11623 = vmatpush3.msra.mxu1 %v7997_v28  ;;  %11698 = vmatprep.mubr.msk.f32.mxu0 %vm11807_vm11, %v17653_v59 }
 0x51a   :  { %11627 = vmatprep.subr.mxu1 %v17653_v59  ;;  %11625 = vmatmul.mubr.msk.f32.vlgmr.msra.gmra.mxu1 %vm7529_vm13, %v16420_v14 }
 0x51b   :  { %11628 = vmatpush3.msra.mxu1 %v8076_v45  ;;  %11631 = vmatprep.mubr.msk.f32.mxu1 %vm11807_vm11, %v17653_v59  ;;  %v9669_v45 = vld [vmem:[%s16630_s8] ss:$0 sm:$0xff] }
 0x51c   :  { %11629 = vmatprep.subr.mxu1 %v17653_v59  ;;  %11691 = vmatpush3.msra.mxu0 %v8807_v39 }
 0x51d   :  { %11630 = vmatpush3.msra.mxu1 %v8075_v16  ;;  %11692 = vmatprep.subr.mxu0 %v17653_v59 }
 0x51e   :  { %11641 = vmatprep.subr.mxu1 %v17653_v59  ;;  %11632 = vmatmul.mubr.msk.f32.vlgmr.msra.gmra.mxu1 %vm7529_vm13, %v16428_v57 }
 0x51f   :  { %11642 = vmatpush3.msra.mxu1 %v8241_v56  ;;  %11645 = vmatprep.mubr.msk.f32.mxu1 %vm11807_vm11, %v17653_v59 }
 0x520   :  { %11643 = vmatprep.subr.mxu1 %v17653_v59  ;;  %11693 = vmatpush3.msra.mxu0 %v8806_v8 }
 0x521   :  { %11644 = vmatpush3.msra.mxu1 %v8240_v23  ;;  %11694 = vmatprep.subr.mxu0 %v17653_v59 }
 0x522   :  { %11655 = vmatprep.subr.mxu1 %v17653_v59  ;;  %11646 = vmatmul.mubr.msk.f32.vlgmr.msra.gmra.mxu1 %vm7529_vm13, %v16451_v13 }
 0x523   :  { %11656 = vmatpush3.msra.mxu1 %v8397_v40  ;;  %11659 = vmatprep.mubr.msk.f32.mxu1 %vm11807_vm11, %v17653_v59 }
 0x524   :  { %11657 = vmatprep.subr.mxu1 %v17653_v59  ;;  %11695 = vmatpush3.msra.mxu0 %v8805_v37 }
 0x525   :  { %11658 = vmatpush3.msra.mxu1 %v8396_v58  ;;  %11696 = vmatprep.subr.mxu0 %v17653_v59 }
 0x526   :  { %11669 = vmatprep.subr.mxu1 %v17653_v59  ;;  %11660 = vmatmul.mubr.msk.f32.vlgmr.msra.gmra.mxu1 %vm7529_vm13, %v16455_v30 }
 0x527   :  { %11670 = vmatpush3.msra.mxu1 %v8562_v18  ;;  %11673 = vmatprep.mubr.msk.f32.mxu1 %vm11807_vm11, %v17653_v59 }
 0x528   :  { %11671 = vmatprep.subr.mxu1 %v17653_v59  ;;  %11697 = vmatpush3.msra.mxu0 %v8804_v17 }
 0x529   :  { %11672 = vmatpush3.msra.mxu1 %v8561_v7 }
 0x52a   :  { %11683 = vmatprep.subr.mxu1 %v17653_v59  ;;  %11674 = vmatmul.mubr.msk.f32.vlgmr.msra.gmra.mxu1 %vm7529_vm13, %v16465_v22 }
 0x52b   :  { %11684 = vmatpush3.msra.mxu1 %v8718_v60  ;;  %11687 = vmatprep.mubr.msk.f32.mxu1 %vm11807_vm11, %v17653_v59 }
 0x52c   :  { %11685 = vmatprep.subr.mxu1 %v17653_v59 }
 0x52d   :  { %11686 = vmatpush3.msra.mxu1 %v8717_v20 }
 0x52e   :  { %11688 = vmatmul.mubr.msk.f32.vlgmr.msra.gmra.mxu1 %vm7529_vm13, %v16474_v5 }
 0x5bc   :  { %v7598_v43 = vpop.f32.mrf.mxu1 }
 0x5be   :  { %v11584_v35 = vpop.f32.mrf.mxu1 }
 0x5c0   :  { %v7672_v24 = vpop.f32.mrf.mxu1 }
 0x5c1   :  { %v7673_v11 = vadd.f32 %v7672_v24, %v7598_v43 }
 0x5c2   :  { %v11591_v52 = vpop.f32.mrf.mxu1 }
 0x5c4   :  { %v7749_v51 = vpop.f32.mrf.mxu1 }
 0x5c5   :  { %v8235_v19 = vpop.f32.mrf.mxu0  ;;  %v7753_v31 = vadd.f32 %v7749_v51, %v7673_v11 }
 0x5c6   :  { %v11598_v33 = vpop.f32.mrf.mxu1 }
 0x5c7   :  { %v11640_v14 = vpop.f32.mrf.mxu0 }
 0x5ca   :  { %v7827_v38 = vpop.f32.mrf.mxu1  ;;  %v8391_v48 = vpop.f32.mrf.mxu0 }
 0x5cb   :  { %v7831_v61 = vadd.f32 %v7827_v38, %v7753_v31 }
 0x5cc   :  { %v11605_v57 = vpop.f32.mrf.mxu1  ;;  %v11654_v9 = vpop.f32.mrf.mxu0 }
 0x5d0   :  { %v7914_v47 = vpop.f32.mrf.mxu1  ;;  %v8556_v2 = vpop.f32.mrf.mxu0 }
 0x5d1   :  { %v7918_v21 = vadd.f32 %v7914_v47, %v7831_v61 }
 0x5d2   :  { %v11612_v59 = vpop.f32.mrf.mxu1  ;;  %v11668_v41 = vpop.f32.mrf.mxu0 }
 0x5d6   :  { %v7992_v15 = vpop.f32.mrf.mxu1  ;;  %v8712_v4 = vpop.f32.mrf.mxu0 }
 0x5d7   :  { %v7996_v26 = vadd.f32 %v7992_v15, %v7918_v21 }
 0x5d8   :  { %v11619_v34 = vpop.f32.mrf.mxu1  ;;  %v11682_v0 = vpop.f32.mrf.mxu0 }
 0x5da   :  { %v8070_v46 = vpop.f32.mrf.mxu1 }
 0x5db   :  { %v8074_v13 = vadd.f32 %v8070_v46, %v7996_v26 }
 0x5dc   :  { %v11626_v12 = vpop.f32.mrf.mxu1 }
 0x5de   :  { %v8148_v50 = vpop.f32.mrf.mxu1 }
 0x5df   :  { %v8152_v32 = vadd.f32 %v8148_v50, %v8074_v13 }
 0x5e0   :  { %v11633_v3 = vpop.f32.mrf.mxu1 }
 0x5e1   :  { %v8239_v30 = vadd.f32 %v8235_v19, %v8152_v32 }
 0x5e2   :  { %v8313_v53 = vpop.f32.mrf.mxu1 }
 0x5e3   :  { %v8317_v55 = vadd.f32 %v8313_v53, %v8239_v30 }
 0x5e4   :  { %v11647_v44 = vpop.f32.mrf.mxu1 }
 0x5e5   :  { %v8395_v10 = vadd.f32 %v8391_v48, %v8317_v55 }
 0x5e6   :  { %v8469_v42 = vpop.f32.mrf.mxu1 }
 0x5e7   :  { %v8473_v36 = vadd.f32 %v8469_v42, %v8395_v10 }
 0x5e8   :  { %v11661_v22 = vpop.f32.mrf.mxu1 }
 0x5e9   :  { %v8560_v62 = vadd.f32 %v8556_v2, %v8473_v36 }
 0x5ea   :  { %v8634_v5 = vpop.f32.mrf.mxu1 }
 0x5eb   :  { %v8638_v63 = vadd.f32 %v8634_v5, %v8560_v62 }
 0x5ec   :  { %v11675_v1 = vpop.f32.mrf.mxu1 }
 0x5ed   :  { %v8716_v54 = vadd.f32 %v8712_v4, %v8638_v63 }
 0x5ee   :  { %v8790_v6 = vpop.f32.mrf.mxu1 }
 0x5ef   :  { %v8794_v27 = vadd.f32 %v8790_v6, %v8716_v54 }
 0x5f0   :  { %v11689_v29 = vpop.f32.mrf.mxu1 }
 0x5f1   :  { %v8802_v49 = vadd.f32 %v9668_v25, %v8794_v27 }
 0x5f3   :  { %v8803_v28 = vmax.f32 %v8802_v49, 0.0 }
 0x5f5   :  { %11699 = vmatmul.mubr.msk.f32.vlgmr.msra.gmra.mxu0 %vm8815_vm14, %v8803_v28 }
 0x6b5   :  { %v8885_v16 = vpop.f32.mrf.mxu0 }
 0x6b6   :  { %v8886_v56 = vadd.f32 %v9669_v45, %v8885_v16 }
 0x6b7   :  { %v11700_v23 = vpop.f32.mrf.mxu0 }
 0x6b8   :  { %8890 = vst.msk [vmem:[#allocation4] sm:$0x3] %vm8889_vm15, %v8886_v56 }
 0x6b9   :  { %11795 = shalt.err (!%p11792_p4)
}
 0x6ba   :  { %8900 = dma.vmem_to_hbm [thread:$0]  %s8898_s27, 32, %s16631_s9, [#allocation5]  }
 0x6bb   :  { %11804 = dma.done.wait [#allocation5], 32  }
 0x6bc   :  { %11805 = vsyncadd [#allocation5], 4294967264 }
 0x6bd   :  { %8904 = vsyncpa [#allocation5], 1 }

</bundles_post_ra>
